<compile_context>
chip_gen: v7x
topology: tpu7x:2x2x1
jax: 0.10.0
libtpu: 0.0.40
codegen_flags: <defaults>
</compile_context>

<pallas_src>
import functools

import jax
import jax.numpy as jnp
from jax.experimental import pallas as pl
from jax.experimental.pallas import tpu as pltpu


# --------------------------------------------------------------------------
# Fused ASPP kernel (one batch element per grid step)
# --------------------------------------------------------------------------
def _aspp_fused_kernel(x_ref, w0_ref, w3_ref, wp_ref, sb_ref, o_ref, xp_scr,
                       *, rates, pad):
    """All ASPP branches for one batch element, fused.

    x_ref  : (1, H, W, Cin)        bf16  unpadded input
    w0_ref : (Cin, Cout)           bf16  1x1-conv weight (branch c0)
    w3_ref : (3*R, 3*Cin, Cout)    bf16  dilated 3x3 weights, row-grouped:
                                         block i*3+ky, rows kx*Cin:(kx+1)*Cin
                                         hold w[ky, kx, :, :] of branch i
    wp_ref : (Cin, Cout)           bf16  image-pool 1x1 weight
    sb_ref : (R+2, 2, Cout)        f32   per-branch folded-BN [scale; bias]
    o_ref  : (1, H, W, (R+2)*Cout) bf16  channel-concatenated output
    xp_scr : (H+2P, W+2P, Cin)     bf16  VMEM scratch: zero-padded input tile
    """
    H, W = o_ref.shape[1], o_ref.shape[2]
    Cin = x_ref.shape[3]
    Cout = w0_ref.shape[1]
    P = pad
    R = len(rates)
    Hp, Wp = H + 2 * P, W + 2 * P

    # ---- Zero-pad x into the VMEM scratch tile ---------------------------
    # The border is re-zeroed every grid step (not only at step 0) so the
    # kernel stays correct when the "parallel" batch axis is split across
    # TensorCores (each core has its own scratch).
    zb = jnp.zeros((P, Wp, Cin), xp_scr.dtype)
    zc = jnp.zeros((H, P, Cin), xp_scr.dtype)
    xp_scr[0:P, :, :] = zb                          # top band
    xp_scr[P + H:Hp, :, :] = zb                     # bottom band
    xp_scr[P:P + H, 0:P, :] = zc                    # left band
    xp_scr[P:P + H, P + W:Wp, :] = zc               # right band
    xp_scr[P:P + H, P:P + W, :] = x_ref[0]          # center (fresh data)

    def bn_relu(y, b):  # y: (M, Cout) f32, b: static branch index
        sb = sb_ref[b]                               # (2, Cout)
        y = jnp.maximum(y * sb[0:1, :] + sb[1:2, :], 0.0)
        return y.astype(jnp.bfloat16)                # cast once, post-epilogue

    # Center window straight from the (unpadded) input block; shared by c0
    # and the image-pool branch.
    center = x_ref[0].reshape(H * W, Cin)            # bf16

    outs = []

    # --- c0 : 1x1 conv -> BN -> ReLU --------------------------------------
    y0 = jnp.dot(center, w0_ref[...], preferred_element_type=jnp.float32)
    outs.append(bn_relu(y0, 0))

    # --- c1..cR : dilated 3x3 conv -> BN -> ReLU ---------------------------
    # Taps folded into the MXU K dimension: per (branch, ky) one im2col
    # activation (H*W, 3*Cin) against a (3*Cin, Cout) weight block -> 3 dots
    # and 2 f32 adds per branch instead of 9 dots + 8 adds (keeps vreg
    # pressure flat: only one live accumulator per branch).
    for i, r in enumerate(rates):
        acc = None
        for ky in range(3):
            y_off = P + (ky - 1) * r
            taps = [xp_scr[y_off:y_off + H,
                           P + (kx - 1) * r:P + (kx - 1) * r + W, :]
                    for kx in range(3)]              # 3 x (H, W, Cin) bf16
            a = jnp.concatenate(taps, axis=-1).reshape(H * W, 3 * Cin)
            d = jnp.dot(a, w3_ref[i * 3 + ky],
                        preferred_element_type=jnp.float32)
            acc = d if acc is None else acc + d
        outs.append(bn_relu(acc, i + 1))

    # --- imagepool : global mean -> 1x1 conv -> BN -> ReLU -> broadcast ----
    # Mean as an MXU dot with a ones vector (f32 accumulation over bf16 data):
    # avoids an f32 copy of the center tile and any XLU cross-sublane reduce.
    ones = jnp.full((1, H * W), 1.0, jnp.bfloat16)
    mean = jnp.dot(ones, center,
                   preferred_element_type=jnp.float32) * (1.0 / (H * W))  # (1,Cin)
    yp = jnp.dot(mean, wp_ref[...].astype(jnp.float32),
                 preferred_element_type=jnp.float32)                      # (1,Cout)
    yp = bn_relu(yp, R + 1)                                               # bf16
    # bilinear upsample of a 1x1 map (align_corners=False) == exact broadcast
    outs.append(jnp.broadcast_to(yp, (H * W, Cout)))

    # --- single lane-dense store of the concatenated bf16 slab -------------
    slab = jnp.concatenate(outs, axis=-1)            # (H*W, (R+2)*Cout) bf16
    o_ref[0, :, :, :] = slab.reshape(H, W, (R + 2) * Cout)


# --------------------------------------------------------------------------
# Wrapper (pallas_call plumbing)
# --------------------------------------------------------------------------
def aspp_fused(x_nhwc_bf16, w0, w3p, wp, sb, rates):
    N, H, W, Cin = x_nhwc_bf16.shape
    Cout = w0.shape[-1]
    R = len(rates)
    Ctot = (R + 2) * Cout
    P = max(rates)
    Hp, Wp = H + 2 * P, W + 2 * P

    kern = functools.partial(_aspp_fused_kernel, rates=tuple(rates), pad=P)

    flops = (2 * N * H * W * Cin * Cout * (1 + 9 * R)     # convs
             + 2 * N * (H * W * Cin + Cin * Cout)         # pool mean + 1x1
             + 3 * N * H * W * Ctot)                      # BN + ReLU
    bytes_accessed = (N * H * W * Cin * 2                 # input (bf16, unpadded)
                      + (2 + 9 * R) * Cin * Cout * 2      # weights (bf16)
                      + (R + 2) * 2 * Cout * 4            # scale/bias (f32)
                      + N * H * W * Ctot * 2)             # output (bf16)

    # TODO(synk): at production sizes add H-strip (with P-row halo) and Cout
    #             grid axes; the whole-image / whole-weight blocks below only
    #             fit VMEM at small test shapes.
    return pl.pallas_call(
        kern,
        out_shape=jax.ShapeDtypeStruct((N, H, W, Ctot), jnp.bfloat16),
        grid=(N,),
        in_specs=[
            pl.BlockSpec((1, H, W, Cin), lambda n: (n, 0, 0, 0)),
            pl.BlockSpec((Cin, Cout), lambda n: (0, 0)),
            pl.BlockSpec((3 * R, 3 * Cin, Cout), lambda n: (0, 0, 0)),
            pl.BlockSpec((Cin, Cout), lambda n: (0, 0)),
            pl.BlockSpec((R + 2, 2, Cout), lambda n: (0, 0, 0)),
        ],
        out_specs=pl.BlockSpec((1, H, W, Ctot), lambda n: (n, 0, 0, 0)),
        scratch_shapes=[pltpu.VMEM((Hp, Wp, Cin), jnp.bfloat16)],
        compiler_params=pltpu.CompilerParams(
            dimension_semantics=("parallel",),
            vmem_limit_bytes=48 * 1024 * 1024),
        cost_estimate=pl.CostEstimate(flops=int(flops), transcendentals=0,
                                      bytes_accessed=int(bytes_accessed)),
    )(x_nhwc_bf16, w0, w3p, wp, sb)


# --------------------------------------------------------------------------
# Parameter init (deterministic, synthetic)
# --------------------------------------------------------------------------
def _init_conv_bn(key, ksize, in_ch, out_ch, eps=1e-5):
    kw, kg, kb, km, kv = jax.random.split(key, 5)
    fan_in = ksize * ksize * in_ch
    # PyTorch conv weight is (out, in, kh, kw); generate in that layout then
    # transpose to the kernel layout (kh, kw, in, out).
    w_oihw = jax.random.normal(kw, (out_ch, in_ch, ksize, ksize),
                               jnp.float32) / jnp.sqrt(float(fan_in))
    w = jnp.transpose(w_oihw, (2, 3, 1, 0))                    # (kh, kw, in, out)
    gamma = jax.random.uniform(kg, (out_ch,), jnp.float32, 0.5, 1.5)
    beta = 0.1 * jax.random.normal(kb, (out_ch,), jnp.float32)
    running_mean = 0.1 * jax.random.normal(km, (out_ch,), jnp.float32)
    running_var = jax.random.uniform(kv, (out_ch,), jnp.float32, 0.5, 1.5)
    scale = gamma / jnp.sqrt(running_var + eps)
    bias = beta - running_mean * scale
    return {"w": w, "scale": scale, "bias": bias}


def init_aspp_params(key, in_ch, out_ch, rates):
    keys = jax.random.split(key, len(rates) + 2)
    params = {"c0": _init_conv_bn(keys[0], 1, in_ch, out_ch)}
    for i, _ in enumerate(rates):
        params[f"c{i + 1}"] = _init_conv_bn(keys[i + 1], 3, in_ch, out_ch)
    params["imagepool"] = _init_conv_bn(keys[-1], 1, in_ch, out_ch)
    return params


# --------------------------------------------------------------------------
# Full _ASPP forward (NCHW in, NCHW out, like the PyTorch module)
# --------------------------------------------------------------------------
def aspp_forward(x_nchw, params, rates):
    x_nhwc = jnp.transpose(x_nchw, (0, 2, 3, 1)).astype(jnp.bfloat16)
    Cin = x_nhwc.shape[-1]
    Cout = params["c0"]["w"].shape[-1]
    R = len(rates)

    # Pack weights/BN params in branch (concat) order.
    w0 = params["c0"]["w"].reshape(Cin, Cout).astype(jnp.bfloat16)
    # (3*R, 3*Cin, Cout): block i*3+ky stacks taps kx=0..2 along the K axis,
    # matching the kernel's im2col channel-concat order.
    w3p = jnp.stack(
        [params[f"c{i + 1}"]["w"][ky].reshape(3 * Cin, Cout)
         for i in range(R) for ky in range(3)],
        axis=0).astype(jnp.bfloat16)
    wp = params["imagepool"]["w"].reshape(Cin, Cout).astype(jnp.bfloat16)

    branch_names = ["c0"] + [f"c{i + 1}" for i in range(R)] + ["imagepool"]
    sb = jnp.stack(
        [jnp.stack([params[b]["scale"], params[b]["bias"]]) for b in branch_names]
    ).astype(jnp.float32)                                      # (R+2, 2, Cout)

    out_nhwc = aspp_fused(x_nhwc, w0, w3p, wp, sb, rates)
    # NOTE: output stays bf16 (halves HBM writeback); cast outside if f32 needed.
    return jnp.transpose(out_nhwc, (0, 3, 1, 2))               # back to NCHW


# --------------------------------------------------------------------------
# Pure-JAX reference: f32 math, but x / conv weights quantized through bf16 so
# the comparison isolates kernel correctness from the (intentional) bf16
# mixed-precision design.
# --------------------------------------------------------------------------
def aspp_reference(x_nchw, params, rates):
    x = jnp.transpose(x_nchw, (0, 2, 3, 1)).astype(jnp.bfloat16).astype(jnp.float32)

    def conv_bn_relu_ref(inp, p, dilation, padding):
        w = p["w"].astype(jnp.bfloat16).astype(jnp.float32)
        y = jax.lax.conv_general_dilated(
            inp, w, window_strides=(1, 1),
            padding=((padding, padding), (padding, padding)),
            rhs_dilation=(dilation, dilation),
            dimension_numbers=("NHWC", "HWIO", "NHWC"))
        return jnp.maximum(y * p["scale"] + p["bias"], 0.0)

    N, H, W, _ = x.shape
    outs = [conv_bn_relu_ref(x, params["c0"], 1, 0)]
    for i, r in enumerate(rates):
        outs.append(conv_bn_relu_ref(x, params[f"c{i + 1}"], r, r))
    p = params["imagepool"]
    mean = jnp.mean(x, axis=(1, 2), keepdims=True)
    y = conv_bn_relu_ref(mean, p, 1, 0)
    outs.append(jnp.broadcast_to(y, (N, H, W, y.shape[-1])))
    return jnp.transpose(jnp.concatenate(outs, axis=-1), (0, 3, 1, 2))


# --------------------------------------------------------------------------
if __name__ == "__main__":
    key = jax.random.PRNGKey(0)
    k_x, k_p = jax.random.split(key)

    N, in_ch, H, W = 2, 4, 16, 16
    out_ch = 4
    rates = (2, 4, 6)

    x = jax.random.normal(k_x, (N, in_ch, H, W), jnp.float32)   # NCHW like PyTorch
    params = init_aspp_params(k_p, in_ch, out_ch, rates)

    out = jax.block_until_ready(aspp_forward(x, params, rates))

    expected_shape = (N, (len(rates) + 2) * out_ch, H, W)
    assert out.shape == expected_shape, (out.shape, expected_shape)
    assert out.dtype == jnp.bfloat16
    out_f32 = out.astype(jnp.float32)
    assert bool(jnp.all(jnp.isfinite(out_f32)))

    ref = jax.block_until_ready(aspp_reference(x, params, rates))
    max_err = float(jnp.max(jnp.abs(out_f32 - ref)))
    assert max_err < 3e-2, f"max abs err vs bf16-quantized reference: {max_err}"

    print("KERNEL_OK")
</pallas_src>

<mosaic_0001>
module attributes {stable_mosaic.version = 11 : i64} {
  func.func @_aspp_fused_kernel(%arg0: i32, %arg1: memref<1x16x16x4xbf16, #tpu.memory_space<vmem>>, %arg2: memref<4x4xbf16, #tpu.memory_space<vmem>>, %arg3: memref<9x12x4xbf16, #tpu.memory_space<vmem>>, %arg4: memref<4x4xbf16, #tpu.memory_space<vmem>>, %arg5: memref<5x2x4xf32, #tpu.memory_space<vmem>>, %arg6: memref<1x16x16x20xbf16, #tpu.memory_space<vmem>>, %arg7: memref<28x28x4xbf16, #tpu.memory_space<vmem>>) attributes {dimension_semantics = [#tpu.dimension_semantics<parallel>], iteration_bounds = array<i64: 2>, scalar_prefetch = 0 : i64, scratch_operands = 1 : i64, tpu.core_type = #tpu.core_type<tc>, window_params = [{transform_indices = @transform_0, window_bounds = array<i64: 1, 16, 16, 4>}, {pipeline_mode = #tpu.pipeline_mode<synchronous>, transform_indices = @transform_1, window_bounds = array<i64: 4, 4>}, {pipeline_mode = #tpu.pipeline_mode<synchronous>, transform_indices = @transform_2, window_bounds = array<i64: 9, 12, 4>}, {pipeline_mode = #tpu.pipeline_mode<synchronous>, transform_indices = @transform_3, window_bounds = array<i64: 4, 4>}, {pipeline_mode = #tpu.pipeline_mode<synchronous>, transform_indices = @transform_4, window_bounds = array<i64: 5, 2, 4>}, {transform_indices = @transform_5, window_bounds = array<i64: 1, 16, 16, 20>}]} {
    %cst = arith.constant 0.000000e+00 : bf16
    %0 = vector.broadcast %cst : bf16 to vector<6x28x4xbf16>
    %cst_0 = arith.constant 0.000000e+00 : bf16
    %1 = vector.broadcast %cst_0 : bf16 to vector<16x6x4xbf16>
    %c0 = arith.constant 0 : index
    %c0_1 = arith.constant 0 : index
    %c0_2 = arith.constant 0 : index
    %2 = vector.load %arg7[%c0, %c0_1, %c0_2] : memref<28x28x4xbf16, #tpu.memory_space<vmem>>, vector<6x28x4xbf16>
    tpu.vector_store %arg7[%c0, %c0_1, %c0_2], %0 {strides = array<i32>} : memref<28x28x4xbf16, #tpu.memory_space<vmem>>, vector<6x28x4xbf16>,
    %c22 = arith.constant 22 : index
    %c0_3 = arith.constant 0 : index
    %c0_4 = arith.constant 0 : index
    %3 = vector.load %arg7[%c22, %c0_3, %c0_4] : memref<28x28x4xbf16, #tpu.memory_space<vmem>>, vector<6x28x4xbf16>
    tpu.vector_store %arg7[%c22, %c0_3, %c0_4], %0 {strides = array<i32>} : memref<28x28x4xbf16, #tpu.memory_space<vmem>>, vector<6x28x4xbf16>,
    %c6 = arith.constant 6 : index
    %c0_5 = arith.constant 0 : index
    %c0_6 = arith.constant 0 : index
    %4 = vector.load %arg7[%c6, %c0_5, %c0_6] : memref<28x28x4xbf16, #tpu.memory_space<vmem>>, vector<16x6x4xbf16>
    tpu.vector_store %arg7[%c6, %c0_5, %c0_6], %1 {strides = array<i32>} : memref<28x28x4xbf16, #tpu.memory_space<vmem>>, vector<16x6x4xbf16>,
    %c6_7 = arith.constant 6 : index
    %c22_8 = arith.constant 22 : index
    %c0_9 = arith.constant 0 : index
    %5 = vector.load %arg7[%c6_7, %c22_8, %c0_9] : memref<28x28x4xbf16, #tpu.memory_space<vmem>>, vector<16x6x4xbf16>
    tpu.vector_store %arg7[%c6_7, %c22_8, %c0_9], %1 {strides = array<i32>} : memref<28x28x4xbf16, #tpu.memory_space<vmem>>, vector<16x6x4xbf16>,
    %c0_10 = arith.constant 0 : index
    %c0_11 = arith.constant 0 : index
    %c0_12 = arith.constant 0 : index
    %c0_13 = arith.constant 0 : index
    %6 = vector.load %arg1[%c0_10, %c0_11, %c0_12, %c0_13] : memref<1x16x16x4xbf16, #tpu.memory_space<vmem>>, vector<1x16x16x4xbf16>
    %7 = vector.shape_cast %6 : vector<1x16x16x4xbf16> to vector<16x16x4xbf16>
    %c6_14 = arith.constant 6 : index
    %c6_15 = arith.constant 6 : index
    %c0_16 = arith.constant 0 : index
    %8 = vector.load %arg7[%c6_14, %c6_15, %c0_16] : memref<28x28x4xbf16, #tpu.memory_space<vmem>>, vector<16x16x4xbf16>
    tpu.vector_store %arg7[%c6_14, %c6_15, %c0_16], %7 {strides = array<i32>} : memref<28x28x4xbf16, #tpu.memory_space<vmem>>, vector<16x16x4xbf16>,
    %c0_17 = arith.constant 0 : index
    %c0_18 = arith.constant 0 : index
    %c0_19 = arith.constant 0 : index
    %c0_20 = arith.constant 0 : index
    %9 = vector.load %arg1[%c0_17, %c0_18, %c0_19, %c0_20] : memref<1x16x16x4xbf16, #tpu.memory_space<vmem>>, vector<1x16x16x4xbf16>
    %10 = vector.shape_cast %9 : vector<1x16x16x4xbf16> to vector<16x16x4xbf16>
    %11 = vector.shape_cast %10 : vector<16x16x4xbf16> to vector<256x4xbf16>
    %c0_21 = arith.constant 0 : index
    %c0_22 = arith.constant 0 : index
    %12 = vector.load %arg2[%c0_21, %c0_22] : memref<4x4xbf16, #tpu.memory_space<vmem>>, vector<4x4xbf16>
    %cst_23 = arith.constant dense<0.000000e+00> : vector<256x4xf32>
    %13 = tpu.matmul %11, %12, %cst_23 {dimension_numbers = #tpu.dot_dimension_numbers<[1], [0], [0], [1], [0, 0, 1, 1], [], []>} : vector<256x4xbf16>, vector<4x4xbf16>, vector<256x4xf32> -> vector<256x4xf32>
    %c0_24 = arith.constant 0 : index
    %c0_25 = arith.constant 0 : index
    %c0_26 = arith.constant 0 : index
    %14 = vector.load %arg5[%c0_24, %c0_25, %c0_26] : memref<5x2x4xf32, #tpu.memory_space<vmem>>, vector<1x2x4xf32>
    %15 = vector.shape_cast %14 : vector<1x2x4xf32> to vector<2x4xf32>
    %16 = vector.extract_strided_slice %15 {offsets = [0, 0], sizes = [1, 4], strides = [1, 1]} : vector<2x4xf32> to vector<1x4xf32>
    %17 = vector.broadcast %16 : vector<1x4xf32> to vector<256x4xf32>
    %18 = arith.mulf %13, %17 : vector<256x4xf32>
    %19 = vector.extract_strided_slice %15 {offsets = [1, 0], sizes = [1, 4], strides = [1, 1]} : vector<2x4xf32> to vector<1x4xf32>
    %20 = vector.broadcast %19 : vector<1x4xf32> to vector<256x4xf32>
    %21 = arith.addf %18, %20 : vector<256x4xf32>
    %cst_27 = arith.constant 0.000000e+00 : f32
    %22 = vector.broadcast %cst_27 : f32 to vector<256x4xf32>
    %23 = arith.maximumf %21, %22 : vector<256x4xf32>
    %24 = arith.truncf %23 : vector<256x4xf32> to vector<256x4xbf16>
    %c4 = arith.constant 4 : index
    %c4_28 = arith.constant 4 : index
    %c0_29 = arith.constant 0 : index
    %25 = vector.load %arg7[%c4, %c4_28, %c0_29] : memref<28x28x4xbf16, #tpu.memory_space<vmem>>, vector<16x16x4xbf16>
    %c4_30 = arith.constant 4 : index
    %c6_31 = arith.constant 6 : index
    %c0_32 = arith.constant 0 : index
    %26 = vector.load %arg7[%c4_30, %c6_31, %c0_32] : memref<28x28x4xbf16, #tpu.memory_space<vmem>>, vector<16x16x4xbf16>
    %c4_33 = arith.constant 4 : index
    %c8 = arith.constant 8 : index
    %c0_34 = arith.constant 0 : index
    %27 = vector.load %arg7[%c4_33, %c8, %c0_34] : memref<28x28x4xbf16, #tpu.memory_space<vmem>>, vector<16x16x4xbf16>
    %28 = tpu.concatenate %25, %26, %27 in 2 : vector<16x16x4xbf16>, vector<16x16x4xbf16>, vector<16x16x4xbf16> -> vector<16x16x12xbf16>
    %29 = vector.shape_cast %28 : vector<16x16x12xbf16> to vector<256x12xbf16>
    %c0_35 = arith.constant 0 : index
    %c0_36 = arith.constant 0 : index
    %c0_37 = arith.constant 0 : index
    %30 = vector.load %arg3[%c0_35, %c0_36, %c0_37] : memref<9x12x4xbf16, #tpu.memory_space<vmem>>, vector<1x12x4xbf16>
    %31 = vector.shape_cast %30 : vector<1x12x4xbf16> to vector<12x4xbf16>
    %cst_38 = arith.constant dense<0.000000e+00> : vector<256x4xf32>
    %32 = tpu.matmul %29, %31, %cst_38 {dimension_numbers = #tpu.dot_dimension_numbers<[1], [0], [0], [1], [0, 0, 1, 1], [], []>} : vector<256x12xbf16>, vector<12x4xbf16>, vector<256x4xf32> -> vector<256x4xf32>
    %c6_39 = arith.constant 6 : index
    %c4_40 = arith.constant 4 : index
    %c0_41 = arith.constant 0 : index
    %33 = vector.load %arg7[%c6_39, %c4_40, %c0_41] : memref<28x28x4xbf16, #tpu.memory_space<vmem>>, vector<16x16x4xbf16>
    %c6_42 = arith.constant 6 : index
    %c6_43 = arith.constant 6 : index
    %c0_44 = arith.constant 0 : index
    %34 = vector.load %arg7[%c6_42, %c6_43, %c0_44] : memref<28x28x4xbf16, #tpu.memory_space<vmem>>, vector<16x16x4xbf16>
    %c6_45 = arith.constant 6 : index
    %c8_46 = arith.constant 8 : index
    %c0_47 = arith.constant 0 : index
    %35 = vector.load %arg7[%c6_45, %c8_46, %c0_47] : memref<28x28x4xbf16, #tpu.memory_space<vmem>>, vector<16x16x4xbf16>
    %36 = tpu.concatenate %33, %34, %35 in 2 : vector<16x16x4xbf16>, vector<16x16x4xbf16>, vector<16x16x4xbf16> -> vector<16x16x12xbf16>
    %37 = vector.shape_cast %36 : vector<16x16x12xbf16> to vector<256x12xbf16>
    %c1 = arith.constant 1 : index
    %c0_48 = arith.constant 0 : index
    %c0_49 = arith.constant 0 : index
    %38 = vector.load %arg3[%c1, %c0_48, %c0_49] : memref<9x12x4xbf16, #tpu.memory_space<vmem>>, vector<1x12x4xbf16>
    %39 = vector.shape_cast %38 : vector<1x12x4xbf16> to vector<12x4xbf16>
    %cst_50 = arith.constant dense<0.000000e+00> : vector<256x4xf32>
    %40 = tpu.matmul %37, %39, %cst_50 {dimension_numbers = #tpu.dot_dimension_numbers<[1], [0], [0], [1], [0, 0, 1, 1], [], []>} : vector<256x12xbf16>, vector<12x4xbf16>, vector<256x4xf32> -> vector<256x4xf32>
    %41 = arith.addf %32, %40 : vector<256x4xf32>
    %c8_51 = arith.constant 8 : index
    %c4_52 = arith.constant 4 : index
    %c0_53 = arith.constant 0 : index
    %42 = vector.load %arg7[%c8_51, %c4_52, %c0_53] : memref<28x28x4xbf16, #tpu.memory_space<vmem>>, vector<16x16x4xbf16>
    %c8_54 = arith.constant 8 : index
    %c6_55 = arith.constant 6 : index
    %c0_56 = arith.constant 0 : index
    %43 = vector.load %arg7[%c8_54, %c6_55, %c0_56] : memref<28x28x4xbf16, #tpu.memory_space<vmem>>, vector<16x16x4xbf16>
    %c8_57 = arith.constant 8 : index
    %c8_58 = arith.constant 8 : index
    %c0_59 = arith.constant 0 : index
    %44 = vector.load %arg7[%c8_57, %c8_58, %c0_59] : memref<28x28x4xbf16, #tpu.memory_space<vmem>>, vector<16x16x4xbf16>
    %45 = tpu.concatenate %42, %43, %44 in 2 : vector<16x16x4xbf16>, vector<16x16x4xbf16>, vector<16x16x4xbf16> -> vector<16x16x12xbf16>
    %46 = vector.shape_cast %45 : vector<16x16x12xbf16> to vector<256x12xbf16>
    %c2 = arith.constant 2 : index
    %c0_60 = arith.constant 0 : index
    %c0_61 = arith.constant 0 : index
    %47 = vector.load %arg3[%c2, %c0_60, %c0_61] : memref<9x12x4xbf16, #tpu.memory_space<vmem>>, vector<1x12x4xbf16>
    %48 = vector.shape_cast %47 : vector<1x12x4xbf16> to vector<12x4xbf16>
    %cst_62 = arith.constant dense<0.000000e+00> : vector<256x4xf32>
    %49 = tpu.matmul %46, %48, %cst_62 {dimension_numbers = #tpu.dot_dimension_numbers<[1], [0], [0], [1], [0, 0, 1, 1], [], []>} : vector<256x12xbf16>, vector<12x4xbf16>, vector<256x4xf32> -> vector<256x4xf32>
    %50 = arith.addf %41, %49 : vector<256x4xf32>
    %c1_63 = arith.constant 1 : index
    %c0_64 = arith.constant 0 : index
    %c0_65 = arith.constant 0 : index
    %51 = vector.load %arg5[%c1_63, %c0_64, %c0_65] : memref<5x2x4xf32, #tpu.memory_space<vmem>>, vector<1x2x4xf32>
    %52 = vector.shape_cast %51 : vector<1x2x4xf32> to vector<2x4xf32>
    %53 = vector.extract_strided_slice %52 {offsets = [0, 0], sizes = [1, 4], strides = [1, 1]} : vector<2x4xf32> to vector<1x4xf32>
    %54 = vector.broadcast %53 : vector<1x4xf32> to vector<256x4xf32>
    %55 = arith.mulf %50, %54 : vector<256x4xf32>
    %56 = vector.extract_strided_slice %52 {offsets = [1, 0], sizes = [1, 4], strides = [1, 1]} : vector<2x4xf32> to vector<1x4xf32>
    %57 = vector.broadcast %56 : vector<1x4xf32> to vector<256x4xf32>
    %58 = arith.addf %55, %57 : vector<256x4xf32>
    %cst_66 = arith.constant 0.000000e+00 : f32
    %59 = vector.broadcast %cst_66 : f32 to vector<256x4xf32>
    %60 = arith.maximumf %58, %59 : vector<256x4xf32>
    %61 = arith.truncf %60 : vector<256x4xf32> to vector<256x4xbf16>
    %c2_67 = arith.constant 2 : index
    %c2_68 = arith.constant 2 : index
    %c0_69 = arith.constant 0 : index
    %62 = vector.load %arg7[%c2_67, %c2_68, %c0_69] : memref<28x28x4xbf16, #tpu.memory_space<vmem>>, vector<16x16x4xbf16>
    %c2_70 = arith.constant 2 : index
    %c6_71 = arith.constant 6 : index
    %c0_72 = arith.constant 0 : index
    %63 = vector.load %arg7[%c2_70, %c6_71, %c0_72] : memref<28x28x4xbf16, #tpu.memory_space<vmem>>, vector<16x16x4xbf16>
    %c2_73 = arith.constant 2 : index
    %c10 = arith.constant 10 : index
    %c0_74 = arith.constant 0 : index
    %64 = vector.load %arg7[%c2_73, %c10, %c0_74] : memref<28x28x4xbf16, #tpu.memory_space<vmem>>, vector<16x16x4xbf16>
    %65 = tpu.concatenate %62, %63, %64 in 2 : vector<16x16x4xbf16>, vector<16x16x4xbf16>, vector<16x16x4xbf16> -> vector<16x16x12xbf16>
    %66 = vector.shape_cast %65 : vector<16x16x12xbf16> to vector<256x12xbf16>
    %c3 = arith.constant 3 : index
    %c0_75 = arith.constant 0 : index
    %c0_76 = arith.constant 0 : index
    %67 = vector.load %arg3[%c3, %c0_75, %c0_76] : memref<9x12x4xbf16, #tpu.memory_space<vmem>>, vector<1x12x4xbf16>
    %68 = vector.shape_cast %67 : vector<1x12x4xbf16> to vector<12x4xbf16>
    %cst_77 = arith.constant dense<0.000000e+00> : vector<256x4xf32>
    %69 = tpu.matmul %66, %68, %cst_77 {dimension_numbers = #tpu.dot_dimension_numbers<[1], [0], [0], [1], [0, 0, 1, 1], [], []>} : vector<256x12xbf16>, vector<12x4xbf16>, vector<256x4xf32> -> vector<256x4xf32>
    %c6_78 = arith.constant 6 : index
    %c2_79 = arith.constant 2 : index
    %c0_80 = arith.constant 0 : index
    %70 = vector.load %arg7[%c6_78, %c2_79, %c0_80] : memref<28x28x4xbf16, #tpu.memory_space<vmem>>, vector<16x16x4xbf16>
    %c6_81 = arith.constant 6 : index
    %c6_82 = arith.constant 6 : index
    %c0_83 = arith.constant 0 : index
    %71 = vector.load %arg7[%c6_81, %c6_82, %c0_83] : memref<28x28x4xbf16, #tpu.memory_space<vmem>>, vector<16x16x4xbf16>
    %c6_84 = arith.constant 6 : index
    %c10_85 = arith.constant 10 : index
    %c0_86 = arith.constant 0 : index
    %72 = vector.load %arg7[%c6_84, %c10_85, %c0_86] : memref<28x28x4xbf16, #tpu.memory_space<vmem>>, vector<16x16x4xbf16>
    %73 = tpu.concatenate %70, %71, %72 in 2 : vector<16x16x4xbf16>, vector<16x16x4xbf16>, vector<16x16x4xbf16> -> vector<16x16x12xbf16>
    %74 = vector.shape_cast %73 : vector<16x16x12xbf16> to vector<256x12xbf16>
    %c4_87 = arith.constant 4 : index
    %c0_88 = arith.constant 0 : index
    %c0_89 = arith.constant 0 : index
    %75 = vector.load %arg3[%c4_87, %c0_88, %c0_89] : memref<9x12x4xbf16, #tpu.memory_space<vmem>>, vector<1x12x4xbf16>
    %76 = vector.shape_cast %75 : vector<1x12x4xbf16> to vector<12x4xbf16>
    %cst_90 = arith.constant dense<0.000000e+00> : vector<256x4xf32>
    %77 = tpu.matmul %74, %76, %cst_90 {dimension_numbers = #tpu.dot_dimension_numbers<[1], [0], [0], [1], [0, 0, 1, 1], [], []>} : vector<256x12xbf16>, vector<12x4xbf16>, vector<256x4xf32> -> vector<256x4xf32>
    %78 = arith.addf %69, %77 : vector<256x4xf32>
    %c10_91 = arith.constant 10 : index
    %c2_92 = arith.constant 2 : index
    %c0_93 = arith.constant 0 : index
    %79 = vector.load %arg7[%c10_91, %c2_92, %c0_93] : memref<28x28x4xbf16, #tpu.memory_space<vmem>>, vector<16x16x4xbf16>
    %c10_94 = arith.constant 10 : index
    %c6_95 = arith.constant 6 : index
    %c0_96 = arith.constant 0 : index
    %80 = vector.load %arg7[%c10_94, %c6_95, %c0_96] : memref<28x28x4xbf16, #tpu.memory_space<vmem>>, vector<16x16x4xbf16>
    %c10_97 = arith.constant 10 : index
    %c10_98 = arith.constant 10 : index
    %c0_99 = arith.constant 0 : index
    %81 = vector.load %arg7[%c10_97, %c10_98, %c0_99] : memref<28x28x4xbf16, #tpu.memory_space<vmem>>, vector<16x16x4xbf16>
    %82 = tpu.concatenate %79, %80, %81 in 2 : vector<16x16x4xbf16>, vector<16x16x4xbf16>, vector<16x16x4xbf16> -> vector<16x16x12xbf16>
    %83 = vector.shape_cast %82 : vector<16x16x12xbf16> to vector<256x12xbf16>
    %c5 = arith.constant 5 : index
    %c0_100 = arith.constant 0 : index
    %c0_101 = arith.constant 0 : index
    %84 = vector.load %arg3[%c5, %c0_100, %c0_101] : memref<9x12x4xbf16, #tpu.memory_space<vmem>>, vector<1x12x4xbf16>
    %85 = vector.shape_cast %84 : vector<1x12x4xbf16> to vector<12x4xbf16>
    %cst_102 = arith.constant dense<0.000000e+00> : vector<256x4xf32>
    %86 = tpu.matmul %83, %85, %cst_102 {dimension_numbers = #tpu.dot_dimension_numbers<[1], [0], [0], [1], [0, 0, 1, 1], [], []>} : vector<256x12xbf16>, vector<12x4xbf16>, vector<256x4xf32> -> vector<256x4xf32>
    %87 = arith.addf %78, %86 : vector<256x4xf32>
    %c2_103 = arith.constant 2 : index
    %c0_104 = arith.constant 0 : index
    %c0_105 = arith.constant 0 : index
    %88 = vector.load %arg5[%c2_103, %c0_104, %c0_105] : memref<5x2x4xf32, #tpu.memory_space<vmem>>, vector<1x2x4xf32>
    %89 = vector.shape_cast %88 : vector<1x2x4xf32> to vector<2x4xf32>
    %90 = vector.extract_strided_slice %89 {offsets = [0, 0], sizes = [1, 4], strides = [1, 1]} : vector<2x4xf32> to vector<1x4xf32>
    %91 = vector.broadcast %90 : vector<1x4xf32> to vector<256x4xf32>
    %92 = arith.mulf %87, %91 : vector<256x4xf32>
    %93 = vector.extract_strided_slice %89 {offsets = [1, 0], sizes = [1, 4], strides = [1, 1]} : vector<2x4xf32> to vector<1x4xf32>
    %94 = vector.broadcast %93 : vector<1x4xf32> to vector<256x4xf32>
    %95 = arith.addf %92, %94 : vector<256x4xf32>
    %cst_106 = arith.constant 0.000000e+00 : f32
    %96 = vector.broadcast %cst_106 : f32 to vector<256x4xf32>
    %97 = arith.maximumf %95, %96 : vector<256x4xf32>
    %98 = arith.truncf %97 : vector<256x4xf32> to vector<256x4xbf16>
    %c0_107 = arith.constant 0 : index
    %c0_108 = arith.constant 0 : index
    %c0_109 = arith.constant 0 : index
    %99 = vector.load %arg7[%c0_107, %c0_108, %c0_109] : memref<28x28x4xbf16, #tpu.memory_space<vmem>>, vector<16x16x4xbf16>
    %c0_110 = arith.constant 0 : index
    %c6_111 = arith.constant 6 : index
    %c0_112 = arith.constant 0 : index
    %100 = vector.load %arg7[%c0_110, %c6_111, %c0_112] : memref<28x28x4xbf16, #tpu.memory_space<vmem>>, vector<16x16x4xbf16>
    %c0_113 = arith.constant 0 : index
    %c12 = arith.constant 12 : index
    %c0_114 = arith.constant 0 : index
    %101 = vector.load %arg7[%c0_113, %c12, %c0_114] : memref<28x28x4xbf16, #tpu.memory_space<vmem>>, vector<16x16x4xbf16>
    %102 = tpu.concatenate %99, %100, %101 in 2 : vector<16x16x4xbf16>, vector<16x16x4xbf16>, vector<16x16x4xbf16> -> vector<16x16x12xbf16>
    %103 = vector.shape_cast %102 : vector<16x16x12xbf16> to vector<256x12xbf16>
    %c6_115 = arith.constant 6 : index
    %c0_116 = arith.constant 0 : index
    %c0_117 = arith.constant 0 : index
    %104 = vector.load %arg3[%c6_115, %c0_116, %c0_117] : memref<9x12x4xbf16, #tpu.memory_space<vmem>>, vector<1x12x4xbf16>
    %105 = vector.shape_cast %104 : vector<1x12x4xbf16> to vector<12x4xbf16>
    %cst_118 = arith.constant dense<0.000000e+00> : vector<256x4xf32>
    %106 = tpu.matmul %103, %105, %cst_118 {dimension_numbers = #tpu.dot_dimension_numbers<[1], [0], [0], [1], [0, 0, 1, 1], [], []>} : vector<256x12xbf16>, vector<12x4xbf16>, vector<256x4xf32> -> vector<256x4xf32>
    %c6_119 = arith.constant 6 : index
    %c0_120 = arith.constant 0 : index
    %c0_121 = arith.constant 0 : index
    %107 = vector.load %arg7[%c6_119, %c0_120, %c0_121] : memref<28x28x4xbf16, #tpu.memory_space<vmem>>, vector<16x16x4xbf16>
    %c6_122 = arith.constant 6 : index
    %c6_123 = arith.constant 6 : index
    %c0_124 = arith.constant 0 : index
    %108 = vector.load %arg7[%c6_122, %c6_123, %c0_124] : memref<28x28x4xbf16, #tpu.memory_space<vmem>>, vector<16x16x4xbf16>
    %c6_125 = arith.constant 6 : index
    %c12_126 = arith.constant 12 : index
    %c0_127 = arith.constant 0 : index
    %109 = vector.load %arg7[%c6_125, %c12_126, %c0_127] : memref<28x28x4xbf16, #tpu.memory_space<vmem>>, vector<16x16x4xbf16>
    %110 = tpu.concatenate %107, %108, %109 in 2 : vector<16x16x4xbf16>, vector<16x16x4xbf16>, vector<16x16x4xbf16> -> vector<16x16x12xbf16>
    %111 = vector.shape_cast %110 : vector<16x16x12xbf16> to vector<256x12xbf16>
    %c7 = arith.constant 7 : index
    %c0_128 = arith.constant 0 : index
    %c0_129 = arith.constant 0 : index
    %112 = vector.load %arg3[%c7, %c0_128, %c0_129] : memref<9x12x4xbf16, #tpu.memory_space<vmem>>, vector<1x12x4xbf16>
    %113 = vector.shape_cast %112 : vector<1x12x4xbf16> to vector<12x4xbf16>
    %cst_130 = arith.constant dense<0.000000e+00> : vector<256x4xf32>
    %114 = tpu.matmul %111, %113, %cst_130 {dimension_numbers = #tpu.dot_dimension_numbers<[1], [0], [0], [1], [0, 0, 1, 1], [], []>} : vector<256x12xbf16>, vector<12x4xbf16>, vector<256x4xf32> -> vector<256x4xf32>
    %115 = arith.addf %106, %114 : vector<256x4xf32>
    %c12_131 = arith.constant 12 : index
    %c0_132 = arith.constant 0 : index
    %c0_133 = arith.constant 0 : index
    %116 = vector.load %arg7[%c12_131, %c0_132, %c0_133] : memref<28x28x4xbf16, #tpu.memory_space<vmem>>, vector<16x16x4xbf16>
    %c12_134 = arith.constant 12 : index
    %c6_135 = arith.constant 6 : index
    %c0_136 = arith.constant 0 : index
    %117 = vector.load %arg7[%c12_134, %c6_135, %c0_136] : memref<28x28x4xbf16, #tpu.memory_space<vmem>>, vector<16x16x4xbf16>
    %c12_137 = arith.constant 12 : index
    %c12_138 = arith.constant 12 : index
    %c0_139 = arith.constant 0 : index
    %118 = vector.load %arg7[%c12_137, %c12_138, %c0_139] : memref<28x28x4xbf16, #tpu.memory_space<vmem>>, vector<16x16x4xbf16>
    %119 = tpu.concatenate %116, %117, %118 in 2 : vector<16x16x4xbf16>, vector<16x16x4xbf16>, vector<16x16x4xbf16> -> vector<16x16x12xbf16>
    %120 = vector.shape_cast %119 : vector<16x16x12xbf16> to vector<256x12xbf16>
    %c8_140 = arith.constant 8 : index
    %c0_141 = arith.constant 0 : index
    %c0_142 = arith.constant 0 : index
    %121 = vector.load %arg3[%c8_140, %c0_141, %c0_142] : memref<9x12x4xbf16, #tpu.memory_space<vmem>>, vector<1x12x4xbf16>
    %122 = vector.shape_cast %121 : vector<1x12x4xbf16> to vector<12x4xbf16>
    %cst_143 = arith.constant dense<0.000000e+00> : vector<256x4xf32>
    %123 = tpu.matmul %120, %122, %cst_143 {dimension_numbers = #tpu.dot_dimension_numbers<[1], [0], [0], [1], [0, 0, 1, 1], [], []>} : vector<256x12xbf16>, vector<12x4xbf16>, vector<256x4xf32> -> vector<256x4xf32>
    %124 = arith.addf %115, %123 : vector<256x4xf32>
    %c3_144 = arith.constant 3 : index
    %c0_145 = arith.constant 0 : index
    %c0_146 = arith.constant 0 : index
    %125 = vector.load %arg5[%c3_144, %c0_145, %c0_146] : memref<5x2x4xf32, #tpu.memory_space<vmem>>, vector<1x2x4xf32>
    %126 = vector.shape_cast %125 : vector<1x2x4xf32> to vector<2x4xf32>
    %127 = vector.extract_strided_slice %126 {offsets = [0, 0], sizes = [1, 4], strides = [1, 1]} : vector<2x4xf32> to vector<1x4xf32>
    %128 = vector.broadcast %127 : vector<1x4xf32> to vector<256x4xf32>
    %129 = arith.mulf %124, %128 : vector<256x4xf32>
    %130 = vector.extract_strided_slice %126 {offsets = [1, 0], sizes = [1, 4], strides = [1, 1]} : vector<2x4xf32> to vector<1x4xf32>
    %131 = vector.broadcast %130 : vector<1x4xf32> to vector<256x4xf32>
    %132 = arith.addf %129, %131 : vector<256x4xf32>
    %cst_147 = arith.constant 0.000000e+00 : f32
    %133 = vector.broadcast %cst_147 : f32 to vector<256x4xf32>
    %134 = arith.maximumf %132, %133 : vector<256x4xf32>
    %135 = arith.truncf %134 : vector<256x4xf32> to vector<256x4xbf16>
    %cst_148 = arith.constant 1.000000e+00 : bf16
    %136 = vector.broadcast %cst_148 : bf16 to vector<1x256xbf16>
    %cst_149 = arith.constant dense<0.000000e+00> : vector<1x4xf32>
    %137 = tpu.matmul %136, %11, %cst_149 {dimension_numbers = #tpu.dot_dimension_numbers<[1], [0], [0], [1], [0, 0, 1, 1], [], []>} : vector<1x256xbf16>, vector<256x4xbf16>, vector<1x4xf32> -> vector<1x4xf32>
    %cst_150 = arith.constant 3.906250e-03 : f32
    %138 = vector.broadcast %cst_150 : f32 to vector<1x4xf32>
    %139 = arith.mulf %137, %138 : vector<1x4xf32>
    %c0_151 = arith.constant 0 : index
    %c0_152 = arith.constant 0 : index
    %140 = vector.load %arg4[%c0_151, %c0_152] : memref<4x4xbf16, #tpu.memory_space<vmem>>, vector<4x4xbf16>
    %141 = arith.extf %140 : vector<4x4xbf16> to vector<4x4xf32>
    %cst_153 = arith.constant dense<0.000000e+00> : vector<1x4xf32>
    %142 = tpu.matmul %139, %141, %cst_153 {dimension_numbers = #tpu.dot_dimension_numbers<[1], [0], [0], [1], [0, 0, 1, 1], [], []>} : vector<1x4xf32>, vector<4x4xf32>, vector<1x4xf32> -> vector<1x4xf32>
    %c4_154 = arith.constant 4 : index
    %c0_155 = arith.constant 0 : index
    %c0_156 = arith.constant 0 : index
    %143 = vector.load %arg5[%c4_154, %c0_155, %c0_156] : memref<5x2x4xf32, #tpu.memory_space<vmem>>, vector<1x2x4xf32>
    %144 = vector.shape_cast %143 : vector<1x2x4xf32> to vector<2x4xf32>
    %145 = vector.extract_strided_slice %144 {offsets = [0, 0], sizes = [1, 4], strides = [1, 1]} : vector<2x4xf32> to vector<1x4xf32>
    %146 = arith.mulf %142, %145 : vector<1x4xf32>
    %147 = vector.extract_strided_slice %144 {offsets = [1, 0], sizes = [1, 4], strides = [1, 1]} : vector<2x4xf32> to vector<1x4xf32>
    %148 = arith.addf %146, %147 : vector<1x4xf32>
    %cst_157 = arith.constant 0.000000e+00 : f32
    %149 = vector.broadcast %cst_157 : f32 to vector<1x4xf32>
    %150 = arith.maximumf %148, %149 : vector<1x4xf32>
    %151 = arith.truncf %150 : vector<1x4xf32> to vector<1x4xbf16>
    %152 = vector.shape_cast %151 : vector<1x4xbf16> to vector<1x4xbf16>
    %153 = vector.broadcast %152 : vector<1x4xbf16> to vector<256x4xbf16>
    %154 = tpu.concatenate %24, %61, %98, %135, %153 in 1 : vector<256x4xbf16>, vector<256x4xbf16>, vector<256x4xbf16>, vector<256x4xbf16>, vector<256x4xbf16> -> vector<256x20xbf16>
    %155 = vector.shape_cast %154 : vector<256x20xbf16> to vector<16x16x20xbf16>
    %c0_158 = arith.constant 0 : index
    %c0_159 = arith.constant 0 : index
    %c0_160 = arith.constant 0 : index
    %c0_161 = arith.constant 0 : index
    %156 = vector.load %arg6[%c0_158, %c0_159, %c0_160, %c0_161] : memref<1x16x16x20xbf16, #tpu.memory_space<vmem>>, vector<1x16x16x20xbf16>
    %157 = vector.shape_cast %156 : vector<1x16x16x20xbf16> to vector<16x16x20xbf16>
    %158 = vector.shape_cast %155 : vector<16x16x20xbf16> to vector<1x16x16x20xbf16>
    tpu.vector_store %arg6[%c0_158, %c0_159, %c0_160, %c0_161], %158 {strides = array<i32>} : memref<1x16x16x20xbf16, #tpu.memory_space<vmem>>, vector<1x16x16x20xbf16>,
    return
  }
  func.func @transform_0(%arg0: i32) -> (i32, i32, i32, i32) {
    %c0_i32 = arith.constant 0 : i32
    %c0_i32_0 = arith.constant 0 : i32
    %c0_i32_1 = arith.constant 0 : i32
    %c0_i32_2 = arith.constant 0 : i32
    return %arg0, %c0_i32, %c0_i32_0, %c0_i32_1 : i32, i32, i32, i32
  }
  func.func @transform_1(%arg0: i32) -> (i32, i32) {
    %c0_i32 = arith.constant 0 : i32
    %c0_i32_0 = arith.constant 0 : i32
    %c0_i32_1 = arith.constant 0 : i32
    return %c0_i32, %c0_i32_0 : i32, i32
  }
  func.func @transform_2(%arg0: i32) -> (i32, i32, i32) {
    %c0_i32 = arith.constant 0 : i32
    %c0_i32_0 = arith.constant 0 : i32
    %c0_i32_1 = arith.constant 0 : i32
    %c0_i32_2 = arith.constant 0 : i32
    return %c0_i32, %c0_i32_0, %c0_i32_1 : i32, i32, i32
  }
  func.func @transform_3(%arg0: i32) -> (i32, i32) {
    %c0_i32 = arith.constant 0 : i32
    %c0_i32_0 = arith.constant 0 : i32
    %c0_i32_1 = arith.constant 0 : i32
    return %c0_i32, %c0_i32_0 : i32, i32
  }
  func.func @transform_4(%arg0: i32) -> (i32, i32, i32) {
    %c0_i32 = arith.constant 0 : i32
    %c0_i32_0 = arith.constant 0 : i32
    %c0_i32_1 = arith.constant 0 : i32
    %c0_i32_2 = arith.constant 0 : i32
    return %c0_i32, %c0_i32_0, %c0_i32_1 : i32, i32, i32
  }
  func.func @transform_5(%arg0: i32) -> (i32, i32, i32, i32) {
    %c0_i32 = arith.constant 0 : i32
    %c0_i32_0 = arith.constant 0 : i32
    %c0_i32_1 = arith.constant 0 : i32
    %c0_i32_2 = arith.constant 0 : i32
    return %arg0, %c0_i32, %c0_i32_0, %c0_i32_1 : i32, i32, i32, i32
  }
}

</mosaic_0001>

<bundles_post_ra>
// kernel: tpu_custom_call.1
= control target key start
LH: loop header
LB: loop body
LE: loop exit
PB: predicated region body
PF: predicated region fallthrough
CT: control target
= control target key end

     0   :  { %10 = vsyncpa [#allocation4], 0  ;;  %s17130_s0 = inlined_call_operand.vmem [shape: bf16[2,16,16,4], index: 0, kind: input, shape index: {}]   ;;  %s17131_s1 = inlined_call_operand.vmem [shape: bf16[4,4], index: 1, kind: input, shape index: {}]   ;;  %s17132_s2 = inlined_call_operand.vmem [shape: bf16[9,12,4], index: 2, kind: input, shape index: {}]   ;;  %s17133_s3 = inlined_call_operand.vmem [shape: bf16[4,4], index: 3, kind: input, shape index: {}]   ;;  %s17134_s4 = inlined_call_operand.vmem [shape: f32[5,2,4], index: 4, kind: input, shape index: {}]   ;;  %s17135_s5 = inlined_call_operand.hbm [shape: bf16[2,16,16,20], index: 5, kind: output, shape index: {}]  }
   0x1   :  { %12 = vsyncpa [#allocation4 + $0x1], 0  ;;  %s13318_s18 = smov 0   ;;  %s13320_s19 = smov 0  }
   0x2   :  { %s13322_s20 = smov 0   ;;  %s13324_s21 = smov 0  }
   0x3 LB: > { %s13339_s22 = sadd.s32 4294967295, %s13276_s21   ;;  %s10632_s23 = sadd.s32 4294967294, %s13276_s21   ;;  %s13276_s21 = sphi %s13324_s21, %s17439_s21   ;;  %s13272_s20 = sphi %s13322_s20, %s17438_s20   ;;  %s13268_s19 = sphi %s13320_s19, %s17437_s19   ;;  %s13264_s18 = sphi %s13318_s18, %s17436_s18  }
   0x4   : > { %s13343_s24 = sadd.s32 1, %s13276_s21   ;;  %s135_s25 = sadd.s32 1, %s13272_s20 }
   0x5   : > { %s132_s26 = ssub.s32 %s13276_s21, %s13343_s24  ;;  %p145_p0 = scmp.ne.s32.totalorder %s13272_s20, %s13268_s19 }
   0x6   : > { %p133_p1 = scmp.eq.s32.totalorder %s132_s26, 0  ;;  %p146_p2 = scmp.eq.s32.totalorder %s13339_s22, 1 }
   0x7   : > { %p151_p3 = scmp.ne.s32.totalorder %s13268_s19, %s13264_s18  ;;  %p152_p4 = scmp.eq.s32.totalorder %s10632_s23, 1 }
   0x8   : > { %s13354_s27 = scalar_select %p133_p1, %s13272_s20, %s135_s25  }
   0x9   : > { %p13356_p5 = por %p146_p2, %p145_p0  ;;  %p13360_p6 = por %p152_p4, %p151_p3 }
   0xa   : > { %p10635_p7 = scmp.ge.s32.totalorder %s13276_s21, 1  ;;  %p190_p8 = scmp.lt.s32.totalorder %s13276_s21, 3 }
   0xc   : > { %p191_p9 = pnand %p10635_p7, %p190_p8 }
   0xe   : > { %194 = sbr.rel (%p191_p9) target bundleno = 1432 (0x598), region = 40 }
  0x15   : > { %vm225_vm0 = vcmask 27648   ;;  %p218_p10 = scmp.lt.s32.totalorder %s13339_s22, 1  ;;  %vm277_vm1 = vcmask 26624   ;;  %v13278_v0 = vmov 0   ;;  %vm294_vm2 = vcmask 27651   ;;  %s13279_s10 = smov 4  }
  0x16   : > { %249 = vst.msk [vmem:[#allocation2 + $0x58] sm:$0xf] %vm225_vm0, %v13278_v0  ;;  %226 = vst.msk [vmem:[#allocation2] sm:$0xf] %vm225_vm0, %v13278_v0  ;;  %vm391_vm3 = vcmask 1042432   ;;  %vm392_vm4 = vcmask 1046532  }
  0x17   : > { %227 = vst.msk [vmem:[#allocation2 + $0x4] sm:$0xf] %vm225_vm0, %v13278_v0  ;;  %228 = vst.msk [vmem:[#allocation2 + $0x8] sm:$0xf] %vm225_vm0, %v13278_v0  ;;  %s219_s30 = scalar_select %p218_p10, %s13339_s22, 1  ;;  %vm1339_vm6 = vcmask 1046528  }
  0x18   : > { %231 = vst.msk [vmem:[#allocation2 + $0x10] sm:$0xf] %vm225_vm0, %v13278_v0  ;;  %232 = vst.msk [vmem:[#allocation2 + $0x14] sm:$0xf] %vm225_vm0, %v13278_v0  ;;  %s13280_s11 = smov 8   ;;  %vm683_vm7 = vcmask 31744  }
  0x19   : > { %233 = vst.msk [vmem:[#allocation2 + $0x18] sm:$0xf] %vm225_vm0, %v13278_v0  ;;  %235 = vst.msk [vmem:[#allocation2 + $0x20] sm:$0xf] %vm225_vm0, %v13278_v0  ;;  %s11587_s6 = sshll.u32 %s219_s30, 7  ;;  %vm229_vm8 = vcmask 25600  }
  0x1a   : > { %236 = vst.msk [vmem:[#allocation2 + $0x24] sm:$0xf] %vm225_vm0, %v13278_v0  ;;  %237 = vst.msk [vmem:[#allocation2 + $0x28] sm:$0xf] %vm225_vm0, %v13278_v0  ;;  %s13509_s9 = scalar_lea.vmem %s17130_s0, %s11587_s6  ;;  %vm732_vm9 = vcmask 1041408   ;;  %vm1725_vm10 = vcmask 1045504  }
  0x1b   : > { %239 = vst.msk [vmem:[#allocation2 + $0x30] sm:$0xf] %vm225_vm0, %v13278_v0  ;;  %240 = vst.msk [vmem:[#allocation2 + $0x34] sm:$0xf] %vm225_vm0, %v13278_v0  ;;  %v328_v1 = vld [vmem:[%s13509_s9 + $0x4] sm:$0xf] }
  0x1c   : > { %241 = vst.msk [vmem:[#allocation2 + $0x38] sm:$0xf] %vm225_vm0, %v13278_v0  ;;  %243 = vst.msk [vmem:[#allocation2 + $0x40] sm:$0xf] %vm225_vm0, %v13278_v0  ;;  %v327_v2 = vld [vmem:[%s13509_s9] sm:$0xf] }
  0x1d   : > { %244 = vst.msk [vmem:[#allocation2 + $0x44] sm:$0xf] %vm225_vm0, %v13278_v0  ;;  %245 = vst.msk [vmem:[#allocation2 + $0x48] sm:$0xf] %vm225_vm0, %v13278_v0  ;;  %v330_v3 = vld [vmem:[%s13509_s9 + $0xc] sm:$0xf] }
  0x1e   : > { %247 = vst.msk [vmem:[#allocation2 + $0x50] sm:$0xf] %vm225_vm0, %v13278_v0  ;;  %248 = vst.msk [vmem:[#allocation2 + $0x54] sm:$0xf] %vm225_vm0, %v13278_v0  ;;  %v396_v4 = vrot.slane %v328_v1, 5  ;;  %v394_v5 = vrot.slane %v327_v2, 5 }
  0x1f   : > { %252 = vst.msk [vmem:[#allocation2 + $0x160] sm:$0xf] %vm225_vm0, %v13278_v0  ;;  %253 = vst.msk [vmem:[#allocation2 + $0x164] sm:$0xf] %vm225_vm0, %v13278_v0  ;;  %v401_v6 = vrot.slane %v330_v3, 5  ;;  %vm1644_vm11 = vcmask 64512  }
  0x20   : > { %254 = vst.msk [vmem:[#allocation2 + $0x168] sm:$0xf] %vm225_vm0, %v13278_v0  ;;  %256 = vst.msk [vmem:[#allocation2 + $0x170] sm:$0xf] %vm225_vm0, %v13278_v0  ;;  %v329_v7 = vld [vmem:[%s13509_s9 + $0x8] sm:$0xf] }
  0x21   : > { %257 = vst.msk [vmem:[#allocation2 + $0x174] sm:$0xf] %vm225_vm0, %v13278_v0  ;;  %258 = vst.msk [vmem:[#allocation2 + $0x178] sm:$0xf] %vm225_vm0, %v13278_v0  ;;  %v399_v9 = vrot.slane %v329_v7, 5  ;;  %v398_v11 = vrot.slane %v396_v4, 4 }
  0x22   : > { %260 = vst.msk [vmem:[#allocation2 + $0x180] sm:$0xf] %vm225_vm0, %v13278_v0  ;;  %261 = vst.msk [vmem:[#allocation2 + $0x184] sm:$0xf] %vm225_vm0, %v13278_v0  ;;  %v395_v16 = vrot.slane %v394_v5, 4  ;;  %v403_v21 = vrot.slane %v401_v6, 4 }
  0x23   : > { %262 = vst.msk [vmem:[#allocation2 + $0x188] sm:$0xf] %vm225_vm0, %v13278_v0  ;;  %264 = vst.msk [vmem:[#allocation2 + $0x190] sm:$0xf] %vm225_vm0, %v13278_v0  ;;  %v1067_v20 = vld [vmem:[#allocation2 + $0x40] sm:$0x8] }
  0x24   : > { %265 = vst.msk [vmem:[#allocation2 + $0x194] sm:$0xf] %vm225_vm0, %v13278_v0  ;;  %266 = vst.msk [vmem:[#allocation2 + $0x198] sm:$0xf] %vm225_vm0, %v13278_v0  ;;  %v13525_v19 = vld [vmem:[#allocation2 + $0x44] sm:$0xf] }
  0x25   : > { %268 = vst.msk [vmem:[#allocation2 + $0x1a0] sm:$0xf] %vm225_vm0, %v13278_v0  ;;  %269 = vst.msk [vmem:[#allocation2 + $0x1a4] sm:$0xf] %vm225_vm0, %v13278_v0  ;;  %v13521_v14 = vld [vmem:[#allocation2 + $0x54] sm:$0xf]  ;;  %v10703_v22 = vcombine.low %v1067_v20, %v13525_v19 }
  0x26   : > { %270 = vst.msk [vmem:[#allocation2 + $0x1a8] sm:$0xf] %vm225_vm0, %v13278_v0  ;;  %272 = vst.msk [vmem:[#allocation2 + $0x1b0] sm:$0xf] %vm225_vm0, %v13278_v0  ;;  %v1069_v15 = vld [vmem:[#allocation2 + $0x50] sm:$0x8] }
  0x27   : > { %273 = vst.msk [vmem:[#allocation2 + $0x1b4] sm:$0xf] %vm225_vm0, %v13278_v0  ;;  %274 = vst.msk [vmem:[#allocation2 + $0x1b8] sm:$0xf] %vm225_vm0, %v13278_v0  ;;  %v10705_v18 = vcombine.low %v1069_v15, %v13521_v14  ;;  %v400_v24 = vrot.slane %v399_v9, 4  ;;  %v1340_v31 = vrot.slane %v10703_v22, 1 }
  0x28   : > { %278 = vst.msk [vmem:[#allocation2 + $0x60] sm:$0x7] %vm277_vm1, %v13278_v0  ;;  %279 = vst.msk [vmem:[#allocation2 + $0x70] sm:$0x7] %vm277_vm1, %v13278_v0  ;;  %v332_v25 = vld [vmem:[%s13509_s9 + $0x14] sm:$0xf] }
  0x29   : > { %280 = vst.msk [vmem:[#allocation2 + $0x80] sm:$0x7] %vm277_vm1, %v13278_v0  ;;  %281 = vst.msk [vmem:[#allocation2 + $0x90] sm:$0x7] %vm277_vm1, %v13278_v0  ;;  %v331_v26 = vld [vmem:[%s13509_s9 + $0x10] sm:$0xf] }
  0x2a   : > { %282 = vst.msk [vmem:[#allocation2 + $0xa0] sm:$0x7] %vm277_vm1, %v13278_v0  ;;  %283 = vst.msk [vmem:[#allocation2 + $0xb0] sm:$0x7] %vm277_vm1, %v13278_v0  ;;  %v1343_v27 = vrot.slane %v10705_v18, 1  ;;  %v406_v28 = vrot.slane %v332_v25, 5 }
  0x2b   : > { %284 = vst.msk [vmem:[#allocation2 + $0xc0] sm:$0x7] %vm277_vm1, %v13278_v0  ;;  %285 = vst.msk [vmem:[#allocation2 + $0xd0] sm:$0x7] %vm277_vm1, %v13278_v0  ;;  %v404_v29 = vrot.slane %v331_v26, 5  ;;  %vm2536_vm12 = vcmask 97280  }
  0x2c   : > { %286 = vst.msk [vmem:[#allocation2 + $0xe0] sm:$0x7] %vm277_vm1, %v13278_v0  ;;  %287 = vst.msk [vmem:[#allocation2 + $0xf0] sm:$0x7] %vm277_vm1, %v13278_v0  ;;  %v334_v30 = vld [vmem:[%s13509_s9 + $0x1c] sm:$0xf] }
  0x2d   : > { %288 = vst.msk [vmem:[#allocation2 + $0x100] sm:$0x7] %vm277_vm1, %v13278_v0  ;;  %289 = vst.msk [vmem:[#allocation2 + $0x110] sm:$0x7] %vm277_vm1, %v13278_v0  ;;  %v411_v33 = vrot.slane %v334_v30, 5  ;;  %v408_v37 = vrot.slane %v406_v28, 4 }
  0x2e   : > { %290 = vst.msk [vmem:[#allocation2 + $0x120] sm:$0x7] %vm277_vm1, %v13278_v0  ;;  %291 = vst.msk [vmem:[#allocation2 + $0x130] sm:$0x7] %vm277_vm1, %v13278_v0  ;;  %v333_v34 = vld [vmem:[%s13509_s9 + $0x18] sm:$0xf] }
  0x2f   : > { %292 = vst.msk [vmem:[#allocation2 + $0x140] sm:$0x7] %vm277_vm1, %v13278_v0  ;;  %293 = vst.msk [vmem:[#allocation2 + $0x150] sm:$0x7] %vm277_vm1, %v13278_v0  ;;  %v336_v35 = vld [vmem:[%s13509_s9 + $0x24] sm:$0xf] }
  0x30   : > { %295 = vst.msk [vmem:[#allocation2 + $0x68] sm:$0x8] %vm294_vm2, %v13278_v0  ;;  %297 = vst.msk [vmem:[#allocation2 + $0x78] sm:$0x8] %vm294_vm2, %v13278_v0  ;;  %v405_v38 = vrot.slane %v404_v29, 4  ;;  %v409_v39 = vrot.slane %v333_v34, 5 }
  0x31   : > { %299 = vst.msk [vmem:[#allocation2 + $0x88] sm:$0x8] %vm294_vm2, %v13278_v0  ;;  %301 = vst.msk [vmem:[#allocation2 + $0x98] sm:$0x8] %vm294_vm2, %v13278_v0  ;;  %v335_v40 = vld [vmem:[%s13509_s9 + $0x20] sm:$0xf] }
  0x32   : > { %303 = vst.msk [vmem:[#allocation2 + $0xa8] sm:$0x8] %vm294_vm2, %v13278_v0  ;;  %305 = vst.msk [vmem:[#allocation2 + $0xb8] sm:$0x8] %vm294_vm2, %v13278_v0  ;;  %v413_v42 = vrot.slane %v411_v33, 4  ;;  %v416_v43 = vrot.slane %v336_v35, 5 }
  0x33   : > { %307 = vst.msk [vmem:[#allocation2 + $0xc8] sm:$0x8] %vm294_vm2, %v13278_v0  ;;  %309 = vst.msk [vmem:[#allocation2 + $0xd8] sm:$0x8] %vm294_vm2, %v13278_v0  ;;  %v414_v44 = vrot.slane %v335_v40, 5  ;;  %v410_v47 = vrot.slane %v409_v39, 4 }
  0x34   : > { %311 = vst.msk [vmem:[#allocation2 + $0xe8] sm:$0x8] %vm294_vm2, %v13278_v0  ;;  %313 = vst.msk [vmem:[#allocation2 + $0xf8] sm:$0x8] %vm294_vm2, %v13278_v0  ;;  %v338_v48 = vld [vmem:[%s13509_s9 + $0x2c] sm:$0xf] }
  0x35   : > { %315 = vst.msk [vmem:[#allocation2 + $0x108] sm:$0x8] %vm294_vm2, %v13278_v0  ;;  %317 = vst.msk [vmem:[#allocation2 + $0x118] sm:$0x8] %vm294_vm2, %v13278_v0  ;;  %v418_v51 = vrot.slane %v416_v43, 4  ;;  %v415_v53 = vrot.slane %v414_v44, 4 }
  0x36   : > { %319 = vst.msk [vmem:[#allocation2 + $0x128] sm:$0x8] %vm294_vm2, %v13278_v0  ;;  %321 = vst.msk [vmem:[#allocation2 + $0x138] sm:$0x8] %vm294_vm2, %v13278_v0  ;;  %v421_v54 = vrot.slane %v338_v48, 5  ;;  %vm7710_vm13 = vcmask 1044480  }
  0x37   : > { %323 = vst.msk [vmem:[#allocation2 + $0x148] sm:$0x8] %vm294_vm2, %v13278_v0  ;;  %325 = vst.msk [vmem:[#allocation2 + $0x158] sm:$0x8] %vm294_vm2, %v13278_v0  ;;  %v337_v55 = vld [vmem:[%s13509_s9 + $0x28] sm:$0xf] }
  0x38   : > { %v12381_v8 = vld [vmem:[#allocation2 + $0x58] ss:$0 sps:$4 sm:$0x77]   ;;  %v12382_v10 = vld [vmem:[#allocation2 + $0x48] ss:$0 sps:$4 sm:$0x77]   ;;  %vm13516_vm5 = vmor %vm391_vm3, %vm392_vm4 }
  0x39   : > { %522 = vst.msk [vmem:[#allocation2 + $0x60] sm:$0x8] %vm294_vm2, %v394_v5  ;;  %v1344_v13 = vrot.slane %v12381_v8, 1  ;;  %525 = vst.msk [vmem:[#allocation2 + $0x70] sm:$0x8] %vm294_vm2, %v399_v9  ;;  %v1341_v17 = vrot.slane %v12382_v10, 1  ;;  %v397_v23 = vsel %vm13516_vm5, %v395_v16, %v396_v4  ;;  %v402_v32 = vsel %vm13516_vm5, %v400_v24, %v401_v6 }
  0x3a   : > { %524 = vst.msk [vmem:[#allocation2 + $0x68] sm:$0x7] %vm277_vm1, %v398_v11  ;;  %527 = vst.msk [vmem:[#allocation2 + $0x78] sm:$0x7] %vm277_vm1, %v403_v21  ;;  %v407_v46 = vsel %vm13516_vm5, %v405_v38, %v406_v28  ;;  %v412_v52 = vsel %vm13516_vm5, %v410_v47, %v411_v33  ;;  %v340_v56 = vld [vmem:[%s13509_s9 + $0x34] sm:$0xf]  ;;  %v417_v62 = vsel %vm13516_vm5, %v415_v53, %v416_v43 }
  0x3b   : > { %1394 = vrot.lane.b32.xlu1 %v1344_v13, %s13279_s10  ;;  %1390 = vrot.lane.b32.xlu0 %v1341_v17, %s13279_s10  ;;  %523 = vst.msk [vmem:[#allocation2 + $0x64] sm:$0xf] %vm225_vm0, %v397_v23  ;;  %v1345_v36 = vsel %vm1339_vm6, %v1343_v27, %v1344_v13  ;;  %526 = vst.msk [vmem:[#allocation2 + $0x74] sm:$0xf] %vm225_vm0, %v402_v32  ;;  %v1342_v41 = vsel %vm1339_vm6, %v1340_v31, %v1341_v17  ;;  %v419_v59 = vrot.slane %v337_v55, 5  ;;  %vm10044_vm14 = vcmask 1043456  }
  0x3c   : > { %528 = vst.msk [vmem:[#allocation2 + $0x80] sm:$0x8] %vm294_vm2, %v404_v29  ;;  %531 = vst.msk [vmem:[#allocation2 + $0x90] sm:$0x8] %vm294_vm2, %v409_v39  ;;  %v423_v63 = vrot.slane %v421_v54, 4  ;;  %v426_v1 = vrot.slane %v340_v56, 5 }
  0x3d   : > { %530 = vst.msk [vmem:[#allocation2 + $0x88] sm:$0x7] %vm277_vm1, %v408_v37  ;;  %533 = vst.msk [vmem:[#allocation2 + $0x98] sm:$0x7] %vm277_vm1, %v413_v42  ;;  %v420_v4 = vrot.slane %v419_v59, 4  ;;  %vm13283_vm15 = vmmov 0  }
  0x3e   : > { %529 = vst.msk [vmem:[#allocation2 + $0x84] sm:$0xf] %vm225_vm0, %v407_v46  ;;  %532 = vst.msk [vmem:[#allocation2 + $0x94] sm:$0xf] %vm225_vm0, %v412_v52  ;;  %v428_v8 = vrot.slane %v426_v1, 4  ;;  %s13284_s23 = smov 12  }
  0x3f   : > { %1392 = vrot.lane.b32.xlu1 %v1345_v36, %s13279_s10  ;;  %1388 = vrot.lane.b32.xlu0 %v1342_v41, %s13279_s10  ;;  %534 = vst.msk [vmem:[#allocation2 + $0xa0] sm:$0x8] %vm294_vm2, %v414_v44  ;;  %537 = vst.msk [vmem:[#allocation2 + $0xb0] sm:$0x8] %vm294_vm2, %v419_v59  ;;  %v339_v9 = vld [vmem:[%s13509_s9 + $0x30] sm:$0xf]  ;;  %v422_v11 = vsel %vm13516_vm5, %v420_v4, %v421_v54 }
  0x40   : > { %v1071_v45 = vld [vmem:[#allocation2 + $0x60] sm:$0x8]  ;;  %v1073_v50 = vld [vmem:[#allocation2 + $0x70] sm:$0x8]  ;;  %536 = vst.msk [vmem:[#allocation2 + $0xa8] sm:$0x7] %vm277_vm1, %v418_v51 }
  0x41   : > { %v12385_v49 = vld [vmem:[#allocation2 + $0x68] ss:$0 sps:$4 sm:$0x77]   ;;  %v12387_v61 = vld [vmem:[#allocation2 + $0x78] ss:$0 sps:$4 sm:$0x77]  }
  0x42   : > { %v1347_v57 = vrot.slane %v12385_v49, 1  ;;  %v13561_v58 = vld [vmem:[#allocation2 + $0x64] sm:$0xf]  ;;  %v13569_v2 = vld [vmem:[#allocation2 + $0x74] sm:$0xf]  ;;  %v1350_v6 = vrot.slane %v12387_v61, 1 }
  0x43   : > { %v10707_v60 = vcombine.low %v1071_v45, %v13561_v58  ;;  %v1075_v3 = vld [vmem:[#allocation2 + $0x80] sm:$0x8]  ;;  %535 = vst.msk [vmem:[#allocation2 + $0xa4] sm:$0xf] %vm225_vm0, %v417_v62  ;;  %v10709_v7 = vcombine.low %v1073_v50, %v13569_v2  ;;  %v424_v13 = vrot.slane %v339_v9, 5  ;;  %s13285_s26 = smov 16  }
  0x44   : > { %1398 = vrot.lane.b32.xlu1 %v1347_v57, %s13279_s10  ;;  %539 = vst.msk [vmem:[#allocation2 + $0xb8] sm:$0x7] %vm277_vm1, %v423_v63  ;;  %v12389_v10 = vld [vmem:[#allocation2 + $0x88] ss:$0 sps:$4 sm:$0x77]   ;;  %s215_s30 = sand.u32 1, %s13268_s19  }
  0x45   : > { %v1346_v5 = vrot.slane %v10707_v60, 1  ;;  %v1349_v16 = vrot.slane %v10709_v7, 1  ;;  %v13579_v17 = vld [vmem:[#allocation2 + $0x84] sm:$0xf]  ;;  %538 = vst.msk [vmem:[#allocation2 + $0xb4] sm:$0xf] %vm225_vm0, %v422_v11 }
  0x46   : > { %542 = vst.msk [vmem:[#allocation2 + $0xc8] sm:$0x7] %vm277_vm1, %v428_v8  ;;  %v1353_v18 = vrot.slane %v12389_v10, 1  ;;  %v10711_v20 = vcombine.low %v1075_v3, %v13579_v17  ;;  %v12391_v21 = vld [vmem:[#allocation2 + $0x98] ss:$0 sps:$4 sm:$0x77]  }
  0x47   : > { %v1348_v15 = vsel %vm1339_vm6, %v1346_v5, %v1347_v57  ;;  %v1077_v22 = vld [vmem:[#allocation2 + $0x90] sm:$0x8]  ;;  %540 = vst.msk [vmem:[#allocation2 + $0xc0] sm:$0x8] %vm294_vm2, %v424_v13  ;;  %v1351_v23 = vsel %vm1339_vm6, %v1349_v16, %v1350_v6  ;;  %v13588_v24 = vld [vmem:[#allocation2 + $0x94] sm:$0xf] }
  0x48   : > { %1396 = vrot.lane.b32.xlu0 %v1348_v15, %s13279_s10  ;;  %1402 = vrot.lane.b32.xlu1 %v1350_v6, %s13279_s10  ;;  %v1079_v25 = vld [vmem:[#allocation2 + $0xa0] sm:$0x8]  ;;  %v1352_v26 = vrot.slane %v10711_v20, 1  ;;  %v10713_v27 = vcombine.low %v1077_v22, %v13588_v24  ;;  %v12393_v28 = vld [vmem:[#allocation2 + $0xa8] ss:$0 sps:$4 sm:$0x77]  }
  0x49   : > { %v425_v29 = vrot.slane %v424_v13, 4  ;;  %v342_v31 = vld [vmem:[%s13509_s9 + $0x3c] sm:$0xf]  ;;  %v1356_v33 = vrot.slane %v12391_v21, 1  ;;  %v341_v35 = vld [vmem:[%s13509_s9 + $0x38] sm:$0xf] }
  0x4a   : > { %v13591_v30 = vld [vmem:[#allocation2 + $0xa4] sm:$0xf]  ;;  %v1354_v32 = vsel %vm1339_vm6, %v1352_v26, %v1353_v18  ;;  %v1355_v36 = vrot.slane %v10713_v27, 1  ;;  %v1081_v37 = vld [vmem:[#allocation2 + $0xb0] sm:$0x8]  ;;  %v431_v39 = vrot.slane %v342_v31, 5 }
  0x4b   : > { %v10715_v34 = vcombine.low %v1079_v25, %v13591_v30  ;;  %v427_v38 = vsel %vm13516_vm5, %v425_v29, %v426_v1  ;;  %v429_v40 = vrot.slane %v341_v35, 5  ;;  %v1359_v42 = vrot.slane %v12393_v28, 1  ;;  %v13604_v44 = vld [vmem:[#allocation2 + $0xb8] ss:$0 sps:$4 sm:$0x77]   ;;  %s10636_s6 = sshll.u32 %s215_s30, 7 }
  0x4c   : > { %1400 = vrot.lane.b32.xlu0 %v1351_v23, %s13279_s10  ;;  %1406 = vrot.lane.b32.xlu1 %v1353_v18, %s13279_s10  ;;  %v13601_v41 = vld [vmem:[#allocation2 + $0xb4] sm:$0xf]  ;;  %541 = vst.msk [vmem:[#allocation2 + $0xc4] sm:$0xf] %vm225_vm0, %v427_v38  ;;  %v433_v46 = vrot.slane %v431_v39, 4  ;;  %v1357_v50 = vsel %vm1339_vm6, %v1355_v36, %v1356_v33  ;;  %v1362_v61 = vrot.slane %v13604_v44, 1 }
  0x4d   : > { %v1358_v43 = vrot.slane %v10715_v34, 1  ;;  %543 = vst.msk [vmem:[#allocation2 + $0xd0] sm:$0x8] %vm294_vm2, %v429_v40  ;;  %v10717_v45 = vcombine.low %v1081_v37, %v13601_v41  ;;  %v430_v47 = vrot.slane %v429_v40, 4  ;;  %v344_v48 = vld [vmem:[%s13509_s9 + $0x44] sm:$0xf] }
  0x4e   : > { %v343_v49 = vld [vmem:[%s13509_s9 + $0x40] sm:$0xf]  ;;  %v13613_v51 = vld [vmem:[#allocation2 + $0xc8] ss:$0 sps:$4 sm:$0x77]   ;;  %v436_v53 = vrot.slane %v344_v48, 5 }
  0x4f   : > { %v1083_v52 = vld [vmem:[#allocation2 + $0xc0] sm:$0x8]  ;;  %v434_v54 = vrot.slane %v343_v49, 5  ;;  %v346_v55 = vld [vmem:[%s13509_s9 + $0x4c] sm:$0xf]  ;;  %v432_v56 = vsel %vm13516_vm5, %v430_v47, %v431_v39  ;;  %v1361_v4 = vrot.slane %v10717_v45, 1  ;;  %v1360_v9 = vsel %vm1339_vm6, %v1358_v43, %v1359_v42 }
  0x50   : > { %1404 = vrot.lane.b32.xlu0 %v1354_v32, %s13279_s10  ;;  %1410 = vrot.lane.b32.xlu1 %v1356_v33, %s13279_s10  ;;  %545 = vst.msk [vmem:[#allocation2 + $0xd8] sm:$0x7] %vm277_vm1, %v433_v46  ;;  %v441_v57 = vrot.slane %v346_v55, 5  ;;  %v345_v59 = vld [vmem:[%s13509_s9 + $0x48] sm:$0xf]  ;;  %v438_v62 = vrot.slane %v436_v53, 4 }
  0x51   : > { %v348_v60 = vld [vmem:[%s13509_s9 + $0x54] sm:$0xf]  ;;  %544 = vst.msk [vmem:[#allocation2 + $0xd4] sm:$0xf] %vm225_vm0, %v432_v56  ;;  %v435_v63 = vrot.slane %v434_v54, 4  ;;  %v439_v1 = vrot.slane %v345_v59, 5  ;;  %v1363_v36 = vsel %vm1339_vm6, %v1361_v4, %v1362_v61 }
  0x52   : > { %546 = vst.msk [vmem:[#allocation2 + $0xe0] sm:$0x8] %vm294_vm2, %v434_v54  ;;  %v347_v3 = vld [vmem:[%s13509_s9 + $0x50] sm:$0xf]  ;;  %v443_v5 = vrot.slane %v441_v57, 4  ;;  %v446_v6 = vrot.slane %v348_v60, 5 }
  0x53   : > { %v444_v7 = vrot.slane %v347_v3, 5  ;;  %v350_v8 = vld [vmem:[%s13509_s9 + $0x5c] sm:$0xf]  ;;  %v13629_v10 = vld [vmem:[#allocation2 + $0xc4] sm:$0xf]  ;;  %v437_v11 = vsel %vm13516_vm5, %v435_v63, %v436_v53  ;;  %v440_v13 = vrot.slane %v439_v1, 4 }
  0x54   : > { %1408 = vrot.lane.b32.xlu0 %v1357_v50, %s13279_s10  ;;  %1414 = vrot.lane.b32.xlu1 %v1359_v42, %s13279_s10  ;;  %548 = vst.msk [vmem:[#allocation2 + $0xe8] sm:$0x7] %vm277_vm1, %v438_v62  ;;  %v451_v15 = vrot.slane %v350_v8, 5  ;;  %v349_v16 = vld [vmem:[%s13509_s9 + $0x58] sm:$0xf]  ;;  %v10719_v18 = vcombine.low %v1083_v52, %v13629_v10  ;;  %v448_v21 = vrot.slane %v446_v6, 4 }
  0x55   : > { %549 = vst.msk [vmem:[#allocation2 + $0xf0] sm:$0x8] %vm294_vm2, %v439_v1  ;;  %v1085_v20 = vld [vmem:[#allocation2 + $0xd0] sm:$0x8]  ;;  %v445_v22 = vrot.slane %v444_v7, 4  ;;  %v449_v23 = vrot.slane %v349_v16, 5  ;;  %v442_v26 = vsel %vm13516_vm5, %v440_v13, %v441_v57 }
  0x56   : > { %547 = vst.msk [vmem:[#allocation2 + $0xe4] sm:$0xf] %vm225_vm0, %v437_v11  ;;  %v1365_v25 = vrot.slane %v13613_v51, 1  ;;  %v453_v27 = vrot.slane %v451_v15, 4  ;;  %v352_v28 = vld [vmem:[%s13509_s9 + $0x64] sm:$0xf] }
  0x57   : > { %551 = vst.msk [vmem:[#allocation2 + $0xf8] sm:$0x7] %vm277_vm1, %v443_v5  ;;  %v351_v29 = vld [vmem:[%s13509_s9 + $0x60] sm:$0xf]  ;;  %v1364_v31 = vrot.slane %v10719_v18, 1  ;;  %v447_v32 = vsel %vm13516_vm5, %v445_v22, %v446_v6  ;;  %v450_v33 = vrot.slane %v449_v23, 4 }
  0x58   : > { %552 = vst.msk [vmem:[#allocation2 + $0x100] sm:$0x8] %vm294_vm2, %v444_v7  ;;  %1412 = vrot.lane.b32.xlu0 %v1360_v9, %s13279_s10  ;;  %1418 = vrot.lane.b32.xlu1 %v1362_v61, %s13279_s10  ;;  %555 = vst.msk [vmem:[#allocation2 + $0x110] sm:$0x8] %vm294_vm2, %v449_v23  ;;  %v456_v34 = vrot.slane %v352_v28, 5  ;;  %v454_v38 = vrot.slane %v351_v29, 5 }
  0x59   : > { %550 = vst.msk [vmem:[#allocation2 + $0xf4] sm:$0xf] %vm225_vm0, %v442_v26  ;;  %v354_v35 = vld [vmem:[%s13509_s9 + $0x6c] sm:$0xf]  ;;  %553 = vst.msk [vmem:[#allocation2 + $0x104] sm:$0xf] %vm225_vm0, %v447_v32  ;;  %v452_v40 = vsel %vm13516_vm5, %v450_v33, %v451_v15  ;;  %v1366_v51 = vsel %vm1339_vm6, %v1364_v31, %v1365_v25 }
  0x5a   : > { %554 = vst.msk [vmem:[#allocation2 + $0x108] sm:$0x7] %vm277_vm1, %v448_v21  ;;  %v12399_v37 = vld [vmem:[#allocation2 + $0xd8] ss:$0 sps:$4 sm:$0x77]   ;;  %v458_v42 = vrot.slane %v456_v34, 4 }
  0x5b   : > { %557 = vst.msk [vmem:[#allocation2 + $0x118] sm:$0x7] %vm277_vm1, %v453_v27  ;;  %v13656_v39 = vld [vmem:[#allocation2 + $0xd4] sm:$0xf]  ;;  %v461_v43 = vrot.slane %v354_v35, 5  ;;  %v1368_v44 = vrot.slane %v12399_v37, 1 }
  0x5c   : > { %v10721_v45 = vcombine.low %v1085_v20, %v13656_v39  ;;  %v1087_v46 = vld [vmem:[#allocation2 + $0xe0] sm:$0x8]  ;;  %556 = vst.msk [vmem:[#allocation2 + $0x114] sm:$0xf] %vm225_vm0, %v452_v40  ;;  %v455_v47 = vrot.slane %v454_v38, 4  ;;  %1416 = vrot.lane.b32.xlu0 %v1363_v36, %s13279_s10  ;;  %1422 = vrot.lane.b32.xlu1 %v1365_v25, %s13279_s10  ;;  %s16987_s7 = scalar_lea.vmem [#allocation3], %s10636_s6 }
  0x5d   : > { %558 = vst.msk [vmem:[#allocation2 + $0x120] sm:$0x8] %vm294_vm2, %v454_v38  ;;  %v353_v48 = vld [vmem:[%s13509_s9 + $0x68] sm:$0xf]  ;;  %v463_v50 = vrot.slane %v461_v43, 4  ;;  %s11588_s8 = sshll.u32 %s13339_s22, 11 }
  0x5e   : > { %v12401_v49 = vld [vmem:[#allocation2 + $0xe8] ss:$0 sps:$4 sm:$0x77]   ;;  %560 = vst.msk [vmem:[#allocation2 + $0x128] sm:$0x7] %vm277_vm1, %v458_v42  ;;  %v1367_v52 = vrot.slane %v10721_v45, 1  ;;  %v457_v54 = vsel %vm13516_vm5, %v455_v47, %v456_v34  ;;  %s17050_s14 = scalar_lea.hbm %s17135_s5, %s11588_s8 }
  0x5f   : > { %v13668_v53 = vld [vmem:[#allocation2 + $0xe4] sm:$0xf]  ;;  %v459_v55 = vrot.slane %v353_v48, 5  ;;  %v1089_v57 = vld [vmem:[#allocation2 + $0xf0] sm:$0x8]  ;;  %v1371_v60 = vrot.slane %v12401_v49, 1 }
  0x60   : > { %v10723_v56 = vcombine.low %v1087_v46, %v13668_v53  ;;  %559 = vst.msk [vmem:[#allocation2 + $0x124] sm:$0xf] %vm225_vm0, %v457_v54  ;;  %v13675_v59 = vld [vmem:[#allocation2 + $0xf4] sm:$0xf]  ;;  %1420 = vrot.lane.b32.xlu0 %v1366_v51, %s13279_s10  ;;  %1426 = vrot.lane.b32.xlu1 %v1368_v44, %s13279_s10  ;;  %v1369_v63 = vsel %vm1339_vm6, %v1367_v52, %v1368_v44  ;;  %v13682_v4 = vld [vmem:[#allocation2 + $0x104] sm:$0xf] }
  0x61   : > { %563 = vst.msk [vmem:[#allocation2 + $0x138] sm:$0x7] %vm277_vm1, %v463_v50  ;;  %v12403_v61 = vld [vmem:[#allocation2 + $0xf8] ss:$0 sps:$4 sm:$0x77]   ;;  %v460_v62 = vrot.slane %v459_v55, 4  ;;  %v10725_v3 = vcombine.low %v1089_v57, %v13675_v59 }
  0x62   : > { %561 = vst.msk [vmem:[#allocation2 + $0x130] sm:$0x8] %vm294_vm2, %v459_v55  ;;  %v1370_v1 = vrot.slane %v10723_v56, 1  ;;  %v1091_v5 = vld [vmem:[#allocation2 + $0x100] sm:$0x8]  ;;  %v1374_v7 = vrot.slane %v12403_v61, 1 }
  0x63   : > { %v462_v6 = vsel %vm13516_vm5, %v460_v62, %v461_v43  ;;  %v12405_v8 = vld [vmem:[#allocation2 + $0x108] ss:$0 sps:$4 sm:$0x77]   ;;  %v1373_v11 = vrot.slane %v10725_v3, 1  ;;  %v10727_v13 = vcombine.low %v1091_v5, %v13682_v4  ;;  %v13691_v15 = vld [vmem:[#allocation2 + $0x114] sm:$0xf] }
  0x64   : > { %1424 = vrot.lane.b32.xlu0 %v1369_v63, %s13279_s10  ;;  %1430 = vrot.lane.b32.xlu1 %v1371_v60, %s13279_s10  ;;  %562 = vst.msk [vmem:[#allocation2 + $0x134] sm:$0xf] %vm225_vm0, %v462_v6  ;;  %v1372_v9 = vsel %vm1339_vm6, %v1370_v1, %v1371_v60  ;;  %v1093_v16 = vld [vmem:[#allocation2 + $0x110] sm:$0x8]  ;;  %v1377_v18 = vrot.slane %v12405_v8, 1  ;;  %s10570_s12 = sshll.u32 %s16987_s7, 4  ;;  %s17068_s12 = int_to_ptr.vmem [resolvable:$true] %s10570_s12 }
  0x65   : > { %v12407_v20 = vld [vmem:[#allocation2 + $0x118] ss:$0 sps:$4 sm:$0x77]   ;;  %v1375_v21 = vsel %vm1339_vm6, %v1373_v11, %v1374_v7  ;;  %v1376_v22 = vrot.slane %v10727_v13, 1  ;;  %v10729_v23 = vcombine.low %v1093_v16, %v13691_v15  ;;  %v1095_v26 = vld [vmem:[#allocation2 + $0x120] sm:$0x8] }
  0x66   : > { %v1380_v27 = vrot.slane %v12407_v20, 1  ;;  %v12409_v28 = vld [vmem:[#allocation2 + $0x128] ss:$0 sps:$4 sm:$0x77]   ;;  %v1100_v42 = vld [vmem:[#allocation2 + $0x58] sm:$0xf] }
  0x67   : > { %v13697_v25 = vld [vmem:[#allocation2 + $0x124] sm:$0xf]  ;;  %v1378_v29 = vsel %vm1339_vm6, %v1376_v22, %v1377_v18  ;;  %v1379_v31 = vrot.slane %v10729_v23, 1  ;;  %v1383_v35 = vrot.slane %v12409_v28, 1  ;;  %v10736_v44 = vcombine.low %v13521_v14, %v1100_v42  ;;  %v1099_v47 = vld [vmem:[#allocation2 + $0x48] sm:$0xf] }
  0x68   : > { %1428 = vrot.lane.b32.xlu0 %v1372_v9, %s13279_s10  ;;  %1434 = vrot.lane.b32.xlu1 %v1374_v7, %s13279_s10  ;;  %v10731_v32 = vcombine.low %v1095_v26, %v13697_v25  ;;  %v12411_v36 = vld [vmem:[#allocation2 + $0x138] ss:$0 sps:$4 sm:$0x77]   ;;  %v10735_v50 = vcombine.low %v13525_v19, %v1099_v47  ;;  %v1101_v54 = vld [vmem:[#allocation2 + $0x68] sm:$0xf]  ;;  %v12473_v20 = vld [vmem:[%s13509_s9] sm:$0xff]  }
  0x69   : > { %v1097_v34 = vld [vmem:[#allocation2 + $0x130] sm:$0x8]  ;;  %v1381_v37 = vsel %vm1339_vm6, %v1379_v31, %v1380_v27  ;;  %v1386_v43 = vrot.slane %v12411_v36, 1  ;;  %v1102_v48 = vld [vmem:[#allocation2 + $0x78] sm:$0xf]  ;;  %v1501_v49 = vrot.slane %v10736_v44, 6  ;;  %v10737_v57 = vcombine.low %v13561_v58, %v1101_v54  ;;  %11785 = vmatprep.mubr.msk.bf16.mxu0 %vm683_vm7, %v12473_v20 }
  0x6a   : > { %v1382_v38 = vrot.slane %v10731_v32, 1  ;;  %v10738_v51 = vcombine.low %v13569_v2, %v1102_v48  ;;  %v1104_v55 = vld [vmem:[#allocation2 + $0x98] sm:$0xf]  ;;  %v1500_v14 = vrot.slane %v10735_v50, 6  ;;  %v1103_v61 = vld [vmem:[#allocation2 + $0x88] sm:$0xf] }
  0x6b   : > { %v13703_v33 = vld [vmem:[#allocation2 + $0x134] sm:$0xf]  ;;  %v10740_v60 = vcombine.low %v13588_v24, %v1104_v55  ;;  %v1106_v62 = vld [vmem:[#allocation2 + $0xb8] sm:$0xf]  ;;  %v1502_v19 = vrot.slane %v10737_v57, 6  ;;  %v10739_v63 = vcombine.low %v13579_v17, %v1103_v61  ;;  %s17088_s15 = scalar_lea.sflag [#allocation4], %s215_s30 }
  0x6c   : > { %1432 = vrot.lane.b32.xlu0 %v1375_v21, %s13279_s10  ;;  %1438 = vrot.lane.b32.xlu1 %v1377_v18, %s13279_s10  ;;  %v10733_v40 = vcombine.low %v1097_v34, %v13703_v33  ;;  %v1384_v45 = vsel %vm1339_vm6, %v1382_v38, %v1383_v35  ;;  %v1503_v56 = vrot.slane %v10738_v51, 6  ;;  %v10742_v1 = vcombine.low %v13601_v41, %v1106_v62  ;;  %v1105_v3 = vld [vmem:[#allocation2 + $0xa8] sm:$0xf]  ;;  %v1108_v5 = vld [vmem:[#allocation2 + $0xd8] sm:$0xf]  ;;  %s13214_s16 = scalar_lea.vmem %s17068_s12, 2048 }
  0x6d   : > { %v1505_v2 = vrot.slane %v10740_v60, 6  ;;  %v1504_v58 = vrot.slane %v10739_v63, 6  ;;  %v10741_v6 = vcombine.low %v13591_v30, %v1105_v3  ;;  %v10744_v7 = vcombine.low %v13656_v39, %v1108_v5  ;;  %v1107_v8 = vld [vmem:[#allocation2 + $0xc8] sm:$0xf]  ;;  %v1110_v9 = vld [vmem:[#allocation2 + $0xf8] sm:$0xf]  ;;  %p13215_p11 = scmp.ne.s32.totalorder %s17068_s12, %s13214_s16 }
  0x6e   : > { %v1385_v46 = vrot.slane %v10733_v40, 1  ;;  %v1507_v24 = vrot.slane %v10742_v1, 6  ;;  %v10743_v11 = vcombine.low %v13629_v10, %v1107_v8  ;;  %v10746_v13 = vcombine.low %v13675_v59, %v1110_v9  ;;  %v1109_v16 = vld [vmem:[#allocation2 + $0xe8] sm:$0xf]  ;;  %v1112_v18 = vld [vmem:[#allocation2 + $0x118] sm:$0xf] }
  0x6f   : > { %v1506_v17 = vrot.slane %v10741_v6, 6  ;;  %v1509_v41 = vrot.slane %v10744_v7, 6  ;;  %v10745_v21 = vcombine.low %v13668_v53, %v1109_v16  ;;  %v10748_v22 = vcombine.low %v13691_v15, %v1112_v18  ;;  %v1111_v23 = vld [vmem:[#allocation2 + $0x108] sm:$0xf]  ;;  %v1114_v26 = vld [vmem:[#allocation2 + $0x138] sm:$0xf]  ;;  %p13216_p12 = pnand %p13215_p11, %p13356_p5 }
  0x70   : > { %1436 = vrot.lane.b32.xlu0 %v1378_v29, %s13279_s10  ;;  %1442 = vrot.lane.b32.xlu1 %v1380_v27, %s13279_s10  ;;  %v1387_v52 = vsel %vm1339_vm6, %v1385_v46, %v1386_v43  ;;  %v1508_v30 = vrot.slane %v10743_v11, 6  ;;  %v1511_v39 = vrot.slane %v10746_v13, 6  ;;  %v10747_v10 = vcombine.low %v13682_v4, %v1111_v23  ;;  %v1113_v29 = vld [vmem:[#allocation2 + $0x128] sm:$0xf]  ;;  %v13744_v31 = vld [vmem:[#allocation2 + $0x64] sm:$0xf] }
  0x71   : > { %v1510_v59 = vrot.slane %v10745_v21, 6  ;;  %v1513_v27 = vrot.slane %v10748_v22, 6  ;;  %v10750_v28 = vcombine.low %v13703_v33, %v1114_v26  ;;  %v1824_v53 = vld [vmem:[#allocation2 + $0x60] sm:$0x8]  ;;  %v10749_v15 = vcombine.low %v13697_v25, %v1113_v29  ;;  %296 = vst.msk [vmem:[#allocation2 + $0x6c] sm:$0x3] %vm229_vm8, %v13278_v0  ;;  %p13217_p13 = pneg %p13216_p12 }
  0x72   : > { %v1512_v32 = vrot.slane %v10747_v10, 6  ;;  %v13749_v34 = vld [vmem:[#allocation2 + $0x68] ss:$0 sps:$4 sm:$0x77]   ;;  %230 = vst.msk [vmem:[#allocation2 + $0xc] sm:$0x3] %vm229_vm8, %v13278_v0  ;;  %v13808_v25 = vcombine.low %v1824_v53, %v13744_v31 }
  0x73   : > { %v1515_v4 = vrot.slane %v10750_v28, 6  ;;  %234 = vst.msk [vmem:[#allocation2 + $0x1c] sm:$0x3] %vm229_vm8, %v13278_v0  ;;  %238 = vst.msk [vmem:[#allocation2 + $0x2c] sm:$0x3] %vm229_vm8, %v13278_v0  ;;  %v1514_v36 = vrot.slane %v10749_v15, 6 }
  0x74   : > { %1440 = vrot.lane.b32.xlu0 %v1381_v37, %s13279_s10  ;;  %1446 = vrot.lane.b32.xlu1 %v1383_v35, %s13279_s10  ;;  %242 = vst.msk [vmem:[#allocation2 + $0x3c] sm:$0x3] %vm229_vm8, %v13278_v0  ;;  %246 = vst.msk [vmem:[#allocation2 + $0x4c] sm:$0x3] %vm229_vm8, %v13278_v0  ;;  %v13810_v33 = vld [vmem:[#allocation2 + $0x74] sm:$0xf] }
  0x75   : > { %250 = vst.msk [vmem:[#allocation2 + $0x5c] sm:$0x3] %vm229_vm8, %v13278_v0  ;;  %255 = vst.msk [vmem:[#allocation2 + $0x16c] sm:$0x3] %vm229_vm8, %v13278_v0  ;;  %v1826_v35 = vld [vmem:[#allocation2 + $0x70] sm:$0x8] }
  0x76   : > { %259 = vst.msk [vmem:[#allocation2 + $0x17c] sm:$0x3] %vm229_vm8, %v13278_v0  ;;  %263 = vst.msk [vmem:[#allocation2 + $0x18c] sm:$0x3] %vm229_vm8, %v13278_v0  ;;  %v2097_v37 = vrot.slane %v13749_v34, 1  ;;  %v2096_v40 = vrot.slane %v13808_v25, 1 }
  0x77   : > { %267 = vst.msk [vmem:[#allocation2 + $0x19c] sm:$0x3] %vm229_vm8, %v13278_v0  ;;  %271 = vst.msk [vmem:[#allocation2 + $0x1ac] sm:$0x3] %vm229_vm8, %v13278_v0  ;;  %v13821_v42 = vld [vmem:[#allocation2 + $0x84] sm:$0xf] }
  0x78   : > { %1444 = vrot.lane.b32.xlu0 %v1384_v45, %s13279_s10  ;;  %1450 = vrot.lane.b32.xlu1 %v1386_v43, %s13279_s10  ;;  %275 = vst.msk [vmem:[#allocation2 + $0x1bc] sm:$0x3] %vm229_vm8, %v13278_v0  ;;  %298 = vst.msk [vmem:[#allocation2 + $0x7c] sm:$0x3] %vm229_vm8, %v13278_v0  ;;  %v1828_v43 = vld [vmem:[#allocation2 + $0x80] sm:$0x8]  ;;  %v2098_v46 = vsel %vm1339_vm6, %v2096_v40, %v2097_v37 }
  0x79   : > { %300 = vst.msk [vmem:[#allocation2 + $0x8c] sm:$0x3] %vm229_vm8, %v13278_v0  ;;  %302 = vst.msk [vmem:[#allocation2 + $0x9c] sm:$0x3] %vm229_vm8, %v13278_v0  ;;  %v13831_v48 = vcombine.low %v1828_v43, %v13821_v42  ;;  %v13834_v50 = vld [vmem:[#allocation2 + $0x94] sm:$0xf] }
  0x7a   : > { %304 = vst.msk [vmem:[#allocation2 + $0xac] sm:$0x3] %vm229_vm8, %v13278_v0  ;;  %306 = vst.msk [vmem:[#allocation2 + $0xbc] sm:$0x3] %vm229_vm8, %v13278_v0  ;;  %v1830_v51 = vld [vmem:[#allocation2 + $0x90] sm:$0x8] }
  0x7b   : > { %308 = vst.msk [vmem:[#allocation2 + $0xcc] sm:$0x3] %vm229_vm8, %v13278_v0  ;;  %310 = vst.msk [vmem:[#allocation2 + $0xdc] sm:$0x3] %vm229_vm8, %v13278_v0  ;;  %v2102_v60 = vrot.slane %v13831_v48, 1  ;;  %v13845_v61 = vcombine.low %v1830_v51, %v13834_v50 }
  0x7c   : > { %1448 = vrot.lane.b32.xlu0 %v1387_v52, %s13279_s10  ;;  %1518 = vrot.lane.b32.xlu1 %v1501_v49, %s13280_s11  ;;  %312 = vst.msk [vmem:[#allocation2 + $0xec] sm:$0x3] %vm229_vm8, %v13278_v0  ;;  %314 = vst.msk [vmem:[#allocation2 + $0xfc] sm:$0x3] %vm229_vm8, %v13278_v0  ;;  %v356_v49 = vld [vmem:[%s13509_s9 + $0x74] sm:$0xf] }
  0x7d   : > { %316 = vst.msk [vmem:[#allocation2 + $0x10c] sm:$0x3] %vm229_vm8, %v13278_v0  ;;  %318 = vst.msk [vmem:[#allocation2 + $0x11c] sm:$0x3] %vm229_vm8, %v13278_v0  ;;  %v466_v52 = vrot.slane %v356_v49, 5  ;;  %v2105_v6 = vrot.slane %v13845_v61, 1 }
  0x7e   : > { %320 = vst.msk [vmem:[#allocation2 + $0x12c] sm:$0x3] %vm229_vm8, %v13278_v0  ;;  %322 = vst.msk [vmem:[#allocation2 + $0x13c] sm:$0x3] %vm229_vm8, %v13278_v0  ;;  %v358_v3 = vld [vmem:[%s13509_s9 + $0x7c] sm:$0xf] }
  0x7f   : > { %324 = vst.msk [vmem:[#allocation2 + $0x14c] sm:$0x3] %vm229_vm8, %v13278_v0  ;;  %326 = vst.msk [vmem:[#allocation2 + $0x15c] sm:$0x3] %vm229_vm8, %v13278_v0  ;;  %v13819_v0 = vcombine.low %v1826_v35, %v13810_v33  ;;  %v13862_v8 = vld [vmem:[#allocation2 + $0xb4] sm:$0xf] }
  0x80   : > { %1516 = vrot.lane.b32.xlu0 %v1500_v14, %s13280_s11  ;;  %1522 = vrot.lane.b32.xlu1 %v1503_v56, %s13280_s11  ;;  %17186 = vst [vmem:[#allocation6_spill] sm:$0xff] %v13808_v25  ;;  %v13815_v38 = vld [vmem:[#allocation2 + $0x78] ss:$0 sps:$4 sm:$0x77]   ;;  %17188 = vst [vmem:[#allocation8_spill] sm:$0xff] %v13831_v48  ;;  %v468_v14 = vrot.slane %v466_v52, 4 }
  0x81   : > { %17187 = vst [vmem:[#allocation7_spill] sm:$0xff] %v13819_v0  ;;  %v13823_v44 = vld [vmem:[#allocation2 + $0x88] ss:$0 sps:$4 sm:$0x77]   ;;  %v2100_v45 = vrot.slane %v13815_v38, 1  ;;  %v2099_v47 = vrot.slane %v13819_v0, 1 }
  0x82   : > { %v2103_v54 = vrot.slane %v13823_v44, 1  ;;  %v13839_v55 = vld [vmem:[#allocation2 + $0x98] ss:$0 sps:$4 sm:$0x77]   ;;  %v355_v56 = vld [vmem:[%s13509_s9 + $0x70] sm:$0xf] }
  0x83   : > { %v2101_v57 = vsel %vm1339_vm6, %v2099_v47, %v2100_v45  ;;  %17189 = vst [vmem:[#allocation9_spill] sm:$0xff] %v13845_v61  ;;  %v464_v62 = vrot.slane %v355_v56, 5  ;;  %566 = vst.msk [vmem:[#allocation2 + $0x148] sm:$0x7] %vm277_vm1, %v468_v14  ;;  %v2106_v5 = vrot.slane %v13839_v55, 1 }
  0x84   : > { %1520 = vrot.lane.b32.xlu0 %v1502_v19, %s13280_s11  ;;  %1526 = vrot.lane.b32.xlu1 %v1505_v2, %s13280_s11  ;;  %v13847_v19 = vld [vmem:[#allocation2 + $0xa4] sm:$0xf]  ;;  %v1832_v2 = vld [vmem:[#allocation2 + $0xa0] sm:$0x8]  ;;  %v1838_v15 = vld [vmem:[#allocation2 + $0xd0] sm:$0x8] }
  0x85   : > { %v13850_v63 = vld [vmem:[#allocation2 + $0xa8] ss:$0 sps:$4 sm:$0x77]   ;;  %v465_v1 = vrot.slane %v464_v62, 4  ;;  %564 = vst.msk [vmem:[#allocation2 + $0x140] sm:$0x8] %vm294_vm2, %v464_v62  ;;  %v13860_v7 = vcombine.low %v1832_v2, %v13847_v19 }
  0x86   : > { %v2109_v16 = vrot.slane %v13850_v63, 1  ;;  %v13871_v18 = vld [vmem:[#allocation2 + $0xb8] ss:$0 sps:$4 sm:$0x77]   ;;  %v13880_v22 = vld [vmem:[#allocation2 + $0xc4] sm:$0xf] }
  0x87   : > { %17190 = vst [vmem:[#allocation10_spill] sm:$0xff] %v13860_v7  ;;  %v467_v9 = vsel %vm13516_vm5, %v465_v1, %v466_v52  ;;  %v1836_v23 = vld [vmem:[#allocation2 + $0xc0] sm:$0x8]  ;;  %v12434_v47 = vld [vmem:[#allocation2 + $0xe8] ss:$0 sps:$4 sm:$0x77]  }
  0x88   : > { %1524 = vrot.lane.b32.xlu0 %v1504_v58, %s13280_s11  ;;  %1530 = vrot.lane.b32.xlu1 %v1507_v24, %s13280_s11  ;;  %v471_v58 = vrot.slane %v358_v3, 5  ;;  %v2104_v24 = vsel %vm1339_vm6, %v2102_v60, %v2103_v54  ;;  %565 = vst.msk [vmem:[#allocation2 + $0x144] sm:$0xf] %vm225_vm0, %v467_v9  ;;  %v13893_v53 = vcombine.low %v1836_v23, %v13880_v22  ;;  %v12437_v62 = vld [vmem:[#allocation2 + $0xf8] ss:$0 sps:$4 sm:$0x77]  }
  0x89   : > { %v1842_v2 = vld [vmem:[#allocation2 + $0xf0] sm:$0x8]  ;;  %v12474_v3 = vld [vmem:[%s13509_s9 + $0x8] sm:$0xff]  }
  0x8a   : > { %v473_v11 = vrot.slane %v471_v58, 4  ;;  %17192 = vst [vmem:[#allocation12_spill] sm:$0xff] %v13893_v53  ;;  %v2114_v40 = vrot.slane %v13893_v53, 1 }
  0x8c   : > { %1528 = vrot.lane.b32.xlu0 %v1506_v17, %s13280_s11  ;;  %1534 = vrot.lane.b32.xlu1 %v1509_v41, %s13280_s11  ;;  %v357_v17 = vld [vmem:[%s13509_s9 + $0x78] sm:$0xf]  ;;  %v1834_v41 = vld [vmem:[#allocation2 + $0xb0] sm:$0x8]  ;;  %569 = vst.msk [vmem:[#allocation2 + $0x158] sm:$0x7] %vm277_vm1, %v473_v11 }
  0x8d   : > { %v469_v13 = vrot.slane %v357_v17, 5  ;;  %v13878_v21 = vcombine.low %v1834_v41, %v13862_v8  ;;  %v13935_v17 = vld [vmem:[#allocation2 + $0x104] sm:$0xf]  ;;  %v1844_v41 = vld [vmem:[#allocation2 + $0x100] sm:$0x8]  ;;  %vm10523_vm1 = vcmask 158720  }
  0x8f   : > { %v470_v20 = vrot.slane %v469_v13, 4  ;;  %567 = vst.msk [vmem:[#allocation2 + $0x150] sm:$0x8] %vm294_vm2, %v469_v13  ;;  %17191 = vst [vmem:[#allocation11_spill] sm:$0xff] %v13878_v21  ;;  %v2111_v29 = vrot.slane %v13878_v21, 1 }
  0x90   : > { %1532 = vrot.lane.b32.xlu0 %v1508_v30, %s13280_s11  ;;  %1538 = vrot.lane.b32.xlu1 %v1511_v39, %s13280_s11  ;;  %v2107_v30 = vsel %vm1339_vm6, %v2105_v6, %v2106_v5  ;;  %v2108_v39 = vrot.slane %v13860_v7, 1 }
  0x91   : > { %v472_v26 = vsel %vm13516_vm5, %v470_v20, %v471_v58  ;;  %v2121_v58 = vrot.slane %v12434_v47, 1  ;;  %v2124_v20 = vrot.slane %v12437_v62, 1  ;;  %v12446_v62 = vld [vmem:[#allocation2 + $0x128] ss:$0 sps:$4 sm:$0x77]  }
  0x92   : > { %568 = vst.msk [vmem:[#allocation2 + $0x154] sm:$0xf] %vm225_vm0, %v472_v26  ;;  %v2110_v28 = vsel %vm1339_vm6, %v2108_v39, %v2109_v16  ;;  %v13950_v26 = vld [vmem:[#allocation2 + $0x114] sm:$0xf]  ;;  %vm10393_vm0 = vcmask 130048  }
  0x94   : > { %1536 = vrot.lane.b32.xlu0 %v1510_v59, %s13280_s11  ;;  %1542 = vrot.lane.b32.xlu1 %v1513_v27, %s13280_s11  ;;  %v2112_v59 = vrot.slane %v13871_v18, 1  ;;  %v12428_v27 = vld [vmem:[#allocation2 + $0xc8] ss:$0 sps:$4 sm:$0x77]  }
  0x95   : > { %v2115_v35 = vrot.slane %v12428_v27, 1 }
  0x97   : > { %v2116_v14 = vsel %vm1339_vm6, %v2114_v40, %v2115_v35  ;;  %v13961_v40 = vld [vmem:[#allocation2 + $0x124] sm:$0xf] }
  0x98   : > { %1540 = vrot.lane.b32.xlu0 %v1512_v32, %s13280_s11  ;;  %1546 = vrot.lane.b32.xlu1 %v1515_v4, %s13280_s11  ;;  %v13897_v32 = vld [vmem:[#allocation2 + $0xd4] sm:$0xf] }
  0x99   : > { %v13906_v43 = vcombine.low %v1838_v15, %v13897_v32 }
  0x9b   : > { %17193 = vst [vmem:[#allocation13_spill] sm:$0xff] %v13906_v43  ;;  %v2117_v56 = vrot.slane %v13906_v43, 1 }
  0x9c   : > { %1544 = vrot.lane.b32.xlu0 %v1514_v36, %s13280_s11  ;;  %2146 = vrot.lane.b32.xlu1 %v2097_v37, %s13279_s10  ;;  %v12431_v36 = vld [vmem:[#allocation2 + $0xd8] ss:$0 sps:$4 sm:$0x77]   ;;  %v2113_v37 = vsel %vm1339_vm6, %v2111_v29, %v2112_v59 }
  0x9d   : > { %v2118_v51 = vrot.slane %v12431_v36, 1  ;;  %v12478_v29 = vld [vmem:[%s13509_s9 + $0x18] sm:$0xff]  }
  0x9f   : > { %v2119_v6 = vsel %vm1339_vm6, %v2117_v56, %v2118_v51 }
  0xa0   : > { %2144 = vrot.lane.b32.xlu0 %v2098_v46, %s13279_s10  ;;  %2150 = vrot.lane.b32.xlu1 %v2100_v45, %s13279_s10  ;;  %v13908_v45 = vld [vmem:[#allocation2 + $0xe4] sm:$0xf]  ;;  %v1840_v46 = vld [vmem:[#allocation2 + $0xe0] sm:$0x8] }
  0xa1   : > { %v13915_v52 = vcombine.low %v1840_v46, %v13908_v45 }
  0xa3   : > { %17194 = vst [vmem:[#allocation14_spill] sm:$0xff] %v13915_v52 }
  0xa4   : > { %2148 = vrot.lane.b32.xlu0 %v2101_v57, %s13279_s10  ;;  %2154 = vrot.lane.b32.xlu1 %v2103_v54, %s13279_s10  ;;  %v602_v54 = vld [vmem:[%s17131_s1] sm:$0x3]  ;;  %v13922_v57 = vld [vmem:[#allocation2 + $0xf4] sm:$0xf] }
  0xa5   : > { %12322 = vmatprep.subr.msk.bf16.mxu0 %vm732_vm9, %v602_v54  ;;  %v734_v1 = vsel %vm732_vm9, %v602_v54, 0  ;;  %v13933_v9 = vcombine.low %v1842_v2, %v13922_v57 }
  0xa6   : > { %11784 = vmatpush3.bf16.msra.mxu0 %v734_v1 }
  0xa7   : > { %17195 = vst [vmem:[#allocation15_spill] sm:$0xff] %v13933_v9  ;;  %v2123_v23 = vrot.slane %v13933_v9, 1 }
  0xa8   : > { %2152 = vrot.lane.b32.xlu0 %v2104_v24, %s13279_s10  ;;  %2158 = vrot.lane.b32.xlu1 %v2106_v5, %s13279_s10  ;;  %v12477_v5 = vld [vmem:[%s13509_s9 + $0x10] sm:$0xff]   ;;  %v2120_v24 = vrot.slane %v13915_v52, 1 }
  0xa9   : > { %11786 = vmatmul.mubr.msk.bf16.vlgmr.msra.gmra.mrb[0].mxu0 %vm683_vm7, %v12474_v3  ;;  %v2125_v46 = vsel %vm1339_vm6, %v2123_v23, %v2124_v20  ;;  %v1856_v23 = vld [vmem:[#allocation2 + $0x68] sm:$0xf] }
  0xaa   : > { %11789 = vmatprep.mubr.msk.bf16.mxu0 %vm683_vm7, %v12477_v5  ;;  %v2122_v39 = vsel %vm1339_vm6, %v2120_v24, %v2121_v58  ;;  %v1857_v5 = vld [vmem:[#allocation2 + $0x78] sm:$0xf] }
  0xac   : > { %2156 = vrot.lane.b32.xlu0 %v2107_v30, %s13279_s10  ;;  %2162 = vrot.lane.b32.xlu1 %v2109_v16, %s13279_s10  ;;  %v12440_v16 = vld [vmem:[#allocation2 + $0x108] ss:$0 sps:$4 sm:$0x77]   ;;  %v13946_v30 = vcombine.low %v1844_v41, %v13935_v17  ;;  %v12489_v41 = vld [vmem:[%s13509_s9 + $0x30] sm:$0xff]  }
  0xad   : > { %v13887_v10 = vpop.permute.xlu1 %1394  ;;  %v13895_v12 = vpop.permute.xlu0 %1390  ;;  %v2127_v15 = vrot.slane %v12440_v16, 1  ;;  %v2133_v16 = vrot.slane %v12446_v62, 1 }
  0xae   : > { %17196 = vst [vmem:[#allocation16_spill] sm:$0xff] %v13946_v30  ;;  %v2126_v36 = vrot.slane %v13946_v30, 1 }
  0xb0   : > { %2160 = vrot.lane.b32.xlu0 %v2110_v28, %s13279_s10  ;;  %2166 = vrot.lane.b32.xlu1 %v2112_v59, %s13279_s10  ;;  %v1846_v28 = vld [vmem:[#allocation2 + $0x110] sm:$0x8]  ;;  %v2128_v1 = vsel %vm1339_vm6, %v2126_v36, %v2127_v15 }
  0xb1   : > { %v13901_v4 = vpop.permute.xlu1 %1392  ;;  %v13911_v49 = vpop.permute.xlu0 %1388  ;;  %v13965_v47 = vcombine.low %v1846_v28, %v13950_v26  ;;  %11790 = vmatmul.mubr.msk.bf16.gmra.mrb[4].mxu0 %vm683_vm7, %v12478_v29  ;;  %v13991_v29 = vld [vmem:[#allocation2 + $0x134] sm:$0xf] }
  0xb3   : > { %17197 = vst [vmem:[#allocation17_spill] sm:$0xff] %v13965_v47  ;;  %v2129_v3 = vrot.slane %v13965_v47, 1 }
  0xb4   : > { %2164 = vrot.lane.b32.xlu0 %v2113_v37, %s13279_s10  ;;  %2170 = vrot.lane.b32.xlu1 %v2115_v35, %s13279_s10  ;;  %v12484_v35 = vld [vmem:[%s13509_s9 + $0x20] sm:$0xff]   ;;  %v12443_v37 = vld [vmem:[#allocation2 + $0x118] ss:$0 sps:$4 sm:$0x77]  }
  0xb5   : > { %11793 = vmatprep.mubr.msk.bf16.mxu0 %vm683_vm7, %v12484_v35  ;;  %v2130_v56 = vrot.slane %v12443_v37, 1  ;;  %v12452_v37 = vld [vmem:[#allocation2 + $0x138] ss:$0 sps:$4 sm:$0x77]  }
  0xb6   : > { %v13924_v60 = vpop.permute.xlu1 %1398 }
  0xb7   : > { %v2131_v28 = vsel %vm1339_vm6, %v2129_v3, %v2130_v56 }
  0xb8   : > { %2168 = vrot.lane.b32.xlu0 %v2116_v14, %s13279_s10  ;;  %2174 = vrot.lane.b32.xlu1 %v2118_v51, %s13279_s10  ;;  %v1848_v51 = vld [vmem:[#allocation2 + $0x120] sm:$0x8] }
  0xb9   : > { %v13976_v2 = vcombine.low %v1848_v51, %v13961_v40 }
  0xba   : > { %v13937_v11 = vpop.permute.xlu0 %1396  ;;  %v13939_v13 = vpop.permute.xlu1 %1402 }
  0xbb   : > { %17198 = vst [vmem:[#allocation18_spill] sm:$0xff] %v13976_v2 }
  0xbc   : > { %2172 = vrot.lane.b32.xlu0 %v2119_v6, %s13279_s10  ;;  %2178 = vrot.lane.b32.xlu1 %v2121_v58, %s13279_s10  ;;  %v12485_v58 = vld [vmem:[%s13509_s9 + $0x28] sm:$0xff]  }
  0xbd   : > { %11794 = vmatmul.mubr.msk.bf16.gmra.mrb[8].mxu0 %vm683_vm7, %v12485_v58  ;;  %v12490_v58 = vld [vmem:[%s13509_s9 + $0x38] sm:$0xff]  }
  0xbe   : > { %v13952_v59 = vpop.permute.xlu0 %1400  ;;  %v13954_v27 = vpop.permute.xlu1 %1406  ;;  %11797 = vmatprep.mubr.msk.bf16.mxu0 %vm683_vm7, %v12489_v41  ;;  %v12496_v41 = vld [vmem:[%s13509_s9 + $0x40] sm:$0xff]  }
  0xc0   : > { %2176 = vrot.lane.b32.xlu0 %v2122_v39, %s13279_s10  ;;  %2182 = vrot.lane.b32.xlu1 %v2124_v20, %s13279_s10  ;;  %v2132_v20 = vrot.slane %v13976_v2, 1  ;;  %v10816_v39 = vcombine.low %v13810_v33, %v1857_v5  ;;  %v1858_v5 = vld [vmem:[#allocation2 + $0x88] sm:$0xf]  ;;  %v14016_v2 = vld [vmem:[#allocation2 + $0x144] sm:$0xf] }
  0xc2   : > { %v13967_v54 = vpop.permute.xlu0 %1404  ;;  %v13969_v14 = vpop.permute.xlu1 %1410  ;;  %v2257_v33 = vrot.slane %v10816_v39, 6  ;;  %v2134_v62 = vsel %vm1339_vm6, %v2132_v20, %v2133_v16 }
  0xc4   : > { %2180 = vrot.lane.b32.xlu0 %v2125_v46, %s13279_s10  ;;  %2186 = vrot.lane.b32.xlu1 %v2127_v15, %s13279_s10  ;;  %v1850_v15 = vld [vmem:[#allocation2 + $0x130] sm:$0x8]  ;;  %v10815_v46 = vcombine.low %v13744_v31, %v1856_v23 }
  0xc5   : > { %v14003_v51 = vcombine.low %v1850_v15, %v13991_v29  ;;  %v1852_v15 = vld [vmem:[#allocation2 + $0x140] sm:$0x8]  ;;  %11798 = vmatmul.mubr.msk.bf16.gmra.mrb[12].mxu0 %vm683_vm7, %v12490_v58  ;;  %v12497_v58 = vld [vmem:[%s13509_s9 + $0x48] sm:$0xff]  }
  0xc6   : > { %v13981_v24 = vpop.permute.xlu0 %1408  ;;  %v13983_v6 = vpop.permute.xlu1 %1414  ;;  %v2256_v39 = vrot.slane %v10815_v46, 6  ;;  %11801 = vmatprep.mubr.msk.bf16.mxu0 %vm683_vm7, %v12496_v41  ;;  %v14029_v46 = vcombine.low %v1852_v15, %v14016_v2  ;;  %v12501_v41 = vld [vmem:[%s13509_s9 + $0x50] sm:$0xff]  }
  0xc7   : > { %17200 = vst [vmem:[#allocation20_spill] sm:$0xff] %v14003_v51  ;;  %v2135_v31 = vrot.slane %v14003_v51, 1  ;;  %v14339_v51 = vld [vmem:[#allocation2 + $0xf0] sm:$0xc] }
  0xc8   : > { %2184 = vrot.lane.b32.xlu0 %v2128_v1, %s13279_s10  ;;  %2190 = vrot.lane.b32.xlu1 %v2130_v56, %s13279_s10  ;;  %v1859_v56 = vld [vmem:[#allocation2 + $0x98] sm:$0xf]  ;;  %17205 = vst [vmem:[#allocation25_spill] sm:$0xff] %v14029_v46  ;;  %17256 = vst [vmem:[#allocation76_spill] sm:$0xff] %v14339_v51 }
  0xc9   : > { %v10818_v23 = vcombine.low %v13834_v50, %v1859_v56  ;;  %v1861_v56 = vld [vmem:[#allocation2 + $0xb8] sm:$0xf] }
  0xca   : > { %v13993_v35 = vpop.permute.xlu0 %1412  ;;  %v13995_v36 = vpop.permute.xlu1 %1418 }
  0xcb   : > { %17199 = vst [vmem:[#allocation19_spill] sm:$0xff] %v13995_v36  ;;  %v2259_v50 = vrot.slane %v10818_v23, 6 }
  0xcc   : > { %2188 = vrot.lane.b32.xlu0 %v2131_v28, %s13279_s10  ;;  %2194 = vrot.lane.b32.xlu1 %v2133_v16, %s13279_s10  ;;  %v2136_v28 = vrot.slane %v12452_v37, 1 }
  0xcd   : > { %11802 = vmatmul.mubr.msk.bf16.gmra.mrb[16].mxu0 %vm683_vm7, %v12497_v58  ;;  %v12502_v58 = vld [vmem:[%s13509_s9 + $0x58] sm:$0xff]  }
  0xce   : > { %v14006_v1 = vpop.permute.xlu0 %1416  ;;  %v14008_v3 = vpop.permute.xlu1 %1422  ;;  %v2137_v37 = vsel %vm1339_vm6, %v2135_v31, %v2136_v28  ;;  %v1854_v31 = vld [vmem:[#allocation2 + $0x150] sm:$0x8]  ;;  %11805 = vmatprep.mubr.msk.bf16.mxu0 %vm683_vm7, %v12501_v41  ;;  %v12508_v41 = vld [vmem:[%s13509_s9 + $0x60] sm:$0xff]  }
  0xcf   : > { %17201 = vst [vmem:[#allocation21_spill] sm:$0xff] %v14006_v1  ;;  %17202 = vst [vmem:[#allocation22_spill] sm:$0xff] %v14008_v3  ;;  %v10817_v3 = vcombine.low %v13821_v42, %v1858_v5  ;;  %v12516_v1 = vld [vmem:[#allocation2 + $0xdc] ss:$0 sps:$4 sm:$0x11]  }
  0xd0   : > { %2192 = vrot.lane.b32.xlu0 %v2134_v62, %s13279_s10  ;;  %2274 = vrot.lane.b32.xlu1 %v2257_v33, %s13280_s11  ;;  %v12458_v33 = vld [vmem:[#allocation2 + $0x148] ss:$0 sps:$4 sm:$0x77]  }
  0xd1   : > { %v2258_v5 = vrot.slane %v10817_v3, 6  ;;  %v12462_v3 = vld [vmem:[#allocation2 + $0x158] ss:$0 sps:$4 sm:$0x77]  }
  0xd2   : > { %v14018_v16 = vpop.permute.xlu0 %1420  ;;  %v14020_v20 = vpop.permute.xlu1 %1426 }
  0xd3   : > { %17203 = vst [vmem:[#allocation23_spill] sm:$0xff] %v14018_v16  ;;  %17204 = vst [vmem:[#allocation24_spill] sm:$0xff] %v14020_v20  ;;  %v2139_v20 = vrot.slane %v12458_v33, 1  ;;  %v1860_v16 = vld [vmem:[#allocation2 + $0xa8] sm:$0xf] }
  0xd4   : > { %2272 = vrot.lane.b32.xlu0 %v2256_v39, %s13280_s11  ;;  %2198 = vrot.lane.b32.xlu1 %v2136_v28, %s13279_s10  ;;  %v10820_v39 = vcombine.low %v13862_v8, %v1861_v56  ;;  %v2138_v28 = vrot.slane %v14029_v46, 1  ;;  %v10819_v33 = vcombine.low %v13847_v19, %v1860_v16  ;;  %v1863_v56 = vld [vmem:[#allocation2 + $0xd8] sm:$0xf]  ;;  %v2142_v16 = vrot.slane %v12462_v3, 1  ;;  %v5045_v46 = vld [vmem:[#allocation2 + $0xc8] sm:$0xf] }
  0xd5   : > { %11806 = vmatmul.mubr.msk.bf16.gmra.mrb[20].mxu0 %vm683_vm7, %v12502_v58  ;;  %v1867_v3 = vld [vmem:[#allocation2 + $0x118] sm:$0xf] }
  0xd6   : > { %v14031_v62 = vpop.permute.xlu0 %1424  ;;  %v14033_v42 = vpop.permute.xlu1 %1430  ;;  %v2261_v8 = vrot.slane %v10820_v39, 6  ;;  %v2260_v19 = vrot.slane %v10819_v33, 6  ;;  %v1862_v39 = vld [vmem:[#allocation2 + $0xc8] sm:$0xf]  ;;  %11809 = vmatprep.mubr.msk.bf16.mxu0 %vm683_vm7, %v12508_v41  ;;  %v10826_v41 = vcombine.low %v13950_v26, %v1867_v3  ;;  %v1871_v26 = vld [vmem:[#allocation2 + $0x158] sm:$0xf] }
  0xd7   : > { %17206 = vst [vmem:[#allocation26_spill] sm:$0xff] %v14031_v62  ;;  %17207 = vst [vmem:[#allocation27_spill] sm:$0xff] %v14033_v42  ;;  %v14045_v42 = vld [vmem:[#allocation2 + $0x154] sm:$0xf]  ;;  %v10821_v33 = vcombine.low %v13880_v22, %v1862_v39 }
  0xd8   : > { %2196 = vrot.lane.b32.xlu0 %v2137_v37, %s13279_s10  ;;  %2278 = vrot.lane.b32.xlu1 %v2259_v50, %s13280_s11  ;;  %v2140_v50 = vsel %vm1339_vm6, %v2138_v28, %v2139_v20  ;;  %v14054_v37 = vcombine.low %v1854_v31, %v14045_v42 }
  0xda   : > { %v14041_v23 = vpop.permute.xlu0 %1428  ;;  %v14043_v15 = vpop.permute.xlu1 %1434  ;;  %17210 = vst [vmem:[#allocation30_spill] sm:$0xff] %v14054_v37  ;;  %v2141_v31 = vrot.slane %v14054_v37, 1  ;;  %v5188_v37 = vrot.slane %v13893_v53, 2  ;;  %v5044_v53 = vld [vmem:[#allocation2 + $0xc4] sm:$0xe] }
  0xdb   : > { %17208 = vst [vmem:[#allocation28_spill] sm:$0xff] %v14041_v23  ;;  %17209 = vst [vmem:[#allocation29_spill] sm:$0xff] %v14043_v15 }
  0xdc   : > { %2276 = vrot.lane.b32.xlu0 %v2258_v5, %s13280_s11  ;;  %2202 = vrot.lane.b32.xlu1 %v2139_v20, %s13279_s10  ;;  %v12517_v5 = vld [vmem:[%s17132_s2 + $0x8] sm:$0x3f]   ;;  %v10822_v20 = vcombine.low %v13897_v32, %v1863_v56  ;;  %v2143_v56 = vsel %vm1339_vm6, %v2141_v31, %v2142_v16  ;;  %v2267_v31 = vrot.slane %v10826_v41, 6  ;;  %v10830_v41 = vcombine.low %v14045_v42, %v1871_v26  ;;  %v2972_v26 = vld [vmem:[#allocation2 + $0x94] sm:$0xf] }
  0xdd   : > { %v2587_v28 = vsel %vm1725_vm10, %v12517_v5, 0  ;;  %12323 = vmatprep.subr.msk.bf16.mxu0 %vm1725_vm10, %v12517_v5  ;;  %12324 = vmatprep.subr.msk.bf16.mxu1 %vm1725_vm10, %v12517_v5  ;;  %v1864_v32 = vld [vmem:[#allocation2 + $0xe8] sm:$0xf] }
  0xde   : > { %v14056_v23 = vpop.permute.xlu0 %1432  ;;  %v14058_v15 = vpop.permute.xlu1 %1438  ;;  %12129 = vmatpush3.bf16.msra.mxu1 %v2587_v28  ;;  %11818 = vmatpush3.bf16.msra.mxu0 %v2587_v28  ;;  %v12509_v28 = vld [vmem:[%s13509_s9 + $0x68] sm:$0xff]  }
  0xdf   : > { %17211 = vst [vmem:[#allocation31_spill] sm:$0xff] %v14056_v23  ;;  %17212 = vst [vmem:[#allocation32_spill] sm:$0xff] %v14058_v15  ;;  %v1865_v15 = vld [vmem:[#allocation2 + $0xf8] sm:$0xf]  ;;  %11810 = vmatmul.mubr.msk.bf16.gmra.mrb[24].mxu0 %vm683_vm7, %v12509_v28  ;;  %v1870_v28 = vld [vmem:[#allocation2 + $0x148] sm:$0xf] }
  0xe0   : > { %2200 = vrot.lane.b32.xlu0 %v2140_v50, %s13279_s10  ;;  %2282 = vrot.lane.b32.xlu1 %v2261_v8, %s13280_s11  ;;  %v2263_v8 = vrot.slane %v10822_v20, 6  ;;  %v10824_v50 = vcombine.low %v13922_v57, %v1865_v15  ;;  %v1866_v57 = vld [vmem:[#allocation2 + $0x108] sm:$0xf]  ;;  %v1869_v15 = vld [vmem:[#allocation2 + $0x138] sm:$0xf] }
  0xe1   : > { %v10828_v3 = vcombine.low %v13991_v29, %v1869_v15  ;;  %v12467_v15 = vld [vmem:[#allocation2 + $0x88] ss:$0 sps:$4 sm:$0x77]  }
  0xe2   : > { %v14072_v23 = vpop.permute.xlu0 %1436  ;;  %v14074_v62 = vpop.permute.xlu1 %1442  ;;  %v2265_v22 = vrot.slane %v10824_v50, 6 }
  0xe3   : > { %17213 = vst [vmem:[#allocation33_spill] sm:$0xff] %v14072_v23  ;;  %17214 = vst [vmem:[#allocation34_spill] sm:$0xff] %v14074_v62  ;;  %v10823_v23 = vcombine.low %v13908_v45, %v1864_v32  ;;  %v12513_v62 = vld [vmem:[%s13509_s9 + $0x70] sm:$0xff]   ;;  %v1868_v45 = vld [vmem:[#allocation2 + $0x128] sm:$0xf]  ;;  %v10825_v32 = vcombine.low %v13935_v17, %v1866_v57  ;;  %v10829_v57 = vcombine.low %v14016_v2, %v1870_v28  ;;  %v3289_v2 = vrot.slane %v12467_v15, 1 }
  0xe4   : > { %2280 = vrot.lane.b32.xlu0 %v2260_v19, %s13280_s11  ;;  %2206 = vrot.lane.b32.xlu1 %v2142_v16, %s13279_s10  ;;  %v2262_v19 = vrot.slane %v10821_v33, 6  ;;  %v3016_v17 = vld [vmem:[#allocation2 + $0x80] sm:$0x8] }
  0xe5   : > { %v2264_v39 = vrot.slane %v10823_v23, 6  ;;  %11813 = vmatprep.mubr.msk.bf16.mxu0 %vm683_vm7, %v12513_v62  ;;  %v2266_v23 = vrot.slane %v10825_v32, 6  ;;  %v10827_v62 = vcombine.low %v13961_v40, %v1868_v45  ;;  %v2271_v40 = vrot.slane %v10830_v41, 6  ;;  %v3018_v32 = vld [vmem:[#allocation2 + $0x90] sm:$0x8] }
  0xe6   : > { %v14083_v58 = vpop.permute.xlu0 %1440  ;;  %v14085_v5 = vpop.permute.xlu1 %1446  ;;  %v2975_v41 = vld [vmem:[#allocation2 + $0xa4] sm:$0xf] }
  0xe7   : > { %17215 = vst [vmem:[#allocation35_spill] sm:$0xff] %v14083_v58  ;;  %17216 = vst [vmem:[#allocation36_spill] sm:$0xff] %v14085_v5  ;;  %v5036_v5 = vld [vmem:[#allocation2 + $0x98] sm:$0xf] }
  0xe8   : > { %2204 = vrot.lane.b32.xlu0 %v2143_v56, %s13279_s10  ;;  %2286 = vrot.lane.b32.xlu1 %v2263_v8, %s13280_s11  ;;  %v12514_v8 = vld [vmem:[%s13509_s9 + $0x78] sm:$0xff]   ;;  %v2269_v56 = vrot.slane %v10828_v3, 6  ;;  %v2270_v3 = vrot.slane %v10829_v57, 6 }
  0xe9   : > { %11814 = vmatmul.mubr.msk.bf16.gmra.mrb[28].mxu0 %vm683_vm7, %v12514_v8  ;;  %v12535_v8 = vld [vmem:[%s17132_s2] sm:$0x3f]  }
  0xea   : > { %v14093_v16 = vpop.permute.xlu0 %1444  ;;  %v14095_v20 = vpop.permute.xlu1 %1450  ;;  %12325 = vmatprep.subr.msk.bf16.mxu1 %vm1725_vm10, %v12535_v8 }
  0xeb   : > { %17217 = vst [vmem:[#allocation37_spill] sm:$0xff] %v14093_v16  ;;  %17218 = vst [vmem:[#allocation38_spill] sm:$0xff] %v14095_v20 }
  0xec   : > { %2284 = vrot.lane.b32.xlu0 %v2262_v19, %s13280_s11  ;;  %2290 = vrot.lane.b32.xlu1 %v2265_v22, %s13280_s11  ;;  %v2969_v19 = vld [vmem:[#allocation2 + $0x84] sm:$0xf] }
  0xee   : > { %v14104_v33 = vpop.permute.xlu0 %1448  ;;  %v14106_v50 = vpop.permute.xlu1 %1518 }
  0xef   : > { %17219 = vst [vmem:[#allocation39_spill] sm:$0xff] %v14104_v33  ;;  %17220 = vst [vmem:[#allocation40_spill] sm:$0xff] %v14106_v50  ;;  %v12425_v50 = vld [vmem:[#allocation2 + $0x48] ss:$0 sps:$4 sm:$0x33]  }
  0xf0   : > { %2288 = vrot.lane.b32.xlu0 %v2264_v39, %s13280_s11  ;;  %2294 = vrot.lane.b32.xlu1 %v2267_v31, %s13280_s11  ;;  %v2268_v39 = vrot.slane %v10827_v62, 6  ;;  %v10899_v31 = vcombine.low %v3016_v17, %v2969_v19  ;;  %v10901_v62 = vcombine.low %v3018_v32, %v2972_v26  ;;  %v3020_v17 = vld [vmem:[#allocation2 + $0xa0] sm:$0x8] }
  0xf1   : > { %v10903_v33 = vcombine.low %v3020_v17, %v2975_v41 }
  0xf2   : > { %v14112_v22 = vpop.permute.xlu0 %1516  ;;  %v14114_v29 = vpop.permute.xlu1 %1522  ;;  %v3291_v15 = vrot.slane %v10901_v62, 1  ;;  %v5170_v62 = vrot.slane %v13808_v25, 2  ;;  %v5030_v25 = vld [vmem:[#allocation2 + $0x78] sm:$0xf] }
  0xf3   : > { %17221 = vst [vmem:[#allocation41_spill] sm:$0xff] %v14112_v22  ;;  %17222 = vst [vmem:[#allocation42_spill] sm:$0xff] %v14114_v29 }
  0xf4   : > { %2292 = vrot.lane.b32.xlu0 %v2266_v23, %s13280_s11  ;;  %2298 = vrot.lane.b32.xlu1 %v2269_v56, %s13280_s11  ;;  %v12469_v23 = vld [vmem:[#allocation2 + $0x98] ss:$0 sps:$4 sm:$0x77]   ;;  %v3288_v56 = vrot.slane %v10899_v31, 1 }
  0xf5   : > { %v3292_v57 = vrot.slane %v12469_v23, 1 }
  0xf6   : > { %v14120_v42 = vpop.permute.xlu0 %1520  ;;  %v14122_v45 = vpop.permute.xlu1 %1526 }
  0xf7   : > { %17223 = vst [vmem:[#allocation43_spill] sm:$0xff] %v14120_v42  ;;  %17224 = vst [vmem:[#allocation44_spill] sm:$0xff] %v14122_v45  ;;  %v3293_v8 = vsel %vm1339_vm6, %v3291_v15, %v3292_v57  ;;  %v14169_v15 = vld [vmem:[%s17132_s2 + $0x20] sm:$0x3f]   ;;  %v14274_v42 = vld [vmem:[#allocation2 + $0x70] sm:$0xc] }
  0xf8   : > { %2296 = vrot.lane.b32.xlu0 %v2268_v39, %s13280_s11  ;;  %2302 = vrot.lane.b32.xlu1 %v2271_v40, %s13280_s11  ;;  %v12471_v39 = vld [vmem:[#allocation2 + $0xa8] ss:$0 sps:$4 sm:$0x77]   ;;  %v3290_v40 = vsel %vm1339_vm6, %v3288_v56, %v3289_v2 }
  0xf9   : > { %v3295_v32 = vrot.slane %v12471_v39, 1  ;;  %v5173_v39 = vrot.slane %v13819_v0, 2  ;;  %12327 = vmatprep.subr.msk.bf16.mxu0 %vm1725_vm10, %v14169_v15  ;;  %v5029_v0 = vld [vmem:[#allocation2 + $0x74] sm:$0xe] }
  0xfa   : > { %v14130_v28 = vpop.permute.xlu0 %1524  ;;  %v14132_v19 = vpop.permute.xlu1 %1530 }
  0xfb   : > { %17225 = vst [vmem:[#allocation45_spill] sm:$0xff] %v14130_v28  ;;  %17226 = vst [vmem:[#allocation46_spill] sm:$0xff] %v14132_v19 }
  0xfc   : > { %2300 = vrot.lane.b32.xlu0 %v2270_v3, %s13280_s11  ;;  %3338 = vrot.lane.b32.xlu1 %v3289_v2, %s13279_s10  ;;  %v3294_v3 = vrot.slane %v10903_v33, 1  ;;  %v5171_v2 = vrot.slane %v13749_v34, 2  ;;  %v5174_v33 = vrot.slane %v13815_v38, 2 }
  0xfe   : > { %v14137_v31 = vpop.permute.xlu0 %1528  ;;  %v14139_v26 = vpop.permute.xlu1 %1534  ;;  %v3296_v56 = vsel %vm1339_vm6, %v3294_v3, %v3295_v32  ;;  %v5175_v38 = vsel %vm1725_vm10, %v5173_v39, %v5174_v33  ;;  %v5027_v3 = vld [vmem:[#allocation2 + $0x68] sm:$0xf]  ;;  %v11099_v39 = vcombine.low %v5029_v0, %v5030_v25  ;;  %v12488_v0 = vld [vmem:[#allocation2 + $0x8c] ss:$0 sps:$4 sm:$0x11]  }
  0xff   : > { %17227 = vst [vmem:[#allocation47_spill] sm:$0xff] %v14137_v31  ;;  %17228 = vst [vmem:[#allocation48_spill] sm:$0xff] %v14139_v26 }
 0x100   : > { %3336 = vrot.lane.b32.xlu0 %v3290_v40, %s13279_s10  ;;  %3342 = vrot.lane.b32.xlu1 %v3292_v57, %s13279_s10  ;;  %v5172_v57 = vsel %vm1725_vm10, %v5170_v62, %v5171_v2 }
 0x102   : > { %v14144_v20 = vpop.permute.xlu0 %1532  ;;  %v14146_v23 = vpop.permute.xlu1 %1538 }
 0x103   : > { %17229 = vst [vmem:[#allocation49_spill] sm:$0xff] %v14144_v20  ;;  %17230 = vst [vmem:[#allocation50_spill] sm:$0xff] %v14146_v23  ;;  %v5042_v23 = vld [vmem:[#allocation2 + $0xb8] sm:$0xf] }
 0x104   : > { %3340 = vrot.lane.b32.xlu0 %v3293_v8, %s13279_s10  ;;  %3346 = vrot.lane.b32.xlu1 %v3295_v32, %s13279_s10  ;;  %v12476_v32 = vld [vmem:[#allocation2 + $0x6c] ss:$0 sps:$4 sm:$0x11]   ;;  %v5026_v8 = vld [vmem:[#allocation2 + $0x64] sm:$0xe] }
 0x105   : > { %v11097_v62 = vcombine.low %v5026_v8, %v5027_v3  ;;  %v5180_v8 = vrot.slane %v13839_v55, 2  ;;  %v5179_v3 = vrot.slane %v13845_v61, 2  ;;  %v12493_v61 = vld [vmem:[#allocation2 + $0x9c] ss:$0 sps:$4 sm:$0x11]  }
 0x106   : > { %v14153_v41 = vpop.permute.xlu0 %1536  ;;  %v14155_v17 = vpop.permute.xlu1 %1542 }
 0x107   : > { %17231 = vst [vmem:[#allocation51_spill] sm:$0xff] %v14153_v41  ;;  %17232 = vst [vmem:[#allocation52_spill] sm:$0xff] %v14155_v17  ;;  %v5182_v41 = vrot.slane %v13860_v7, 2 }
 0x108   : > { %3344 = vrot.lane.b32.xlu0 %v3296_v56, %s13279_s10  ;;  %5220 = vrot.lane.b32.xlu1 %v5171_v2, %s13279_s10 }
 0x10a   : > { %v14162_v40 = vpop.permute.xlu0 %1540  ;;  %v14164_v34 = vpop.permute.xlu1 %1546 }
 0x10b   : > { %17233 = vst [vmem:[#allocation53_spill] sm:$0xff] %v14162_v40  ;;  %17234 = vst [vmem:[#allocation54_spill] sm:$0xff] %v14164_v34  ;;  %v5176_v40 = vrot.slane %v13831_v48, 2  ;;  %v5033_v48 = vld [vmem:[#allocation2 + $0x88] sm:$0xf] }
 0x10c   : > { %5218 = vrot.lane.b32.xlu0 %v5172_v57, %s13279_s10  ;;  %5224 = vrot.lane.b32.xlu1 %v5174_v33, %s13279_s10  ;;  %v12481_v57 = vld [vmem:[#allocation2 + $0x7c] ss:$0 sps:$4 sm:$0x11]  }
 0x10e   : > { %v14176_v2 = vpop.permute.xlu0 %1544  ;;  %v14178_v56 = vpop.permute.xlu1 %2146 }
 0x10f   : > { %17235 = vst [vmem:[#allocation55_spill] sm:$0xff] %v14176_v2  ;;  %v5177_v2 = vrot.slane %v13823_v44, 2  ;;  %v5032_v44 = vld [vmem:[#allocation2 + $0x84] sm:$0xe] }
 0x110   : > { %5222 = vrot.lane.b32.xlu0 %v5175_v38, %s13279_s10  ;;  %5412 = vrot.lane.b32.xlu1 %v12476_v32, %s13280_s11 }
 0x112   : > { %v14182_v34 = vpop.permute.xlu0 %2144  ;;  %v14184_v33 = vpop.permute.xlu1 %2150 }
 0x114   : > { %5410 = vrot.lane.b32.xlu0 %v11097_v62, %s13280_s11  ;;  %5416 = vrot.lane.b32.xlu1 %v12481_v57, %s13280_s11  ;;  %v5178_v62 = vsel %vm1725_vm10, %v5176_v40, %v5177_v2  ;;  %v11101_v40 = vcombine.low %v5032_v44, %v5033_v48  ;;  %v5186_v48 = vrot.slane %v13871_v18, 2 }
 0x116   : > { %v14190_v38 = vpop.permute.xlu0 %2148  ;;  %v14192_v32 = vpop.permute.xlu1 %2154 }
 0x118   : > { %5414 = vrot.lane.b32.xlu0 %v11099_v39, %s13280_s11  ;;  %5228 = vrot.lane.b32.xlu1 %v5177_v2, %s13279_s10  ;;  %v5181_v39 = vsel %vm1725_vm10, %v5179_v3, %v5180_v8  ;;  %v5035_v2 = vld [vmem:[#allocation2 + $0x94] sm:$0xe]  ;;  %v5183_v3 = vrot.slane %v13850_v63, 2  ;;  %v12500_v63 = vld [vmem:[#allocation2 + $0xac] ss:$0 sps:$4 sm:$0x11]  }
 0x11a   : > { %v14199_v57 = vpop.permute.xlu0 %2152  ;;  %v14201_v25 = vpop.permute.xlu1 %2158  ;;  %v5184_v44 = vsel %vm1725_vm10, %v5182_v41, %v5183_v3 }
 0x11c   : > { %5226 = vrot.lane.b32.xlu0 %v5178_v62, %s13279_s10  ;;  %5232 = vrot.lane.b32.xlu1 %v5180_v8, %s13279_s10  ;;  %v11103_v8 = vcombine.low %v5035_v2, %v5036_v5 }
 0x11e   : > { %v14206_v16 = vpop.permute.xlu0 %2156  ;;  %v14208_v55 = vpop.permute.xlu1 %2162 }
 0x11f   : > { %17236 = vst [vmem:[#allocation56_spill] sm:$0xff] %v14208_v55 }
 0x120   : > { %5230 = vrot.lane.b32.xlu0 %v5181_v39, %s13279_s10  ;;  %5420 = vrot.lane.b32.xlu1 %v12488_v0, %s13280_s11  ;;  %v5185_v0 = vrot.slane %v13878_v21, 2  ;;  %v12505_v21 = vld [vmem:[#allocation2 + $0xbc] ss:$0 sps:$4 sm:$0x11]  }
 0x122   : > { %v14212_v17 = vpop.permute.xlu0 %2160  ;;  %v14214_v62 = vpop.permute.xlu1 %2166  ;;  %v5187_v2 = vsel %vm1725_vm10, %v5185_v0, %v5186_v48  ;;  %v13030_v0 = vld [vmem:[#allocation2 + $0xc8] ss:$0 sps:$4 sm:$0x77]  }
 0x123   : > { %17237 = vst [vmem:[#allocation57_spill] sm:$0xff] %v14212_v17  ;;  %v5189_v26 = vrot.slane %v13030_v0, 2  ;;  %v1779_v0 = vld [vmem:[#allocation2 + $0x70] sm:$0xc]  ;;  %v14348_v17 = vld [vmem:[#allocation2 + $0x94] sm:$0xf] }
 0x124   : > { %5418 = vrot.lane.b32.xlu0 %v11101_v40, %s13280_s11  ;;  %5424 = vrot.lane.b32.xlu1 %v12493_v61, %s13280_s11  ;;  %v5038_v40 = vld [vmem:[#allocation2 + $0xa4] sm:$0xe] }
 0x126   : > { %v14220_v58 = vpop.permute.xlu0 %2164  ;;  %v14222_v39 = vpop.permute.xlu1 %2170 }
 0x127   : > { %17238 = vst [vmem:[#allocation58_spill] sm:$0xff] %v14222_v39 }
 0x128   : > { %5422 = vrot.lane.b32.xlu0 %v11103_v8, %s13280_s11  ;;  %5236 = vrot.lane.b32.xlu1 %v5183_v3, %s13279_s10  ;;  %v5039_v8 = vld [vmem:[#allocation2 + $0xa8] sm:$0xf]  ;;  %v5041_v3 = vld [vmem:[#allocation2 + $0xb4] sm:$0xe] }
 0x129   : > { %v11105_v41 = vcombine.low %v5038_v40, %v5039_v8  ;;  %v5191_v8 = vrot.slane %v13906_v43, 2  ;;  %v1776_v43 = vld [vmem:[#allocation2 + $0x60] sm:$0xc] }
 0x12a   : > { %v14229_v61 = vpop.permute.xlu0 %2168  ;;  %v14231_v5 = vpop.permute.xlu1 %2174 }
 0x12b   : > { %17239 = vst [vmem:[#allocation59_spill] sm:$0xff] %v14229_v61  ;;  %17240 = vst [vmem:[#allocation60_spill] sm:$0xff] %v14231_v5 }
 0x12c   : > { %5234 = vrot.lane.b32.xlu0 %v5184_v44, %s13279_s10  ;;  %5240 = vrot.lane.b32.xlu1 %v5186_v48, %s13279_s10  ;;  %v11107_v48 = vcombine.low %v5041_v3, %v5042_v23  ;;  %v12512_v3 = vld [vmem:[#allocation2 + $0xcc] ss:$0 sps:$4 sm:$0x11]  }
 0x12e   : > { %v14236_v7 = vpop.permute.xlu0 %2172  ;;  %v14238_v18 = vpop.permute.xlu1 %2178 }
 0x12f   : > { %17241 = vst [vmem:[#allocation61_spill] sm:$0xff] %v14236_v7  ;;  %17242 = vst [vmem:[#allocation62_spill] sm:$0xff] %v14238_v18  ;;  %v14297_v18 = vld [vmem:[#allocation2 + $0xa0] sm:$0xc] }
 0x130   : > { %5238 = vrot.lane.b32.xlu0 %v5187_v2, %s13279_s10  ;;  %5428 = vrot.lane.b32.xlu1 %v12500_v63, %s13280_s11  ;;  %v13031_v63 = vld [vmem:[#allocation2 + $0xd8] ss:$0 sps:$4 sm:$0x77]  }
 0x131   : > { %v5192_v40 = vrot.slane %v13031_v63, 2  ;;  %v14264_v63 = vld [vmem:[#allocation2 + $0x50] sm:$0xc]  ;;  %v12486_v7 = vld [vmem:[#allocation2 + $0x98] ss:$0 sps:$4 sm:$0x33]  }
 0x132   : > { %v14242_v20 = vpop.permute.xlu0 %2176  ;;  %v14244_v44 = vpop.permute.xlu1 %2182  ;;  %v17284_v51 = vld [vmem:[#allocation59_spill] sm:$0xff] }
 0x133   : > { %17243 = vst [vmem:[#allocation63_spill] sm:$0xff] %v14242_v20  ;;  %17244 = vst [vmem:[#allocation64_spill] sm:$0xff] %v14244_v44  ;;  %v5193_v19 = vsel %vm1725_vm10, %v5191_v8, %v5192_v40  ;;  %v11109_v8 = vcombine.low %v5044_v53, %v5045_v46  ;;  %v13035_v46 = vld [vmem:[#allocation2 + $0xe8] ss:$0 sps:$4 sm:$0x77]  }
 0x134   : > { %5426 = vrot.lane.b32.xlu0 %v11105_v41, %s13280_s11  ;;  %5432 = vrot.lane.b32.xlu1 %v12505_v21, %s13280_s11  ;;  %v5190_v41 = vsel %vm1725_vm10, %v5188_v37, %v5189_v26  ;;  %v14295_v20 = vld [vmem:[#allocation2 + $0x90] sm:$0xc]  ;;  %v14318_v44 = vld [vmem:[#allocation2 + $0x74] sm:$0xf] }
 0x136   : > { %v14249_v31 = vpop.permute.xlu0 %2180  ;;  %v14251_v2 = vpop.permute.xlu1 %2186 }
 0x137   : > { %17245 = vst [vmem:[#allocation65_spill] sm:$0xff] %v14249_v31  ;;  %17246 = vst [vmem:[#allocation66_spill] sm:$0xff] %v14251_v2  ;;  %v5048_v2 = vld [vmem:[#allocation2 + $0xd8] sm:$0xf]  ;;  %v14287_v31 = vld [vmem:[#allocation2 + $0x54] sm:$0xf] }
 0x138   : > { %5430 = vrot.lane.b32.xlu0 %v11107_v48, %s13280_s11  ;;  %5244 = vrot.lane.b32.xlu1 %v5189_v26, %s13279_s10  ;;  %v12479_v48 = vld [vmem:[#allocation2 + $0x78] ss:$0 sps:$4 sm:$0x33]   ;;  %v13032_v26 = vld [vmem:[#allocation2 + $0x74] sm:$0xf] }
 0x139   : > { %v10753_v45 = vcombine.low %v1779_v0, %v13032_v26  ;;  %v14282_v0 = vld [vmem:[#allocation2 + $0x64] sm:$0xf] }
 0x13a   : > { %v14257_v21 = vpop.permute.xlu0 %2184  ;;  %v14259_v23 = vpop.permute.xlu1 %2190  ;;  %17251 = vst [vmem:[#allocation71_spill] sm:$0xff] %v14282_v0  ;;  %v10751_v26 = vcombine.low %v1776_v43, %v14282_v0  ;;  %v14299_v43 = vld [vmem:[#allocation2 + $0xb0] sm:$0xc] }
 0x13b   : > { %17247 = vst [vmem:[#allocation67_spill] sm:$0xff] %v14257_v21  ;;  %17248 = vst [vmem:[#allocation68_spill] sm:$0xff] %v14259_v23  ;;  %v14270_v23 = vld [vmem:[#allocation2 + $0x40] sm:$0xc]  ;;  %v2312_v53 = vsel %vm683_vm7, %v10753_v45, %v14190_v38  ;;  %v5194_v45 = vrot.slane %v13915_v52, 2 }
 0x13c   : > { %5242 = vrot.lane.b32.xlu0 %v5190_v41, %s13279_s10  ;;  %5248 = vrot.lane.b32.xlu1 %v5192_v40, %s13279_s10  ;;  %v14272_v41 = vld [vmem:[#allocation2 + $0x60] sm:$0xc]  ;;  %v12475_v40 = vld [vmem:[#allocation2 + $0x68] ss:$0 sps:$4 sm:$0x33]  }
 0x13d   : > { %v14276_v21 = vld [vmem:[#allocation2 + $0x80] sm:$0xc]  ;;  %v14310_v38 = vld [vmem:[#allocation2 + $0x44] sm:$0xf]  ;;  %v13040_v52 = vld [vmem:[#allocation2 + $0x94] sm:$0xf] }
 0x13e   : > { %v14266_v28 = vpop.permute.xlu0 %2188  ;;  %v14268_v37 = vpop.permute.xlu1 %2194 }
 0x13f   : > { %17249 = vst [vmem:[#allocation69_spill] sm:$0xff] %v14266_v28  ;;  %17250 = vst [vmem:[#allocation70_spill] sm:$0xff] %v14268_v37  ;;  %v5047_v28 = vld [vmem:[#allocation2 + $0xd4] sm:$0xe]  ;;  %v14280_v37 = vld [vmem:[#allocation2 + $0x90] sm:$0xc] }
 0x140   : > { %5246 = vrot.lane.b32.xlu0 %v5193_v19, %s13279_s10  ;;  %5436 = vrot.lane.b32.xlu1 %v12512_v3, %s13280_s11  ;;  %v2315_v19 = vsel %vm683_vm7, %v12479_v48, %v14184_v33  ;;  %v5195_v3 = vrot.slane %v13035_v46, 2  ;;  %v11111_v33 = vcombine.low %v5047_v28, %v5048_v2  ;;  %v14314_v46 = vld [vmem:[#allocation2 + $0x64] sm:$0xf]  ;;  %v14326_v28 = vld [vmem:[#allocation2 + $0xc0] sm:$0xc] }
 0x141   : > { %17253 = vst [vmem:[#allocation73_spill] sm:$0xff] %v14326_v28  ;;  %v14328_v2 = vld [vmem:[#allocation2 + $0xd0] sm:$0xc]  ;;  %v14334_v48 = vld [vmem:[#allocation2 + $0x80] sm:$0xc] }
 0x142   : > { %v14285_v29 = vpop.permute.xlu0 %2192  ;;  %v2275_v22 = vpop.permute.xlu1 %2274  ;;  %17254 = vst [vmem:[#allocation74_spill] sm:$0xff] %v14328_v2 }
 0x143   : > { %17252 = vst [vmem:[#allocation72_spill] sm:$0xff] %v14285_v29  ;;  %v14302_v0 = vsel %vm1644_vm11, %v2312_v53, %v2275_v22  ;;  %v14305_v29 = vsel %vm1644_vm11, %v2315_v19, %v2275_v22  ;;  %v2309_v19 = vsel %vm683_vm7, %v12475_v40, %v14178_v56  ;;  %v2306_v53 = vsel %vm683_vm7, %v10751_v26, %v14182_v34 }
 0x144   : > { %5434 = vrot.lane.b32.xlu0 %v11109_v8, %s13280_s11  ;;  %5440 = vrot.lane.b32.xlu1 %v12516_v1, %s13280_s11  ;;  %v14322_v8 = vld [vmem:[#allocation2 + $0x84] sm:$0xf]  ;;  %v10757_v22 = vcombine.low %v14280_v37, %v13040_v52  ;;  %v12423_v1 = vld [vmem:[#allocation2 + $0x58] ss:$0 sps:$4 sm:$0x33]   ;;  %v2483_v5 = vrot.slane %v14302_v0, 2 }
 0x145   : > { %v2484_v56 = vrot.slane %v14305_v29, 2  ;;  %v13041_v52 = vld [vmem:[#allocation2 + $0xf8] ss:$0 sps:$4 sm:$0x77]   ;;  %v14352_v29 = vld [vmem:[#allocation2 + $0xa4] sm:$0xf] }
 0x146   : > { %v2273_v61 = vpop.permute.xlu0 %2272  ;;  %v14337_v39 = vpop.permute.xlu1 %2198  ;;  %v5198_v37 = vrot.slane %v13041_v52, 2  ;;  %17257 = vst [vmem:[#allocation77_spill] sm:$0xff] %v14352_v29  ;;  %v12482_v52 = vld [vmem:[#allocation2 + $0x88] ss:$0 sps:$4 sm:$0x33]   ;;  %v5771_v29 = vsel %vm1725_vm10, %v14169_v15, 0 }
 0x147   : > { %17255 = vst [vmem:[#allocation75_spill] sm:$0xff] %v14337_v39  ;;  %v2401_v34 = vsel %vm1644_vm11, %v2306_v53, %v2273_v61  ;;  %v2402_v40 = vsel %vm1644_vm11, %v2309_v19, %v2273_v61  ;;  %v5197_v39 = vrot.slane %v13933_v9, 2  ;;  %v14356_v53 = vld [vmem:[#allocation2 + $0xb4] sm:$0xf]  ;;  %v5196_v19 = vsel %vm1725_vm10, %v5194_v45, %v5195_v3  ;;  %v13046_v9 = vld [vmem:[#allocation2 + $0x84] sm:$0xf] }
 0x148   : > { %v2480_v26 = vrot.slane %v2401_v34, 2  ;;  %v2481_v47 = vrot.slane %v2402_v40, 2  ;;  %5438 = vrot.lane.b32.xlu0 %v11111_v33, %s13280_s11  ;;  %5252 = vrot.lane.b32.xlu1 %v5195_v3, %s13279_s10  ;;  %17258 = vst [vmem:[#allocation78_spill] sm:$0xff] %v14356_v53  ;;  %v14361_v34 = vld [vmem:[#allocation2 + $0xc4] sm:$0xf]  ;;  %v10755_v0 = vcombine.low %v14334_v48, %v13046_v9  ;;  %v2327_v40 = vsel %vm683_vm7, %v12486_v7, %v14201_v25 }
 0x149   : > { %17259 = vst [vmem:[#allocation79_spill] sm:$0xff] %v14361_v34  ;;  %v12429_v33 = vld [vmem:[#allocation2 + $0x68] ss:$0 sps:$4 sm:$0x33]   ;;  %v14371_v3 = vld [vmem:[#allocation2 + $0xd4] sm:$0xf]  ;;  %v2324_v9 = vsel %vm683_vm7, %v10757_v22, %v14206_v16  ;;  %v14391_v25 = vsel %vm683_vm7, %v12423_v1, %v13887_v10  ;;  %v2321_v10 = vsel %vm683_vm7, %v12482_v52, %v14192_v32  ;;  %v17263_v32 = vcombine.low %v14270_v23, %v14310_v38 }
 0x14a   : > { %v14366_v55 = vpop.permute.xlu0 %2196  ;;  %v2482_v61 = vsel %vm1725_vm10, %v2480_v26, %v2481_v47  ;;  %v2279_v36 = vpop.permute.xlu1 %2278  ;;  %v12432_v53 = vld [vmem:[#allocation2 + $0x78] ss:$0 sps:$4 sm:$0x33]   ;;  %17260 = vst [vmem:[#allocation80_spill] sm:$0xff] %v14371_v3  ;;  %v1791_v48 = vld [vmem:[#allocation2 + $0xb0] sm:$0xc]  ;;  %v2485_v47 = vsel %vm1725_vm10, %v2483_v5, %v2484_v56  ;;  %v14395_v5 = vsel %vm683_vm7, %v12425_v50, %v13895_v12  ;;  %v5199_v56 = vsel %vm1725_vm10, %v5197_v39, %v5198_v37 }
 0x14b   : > { %11819 = vmatprep.mubr.msk.bf16.mxu0 %vm2536_vm12, %v2482_v61  ;;  %v12435_v26 = vld [vmem:[#allocation2 + $0x88] ss:$0 sps:$4 sm:$0x33]   ;;  %v14381_v15 = vld [vmem:[#allocation2 + $0xf4] sm:$0xf]  ;;  %v2410_v28 = vsel %vm1644_vm11, %v2324_v9, %v2279_v36  ;;  %v2411_v45 = vsel %vm1644_vm11, %v2327_v40, %v2279_v36  ;;  %v17262_v61 = vcombine.low %v14264_v63, %v14287_v31  ;;  %v2318_v12 = vsel %vm683_vm7, %v10755_v0, %v14199_v57 }
 0x14c   : > { %17261 = vst [vmem:[#allocation81_spill] sm:$0xff] %v14381_v15  ;;  %5250 = vrot.lane.b32.xlu0 %v5196_v19, %s13279_s10  ;;  %11820 = vmatmul.mubr.msk.bf16.vlgmr.msra.gmra.mrb[32].mxu0 %vm2536_vm12, %v2485_v47  ;;  %v12521_v7 = vld [vmem:[#allocation2 + $0xec] ss:$0 sps:$4 sm:$0x11]   ;;  %v5050_v16 = vld [vmem:[#allocation2 + $0xe4] sm:$0xe]  ;;  %v14419_v57 = vsel %vm683_vm7, %v17263_v32, %v13911_v49  ;;  %v14435_v49 = vsel %vm683_vm7, %v12432_v53, %v13939_v13 }
 0x14d   : > { %v12491_v22 = vld [vmem:[#allocation2 + $0xb8] ss:$0 sps:$4 sm:$0x33]   ;;  %5256 = vrot.lane.b32.xlu1 %v5198_v37, %s13279_s10  ;;  %v5051_v36 = vld [vmem:[#allocation2 + $0xe8] sm:$0xf]  ;;  %11920 = vmatpush3.bf16.msra.mxu0 %v5771_v29  ;;  %v14404_v19 = vsel %vm683_vm7, %v17262_v61, %v13901_v4  ;;  %v2489_v47 = vrot.slane %v2410_v28, 2  ;;  %v17265_v38 = vcombine.low %v14274_v42, %v14318_v44  ;;  %v17267_v13 = vcombine.low %v14276_v21, %v14322_v8 }
 0x14e   : > { %v13049_v50 = vld [vmem:[#allocation2 + $0xb4] sm:$0xf]  ;;  %v2277_v40 = vpop.permute.xlu0 %2276  ;;  %v14410_v9 = vpop.permute.xlu1 %2202  ;;  %v12438_v39 = vld [vmem:[#allocation2 + $0x98] ss:$0 sps:$4 sm:$0x33]   ;;  %v2490_v34 = vrot.slane %v2411_v45, 2  ;;  %v11113_v28 = vcombine.low %v5050_v16, %v5051_v36 }
 0x14f   : > { %v10761_v1 = vcombine.low %v1791_v48, %v13049_v50  ;;  %v12441_v37 = vld [vmem:[#allocation2 + $0xa8] ss:$0 sps:$4 sm:$0x33]   ;;  %v1788_v29 = vld [vmem:[#allocation2 + $0xa0] sm:$0xc]  ;;  %v2407_v31 = vsel %vm1644_vm11, %v2318_v12, %v2277_v40  ;;  %v2408_v4 = vsel %vm1644_vm11, %v2321_v10, %v2277_v40  ;;  %v14424_v12 = vsel %vm683_vm7, %v12429_v33, %v13924_v60  ;;  %v17276_v32 = vld [vmem:[#allocation57_spill] sm:$0xff] }
 0x150   : > { %v12523_v63 = vld [vmem:[#allocation2 + $0xfc] ss:$0 sps:$4 sm:$0x11]   ;;  %v12444_v0 = vld [vmem:[#allocation2 + $0xb8] ss:$0 sps:$4 sm:$0x33]   ;;  %5254 = vrot.lane.b32.xlu0 %v5199_v56, %s13279_s10  ;;  %v17264_v10 = vcombine.low %v14272_v41, %v14314_v46  ;;  %v14442_v16 = vsel %vm683_vm7, %v17265_v38, %v13952_v59  ;;  %v14456_v41 = vsel %vm683_vm7, %v17267_v13, %v13967_v54  ;;  %v2491_v21 = vsel %vm1725_vm10, %v2489_v47, %v2490_v34 }
 0x151   : > { %v12487_v52 = vld [vmem:[#allocation2 + $0xa8] ss:$0 sps:$4 sm:$0x33]   ;;  %v2486_v48 = vrot.slane %v2407_v31, 2  ;;  %v2487_v61 = vrot.slane %v2408_v4, 2  ;;  %5444 = vrot.lane.b32.xlu1 %v12521_v7, %s13280_s11  ;;  %v2339_v7 = vsel %vm683_vm7, %v12491_v22, %v14214_v62  ;;  %v5200_v62 = vrot.slane %v13946_v30, 2 }
 0x152   : > { %v5053_v45 = vld [vmem:[#allocation2 + $0xf4] sm:$0xe]  ;;  %v14431_v23 = vsel %vm683_vm7, %v17264_v10, %v13937_v11  ;;  %v14444_v60 = vld [vmem:[#allocation2 + $0xd0] sm:$0xc]  ;;  %v5054_v33 = vld [vmem:[#allocation2 + $0xf8] sm:$0xf]  ;;  %v14449_v11 = vsel %vm683_vm7, %v12435_v26, %v13954_v27  ;;  %v14458_v59 = vpop.permute.xlu0 %2200  ;;  %v2283_v53 = vpop.permute.xlu1 %2282  ;;  %v2336_v27 = vsel %vm683_vm7, %v10761_v1, %v14220_v58  ;;  %v14480_v34 = vsel %vm683_vm7, %v12438_v39, %v13969_v14 }
 0x153   : > { %17266 = vst [vmem:[#allocation82_spill] sm:$0xff] %v14449_v11  ;;  %v13050_v42 = vld [vmem:[#allocation2 + $0xa4] sm:$0xf]  ;;  %v2488_v46 = vsel %vm1725_vm10, %v2486_v48, %v2487_v61  ;;  %v13051_v8 = vld [vmem:[#allocation2 + $0x108] ss:$0 sps:$4 sm:$0x77]   ;;  %v2416_v50 = vsel %vm1644_vm11, %v2336_v27, %v2283_v53  ;;  %v2417_v40 = vsel %vm1644_vm11, %v2339_v7, %v2283_v53  ;;  %v11115_v58 = vcombine.low %v5053_v45, %v5054_v33 }
 0x154   : > { %v10759_v44 = vcombine.low %v1788_v29, %v13050_v42  ;;  %11823 = vmatprep.mubr.msk.bf16.mxu0 %vm2536_vm12, %v2488_v46  ;;  %v5201_v54 = vrot.slane %v13051_v8, 2  ;;  %v14467_v26 = vld [vmem:[#allocation2 + $0xc0] sm:$0xc]  ;;  %v14471_v36 = vld [vmem:[#allocation2 + $0xf0] sm:$0xc]  ;;  %5442 = vrot.lane.b32.xlu0 %v11113_v28, %s13280_s11  ;;  %v17268_v22 = vcombine.low %v14295_v20, %v14348_v17  ;;  %v14491_v29 = vsel %vm683_vm7, %v12441_v37, %v13983_v6  ;;  %v17270_v47 = vld [vmem:[#allocation77_spill] sm:$0xff] }
 0x155   : > { %v14469_v56 = vld [vmem:[#allocation2 + $0xe0] sm:$0xc]  ;;  %11824 = vmatmul.mubr.msk.bf16.gmra.mrb[36].mxu0 %vm2536_vm12, %v2491_v21  ;;  %17269 = vst [vmem:[#allocation83_spill] sm:$0xff] %v14491_v29  ;;  %v17271_v31 = vcombine.low %v14297_v18, %v17270_v47  ;;  %v12498_v14 = vld [vmem:[#allocation2 + $0xd8] ss:$0 sps:$4 sm:$0x33]   ;;  %5448 = vrot.lane.b32.xlu1 %v12523_v63, %s13280_s11 }
 0x156   : > { %v14487_v1 = vsel %vm683_vm7, %v17268_v22, %v13981_v24  ;;  %v17273_v39 = vld [vmem:[#allocation19_spill] sm:$0xff]  ;;  %v17275_v24 = vld [vmem:[#allocation56_spill] sm:$0xff]  ;;  %v2330_v6 = vsel %vm683_vm7, %v10759_v44, %v17276_v32  ;;  %v14510_v18 = vld [vmem:[#allocation2 + $0x100] sm:$0xc]  ;;  %v2281_v61 = vpop.permute.xlu0 %2280  ;;  %v14514_v28 = vpop.permute.xlu1 %2206  ;;  %v2495_v45 = vrot.slane %v2416_v50, 2  ;;  %v2496_v10 = vrot.slane %v2417_v40, 2 }
 0x157   : > { %v14498_v4 = vsel %vm683_vm7, %v17271_v31, %v13993_v35  ;;  %v14503_v20 = vsel %vm683_vm7, %v12444_v0, %v17273_v39  ;;  %v2333_v17 = vsel %vm683_vm7, %v12487_v52, %v17275_v24  ;;  %v13052_v37 = vld [vmem:[#allocation2 + $0xd4] sm:$0xf]  ;;  %v14512_v35 = vld [vmem:[#allocation2 + $0x110] sm:$0xc]  ;;  %v14516_v63 = vld [vmem:[#allocation2 + $0x120] sm:$0xc]  ;;  %v2413_v52 = vsel %vm1644_vm11, %v2330_v6, %v2281_v61 }
 0x158   : > { %17272 = vst [vmem:[#allocation77_spill] sm:$0xff] %v14498_v4  ;;  %17274 = vst [vmem:[#allocation19_spill] sm:$0xff] %v14503_v20  ;;  %v10765_v48 = vcombine.low %v14444_v60, %v13052_v37  ;;  %v14518_v0 = vld [vmem:[#allocation2 + $0x130] sm:$0xc]  ;;  %v2414_v38 = vsel %vm1644_vm11, %v2333_v17, %v2281_v61  ;;  %v2492_v13 = vrot.slane %v2413_v52, 2  ;;  %5446 = vrot.lane.b32.xlu0 %v11115_v58, %s13280_s11  ;;  %v17277_v46 = vld [vmem:[#allocation17_spill] sm:$0xff] }
 0x159   : > { %v12494_v33 = vld [vmem:[#allocation2 + $0xc8] ss:$0 sps:$4 sm:$0x33]   ;;  %v2493_v60 = vrot.slane %v2414_v38, 2  ;;  %v5203_v53 = vrot.slane %v17277_v46, 2  ;;  %5260 = vrot.lane.b32.xlu1 %v5201_v54, %s13279_s10  ;;  %v5202_v58 = vsel %vm1725_vm10, %v5200_v62, %v5201_v54  ;;  %v17278_v37 = vld [vmem:[#allocation60_spill] sm:$0xff]  ;;  %v2497_v24 = vsel %vm1725_vm10, %v2495_v45, %v2496_v10 }
 0x15a   : > { %v13053_v42 = vld [vmem:[#allocation2 + $0x118] ss:$0 sps:$4 sm:$0x77]   ;;  %v13054_v7 = vld [vmem:[#allocation2 + $0xc4] sm:$0xf]  ;;  %v14551_v54 = vpop.permute.xlu0 %2204  ;;  %v2287_v6 = vpop.permute.xlu1 %2286  ;;  %v2351_v61 = vsel %vm683_vm7, %v12498_v14, %v17278_v37  ;;  %v17282_v30 = vld [vmem:[#allocation40_spill] sm:$0xff] }
 0x15b   : > { %v5204_v44 = vrot.slane %v13053_v42, 2  ;;  %v10763_v27 = vcombine.low %v14467_v26, %v13054_v7  ;;  %v14525_v21 = vld [vmem:[#allocation2 + $0xe4] sm:$0xf]  ;;  %v14529_v50 = vld [vmem:[#allocation2 + $0xf4] sm:$0xf]  ;;  %v2494_v62 = vsel %vm1725_vm10, %v2492_v13, %v2493_v60  ;;  %v17279_v52 = vld [vmem:[#allocation61_spill] sm:$0xff]  ;;  %v2423_v14 = vsel %vm1644_vm11, %v2351_v61, %v2287_v6 }
 0x15c   : > { %v14535_v22 = vld [vmem:[#allocation2 + $0x104] sm:$0xf]  ;;  %v14539_v26 = vld [vmem:[#allocation2 + $0x114] sm:$0xf]  ;;  %v14547_v17 = vld [vmem:[#allocation2 + $0x140] sm:$0xc]  ;;  %v2348_v38 = vsel %vm683_vm7, %v10765_v48, %v17279_v52  ;;  %11827 = vmatprep.mubr.msk.bf16.mxu0 %vm2536_vm12, %v2494_v62  ;;  %5258 = vrot.lane.b32.xlu0 %v5202_v58, %s13279_s10  ;;  %v14589_v45 = vsel %vm1644_vm11, %v14404_v19, %v17282_v30 }
 0x15d   : > { %v14543_v39 = vld [vmem:[#allocation2 + $0x124] sm:$0xf]  ;;  %v14549_v32 = vld [vmem:[#allocation2 + $0x150] sm:$0xc]  ;;  %v14558_v42 = vld [vmem:[#allocation2 + $0x134] sm:$0xf]  ;;  %v2422_v8 = vsel %vm1644_vm11, %v2348_v38, %v2287_v6  ;;  %11828 = vmatmul.mubr.msk.bf16.gmra.mrb[40].mxu0 %vm2536_vm12, %v2497_v24  ;;  %5264 = vrot.lane.b32.xlu1 %v5204_v44, %s13279_s10  ;;  %v5205_v58 = vsel %vm1725_vm10, %v5203_v53, %v5204_v44  ;;  %v2342_v38 = vsel %vm683_vm7, %v10763_v27, %v17284_v51 }
 0x15e   : > { %v12526_v31 = vld [vmem:[#allocation2 + $0x10c] ss:$0 sps:$4 sm:$0x11]   ;;  %v5056_v47 = vld [vmem:[#allocation2 + $0x104] sm:$0xe]  ;;  %v17281_v61 = vld [vmem:[#allocation20_spill] sm:$0xff]  ;;  %v2285_v53 = vpop.permute.xlu0 %2284  ;;  %v2291_v6 = vpop.permute.xlu1 %2290 }
 0x15f   : > { %v5057_v40 = vld [vmem:[#allocation2 + $0x108] sm:$0xf]  ;;  %v12503_v60 = vld [vmem:[#allocation2 + $0xf8] ss:$0 sps:$4 sm:$0x33]   ;;  %v17280_v10 = vld [vmem:[#allocation18_spill] sm:$0xff]  ;;  %v2419_v29 = vsel %vm1644_vm11, %v2342_v38, %v2285_v53 }
 0x160   : > { %v12499_v13 = vld [vmem:[#allocation2 + $0xe8] ss:$0 sps:$4 sm:$0x33]   ;;  %v14568_v48 = vld [vmem:[#allocation2 + $0x114] sm:$0xe]  ;;  %v5206_v52 = vrot.slane %v17280_v10, 2  ;;  %5262 = vrot.lane.b32.xlu0 %v5205_v58, %s13279_s10  ;;  %v11117_v51 = vcombine.low %v5056_v47, %v5057_v40 }
 0x161   : > { %v14570_v37 = vld [vmem:[#allocation2 + $0x118] sm:$0xf]  ;;  %v14572_v62 = vld [vmem:[#allocation2 + $0x128] ss:$0 sps:$4 sm:$0x77]   ;;  %v5209_v46 = vrot.slane %v17281_v61, 2  ;;  %5452 = vrot.lane.b32.xlu1 %v12526_v31, %s13280_s11  ;;  %v17289_v31 = vcombine.low %v14469_v56, %v14525_v21 }
 0x162   : > { %v14576_v7 = vld [vmem:[#allocation2 + $0x144] sm:$0xf]  ;;  %v14582_v24 = vld [vmem:[#allocation2 + $0x138] ss:$0 sps:$4 sm:$0x77]   ;;  %v2501_v2 = vrot.slane %v2422_v8, 2  ;;  %v11119_v27 = vcombine.low %v14568_v48, %v14570_v37 }
 0x163   : > { %v17283_v10 = vld [vmem:[#allocation58_spill] sm:$0xff]  ;;  %v14595_v3 = vld [vmem:[#allocation2 + $0x154] sm:$0xf]  ;;  %v2502_v61 = vrot.slane %v2423_v14, 2  ;;  %v2498_v11 = vrot.slane %v2419_v29, 2  ;;  %v17286_v14 = vrot.slane %v14582_v24, 2 }
 0x164   : > { %v2345_v15 = vsel %vm683_vm7, %v12494_v33, %v17283_v10  ;;  %v10781_v44 = vcombine.low %v14549_v32, %v14595_v3  ;;  %v12528_v4 = vld [vmem:[#allocation2 + $0x11c] ss:$0 sps:$4 sm:$0x11]   ;;  %v12506_v20 = vld [vmem:[#allocation2 + $0x108] ss:$0 sps:$4 sm:$0x33]   ;;  %v14607_v10 = vsel %vm1644_vm11, %v14391_v25, %v17282_v30  ;;  %5450 = vrot.lane.b32.xlu0 %v11117_v51, %s13280_s11 }
 0x165   : > { %v2420_v19 = vsel %vm1644_vm11, %v2345_v15, %v2285_v53  ;;  %v17285_v15 = vrot.slane %v14572_v62, 2  ;;  %v14619_v40 = vsel %vm1725_vm10, %v5209_v46, %v17286_v14  ;;  %v14621_v47 = vld [vmem:[#allocation2 + $0x124] sm:$0xe]  ;;  %v14623_v48 = vld [vmem:[#allocation2 + $0x128] sm:$0xf]  ;;  %v2289_v53 = vpop.permute.xlu0 %2288  ;;  %v17292_v14 = vcombine.low %v14471_v36, %v14529_v50  ;;  %v17293_v50 = vld [vmem:[#allocation41_spill] sm:$0xff]  ;;  %5456 = vrot.lane.b32.xlu1 %v12528_v4, %s13280_s11 }
 0x166   : > { %v2499_v33 = vrot.slane %v2420_v19, 2  ;;  %v17287_v30 = vld [vmem:[#allocation62_spill] sm:$0xff]  ;;  %v17288_v37 = vld [vmem:[#allocation63_spill] sm:$0xff]  ;;  %v2295_v19 = vpop.permute.xlu1 %2294  ;;  %v2503_v21 = vsel %vm1725_vm10, %v2501_v2, %v2502_v61  ;;  %v1730_v36 = vrot.slane %v14607_v10, 2  ;;  %v14657_v2 = vsel %vm1644_vm11, %v14395_v5, %v17293_v50 }
 0x167   : > { %v14614_v29 = vsel %vm1725_vm10, %v5206_v52, %v17285_v15  ;;  %v2357_v25 = vsel %vm683_vm7, %v12499_v13, %v17287_v30  ;;  %v2354_v38 = vsel %vm683_vm7, %v17289_v31, %v17288_v37  ;;  %v17290_v52 = vld [vmem:[#allocation64_spill] sm:$0xff]  ;;  %v17291_v15 = vld [vmem:[#allocation65_spill] sm:$0xff]  ;;  %v12511_v61 = vld [vmem:[#allocation2 + $0x128] ss:$0 sps:$4 sm:$0x33]  }
 0x168   : > { %v2363_v58 = vsel %vm683_vm7, %v12503_v60, %v17290_v52  ;;  %v2500_v46 = vsel %vm1725_vm10, %v2498_v11, %v2499_v33  ;;  %v2360_v8 = vsel %vm683_vm7, %v17292_v14, %v17291_v15  ;;  %v12510_v13 = vld [vmem:[#allocation2 + $0x118] ss:$0 sps:$4 sm:$0x33]   ;;  %v2425_v30 = vsel %vm1644_vm11, %v2354_v38, %v2289_v53  ;;  %v17294_v51 = vld [vmem:[#allocation42_spill] sm:$0xff]  ;;  %v17296_v38 = vld [vmem:[#allocation67_spill] sm:$0xff]  ;;  %5454 = vrot.lane.b32.xlu0 %v11119_v27, %s13280_s11 }
 0x169   : > { %v2426_v56 = vsel %vm1644_vm11, %v2357_v25, %v2289_v53  ;;  %11831 = vmatprep.mubr.msk.bf16.mxu0 %vm2536_vm12, %v2500_v46  ;;  %v2428_v60 = vsel %vm1644_vm11, %v2360_v8, %v2291_v6  ;;  %v2429_v11 = vsel %vm1644_vm11, %v2363_v58, %v2291_v6  ;;  %v2504_v33 = vrot.slane %v2425_v30, 2  ;;  %v17295_v31 = vld [vmem:[#allocation66_spill] sm:$0xff]  ;;  %v12524_v58 = vld [vmem:[#allocation2 + $0x158] ss:$0 sps:$4 sm:$0x33]   ;;  %v2293_v53 = vpop.permute.xlu0 %2292 }
 0x16a   : > { %v2505_v37 = vrot.slane %v2426_v56, 2  ;;  %11832 = vmatmul.mubr.msk.bf16.gmra.mrb[44].mxu0 %vm2536_vm12, %v2503_v21  ;;  %v14652_v25 = vsel %vm1644_vm11, %v14419_v57, %v17293_v50  ;;  %v11121_v6 = vcombine.low %v14621_v47, %v14623_v48  ;;  %v14665_v8 = vsel %vm1644_vm11, %v14442_v16, %v17294_v51  ;;  %v14675_v46 = vpop.permute.xlu1 %2298  ;;  %v4994_v10 = vld [vmem:[#allocation2 + $0x60] sm:$0xe]  ;;  %v17345_v48 = vld [vmem:[#allocation35_spill] sm:$0xff] }
 0x16b   : > { %v2369_v57 = vsel %vm683_vm7, %v12506_v20, %v17295_v31  ;;  %v17297_v52 = vcombine.low %v14510_v18, %v14535_v22  ;;  %v2507_v15 = vrot.slane %v2428_v60, 2  ;;  %v2508_v14 = vrot.slane %v2429_v11, 2  ;;  %v17298_v11 = vld [vmem:[#allocation43_spill] sm:$0xff] }
 0x16c   : > { %v2506_v4 = vsel %vm1725_vm10, %v2504_v33, %v2505_v37  ;;  %v2432_v30 = vsel %vm1644_vm11, %v2369_v57, %v2293_v53  ;;  %v1726_v20 = vrot.slane %v14652_v25, 2  ;;  %v14684_v18 = vsel %vm1644_vm11, %v14435_v49, %v17294_v51  ;;  %v17299_v37 = vld [vmem:[#allocation68_spill] sm:$0xff]  ;;  %v17301_v51 = vld [vmem:[#allocation69_spill] sm:$0xff]  ;;  %v17303_v57 = vld [vmem:[#allocation70_spill] sm:$0xff]  ;;  %5266 = vrot.lane.b32.xlu0 %v14614_v29, %s13279_s10 }
 0x16d   : > { %v2366_v5 = vsel %vm683_vm7, %v17297_v52, %v17296_v38  ;;  %11835 = vmatprep.mubr.msk.bf16.mxu0 %vm2536_vm12, %v2506_v4  ;;  %v2511_v56 = vrot.slane %v2432_v30, 2  ;;  %v1727_v21 = vrot.slane %v14657_v2, 2  ;;  %v1735_v60 = vrot.slane %v14665_v8, 2  ;;  %v17304_v52 = vld [vmem:[#allocation72_spill] sm:$0xff] }
 0x16e   : > { %v2431_v16 = vsel %vm1644_vm11, %v2366_v5, %v2293_v53  ;;  %v14692_v33 = vsel %vm1644_vm11, %v14431_v23, %v17298_v11  ;;  %v2375_v50 = vsel %vm683_vm7, %v12510_v13, %v17299_v37  ;;  %v17300_v49 = vrot.slane %v14572_v62, 2  ;;  %v12520_v13 = vld [vmem:[#allocation2 + $0x148] ss:$0 sps:$4 sm:$0x33]   ;;  %v2297_v53 = vpop.permute.xlu0 %2296  ;;  %v2303_v4 = vpop.permute.xlu1 %2302 }
 0x16f   : > { %v2510_v22 = vrot.slane %v2431_v16, 2  ;;  %v17302_v27 = vcombine.low %v14512_v35, %v14539_v26  ;;  %v2381_v38 = vsel %vm683_vm7, %v12511_v61, %v17303_v57  ;;  %v17305_v23 = vcombine.low %v14516_v63, %v14543_v39  ;;  %v5066_v57 = vld [vmem:[#allocation2 + $0x138] sm:$0xf]  ;;  %v13066_v2 = vld [vmem:[#allocation2 + $0x148] ss:$0 sps:$4 sm:$0x77]  }
 0x170   : > { %5268 = vrot.lane.b32.xlu1 %v17300_v49, %s13279_s10  ;;  %v2399_v62 = vsel %vm683_vm7, %v12524_v58, %v14514_v28  ;;  %v2396_v35 = vsel %vm683_vm7, %v10781_v44, %v14551_v54  ;;  %v2435_v61 = vsel %vm1644_vm11, %v2375_v50, %v2295_v19  ;;  %v2509_v63 = vsel %vm1725_vm10, %v2507_v15, %v2508_v14  ;;  %v12518_v44 = vld [vmem:[#allocation2 + $0x138] ss:$0 sps:$4 sm:$0x33]   ;;  %v12531_v15 = vld [vmem:[#allocation2 + $0x12c] ss:$0 sps:$4 sm:$0x11]  }
 0x171   : > { %v2372_v31 = vsel %vm683_vm7, %v17302_v27, %v17301_v51  ;;  %v2378_v5 = vsel %vm683_vm7, %v17305_v23, %v17304_v52  ;;  %v1736_v39 = vrot.slane %v14684_v18, 2  ;;  %v2438_v28 = vsel %vm1644_vm11, %v2381_v38, %v2297_v53  ;;  %v14740_v14 = vld [vmem:[#allocation2 + $0x134] sm:$0xe]  ;;  %v12447_v49 = vld [vmem:[#allocation2 + $0xc8] ss:$0 sps:$4 sm:$0x33]   ;;  %5270 = vrot.lane.b32.xlu0 %v14619_v40, %s13279_s10 }
 0x172   : > { %v2434_v26 = vsel %vm1644_vm11, %v2372_v31, %v2295_v19  ;;  %v2437_v16 = vsel %vm1644_vm11, %v2378_v5, %v2297_v53  ;;  %11836 = vmatmul.mubr.msk.bf16.gmra.mrb[48].mxu0 %vm2536_vm12, %v2509_v63  ;;  %v2512_v3 = vsel %vm1725_vm10, %v2510_v22, %v2511_v56  ;;  %v14731_v32 = vsel %vm1644_vm11, %v14424_v12, %v17298_v11  ;;  %v2301_v37 = vpop.permute.xlu0 %2300  ;;  %v14749_v50 = vpop.permute.xlu1 %3338  ;;  %v17311_v53 = vld [vmem:[#allocation44_spill] sm:$0xff]  ;;  %v13065_v40 = vld [vmem:[%s17132_s2] sm:$0x3f]  }
 0x173   : > { %v1732_v54 = vrot.slane %v14692_v33, 2  ;;  %v2446_v19 = vsel %vm1644_vm11, %v2396_v35, %v2303_v4  ;;  %v2447_v58 = vsel %vm1644_vm11, %v2399_v62, %v2303_v4  ;;  %11839 = vmatprep.mubr.msk.bf16.mxu0 %vm2536_vm12, %v2512_v3  ;;  %v17306_v29 = vrot.slane %v14582_v24, 2  ;;  %v17313_v3 = vld [vmem:[#allocation45_spill] sm:$0xff]  ;;  %v13072_v18 = vld [vmem:[#allocation2 + $0x74] sm:$0xf] }
 0x174   : > { %v2393_v12 = vsel %vm683_vm7, %v12520_v13, %v14410_v9  ;;  %v17307_v30 = vcombine.low %v14547_v17, %v14576_v7  ;;  %v2513_v56 = vrot.slane %v2434_v26, 2  ;;  %v2514_v11 = vrot.slane %v2435_v61, 2  ;;  %v17308_v17 = vld [vmem:[#allocation21_spill] sm:$0xff]  ;;  %v17309_v7 = vld [vmem:[#allocation78_spill] sm:$0xff] }
 0x175   : > { %5272 = vrot.lane.b32.xlu1 %v17306_v29, %s13279_s10  ;;  %v2516_v24 = vrot.slane %v2437_v16, 2  ;;  %v2517_v51 = vrot.slane %v2438_v28, 2  ;;  %v2444_v31 = vsel %vm1644_vm11, %v2393_v12, %v2301_v37  ;;  %v2525_v9 = vrot.slane %v2446_v19, 2  ;;  %5458 = vrot.lane.b32.xlu0 %v11121_v6, %s13280_s11  ;;  %v17316_v12 = vld [vmem:[#allocation22_spill] sm:$0xff] }
 0x176   : > { %v2390_v22 = vsel %vm683_vm7, %v17307_v30, %v14458_v59  ;;  %v2526_v38 = vrot.slane %v2447_v58, 2  ;;  %v2523_v23 = vrot.slane %v2444_v31, 2  ;;  %v12534_v59 = vld [vmem:[#allocation2 + $0x13c] ss:$0 sps:$4 sm:$0x11]   ;;  %v17310_v5 = vcombine.low %v14299_v43, %v17309_v7  ;;  %v14781_v61 = vpop.permute.xlu0 %3336  ;;  %v14784_v16 = vpop.permute.xlu1 %3342  ;;  %v17324_v7 = vld [vmem:[#allocation23_spill] sm:$0xff] }
 0x177   : > { %v2443_v27 = vsel %vm1644_vm11, %v2390_v22, %v2301_v37  ;;  %v1733_v62 = vrot.slane %v14731_v32, 2  ;;  %v14764_v4 = vsel %vm1644_vm11, %v14487_v1, %v17311_v53  ;;  %v2804_v35 = vsel %vm1725_vm10, %v13065_v40, 0  ;;  %v17317_v22 = vld [vmem:[#allocation82_spill] sm:$0xff] }
 0x178   : > { %v2522_v52 = vrot.slane %v2443_v27, 2  ;;  %v1592_v13 = vsel %vm683_vm7, %v17310_v5, %v17308_v17  ;;  %v14774_v43 = vsel %vm1644_vm11, %v14480_v34, %v17311_v53  ;;  %v17312_v26 = vcombine.low %v14518_v0, %v14558_v42  ;;  %v17314_v34 = vld [vmem:[#allocation75_spill] sm:$0xff]  ;;  %v12450_v42 = vld [vmem:[#allocation2 + $0xd8] ss:$0 sps:$4 sm:$0x33]  }
 0x179   : > { %5460 = vrot.lane.b32.xlu1 %v12531_v15, %s13280_s11  ;;  %v11123_v28 = vcombine.low %v14740_v14, %v5066_v57  ;;  %v14790_v19 = vsel %vm1644_vm11, %v14456_v41, %v17313_v3  ;;  %v2387_v58 = vsel %vm683_vm7, %v12518_v44, %v17314_v34  ;;  %v2527_v41 = vsel %vm1725_vm10, %v2525_v9, %v2526_v38  ;;  %v17315_v15 = vld [vmem:[#allocation25_spill] sm:$0xff]  ;;  %v17320_v57 = vld [vmem:[#allocation47_spill] sm:$0xff] }
 0x17a   : > { %v2384_v1 = vsel %vm683_vm7, %v17312_v26, %v14366_v55  ;;  %v2524_v63 = vsel %vm1725_vm10, %v2522_v52, %v2523_v23  ;;  %v2515_v55 = vsel %vm1725_vm10, %v2513_v56, %v2514_v11  ;;  %v2441_v29 = vsel %vm1644_vm11, %v2387_v58, %v14675_v46  ;;  %v17318_v56 = vld [vmem:[#allocation46_spill] sm:$0xff]  ;;  %v14830_v37 = vpop.permute.xlu0 %3340  ;;  %v17321_v9 = vld [vmem:[#allocation77_spill] sm:$0xff]  ;;  %v17322_v52 = vld [vmem:[#allocation83_spill] sm:$0xff] }
 0x17b   : > { %v2440_v0 = vsel %vm1644_vm11, %v2384_v1, %v14675_v46  ;;  %11847 = vmatprep.mubr.msk.bf16.mxu1 %vm2536_vm12, %v2524_v63  ;;  %11840 = vmatmul.mubr.msk.bf16.gmra.mrb[52].mxu0 %vm2536_vm12, %v2515_v55  ;;  %v2518_v44 = vsel %vm1725_vm10, %v2516_v24, %v2517_v51  ;;  %v5212_v14 = vrot.slane %v17315_v15, 2  ;;  %v1601_v30 = vsel %vm683_vm7, %v12447_v49, %v17316_v12  ;;  %v14832_v49 = vpop.permute.xlu1 %3346  ;;  %v17325_v5 = vld [vmem:[#allocation73_spill] sm:$0xff]  ;;  %v17329_v1 = vld [vmem:[#allocation26_spill] sm:$0xff] }
 0x17c   : > { %v14813_v46 = vsel %vm1644_vm11, %v17317_v22, %v17313_v3  ;;  %11848 = vmatmul.mubr.msk.bf16.vlgmr.msra.gmra.mrb[0].mxu1 %vm2536_vm12, %v2527_v41  ;;  %11843 = vmatprep.mubr.msk.bf16.mxu0 %vm2536_vm12, %v2518_v44  ;;  %v1728_v47 = vsel %vm1725_vm10, %v1726_v20, %v1727_v21  ;;  %v1742_v6 = vrot.slane %v14774_v43, 2  ;;  %v14826_v11 = vsel %vm1644_vm11, %v1592_v13, %v17318_v56  ;;  %v17319_v21 = vld [vmem:[#allocation19_spill] sm:$0xff]  ;;  %v17330_v63 = vld [vmem:[#allocation74_spill] sm:$0xff]  ;;  %v17331_v3 = vld [vmem:[#allocation80_spill] sm:$0xff] }
 0x17d   : > { %11853 = vmatprep.mubr.msk.bf16.mxu1 %vm2536_vm12, %v1728_v47  ;;  %5464 = vrot.lane.b32.xlu1 %v12534_v59, %s13280_s11  ;;  %v5213_v25 = vrot.slane %v13066_v2, 2  ;;  %v1738_v20 = vrot.slane %v14790_v19, 2  ;;  %v14838_v24 = vsel %vm1644_vm11, %v17319_v21, %v17318_v56  ;;  %v2519_v51 = vrot.slane %v2440_v0, 2  ;;  %v17323_v59 = vld [vmem:[#allocation30_spill] sm:$0xff]  ;;  %v17326_v13 = vld [vmem:[#allocation79_spill] sm:$0xff]  ;;  %v17333_v44 = vld [vmem:[#allocation48_spill] sm:$0xff] }
 0x17e   : > { %v2520_v27 = vrot.slane %v2441_v29, 2  ;;  %11852 = vmatpush3.bf16.msra.mxu1 %v2804_v35  ;;  %v1739_v31 = vrot.slane %v14813_v46, 2  ;;  %v14844_v38 = vsel %vm1644_vm11, %v17321_v9, %v17320_v57  ;;  %v14849_v23 = vsel %vm1644_vm11, %v17322_v52, %v17320_v57  ;;  %5462 = vrot.lane.b32.xlu0 %v11123_v28, %s13280_s11  ;;  %v17328_v35 = vld [vmem:[#allocation24_spill] sm:$0xff]  ;;  %v14865_v0 = vld [vmem:[#allocation2 + $0xe0] sm:$0xc]  ;;  %v17342_v41 = vld [vmem:[#allocation27_spill] sm:$0xff] }
 0x17f   : > { %v5215_v17 = vrot.slane %v17323_v59, 2  ;;  %v17327_v53 = vcombine.low %v17325_v5, %v17326_v13  ;;  %v1607_v26 = vsel %vm683_vm7, %v12450_v42, %v17328_v35  ;;  %v17332_v34 = vcombine.low %v17330_v63, %v17331_v3  ;;  %v12456_v55 = vld [vmem:[#allocation2 + $0xf8] ss:$0 sps:$4 sm:$0x33]   ;;  %v14875_v42 = vpop.permute.xlu0 %3344  ;;  %v14877_v22 = vpop.permute.xlu1 %5220  ;;  %v14886_v9 = vld [vmem:[#allocation2 + $0x144] sm:$0xe] }
 0x180   : > { %v5214_v28 = vsel %vm1725_vm10, %v5212_v14, %v5213_v25  ;;  %v13067_v47 = vld [vmem:[#allocation2 + $0x158] ss:$0 sps:$4 sm:$0x77]   ;;  %v14883_v21 = vsel %vm1644_vm11, %v1607_v26, %v17333_v44  ;;  %v2521_v57 = vsel %vm1725_vm10, %v2519_v51, %v2520_v27  ;;  %v12453_v52 = vld [vmem:[#allocation2 + $0xe8] ss:$0 sps:$4 sm:$0x33]  }
 0x181   : > { %v1598_v40 = vsel %vm683_vm7, %v17327_v53, %v17324_v7  ;;  %v1604_v58 = vsel %vm683_vm7, %v17332_v34, %v17329_v1  ;;  %5276 = vrot.lane.b32.xlu1 %v5213_v25, %s13279_s10  ;;  %v5216_v56 = vrot.slane %v13067_v47, 2  ;;  %v14888_v25 = vld [vmem:[#allocation2 + $0x110] sm:$0xc]  ;;  %v17334_v7 = vld [vmem:[#allocation49_spill] sm:$0xff]  ;;  %v17335_v51 = vrot.slane %v14589_v45, 2  ;;  %v17341_v34 = vld [vmem:[#allocation50_spill] sm:$0xff] }
 0x182   : > { %v14872_v12 = vsel %vm1644_vm11, %v1604_v58, %v17333_v44  ;;  %v14892_v5 = vsel %vm1644_vm11, %v1598_v40, %v17334_v7  ;;  %v14896_v13 = vsel %vm1644_vm11, %v1601_v30, %v17334_v7  ;;  %5274 = vrot.lane.b32.xlu0 %v5214_v28, %s13279_s10  ;;  %v12540_v53 = vld [vmem:[#allocation2 + $0x14c] ss:$0 sps:$4 sm:$0x11]   ;;  %v5069_v35 = vld [vmem:[#allocation2 + $0x148] sm:$0xf]  ;;  %v1734_v30 = vsel %vm1725_vm10, %v1732_v54, %v1733_v62  ;;  %v17337_v54 = vld [vmem:[#allocation76_spill] sm:$0xff] }
 0x183   : > { %11844 = vmatmul.mubr.msk.bf16.gmra.mrb[56].mxu0 %vm2536_vm12, %v2521_v57  ;;  %v1731_v27 = vsel %vm1725_vm10, %v17335_v51, %v1730_v36  ;;  %v4096_v26 = vld [vmem:[#allocation2 + $0x24] sm:$0xf]  ;;  %v14905_v1 = vld [vmem:[#allocation2 + $0x100] sm:$0xc]  ;;  %v5217_v45 = vsel %vm1725_vm10, %v5215_v17, %v5216_v56  ;;  %v5219_v32 = vpop.permute.xlu0 %5218  ;;  %v5225_v33 = vpop.permute.xlu1 %5224  ;;  %v17336_v44 = vld [vmem:[#allocation31_spill] sm:$0xff] }
 0x184   : > { %v14907_v40 = vld [vmem:[#allocation2 + $0x120] sm:$0xc]  ;;  %11854 = vmatmul.mubr.msk.bf16.vlgmr.msra.gmra.mrb[4].mxu1 %vm2536_vm12, %v1731_v27  ;;  %v13068_v36 = vld [vmem:[#allocation2 + $0xe4] sm:$0xf]  ;;  %v17338_v62 = vld [vmem:[#allocation81_spill] sm:$0xff]  ;;  %v898_v27 = vlaneseq }
 0x185   : > { %v4143_v63 = vld [vmem:[#allocation2 + $0x20] sm:$0x8]  ;;  %v10691_v3 = vcombine.low %v14865_v0, %v13068_v36  ;;  %v12538_v28 = vld [vmem:[#allocation2 + $0x68] ss:$0 sps:$4 sm:$0x11]   ;;  %11857 = vmatprep.mubr.msk.bf16.mxu1 %vm2536_vm12, %v1734_v30  ;;  %5280 = vrot.lane.b32.xlu1 %v5216_v56, %s13279_s10  ;;  %v17339_v47 = vcombine.low %v17337_v54, %v17338_v62  ;;  %v17340_v36 = vld [vmem:[#allocation29_spill] sm:$0xff] }
 0x186   : > { %v5071_v7 = vld [vmem:[#allocation2 + $0x154] sm:$0xe]  ;;  %v5072_v51 = vld [vmem:[#allocation2 + $0x158] sm:$0xf]  ;;  %v1619_v30 = vsel %vm683_vm7, %v12456_v55, %v17340_v36  ;;  %5278 = vrot.lane.b32.xlu0 %v5217_v45, %s13279_s10  ;;  %v14935_v58 = vld [vmem:[#allocation2 + $0x70] sm:$0xe]  ;;  %v10999_v62 = vcombine.low %v4143_v63, %v4096_v26  ;;  %v1613_v45 = vsel %vm683_vm7, %v12453_v52, %v17342_v41 }
 0x187   : > { %v1616_v17 = vsel %vm683_vm7, %v17339_v47, %v17336_v44  ;;  %v11125_v44 = vcombine.low %v14886_v9, %v5069_v35  ;;  %v12542_v54 = vld [vmem:[#allocation2 + $0x15c] ss:$0 sps:$4 sm:$0x11]   ;;  %v4099_v47 = vld [vmem:[#allocation2 + $0x34] sm:$0xf]  ;;  %v14941_v55 = vsel %vm1644_vm11, %v1619_v30, %v17341_v34  ;;  %v1737_v9 = vsel %vm1725_vm10, %v1735_v60, %v1736_v39 }
 0x188   : > { %v14932_v56 = vsel %vm1644_vm11, %v1616_v17, %v17341_v34  ;;  %v4145_v57 = vld [vmem:[#allocation2 + $0x30] sm:$0x8]  ;;  %v13069_v0 = vld [vmem:[#allocation2 + $0x114] sm:$0xf]  ;;  %v899_v17 = vshrl.u32 %v898_v27, 7  ;;  %v5223_v34 = vpop.permute.xlu0 %5222  ;;  %v5413_v27 = vpop.permute.xlu1 %5412  ;;  %v11067_v8 = vcombine.low %v14935_v58, %v13072_v18  ;;  %v1740_v39 = vsel %vm1725_vm10, %v1738_v20, %v1739_v31 }
 0x189   : > { %v10697_v29 = vcombine.low %v14888_v25, %v13069_v0  ;;  %v12544_v36 = vld [vmem:[#allocation2 + $0x28] ss:$0 sps:$4 sm:$0x77]   ;;  %v14945_v2 = vld [vmem:[#allocation2 + $0x104] sm:$0xf]  ;;  %5468 = vrot.lane.b32.xlu1 %v12540_v53, %s13280_s11  ;;  %v17344_v30 = vld [vmem:[#allocation28_spill] sm:$0xff]  ;;  %v5479_v53 = vsel %vm683_vm7, %v12538_v28, %v14877_v22 }
 0x18a   : > { %v14949_v35 = vld [vmem:[#allocation2 + $0x124] sm:$0xf]  ;;  %v17343_v25 = vld [vmem:[#allocation71_spill] sm:$0xff]  ;;  %v12539_v0 = vld [vmem:[#allocation2 + $0x78] ss:$0 sps:$4 sm:$0x11]   ;;  %v1610_v41 = vsel %vm683_vm7, %v10691_v3, %v17344_v30  ;;  %5466 = vrot.lane.b32.xlu0 %v11125_v44, %s13280_s11  ;;  %v11127_v3 = vcombine.low %v5071_v7, %v5072_v51  ;;  %v5573_v60 = vsel %vm1644_vm11, %v5479_v53, %v5413_v27 }
 0x18b   : > { %v11065_v63 = vcombine.low %v4994_v10, %v17343_v25  ;;  %v12461_v52 = vld [vmem:[#allocation2 + $0x118] ss:$0 sps:$4 sm:$0x33]   ;;  %v11001_v10 = vcombine.low %v4145_v57, %v4099_v47  ;;  %v1760_v25 = vrot.slane %v14941_v55, 2  ;;  %v4447_v30 = vrot.slane %v10999_v62, 2  ;;  %v17346_v22 = vld [vmem:[#allocation51_spill] sm:$0xff] }
 0x18c   : > { %v14963_v26 = vld [vmem:[#allocation2 + $0x38] ss:$0 sps:$4 sm:$0x77]   ;;  %v1628_v14 = vsel %vm683_vm7, %v10697_v29, %v17345_v48  ;;  %11858 = vmatmul.mubr.msk.bf16.gmra.mrb[8].mxu1 %vm2536_vm12, %v1737_v9  ;;  %v14981_v28 = vsel %vm1644_vm11, %v1610_v41, %v17346_v22  ;;  %v5411_v48 = vpop.permute.xlu0 %5410  ;;  %v5417_v29 = vpop.permute.xlu1 %5416  ;;  %v4448_v58 = vrot.slane %v12544_v36, 2  ;;  %v14986_v7 = vsub.s32 0, %v899_v17  ;;  %v17347_v36 = vld [vmem:[#allocation34_spill] sm:$0xff] }
 0x18d   : > { %v5476_v57 = vsel %vm683_vm7, %v11065_v63, %v5219_v32  ;;  %11861 = vmatprep.mubr.msk.bf16.mxu1 %vm2536_vm12, %v1740_v39  ;;  %5472 = vrot.lane.b32.xlu1 %v12542_v54, %s13280_s11  ;;  %v14990_v19 = vsel %vm1644_vm11, %v1613_v45, %v17346_v22  ;;  %v4451_v20 = vrot.slane %v14963_v26, 2  ;;  %v4450_v31 = vrot.slane %v11001_v10, 2  ;;  %v897_v32 = vld [vmem:[%s17134_s4] sm:$0x3]  ;;  %v17348_v63 = vld [vmem:[#allocation52_spill] sm:$0xff] }
 0x18e   : > { %v5571_v46 = vsel %vm1644_vm11, %v5476_v57, %v5411_v48  ;;  %v5485_v51 = vsel %vm683_vm7, %v12539_v0, %v5225_v33  ;;  %v5667_v44 = vrot.slane %v5573_v60, 1  ;;  %5470 = vrot.lane.b32.xlu0 %v11127_v3, %s13280_s11  ;;  %v14999_v62 = vsub.s32 1, %v899_v17  ;;  %v12459_v47 = vld [vmem:[#allocation2 + $0x108] ss:$0 sps:$4 sm:$0x33]  }
 0x18f   : > { %v5666_v54 = vrot.slane %v5571_v46, 1  ;;  %v1631_v45 = vsel %vm683_vm7, %v12461_v52, %v17347_v36  ;;  %v12463_v9 = vld [vmem:[#allocation2 + $0x128] ss:$0 sps:$4 sm:$0x33]   ;;  %v15005_v26 = vsel %vm1644_vm11, %v1628_v14, %v17348_v63  ;;  %v5577_v27 = vsel %vm1644_vm11, %v5485_v51, %v5417_v29  ;;  %v4102_v53 = vld [vmem:[#allocation2 + $0x44] sm:$0xf] }
 0x190   : > { %v4449_v41 = vsel %vm1725_vm10, %v4447_v30, %v4448_v58  ;;  %v5482_v33 = vsel %vm683_vm7, %v11067_v8, %v5223_v34  ;;  %v5415_v0 = vpop.permute.xlu0 %5414  ;;  %v15012_v10 = vpop.permute.xlu1 %5228  ;;  %v17349_v52 = vrot.slane %v14764_v4, 2  ;;  %v4147_v3 = vld [vmem:[#allocation2 + $0x40] sm:$0x8]  ;;  %v15020_v18 = vrot.slane %v897_v32, %v14986_v7  ;;  %v12628_v34 = vld [vmem:[%s17132_s2 + $0x18] sm:$0x3f]  }
 0x191   : > { %4497 = vrot.lane.b32.xlu1 %v4448_v58, %s13279_s10  ;;  %v5668_v17 = vsel %vm1339_vm6, %v5666_v54, %v5667_v44  ;;  %v15025_v30 = vld [vmem:[#allocation2 + $0x130] sm:$0xc]  ;;  %v1756_v8 = vrot.slane %v14981_v28, 2  ;;  %v1757_v60 = vrot.slane %v14990_v19, 2  ;;  %v15031_v4 = vsel %vm1644_vm11, %v1631_v45, %v17348_v63  ;;  %12328 = vmatprep.subr.msk.bf16.mxu0 %vm1725_vm10, %v12628_v34  ;;  %v15047_v46 = vld [vmem:[#allocation2 + $0x80] sm:$0xe] }
 0x192   : > { %v1743_v14 = vsel %vm1725_vm10, %v17349_v52, %v1742_v6  ;;  %v5575_v43 = vsel %vm1644_vm11, %v5482_v33, %v5415_v0  ;;  %11921 = vmatprep.mubr.msk.bf16.mxu0 %vm2536_vm12, %v5668_v17  ;;  %v1765_v6 = vrot.slane %v15005_v26, 2  ;;  %v5670_v39 = vrot.slane %v5577_v27, 1  ;;  %4495 = vrot.lane.b32.xlu0 %v4449_v41, %s13279_s10  ;;  %v11787_v54 = vpop.f32.mrb[0].mxu0  ;;  %v17352_v33 = vld [vmem:[#allocation32_spill] sm:$0xff]  ;;  %v17353_v17 = vld [vmem:[#allocation33_spill] sm:$0xff] }
 0x193   : > { %v5669_v22 = vrot.slane %v5575_v43, 1  ;;  %v15038_v57 = vrot.slane %v897_v32, %v14999_v62  ;;  %v17350_v48 = vrot.slane %v14849_v23, 2  ;;  %v17351_v29 = vrot.slane %v14844_v38, 2  ;;  %v15051_v32 = vld [vmem:[#allocation2 + $0x134] sm:$0xf] }
 0x194   : > { %11862 = vmatmul.mubr.msk.bf16.gmra.mrb[12].mxu1 %vm2536_vm12, %v1743_v14  ;;  %v4452_v51 = vsel %vm1725_vm10, %v4450_v31, %v4451_v20  ;;  %v11003_v44 = vcombine.low %v4147_v3, %v4102_v53  ;;  %v5988_v36 = vsel %vm1725_vm10, %v12628_v34, 0  ;;  %v10701_v45 = vcombine.low %v15025_v30, %v15051_v32  ;;  %v5227_v38 = vpop.permute.xlu0 %5226  ;;  %v15059_v27 = vpop.permute.xlu1 %5232  ;;  %v12551_v31 = vld [vmem:[#allocation2 + $0x2c] ss:$0 sps:$4 sm:$0x11]   ;;  %v17355_v53 = vld [vmem:[#allocation36_spill] sm:$0xff] }
 0x195   : > { %v1746_v58 = vsel %vm1725_vm10, %v17351_v29, %v17350_v48  ;;  %v1766_v63 = vrot.slane %v15031_v4, 2  ;;  %v5671_v23 = vsel %vm1339_vm6, %v5669_v22, %v5670_v39  ;;  %4501 = vrot.lane.b32.xlu1 %v4451_v20, %s13279_s10  ;;  %v904_v41 = vmul.f32 %v11787_v54, %v15020_v18  ;;  %v17356_v20 = vld [vmem:[#allocation37_spill] sm:$0xff]  ;;  %v12546_v39 = vld [vmem:[#allocation2 + $0x88] ss:$0 sps:$4 sm:$0x11]   ;;  %v770_v22 = vpop.f32.mrb[1].mxu0 }
 0x196   : > { %11865 = vmatprep.mubr.msk.bf16.mxu1 %vm2536_vm12, %v1746_v58  ;;  %v15064_v0 = vsel %vm683_vm7, %v12459_v47, %v17352_v33  ;;  %v17354_v52 = vcombine.low %v14905_v1, %v14945_v2  ;;  %v15073_v3 = vsel %vm683_vm7, %v12463_v9, %v17355_v53  ;;  %v17357_v34 = vcombine.low %v14907_v40, %v14949_v35  ;;  %v12552_v47 = vld [vmem:[#allocation2 + $0x24] sm:$0xfe]   ;;  %v17358_v48 = vld [vmem:[#allocation53_spill] sm:$0xff]  ;;  %v15088_v1 = vld [vmem:[#allocation2 + $0x90] sm:$0xe]  ;;  %v11788_v58 = vpop.f32.mrb[2].mxu0 }
 0x197   : > { %11922 = vmatmul.mubr.msk.bf16.vlgmr.msra.gmra.mrb[60].mxu0 %vm2536_vm12, %v5671_v23  ;;  %4499 = vrot.lane.b32.xlu0 %v4452_v51, %s13279_s10  ;;  %v12553_v9 = vld [vmem:[#allocation2 + $0x3c] ss:$0 sps:$4 sm:$0x11]   ;;  %v15090_v29 = vld [vmem:[#allocation2 + $0x48] ss:$0 sps:$4 sm:$0x77]   ;;  %v940_v40 = vadd.f32 %v15038_v57, %v904_v41  ;;  %v902_v35 = vmul.f32 %v15020_v18, %v770_v22 }
 0x198   : > { %v1622_v14 = vsel %vm683_vm7, %v17354_v52, %v17353_v17  ;;  %v15080_v43 = vsel %vm683_vm7, %v17357_v34, %v17356_v20  ;;  %11954 = vmatpush3.bf16.msra.mxu0 %v5988_v36  ;;  %v12549_v54 = vld [vmem:[#allocation2 + $0x98] ss:$0 sps:$4 sm:$0x11]   ;;  %v17359_v23 = vrot.slane %v14838_v24, 2  ;;  %v17360_v33 = vrot.slane %v14826_v11, 2  ;;  %v773_v34 = vpop.f32.mrb[3].mxu0  ;;  %v5231_v11 = vpop.permute.xlu0 %5230 }
 0x199   : > { %v15085_v2 = vsel %vm1644_vm11, %v1622_v14, %v17358_v48  ;;  %v4453_v52 = vrot.slane %v11003_v44, 2  ;;  %v17361_v51 = vrot.slane %v14883_v21, 2  ;;  %v17362_v14 = vrot.slane %v14872_v12, 2  ;;  %v15106_v41 = vld [vmem:[#allocation2 + $0x58] ss:$0 sps:$4 sm:$0x77]   ;;  %4689 = vrot.lane.b32.xlu1 %v12551_v31, %s13280_s11  ;;  %v5421_v44 = vpop.permute.xlu1 %5420 }
 0x19a   : > { %v1749_v17 = vsel %vm1725_vm10, %v17360_v33, %v17359_v23  ;;  %v4105_v20 = vld [vmem:[#allocation2 + $0x54] sm:$0xf]  ;;  %v905_v36 = vmul.f32 %v11788_v58, %v15020_v18  ;;  %v13074_v22 = vld [vmem:[#allocation2 + $0x84] sm:$0xf]  ;;  %v17363_v21 = vrot.slane %v14896_v13, 2  ;;  %v17364_v12 = vrot.slane %v14892_v5, 2 }
 0x19b   : > { %v15104_v53 = vsel %vm1725_vm10, %v17362_v14, %v17361_v51  ;;  %v11069_v24 = vcombine.low %v15047_v46, %v13074_v22  ;;  %v4149_v33 = vld [vmem:[#allocation2 + $0x50] sm:$0x8]  ;;  %v938_v51 = vadd.f32 %v15038_v57, %v902_v35  ;;  %v903_v14 = vmul.f32 %v15020_v18, %v773_v34  ;;  %4687 = vrot.lane.b32.xlu0 %v12552_v47, %s13280_s11  ;;  %v12554_v35 = vld [vmem:[#allocation2 + $0x34] sm:$0xfe]   ;;  %v12562_v30 = vld [vmem:[#allocation2 + $0x44] sm:$0xfe]  }
 0x19c   : > { %v1752_v23 = vsel %vm1725_vm10, %v17364_v12, %v17363_v21  ;;  %v1762_v58 = vrot.slane %v15085_v2, 2  ;;  %v15124_v46 = vsel %vm1725_vm10, %v1756_v8, %v1757_v60  ;;  %v972_v31 = vmax.f32 %v940_v40, 0.0  ;;  %v13075_v19 = vld [vmem:[#allocation2 + $0x94] sm:$0xf]  ;;  %11866 = vmatmul.mubr.msk.bf16.gmra.mrb[16].mxu1 %vm2536_vm12, %v1749_v17  ;;  %v4153_v26 = vld [vmem:[#allocation2 + $0x70] sm:$0x8] }
 0x19d   : > { %v941_v13 = vadd.f32 %v15038_v57, %v905_v36  ;;  %v5491_v5 = vsel %vm683_vm7, %v12546_v39, %v15012_v10  ;;  %v4454_v34 = vrot.slane %v15090_v29, 2  ;;  %v970_v22 = vmax.f32 %v938_v51, 0.0  ;;  %v11791_v36 = vpop.f32.mrb[4].mxu0  ;;  %11869 = vmatprep.mubr.msk.bf16.mxu1 %vm2536_vm12, %v1752_v23  ;;  %4693 = vrot.lane.b32.xlu1 %v12553_v9, %s13280_s11  ;;  %v5419_v39 = vpop.permute.xlu0 %5418  ;;  %v12563_v32 = vld [vmem:[#allocation2 + $0x5c] ss:$0 sps:$4 sm:$0x11]  }
 0x19e   : > { %v939_v21 = vadd.f32 %v15038_v57, %v903_v14  ;;  %v11071_v28 = vcombine.low %v15088_v1, %v13075_v19  ;;  %v5581_v8 = vsel %vm1644_vm11, %v5491_v5, %v5421_v44  ;;  %v11005_v60 = vcombine.low %v4149_v33, %v4105_v20  ;;  %v5425_v47 = vpop.permute.xlu1 %5424  ;;  %v4108_v19 = vld [vmem:[#allocation2 + $0x64] sm:$0xf] }
 0x19f   : > { %v973_v40 = vmax.f32 %v941_v13, 0.0  ;;  %v5488_v10 = vsel %vm683_vm7, %v11069_v24, %v5227_v38  ;;  %v4455_v29 = vsel %vm1725_vm10, %v4453_v52, %v4454_v34  ;;  %v908_v1 = vmul.f32 %v11791_v36, %v15020_v18  ;;  %v786_v38 = vpop.f32.mrb[5].mxu0  ;;  %4691 = vrot.lane.b32.xlu0 %v12554_v35, %s13280_s11 }
 0x1a0   : > { %v971_v12 = vmax.f32 %v939_v21, 0.0  ;;  %v5497_v44 = vsel %vm683_vm7, %v12549_v54, %v15059_v27  ;;  %v5579_v17 = vsel %vm1644_vm11, %v5488_v10, %v5419_v39  ;;  %v4457_v20 = vrot.slane %v15106_v41, 2  ;;  %v11792_v51 = vpop.f32.mrb[6].mxu0 }
 0x1a1   : > { %v15144_v33 = vpack.c.bf16 %v973_v40, %v972_v31  ;;  %v5673_v24 = vrot.slane %v5581_v8, 1  ;;  %v5672_v23 = vrot.slane %v5579_v17, 1  ;;  %v944_v52 = vadd.f32 %v15038_v57, %v908_v1  ;;  %v789_v41 = vpop.f32.mrb[7].mxu0  ;;  %4505 = vrot.lane.b32.xlu1 %v4454_v34, %s13279_s10  ;;  %v5423_v35 = vpop.permute.xlu0 %5422  ;;  %v4151_v8 = vld [vmem:[#allocation2 + $0x60] sm:$0x8]  ;;  %v17367_v34 = vld [vmem:[#allocation55_spill] sm:$0xff] }
 0x1a2   : > { %v15147_v9 = vpack.c.bf16 %v971_v12, %v970_v22  ;;  %v5585_v14 = vsel %vm1644_vm11, %v5497_v44, %v5425_v47  ;;  %v4456_v13 = vrot.slane %v11005_v60, 2  ;;  %v906_v27 = vmul.f32 %v15020_v18, %v786_v38  ;;  %v15161_v21 = vpop.permute.xlu1 %5236  ;;  %v12465_v40 = vld [vmem:[#allocation2 + $0x138] ss:$0 sps:$4 sm:$0x33]  }
 0x1a3   : > { %17365 = vst [vmem:[#allocation56_spill] sm:$0xff] %v15144_v33  ;;  %v909_v54 = vmul.f32 %v11792_v51, %v15020_v18  ;;  %v15156_v31 = vsel %vm1644_vm11, %v15064_v0, %v17358_v48  ;;  %v5494_v5 = vsel %vm683_vm7, %v11071_v28, %v5231_v11  ;;  %v5674_v22 = vsel %vm1339_vm6, %v5672_v23, %v5673_v24  ;;  %v12561_v1 = vld [vmem:[#allocation2 + $0x4c] ss:$0 sps:$4 sm:$0x11]   ;;  %v11795_v24 = vpop.f32.mrb[8].mxu0 }
 0x1a4   : > { %17366 = vst [vmem:[#allocation57_spill] sm:$0xff] %v15147_v9  ;;  %v907_v60 = vmul.f32 %v15020_v18, %v789_v41  ;;  %v5583_v36 = vsel %vm1644_vm11, %v5494_v5, %v5423_v35  ;;  %11925 = vmatprep.mubr.msk.bf16.mxu0 %vm2536_vm12, %v5674_v22  ;;  %v976_v0 = vmax.f32 %v944_v52, 0.0  ;;  %v942_v48 = vadd.f32 %v15038_v57, %v906_v27  ;;  %v5002_v41 = vld [vmem:[#allocation2 + $0xa0] sm:$0xe]  ;;  %v802_v5 = vpop.f32.mrb[9].mxu0 }
 0x1a5   : > { %v945_v11 = vadd.f32 %v15038_v57, %v909_v54  ;;  %v15171_v28 = vsel %vm1644_vm11, %v15080_v43, %v17367_v34  ;;  %v5676_v10 = vrot.slane %v5585_v14, 1  ;;  %v5675_v39 = vrot.slane %v5583_v36, 1  ;;  %4503 = vrot.lane.b32.xlu0 %v4455_v29, %s13279_s10  ;;  %11870 = vmatmul.mubr.msk.bf16.gmra.mrb[20].mxu1 %vm2536_vm12, %v15104_v53  ;;  %v12556_v43 = vld [vmem:[#allocation2 + $0xa8] ss:$0 sps:$4 sm:$0x11]   ;;  %v5235_v29 = vpop.permute.xlu0 %5234 }
 0x1a6   : > { %v943_v47 = vadd.f32 %v15038_v57, %v907_v60  ;;  %v4458_v12 = vsel %vm1725_vm10, %v4456_v13, %v4457_v20  ;;  %v11007_v44 = vcombine.low %v4151_v8, %v4108_v19  ;;  %v974_v17 = vmax.f32 %v942_v48, 0.0  ;;  %11873 = vmatprep.mubr.msk.bf16.mxu1 %vm2536_vm12, %v15124_v46  ;;  %4509 = vrot.lane.b32.xlu1 %v4457_v20, %s13279_s10  ;;  %v15183_v51 = vpop.permute.xlu1 %5240  ;;  %v17368_v13 = vld [vmem:[#allocation38_spill] sm:$0xff]  ;;  %v17369_v54 = vld [vmem:[#allocation39_spill] sm:$0xff]  ;;  %v15205_v22 = vld [vmem:[#allocation2 + $0xb0] sm:$0xe] }
 0x1a7   : > { %v977_v38 = vmax.f32 %v945_v11, 0.0  ;;  %v1763_v23 = vrot.slane %v15156_v31, 2  ;;  %v5677_v52 = vsel %vm1339_vm6, %v5675_v39, %v5676_v10  ;;  %v912_v14 = vmul.f32 %v11795_v24, %v15020_v18  ;;  %v12559_v36 = vld [vmem:[#allocation2 + $0xb8] ss:$0 sps:$4 sm:$0x11]  }
 0x1a8   : > { %v975_v53 = vmax.f32 %v943_v47, 0.0  ;;  %v15188_v27 = vsel %vm683_vm7, %v12465_v40, %v17368_v13  ;;  %v1640_v46 = vsel %vm683_vm7, %v10701_v45, %v17369_v54  ;;  %v1768_v20 = vrot.slane %v15171_v28, 2  ;;  %11926 = vmatmul.mubr.msk.bf16.gmra.mrb[64].mxu0 %vm2536_vm12, %v5677_v52  ;;  %v15207_v45 = vld [vmem:[#allocation2 + $0x68] ss:$0 sps:$4 sm:$0x77]   ;;  %v11796_v40 = vpop.f32.mrb[10].mxu0 }
 0x1a9   : > { %v15197_v31 = vpack.c.bf16 %v977_v38, %v976_v0  ;;  %v15202_v35 = vsel %vm1644_vm11, %v15073_v3, %v17367_v34  ;;  %4507 = vrot.lane.b32.xlu0 %v4458_v12, %s13279_s10  ;;  %v948_v8 = vadd.f32 %v15038_v57, %v912_v14  ;;  %v910_v60 = vmul.f32 %v15020_v18, %v802_v5  ;;  %v15225_v34 = vld [vmem:[#allocation2 + $0x78] ss:$0 sps:$4 sm:$0x77]   ;;  %v4111_v10 = vld [vmem:[#allocation2 + $0x74] sm:$0xf]  ;;  %v805_v47 = vpop.f32.mrb[11].mxu0  ;;  %v5239_v4 = vpop.permute.xlu0 %5238 }
 0x1aa   : > { %v15209_v19 = vpack.c.bf16 %v975_v53, %v974_v17  ;;  %v17372_v3 = vrot.slane %v14932_v56, 2  ;;  %v4459_v48 = vrot.slane %v11007_v44, 2  ;;  %v15223_v11 = vsel %vm1725_vm10, %v1765_v6, %v1766_v63  ;;  %v17373_v12 = vld [vmem:[#allocation54_spill] sm:$0xff]  ;;  %4697 = vrot.lane.b32.xlu1 %v12561_v1, %s13280_s11  ;;  %v5429_v44 = vpop.permute.xlu1 %5428  ;;  %v12564_v1 = vld [vmem:[#allocation2 + $0x54] sm:$0xfe]   ;;  %v11799_v5 = vpop.f32.mrb[12].mxu0 }
 0x1ab   : > { %17370 = vst [vmem:[#allocation60_spill] sm:$0xff] %v15197_v31  ;;  %v913_v39 = vmul.f32 %v11796_v40, %v15020_v18  ;;  %v15230_v55 = vsel %vm1644_vm11, %v1640_v46, %v17373_v12  ;;  %v13076_v56 = vld [vmem:[#allocation2 + $0xa4] sm:$0xf]  ;;  %v946_v6 = vadd.f32 %v15038_v57, %v910_v60  ;;  %v911_v63 = vmul.f32 %v15020_v18, %v805_v47  ;;  %v13077_v46 = vld [vmem:[#allocation2 + $0xb4] sm:$0xf] }
 0x1ac   : > { %17371 = vst [vmem:[#allocation61_spill] sm:$0xff] %v15209_v19  ;;  %v1761_v0 = vsel %vm1725_vm10, %v17372_v3, %v1760_v25  ;;  %v11073_v25 = vcombine.low %v5002_v41, %v13076_v56  ;;  %v1769_v17 = vrot.slane %v15202_v35, 2  ;;  %v1764_v38 = vsel %vm1725_vm10, %v1762_v58, %v1763_v23  ;;  %v13102_v9 = vld [vmem:[#allocation2 + $0xd4] sm:$0xf] }
 0x1ad   : > { %v980_v24 = vmax.f32 %v948_v8, 0.0  ;;  %v949_v52 = vadd.f32 %v15038_v57, %v913_v39  ;;  %v5503_v53 = vsel %vm683_vm7, %v12556_v43, %v15161_v21  ;;  %4695 = vrot.lane.b32.xlu0 %v12562_v30, %s13280_s11  ;;  %v4460_v14 = vrot.slane %v15207_v45, 2  ;;  %11874 = vmatmul.mubr.msk.bf16.gmra.mrb[24].mxu1 %vm2536_vm12, %v1761_v0  ;;  %v5427_v43 = vpop.permute.xlu0 %5426 }
 0x1ae   : > { %v978_v13 = vmax.f32 %v946_v6, 0.0  ;;  %v947_v54 = vadd.f32 %v15038_v57, %v911_v63  ;;  %v11075_v41 = vcombine.low %v15205_v22, %v13077_v46  ;;  %v5589_v2 = vsel %vm1644_vm11, %v5503_v53, %v5429_v44  ;;  %11877 = vmatprep.mubr.msk.bf16.mxu1 %vm2536_vm12, %v1764_v38  ;;  %4701 = vrot.lane.b32.xlu1 %v12563_v32, %s13280_s11  ;;  %v5433_v35 = vpop.permute.xlu1 %5432  ;;  %v4114_v38 = vld [vmem:[#allocation2 + $0x84] sm:$0xf] }
 0x1af   : > { %v11009_v58 = vcombine.low %v4153_v26, %v4111_v10  ;;  %v981_v23 = vmax.f32 %v949_v52, 0.0  ;;  %v5500_v21 = vsel %vm683_vm7, %v11073_v25, %v5235_v29  ;;  %v4461_v30 = vsel %vm1725_vm10, %v4459_v48, %v4460_v14  ;;  %v818_v29 = vpop.f32.mrb[13].mxu0 }
 0x1b0   : > { %v979_v45 = vmax.f32 %v947_v54, 0.0  ;;  %v916_v22 = vmul.f32 %v11799_v5, %v15020_v18  ;;  %v5509_v8 = vsel %vm683_vm7, %v12559_v36, %v15183_v51  ;;  %v5587_v60 = vsel %vm1644_vm11, %v5500_v21, %v5427_v43  ;;  %v11800_v39 = vpop.f32.mrb[14].mxu0  ;;  %v12566_v43 = vld [vmem:[#allocation2 + $0xc8] ss:$0 sps:$4 sm:$0x11]  }
 0x1b1   : > { %v4463_v40 = vrot.slane %v15225_v34, 2  ;;  %v15257_v3 = vpack.c.bf16 %v981_v23, %v980_v24  ;;  %v5679_v0 = vrot.slane %v5589_v2, 1  ;;  %v5678_v10 = vrot.slane %v5587_v60, 1  ;;  %4699 = vrot.lane.b32.xlu0 %v12564_v1, %s13280_s11  ;;  %v821_v34 = vpop.f32.mrb[15].mxu0  ;;  %v5431_v26 = vpop.permute.xlu0 %5430  ;;  %v4155_v24 = vld [vmem:[#allocation2 + $0x80] sm:$0x8] }
 0x1b2   : > { %v15260_v32 = vpack.c.bf16 %v979_v45, %v978_v13  ;;  %v952_v48 = vadd.f32 %v15038_v57, %v916_v22  ;;  %v5593_v47 = vsel %vm1644_vm11, %v5509_v8, %v5433_v35  ;;  %v4462_v56 = vrot.slane %v11009_v58, 2  ;;  %4513 = vrot.lane.b32.xlu1 %v4460_v14, %s13279_s10  ;;  %v5245_v63 = vpop.permute.xlu1 %5244  ;;  %v11803_v5 = vpop.f32.mrb[16].mxu0  ;;  %v5006_v45 = vld [vmem:[#allocation2 + $0xc0] sm:$0xe]  ;;  %v15297_v8 = vld [vmem:[#allocation2 + $0xd0] sm:$0xe] }
 0x1b3   : > { %17374 = vst [vmem:[#allocation40_spill] sm:$0xff] %v15257_v3  ;;  %v914_v51 = vmul.f32 %v15020_v18, %v818_v29  ;;  %v917_v36 = vmul.f32 %v11800_v39, %v15020_v18  ;;  %v15269_v25 = vsel %vm1644_vm11, %v15188_v27, %v17373_v12  ;;  %v5506_v44 = vsel %vm683_vm7, %v11075_v41, %v5239_v4  ;;  %v12571_v41 = vld [vmem:[#allocation2 + $0x6c] ss:$0 sps:$4 sm:$0x11]   ;;  %v12572_v60 = vld [vmem:[#allocation2 + $0x64] sm:$0xfe]  }
 0x1b4   : > { %17375 = vst [vmem:[#allocation58_spill] sm:$0xff] %v15260_v32  ;;  %v5680_v6 = vsel %vm1339_vm6, %v5678_v10, %v5679_v0  ;;  %v915_v52 = vmul.f32 %v15020_v18, %v821_v34  ;;  %v5591_v53 = vsel %vm1644_vm11, %v5506_v44, %v5431_v26  ;;  %v984_v1 = vmax.f32 %v952_v48, 0.0  ;;  %v12575_v29 = vld [vmem:[#allocation2 + $0x88] ss:$0 sps:$4 sm:$0x77]  }
 0x1b5   : > { %11929 = vmatprep.mubr.msk.bf16.mxu0 %vm2536_vm12, %v5680_v6  ;;  %v950_v27 = vadd.f32 %v15038_v57, %v914_v51  ;;  %v953_v12 = vadd.f32 %v15038_v57, %v917_v36  ;;  %v5682_v4 = vrot.slane %v5593_v47, 1  ;;  %v5681_v13 = vrot.slane %v5591_v53, 1  ;;  %4511 = vrot.lane.b32.xlu0 %v4461_v30, %s13279_s10  ;;  %v5243_v28 = vpop.permute.xlu0 %5242  ;;  %v12569_v47 = vld [vmem:[#allocation2 + $0xd8] ss:$0 sps:$4 sm:$0x11]  }
 0x1b6   : > { %v1770_v14 = vsel %vm1725_vm10, %v1768_v20, %v1769_v17  ;;  %v951_v54 = vadd.f32 %v15038_v57, %v915_v52  ;;  %11878 = vmatmul.mubr.msk.bf16.gmra.mrb[28].mxu1 %vm2536_vm12, %v15223_v11  ;;  %v4464_v46 = vsel %vm1725_vm10, %v4462_v56, %v4463_v40  ;;  %v11011_v2 = vcombine.low %v4155_v24, %v4114_v38  ;;  %v5249_v17 = vpop.permute.xlu1 %5248  ;;  %v15303_v51 = vld [vmem:[#allocation2 + $0x98] ss:$0 sps:$4 sm:$0x77]   ;;  %v4117_v36 = vld [vmem:[#allocation2 + $0x94] sm:$0xf] }
 0x1b7   : > { %v982_v58 = vmax.f32 %v950_v27, 0.0  ;;  %v985_v23 = vmax.f32 %v953_v12, 0.0  ;;  %v1771_v21 = vrot.slane %v15230_v55, 2  ;;  %11881 = vmatprep.mubr.msk.bf16.mxu1 %vm2536_vm12, %v1770_v14  ;;  %4517 = vrot.lane.b32.xlu1 %v4463_v40, %s13279_s10  ;;  %v5683_v20 = vsel %vm1339_vm6, %v5681_v13, %v5682_v4  ;;  %v834_v55 = vpop.f32.mrb[17].mxu0  ;;  %v13078_v44 = vld [vmem:[#allocation2 + $0xc4] sm:$0xf] }
 0x1b8   : > { %v983_v35 = vmax.f32 %v951_v54, 0.0  ;;  %v920_v11 = vmul.f32 %v11803_v5, %v15020_v18  ;;  %v1772_v30 = vrot.slane %v15269_v25, 2  ;;  %11930 = vmatmul.mubr.msk.bf16.gmra.mrb[68].mxu0 %vm2536_vm12, %v5683_v20  ;;  %v12573_v40 = vld [vmem:[#allocation2 + $0x7c] ss:$0 sps:$4 sm:$0x11]   ;;  %v918_v48 = vmul.f32 %v15020_v18, %v834_v55  ;;  %v11804_v39 = vpop.f32.mrb[18].mxu0 }
 0x1b9   : > { %v15294_v22 = vpack.c.bf16 %v985_v23, %v984_v1  ;;  %4515 = vrot.lane.b32.xlu0 %v4464_v46, %s13279_s10  ;;  %v4465_v56 = vrot.slane %v11011_v2, 2  ;;  %v921_v34 = vmul.f32 %v11804_v39, %v15020_v18  ;;  %v837_v25 = vpop.f32.mrb[19].mxu0  ;;  %v11077_v26 = vcombine.low %v5006_v45, %v13078_v44  ;;  %v5247_v6 = vpop.permute.xlu0 %5246  ;;  %v4157_v24 = vld [vmem:[#allocation2 + $0x90] sm:$0x8]  ;;  %v12574_v13 = vld [vmem:[#allocation2 + $0x74] sm:$0xfe]  }
 0x1ba   : > { %v15299_v0 = vpack.c.bf16 %v983_v35, %v982_v58  ;;  %v956_v10 = vadd.f32 %v15038_v57, %v920_v11  ;;  %v5437_v38 = vpop.permute.xlu1 %5436  ;;  %v954_v52 = vadd.f32 %v15038_v57, %v918_v48  ;;  %v919_v53 = vmul.f32 %v15020_v18, %v837_v25 }
 0x1bb   : > { %17376 = vst [vmem:[#allocation59_spill] sm:$0xff] %v15294_v22  ;;  %4705 = vrot.lane.b32.xlu1 %v12571_v41, %s13280_s11  ;;  %v1773_v1 = vsel %vm1725_vm10, %v1771_v21, %v1772_v30  ;;  %v957_v12 = vadd.f32 %v15038_v57, %v921_v34  ;;  %v5515_v4 = vsel %vm683_vm7, %v12566_v43, %v5245_v63  ;;  %v4466_v14 = vrot.slane %v12575_v29, 2  ;;  %v13079_v41 = vld [vmem:[#allocation2 + $0xd4] sm:$0xf]  ;;  %v11807_v21 = vpop.f32.mrb[20].mxu0 }
 0x1bc   : > { %17377 = vst [vmem:[#allocation62_spill] sm:$0xff] %v15299_v0  ;;  %v988_v27 = vmax.f32 %v956_v10, 0.0  ;;  %v986_v54 = vmax.f32 %v954_v52, 0.0  ;;  %v955_v46 = vadd.f32 %v15038_v57, %v919_v53  ;;  %v11079_v2 = vcombine.low %v15297_v8, %v13079_v41  ;;  %v4159_v29 = vld [vmem:[#allocation2 + $0xa0] sm:$0x8] }
 0x1bd   : > { %4703 = vrot.lane.b32.xlu0 %v12572_v60, %s13280_s11  ;;  %v5597_v58 = vsel %vm1644_vm11, %v5515_v4, %v5437_v38  ;;  %v11013_v23 = vcombine.low %v4157_v24, %v4117_v36  ;;  %v989_v5 = vmax.f32 %v957_v12, 0.0  ;;  %v5512_v20 = vsel %vm683_vm7, %v11077_v26, %v5243_v28  ;;  %v5435_v63 = vpop.permute.xlu0 %5434  ;;  %v4120_v60 = vld [vmem:[#allocation2 + $0xa4] sm:$0xf]  ;;  %v850_v28 = vpop.f32.mrb[21].mxu0 }
 0x1be   : > { %11882 = vmatmul.mubr.msk.bf16.gmra.mrb[0].mxu1 %vm2536_vm12, %v1773_v1  ;;  %v5441_v43 = vpop.permute.xlu1 %5440  ;;  %v4467_v35 = vsel %vm1725_vm10, %v4465_v56, %v4466_v14  ;;  %v987_v11 = vmax.f32 %v955_v46, 0.0  ;;  %v924_v30 = vmul.f32 %v11807_v21, %v15020_v18  ;;  %v5521_v45 = vsel %vm683_vm7, %v12569_v47, %v5249_v17  ;;  %v11808_v36 = vpop.f32.mrb[22].mxu0  ;;  %v5010_v46 = vld [vmem:[#allocation2 + $0xe0] sm:$0xe] }
 0x1bf   : > { %4709 = vrot.lane.b32.xlu1 %v12573_v40, %s13280_s11  ;;  %v5595_v55 = vsel %vm1644_vm11, %v5512_v20, %v5435_v63  ;;  %v4469_v8 = vrot.slane %v15303_v51, 2  ;;  %v15324_v10 = vpack.c.bf16 %v989_v5, %v988_v27  ;;  %v5685_v48 = vrot.slane %v5597_v58, 1  ;;  %v853_v25 = vpop.f32.mrb[23].mxu0  ;;  %v12576_v21 = vld [vmem:[#allocation2 + $0xe8] ss:$0 sps:$4 sm:$0x11]  }
 0x1c0   : > { %v5684_v40 = vrot.slane %v5595_v55, 1  ;;  %v15327_v39 = vpack.c.bf16 %v987_v11, %v986_v54  ;;  %v960_v56 = vadd.f32 %v15038_v57, %v924_v30  ;;  %v5601_v17 = vsel %vm1644_vm11, %v5521_v45, %v5441_v43  ;;  %v11811_v5 = vpop.f32.mrb[24].mxu0  ;;  %v15350_v45 = vld [vmem:[#allocation2 + $0xf0] sm:$0xe]  ;;  %v12582_v55 = vld [vmem:[#allocation2 + $0x84] sm:$0xfe]  }
 0x1c1   : > { %17378 = vst [vmem:[#allocation63_spill] sm:$0xff] %v15324_v10  ;;  %4707 = vrot.lane.b32.xlu0 %v12574_v13, %s13280_s11  ;;  %v4468_v47 = vrot.slane %v11013_v23, 2  ;;  %v922_v34 = vmul.f32 %v15020_v18, %v850_v28  ;;  %v925_v51 = vmul.f32 %v11808_v36, %v15020_v18  ;;  %v5518_v44 = vsel %vm683_vm7, %v11079_v2, %v5247_v6  ;;  %v5439_v26 = vpop.permute.xlu0 %5438  ;;  %v15344_v2 = vld [vmem:[#allocation2 + $0xa8] ss:$0 sps:$4 sm:$0x77]   ;;  %v866_v11 = vpop.f32.mrb[25].mxu0 }
 0x1c2   : > { %17379 = vst [vmem:[#allocation64_spill] sm:$0xff] %v15327_v39  ;;  %v5686_v38 = vsel %vm1339_vm6, %v5684_v40, %v5685_v48  ;;  %v5253_v24 = vpop.permute.xlu1 %5252  ;;  %v11015_v52 = vcombine.low %v4159_v29, %v4120_v60  ;;  %v923_v53 = vmul.f32 %v15020_v18, %v853_v25  ;;  %v5599_v1 = vsel %vm1644_vm11, %v5518_v44, %v5439_v26  ;;  %v11812_v48 = vpop.f32.mrb[26].mxu0  ;;  %v15356_v40 = vld [vmem:[#allocation2 + $0xb8] ss:$0 sps:$4 sm:$0x77]  }
 0x1c3   : > { %4521 = vrot.lane.b32.xlu1 %v4466_v14, %s13279_s10  ;;  %11933 = vmatprep.mubr.msk.bf16.mxu0 %vm2536_vm12, %v5686_v38  ;;  %v992_v27 = vmax.f32 %v960_v56, 0.0  ;;  %v958_v12 = vadd.f32 %v15038_v57, %v922_v34  ;;  %v961_v4 = vadd.f32 %v15038_v57, %v925_v51  ;;  %v5688_v13 = vrot.slane %v5601_v17, 1  ;;  %v12581_v14 = vld [vmem:[#allocation2 + $0x8c] ss:$0 sps:$4 sm:$0x11]  }
 0x1c4   : > { %v5687_v6 = vrot.slane %v5599_v1, 1  ;;  %v959_v54 = vadd.f32 %v15038_v57, %v923_v53  ;;  %v4470_v41 = vsel %vm1725_vm10, %v4468_v47, %v4469_v8  ;;  %v4471_v60 = vrot.slane %v11015_v52, 2  ;;  %v869_v47 = vpop.f32.mrb[27].mxu0  ;;  %v12579_v34 = vld [vmem:[#allocation2 + $0xf8] ss:$0 sps:$4 sm:$0x11]  }
 0x1c5   : > { %4519 = vrot.lane.b32.xlu0 %v4467_v35, %s13279_s10  ;;  %v990_v58 = vmax.f32 %v958_v12, 0.0  ;;  %v993_v23 = vmax.f32 %v961_v4, 0.0  ;;  %v5251_v20 = vpop.permute.xlu0 %5250  ;;  %v928_v35 = vmul.f32 %v11811_v5, %v15020_v18  ;;  %v926_v28 = vmul.f32 %v15020_v18, %v866_v11  ;;  %v4123_v51 = vld [vmem:[#allocation2 + $0xb4] sm:$0xf]  ;;  %v4161_v25 = vld [vmem:[#allocation2 + $0xb0] sm:$0x8] }
 0x1c6   : > { %v5689_v63 = vsel %vm1339_vm6, %v5687_v6, %v5688_v13  ;;  %v991_v43 = vmax.f32 %v959_v54, 0.0  ;;  %v5257_v30 = vpop.permute.xlu1 %5256  ;;  %v929_v17 = vmul.f32 %v11812_v48, %v15020_v18  ;;  %v927_v26 = vmul.f32 %v15020_v18, %v869_v47  ;;  %v13080_v38 = vld [vmem:[#allocation2 + $0xe4] sm:$0xf]  ;;  %v12679_v10 = vld [vmem:[#allocation2 + $0x138] ss:$0 sps:$4 sm:$0x77]  }
 0x1c7   : > { %4525 = vrot.lane.b32.xlu1 %v4469_v8, %s13279_s10  ;;  %11934 = vmatmul.mubr.msk.bf16.gmra.mrb[72].mxu0 %vm2536_vm12, %v5689_v63  ;;  %v15352_v29 = vpack.c.bf16 %v993_v23, %v992_v27  ;;  %v12583_v8 = vld [vmem:[#allocation2 + $0x9c] ss:$0 sps:$4 sm:$0x11]   ;;  %v964_v36 = vadd.f32 %v15038_v57, %v928_v35  ;;  %v962_v44 = vadd.f32 %v15038_v57, %v926_v28  ;;  %v4472_v4 = vrot.slane %v15344_v2, 2  ;;  %v11815_v35 = vpop.f32.mrb[28].mxu0 }
 0x1c8   : > { %v15358_v56 = vpack.c.bf16 %v991_v43, %v990_v58  ;;  %v11081_v52 = vcombine.low %v5010_v46, %v13080_v38  ;;  %v965_v27 = vadd.f32 %v15038_v57, %v929_v17  ;;  %v963_v6 = vadd.f32 %v15038_v57, %v927_v26  ;;  %v12584_v46 = vld [vmem:[#allocation2 + $0x94] sm:$0xfe]  }
 0x1c9   : > { %17380 = vst [vmem:[#allocation65_spill] sm:$0xff] %v15352_v29  ;;  %4523 = vrot.lane.b32.xlu0 %v4470_v41, %s13279_s10  ;;  %v5255_v53 = vpop.permute.xlu0 %5254  ;;  %v996_v1 = vmax.f32 %v964_v36, 0.0  ;;  %v994_v13 = vmax.f32 %v962_v44, 0.0  ;;  %v5527_v54 = vsel %vm683_vm7, %v12576_v21, %v5253_v24  ;;  %v13081_v41 = vld [vmem:[#allocation2 + $0xf4] sm:$0xf]  ;;  %v4473_v5 = vsel %vm1725_vm10, %v4471_v60, %v4472_v4 }
 0x1ca   : > { %17381 = vst [vmem:[#allocation41_spill] sm:$0xff] %v15358_v56  ;;  %v5445_v12 = vpop.permute.xlu1 %5444  ;;  %v11083_v58 = vcombine.low %v15350_v45, %v13081_v41  ;;  %v997_v23 = vmax.f32 %v965_v27, 0.0  ;;  %v11017_v63 = vcombine.low %v4161_v25, %v4123_v51  ;;  %v995_v43 = vmax.f32 %v963_v6, 0.0 }
 0x1cb   : > { %4713 = vrot.lane.b32.xlu1 %v12581_v14, %s13280_s11  ;;  %v5605_v14 = vsel %vm1644_vm11, %v5527_v54, %v5445_v12  ;;  %v5524_v2 = vsel %vm683_vm7, %v11081_v52, %v5251_v20  ;;  %v4475_v24 = vrot.slane %v15356_v40, 2  ;;  %v932_v45 = vmul.f32 %v11815_v35, %v15020_v18  ;;  %v12586_v35 = vld [vmem:[#allocation2 + $0x108] ss:$0 sps:$4 sm:$0x11]  }
 0x1cc   : > { %v15376_v21 = vpack.c.bf16 %v997_v23, %v996_v1  ;;  %v5533_v28 = vsel %vm683_vm7, %v12579_v34, %v5257_v30  ;;  %v15381_v36 = vpack.c.bf16 %v995_v43, %v994_v13  ;;  %v5691_v47 = vrot.slane %v5605_v14, 1  ;;  %v5014_v23 = vld [vmem:[#allocation2 + $0x100] sm:$0xe] }
 0x1cd   : > { %4711 = vrot.lane.b32.xlu0 %v12582_v55, %s13280_s11  ;;  %v5443_v11 = vpop.permute.xlu0 %5442  ;;  %v882_v55 = vpop.f32.mrb[29].mxu0  ;;  %v968_v40 = vadd.f32 %v15038_v57, %v932_v45  ;;  %v4474_v30 = vrot.slane %v11017_v63, 2  ;;  %v5530_v38 = vsel %vm683_vm7, %v11083_v58, %v5255_v53  ;;  %v12591_v53 = vld [vmem:[#allocation2 + $0xac] ss:$0 sps:$4 sm:$0x11]  }
 0x1ce   : > { %17382 = vst [vmem:[#allocation42_spill] sm:$0xff] %v15376_v21  ;;  %v5603_v48 = vsel %vm1644_vm11, %v5524_v2, %v5443_v11  ;;  %v5449_v60 = vpop.permute.xlu1 %5448  ;;  %17383 = vst [vmem:[#allocation66_spill] sm:$0xff] %v15381_v36  ;;  %v930_v17 = vmul.f32 %v15020_v18, %v882_v55  ;;  %v11816_v20 = vpop.f32.mrb[30].mxu0  ;;  %v4163_v63 = vld [vmem:[#allocation2 + $0xc0] sm:$0x8] }
 0x1cf   : > { %4717 = vrot.lane.b32.xlu1 %v12583_v8, %s13280_s11  ;;  %v5690_v8 = vrot.slane %v5603_v48, 1  ;;  %v933_v51 = vmul.f32 %v11816_v20, %v15020_v18  ;;  %v885_v25 = vpop.f32.mrb[31].mxu0  ;;  %v5609_v44 = vsel %vm1644_vm11, %v5533_v28, %v5449_v60  ;;  %v1000_v27 = vmax.f32 %v968_v40, 0.0  ;;  %v12592_v28 = vld [vmem:[#allocation2 + $0xa4] sm:$0xfe]  }
 0x1d0   : > { %v966_v34 = vadd.f32 %v15038_v57, %v930_v17  ;;  %v931_v26 = vmul.f32 %v15020_v18, %v885_v25  ;;  %v4476_v14 = vsel %vm1725_vm10, %v4474_v30, %v4475_v24  ;;  %v12593_v48 = vld [vmem:[#allocation2 + $0xbc] ss:$0 sps:$4 sm:$0x11]   ;;  %v4129_v60 = vld [vmem:[#allocation2 + $0xd4] sm:$0xf] }
 0x1d1   : > { %4715 = vrot.lane.b32.xlu0 %v12584_v46, %s13280_s11  ;;  %v5447_v52 = vpop.permute.xlu0 %5446  ;;  %v5692_v1 = vsel %vm1339_vm6, %v5690_v8, %v5691_v47  ;;  %v969_v12 = vadd.f32 %v15038_v57, %v933_v51  ;;  %v5694_v46 = vrot.slane %v5609_v44, 1  ;;  %v4165_v20 = vld [vmem:[#allocation2 + $0xd0] sm:$0x8]  ;;  %v13082_v47 = vld [vmem:[#allocation2 + $0x104] sm:$0xf] }
 0x1d2   : > { %v5607_v13 = vsel %vm1644_vm11, %v5530_v38, %v5447_v52  ;;  %11937 = vmatprep.mubr.msk.bf16.mxu0 %vm2536_vm12, %v5692_v1  ;;  %v5261_v6 = vpop.permute.xlu1 %5260  ;;  %v998_v54 = vmax.f32 %v966_v34, 0.0  ;;  %v967_v41 = vadd.f32 %v15038_v57, %v931_v26  ;;  %v12589_v8 = vld [vmem:[#allocation2 + $0x118] ss:$0 sps:$4 sm:$0x11]   ;;  %v5016_v51 = vld [vmem:[#allocation2 + $0x110] sm:$0xe]  ;;  %v11021_v1 = vcombine.low %v4165_v20, %v4129_v60 }
 0x1d3   : > { %4529 = vrot.lane.b32.xlu1 %v4472_v4, %s13279_s10  ;;  %v5693_v18 = vrot.slane %v5607_v13, 1  ;;  %v4126_v4 = vld [vmem:[#allocation2 + $0xc4] sm:$0xf]  ;;  %v1001_v58 = vmax.f32 %v969_v12, 0.0  ;;  %v5539_v44 = vsel %vm683_vm7, %v12586_v35, %v5261_v6  ;;  %v12594_v30 = vld [vmem:[#allocation2 + $0xb4] sm:$0xfe]  }
 0x1d4   : > { %v999_v43 = vmax.f32 %v967_v41, 0.0  ;;  %v11019_v17 = vcombine.low %v4163_v63, %v4126_v4  ;;  %v12598_v52 = vld [vmem:[#allocation2 + $0xd8] ss:$0 sps:$4 sm:$0x77]   ;;  %v13083_v12 = vld [vmem:[#allocation2 + $0x114] sm:$0xf] }
 0x1d5   : > { %4527 = vrot.lane.b32.xlu0 %v4473_v5, %s13279_s10  ;;  %v5259_v2 = vpop.permute.xlu0 %5258  ;;  %v5695_v11 = vsel %vm1339_vm6, %v5693_v18, %v5694_v46  ;;  %v15401_v45 = vpack.c.bf16 %v1001_v58, %v1000_v27  ;;  %v12595_v5 = vld [vmem:[#allocation2 + $0xc8] ss:$0 sps:$4 sm:$0x77]   ;;  %v11087_v13 = vcombine.low %v5016_v51, %v13083_v12  ;;  %v4481_v35 = vrot.slane %v12598_v52, 2  ;;  %v5020_v12 = vld [vmem:[#allocation2 + $0x130] sm:$0xe] }
 0x1d6   : > { %11938 = vmatmul.mubr.msk.bf16.gmra.mrb[76].mxu0 %vm2536_vm12, %v5695_v11  ;;  %v5265_v57 = vpop.permute.xlu1 %5264  ;;  %v15404_v55 = vpack.c.bf16 %v999_v43, %v998_v54  ;;  %v4478_v34 = vrot.slane %v12595_v5, 2  ;;  %v4477_v38 = vrot.slane %v11019_v17, 2  ;;  %v12596_v60 = vld [vmem:[#allocation2 + $0x128] ss:$0 sps:$4 sm:$0x11]  }
 0x1d7   : > { %4533 = vrot.lane.b32.xlu1 %v4475_v24, %s13279_s10  ;;  %17384 = vst [vmem:[#allocation67_spill] sm:$0xff] %v15401_v45  ;;  %v11085_v24 = vcombine.low %v5014_v23, %v13082_v47  ;;  %v5545_v6 = vsel %vm683_vm7, %v12589_v8, %v5265_v57  ;;  %v4480_v23 = vrot.slane %v11021_v1, 2  ;;  %v4132_v47 = vld [vmem:[#allocation2 + $0xe4] sm:$0xf]  ;;  %v5018_v8 = vld [vmem:[#allocation2 + $0x120] sm:$0xe] }
 0x1d8   : > { %17385 = vst [vmem:[#allocation43_spill] sm:$0xff] %v15404_v55  ;;  %v4479_v58 = vsel %vm1725_vm10, %v4477_v38, %v4478_v34  ;;  %v12602_v51 = vld [vmem:[#allocation2 + $0xc4] sm:$0xfe]   ;;  %v12599_v1 = vld [vmem:[#allocation2 + $0x138] ss:$0 sps:$4 sm:$0x11]  }
 0x1d9   : > { %4531 = vrot.lane.b32.xlu0 %v4476_v14, %s13279_s10  ;;  %v5263_v40 = vpop.permute.xlu0 %5262  ;;  %v5536_v27 = vsel %vm683_vm7, %v11085_v24, %v5259_v2  ;;  %v4167_v24 = vld [vmem:[#allocation2 + $0xe0] sm:$0x8]  ;;  %v13084_v38 = vld [vmem:[#allocation2 + $0x124] sm:$0xf]  ;;  %v12675_v21 = vld [vmem:[#allocation2 + $0x114] sm:$0xfe]  }
 0x1da   : > { %v5453_v25 = vpop.permute.xlu1 %5452  ;;  %v5542_v14 = vsel %vm683_vm7, %v11087_v13, %v5263_v40  ;;  %v11089_v52 = vcombine.low %v5018_v8, %v13084_v38  ;;  %v12606_v38 = vld [vmem:[#allocation2 + $0x148] ss:$0 sps:$4 sm:$0x11]   ;;  %v12669_v36 = vld [vmem:[#allocation2 + $0xb8] ss:$0 sps:$4 sm:$0x11]  }
 0x1db   : > { %4721 = vrot.lane.b32.xlu1 %v12591_v53, %s13280_s11  ;;  %v5613_v26 = vsel %vm1644_vm11, %v5539_v44, %v5453_v25  ;;  %v12603_v25 = vld [vmem:[#allocation2 + $0xdc] ss:$0 sps:$4 sm:$0x11]   ;;  %v12605_v44 = vld [vmem:[#allocation2 + $0xe8] ss:$0 sps:$4 sm:$0x77]  }
 0x1dc   : > { %v5697_v18 = vrot.slane %v5613_v26, 1  ;;  %v11023_v26 = vcombine.low %v4167_v24, %v4132_v47 }
 0x1dd   : > { %4719 = vrot.lane.b32.xlu0 %v12592_v28, %s13280_s11  ;;  %v5451_v54 = vpop.permute.xlu0 %5450  ;;  %v4482_v28 = vsel %vm1725_vm10, %v4480_v23, %v4481_v35 }
 0x1de   : > { %v5611_v41 = vsel %vm1644_vm11, %v5536_v27, %v5451_v54  ;;  %v5457_v46 = vpop.permute.xlu1 %5456 }
 0x1df   : > { %4725 = vrot.lane.b32.xlu1 %v12593_v48, %s13280_s11  ;;  %v5696_v53 = vrot.slane %v5611_v41, 1  ;;  %v5617_v4 = vsel %vm1644_vm11, %v5545_v6, %v5457_v46  ;;  %v12601_v48 = vld [vmem:[#allocation2 + $0xcc] ss:$0 sps:$4 sm:$0x11]   ;;  %v12604_v46 = vld [vmem:[#allocation2 + $0xd4] sm:$0xfe]  }
 0x1e0   : > { %v5700_v57 = vrot.slane %v5617_v4, 1  ;;  %v13085_v4 = vld [vmem:[#allocation2 + $0x134] sm:$0xf] }
 0x1e1   : > { %4723 = vrot.lane.b32.xlu0 %v12594_v30, %s13280_s11  ;;  %v5455_v63 = vpop.permute.xlu0 %5454  ;;  %v5698_v43 = vsel %vm1339_vm6, %v5696_v53, %v5697_v18  ;;  %v4135_v30 = vld [vmem:[#allocation2 + $0xf4] sm:$0xf]  ;;  %v4483_v18 = vrot.slane %v11023_v26, 2  ;;  %v4171_v26 = vld [vmem:[#allocation2 + $0x100] sm:$0x8] }
 0x1e2   : > { %v5615_v2 = vsel %vm1644_vm11, %v5542_v14, %v5455_v63  ;;  %11941 = vmatprep.mubr.msk.bf16.mxu0 %vm2536_vm12, %v5698_v43  ;;  %v5269_v11 = vpop.permute.xlu1 %5268  ;;  %v4484_v14 = vrot.slane %v12605_v44, 2  ;;  %v12608_v63 = vld [vmem:[#allocation2 + $0xf8] ss:$0 sps:$4 sm:$0x77]   ;;  %v5022_v44 = vld [vmem:[#allocation2 + $0x140] sm:$0xe] }
 0x1e3   : > { %4537 = vrot.lane.b32.xlu1 %v4478_v34, %s13279_s10  ;;  %v5699_v5 = vrot.slane %v5615_v2, 1  ;;  %v4169_v34 = vld [vmem:[#allocation2 + $0xf0] sm:$0x8]  ;;  %v5551_v41 = vsel %vm683_vm7, %v12596_v60, %v5269_v11  ;;  %v4487_v47 = vrot.slane %v12608_v63, 2 }
 0x1e4   : > { %v11025_v54 = vcombine.low %v4169_v34, %v4135_v30  ;;  %v4138_v34 = vld [vmem:[#allocation2 + $0x104] sm:$0xf] }
 0x1e5   : > { %4535 = vrot.lane.b32.xlu0 %v4479_v58, %s13279_s10  ;;  %v5267_v17 = vpop.permute.xlu0 %5266  ;;  %v5701_v20 = vsel %vm1339_vm6, %v5699_v5, %v5700_v57  ;;  %v11091_v58 = vcombine.low %v5020_v12, %v13085_v4  ;;  %v4141_v12 = vld [vmem:[#allocation2 + $0x114] sm:$0xf]  ;;  %v12615_v4 = vld [vmem:[#allocation2 + $0x108] ss:$0 sps:$4 sm:$0x77]  }
 0x1e6   : > { %11942 = vmatmul.mubr.msk.bf16.gmra.mrb[80].mxu0 %vm2536_vm12, %v5701_v20  ;;  %v5548_v53 = vsel %vm683_vm7, %v11089_v52, %v5267_v17 }
 0x1e7   : > { %4541 = vrot.lane.b32.xlu1 %v4481_v35, %s13279_s10  ;;  %v5273_v40 = vpop.permute.xlu1 %5272  ;;  %v4486_v35 = vrot.slane %v11025_v54, 2  ;;  %v12613_v54 = vld [vmem:[#allocation2 + $0xfc] ss:$0 sps:$4 sm:$0x11]  }
 0x1e8   : > { %v5557_v2 = vsel %vm683_vm7, %v12599_v1, %v5273_v40 }
 0x1e9   : > { %4539 = vrot.lane.b32.xlu0 %v4482_v28, %s13279_s10  ;;  %v5271_v27 = vpop.permute.xlu0 %5270  ;;  %v4488_v30 = vsel %vm1725_vm10, %v4486_v35, %v4487_v47  ;;  %v12614_v35 = vld [vmem:[#allocation2 + $0xf4] sm:$0xfe]  }
 0x1ea   : > { %v5554_v60 = vsel %vm683_vm7, %v11091_v58, %v5271_v27  ;;  %v12612_v27 = vld [vmem:[#allocation2 + $0xe4] sm:$0xfe]   ;;  %v12609_v58 = vld [vmem:[#allocation2 + $0x158] ss:$0 sps:$4 sm:$0x11]  }
 0x1eb   : > { %4729 = vrot.lane.b32.xlu1 %v12601_v48, %s13280_s11  ;;  %v5461_v13 = vpop.permute.xlu1 %5460  ;;  %v4485_v48 = vsel %vm1725_vm10, %v4483_v18, %v4484_v14 }
 0x1ec   : > { %v5621_v6 = vsel %vm1644_vm11, %v5551_v41, %v5461_v13  ;;  %v11027_v41 = vcombine.low %v4171_v26, %v4138_v34 }
 0x1ed   : > { %4727 = vrot.lane.b32.xlu0 %v12602_v51, %s13280_s11  ;;  %v5459_v23 = vpop.permute.xlu0 %5458  ;;  %v5703_v11 = vrot.slane %v5621_v6, 1  ;;  %v13086_v6 = vld [vmem:[#allocation2 + $0x144] sm:$0xf] }
 0x1ee   : > { %v5619_v43 = vsel %vm1644_vm11, %v5548_v53, %v5459_v23  ;;  %v11093_v18 = vcombine.low %v5022_v44, %v13086_v6  ;;  %v5024_v23 = vld [vmem:[#allocation2 + $0x150] sm:$0xe]  ;;  %v12616_v6 = vld [vmem:[#allocation2 + $0x28] ss:$0 sps:$4 sm:$0x11]  }
 0x1ef   : > { %4733 = vrot.lane.b32.xlu1 %v12603_v25, %s13280_s11  ;;  %v5702_v57 = vrot.slane %v5619_v43, 1  ;;  %v5465_v5 = vpop.permute.xlu1 %5464  ;;  %v12611_v25 = vld [vmem:[#allocation2 + $0xec] ss:$0 sps:$4 sm:$0x11]  }
 0x1f0   : > { %v5625_v28 = vsel %vm1644_vm11, %v5557_v2, %v5465_v5  ;;  %v4489_v2 = vrot.slane %v11027_v41, 2  ;;  %v13087_v5 = vld [vmem:[#allocation2 + $0x154] sm:$0xf] }
 0x1f1   : > { %4731 = vrot.lane.b32.xlu0 %v12604_v46, %s13280_s11  ;;  %v5463_v17 = vpop.permute.xlu0 %5462  ;;  %v5704_v20 = vsel %vm1339_vm6, %v5702_v57, %v5703_v11  ;;  %v5706_v8 = vrot.slane %v5625_v28, 1  ;;  %v4173_v46 = vld [vmem:[#allocation2 + $0x110] sm:$0x8]  ;;  %v11095_v28 = vcombine.low %v5024_v23, %v13087_v5  ;;  %v6156_v5 = vld [vmem:[#allocation2 + $0xb4] sm:$0xf] }
 0x1f2   : > { %v5623_v24 = vsel %vm1644_vm11, %v5554_v60, %v5463_v17  ;;  %11945 = vmatprep.mubr.msk.bf16.mxu0 %vm2536_vm12, %v5704_v20  ;;  %v4490_v60 = vrot.slane %v12615_v4, 2  ;;  %v12618_v17 = vld [vmem:[#allocation2 + $0x118] ss:$0 sps:$4 sm:$0x77]   ;;  %v4095_v4 = vld [vmem:[#allocation2 + $0x20] sm:$0xe] }
 0x1f3   : > { %4545 = vrot.lane.b32.xlu1 %v4484_v14, %s13279_s10  ;;  %v5705_v40 = vrot.slane %v5623_v24, 1  ;;  %v5277_v51 = vpop.permute.xlu1 %5276  ;;  %v11029_v14 = vcombine.low %v4173_v46, %v4141_v12  ;;  %v6200_v46 = vld [vmem:[#allocation2 + $0xa0] sm:$0x8] }
 0x1f4   : > { %v5563_v63 = vsel %vm683_vm7, %v12606_v38, %v5277_v51  ;;  %v4491_v44 = vsel %vm1725_vm10, %v4489_v2, %v4490_v60  ;;  %v4493_v38 = vrot.slane %v12618_v17, 2 }
 0x1f5   : > { %4543 = vrot.lane.b32.xlu0 %v4485_v48, %s13279_s10  ;;  %v5275_v52 = vpop.permute.xlu0 %5274  ;;  %v5707_v1 = vsel %vm1339_vm6, %v5705_v40, %v5706_v8 }
 0x1f6   : > { %11946 = vmatmul.mubr.msk.bf16.gmra.mrb[84].mxu0 %vm2536_vm12, %v5707_v1  ;;  %v5560_v57 = vsel %vm683_vm7, %v11093_v18, %v5275_v52 }
 0x1f7   : > { %4549 = vrot.lane.b32.xlu1 %v4487_v47, %s13279_s10  ;;  %v5281_v13 = vpop.permute.xlu1 %5280  ;;  %v4492_v47 = vrot.slane %v11029_v14, 2  ;;  %v12625_v14 = vld [vmem:[#allocation2 + $0x11c] ss:$0 sps:$4 sm:$0x11]  }
 0x1f8   : > { %v5569_v24 = vsel %vm683_vm7, %v12609_v58, %v5281_v13  ;;  %v12622_v13 = vld [vmem:[#allocation2 + $0x10c] ss:$0 sps:$4 sm:$0x11]   ;;  %v12624_v58 = vld [vmem:[#allocation2 + $0x104] sm:$0xfe]  }
 0x1f9   : > { %4547 = vrot.lane.b32.xlu0 %v4488_v30, %s13279_s10  ;;  %v5279_v53 = vpop.permute.xlu0 %5278  ;;  %v4494_v41 = vsel %vm1725_vm10, %v4492_v47, %v4493_v38 }
 0x1fa   : > { %v5566_v30 = vsel %vm683_vm7, %v11095_v28, %v5279_v53  ;;  %v6202_v28 = vld [vmem:[#allocation2 + $0xb0] sm:$0x8] }
 0x1fb   : > { %4737 = vrot.lane.b32.xlu1 %v12611_v25, %s13280_s11  ;;  %v5469_v43 = vpop.permute.xlu1 %5468 }
 0x1fc   : > { %v5629_v11 = vsel %vm1644_vm11, %v5563_v63, %v5469_v43  ;;  %v12627_v63 = vld [vmem:[#allocation2 + $0xa8] ss:$0 sps:$4 sm:$0x77]  }
 0x1fd   : > { %4735 = vrot.lane.b32.xlu0 %v12612_v27, %s13280_s11  ;;  %v5467_v48 = vpop.permute.xlu0 %5466  ;;  %v5709_v8 = vrot.slane %v5629_v11, 1  ;;  %v12620_v11 = vld [vmem:[#allocation2 + $0x38] ss:$0 sps:$4 sm:$0x11]  }
 0x1fe   : > { %v5627_v20 = vsel %vm1644_vm11, %v5560_v57, %v5467_v48  ;;  %v4098_v48 = vld [vmem:[#allocation2 + $0x30] sm:$0xe] }
 0x1ff   : > { %4741 = vrot.lane.b32.xlu1 %v12613_v54, %s13280_s11  ;;  %v5708_v40 = vrot.slane %v5627_v20, 1  ;;  %v5473_v51 = vpop.permute.xlu1 %5472  ;;  %v6153_v54 = vld [vmem:[#allocation2 + $0xa4] sm:$0xf] }
 0x200   : > { %v5633_v25 = vsel %vm1644_vm11, %v5569_v24, %v5473_v51  ;;  %v11197_v43 = vcombine.low %v6200_v46, %v6153_v54  ;;  %v12631_v24 = vld [vmem:[#allocation2 + $0xb8] ss:$0 sps:$4 sm:$0x77]  }
 0x201   : > { %4739 = vrot.lane.b32.xlu0 %v12614_v35, %s13280_s11  ;;  %v5471_v34 = vpop.permute.xlu0 %5470  ;;  %v5710_v26 = vsel %vm1339_vm6, %v5708_v40, %v5709_v8  ;;  %v5712_v1 = vrot.slane %v5633_v25, 1  ;;  %v13088_v35 = vld [vmem:[#allocation2 + $0x24] sm:$0xf]  ;;  %v11199_v40 = vcombine.low %v6202_v28, %v6156_v5  ;;  %v13089_v25 = vld [vmem:[#allocation2 + $0x34] sm:$0xf] }
 0x202   : > { %v5631_v52 = vsel %vm1644_vm11, %v5566_v30, %v5471_v34  ;;  %11949 = vmatprep.mubr.msk.bf16.mxu0 %vm2536_vm12, %v5710_v26  ;;  %v10967_v2 = vcombine.low %v4095_v4, %v13088_v35  ;;  %v6504_v47 = vrot.slane %v11197_v43, 2  ;;  %v6505_v34 = vrot.slane %v12627_v63, 2  ;;  %v6204_v43 = vld [vmem:[#allocation2 + $0xc0] sm:$0x8] }
 0x203   : > { %4553 = vrot.lane.b32.xlu1 %v4490_v60, %s13279_s10  ;;  %v5711_v27 = vrot.slane %v5631_v52, 1  ;;  %v4498_v12 = vpop.permute.xlu1 %4497  ;;  %v12626_v60 = vld [vmem:[#allocation2 + $0x114] sm:$0xfe]   ;;  %v6507_v54 = vrot.slane %v11199_v40, 2  ;;  %v13091_v40 = vld [vmem:[#allocation2 + $0x44] sm:$0xf] }
 0x204   : > { %v4756_v17 = vsel %vm683_vm7, %v12616_v6, %v4498_v12  ;;  %v12635_v28 = vld [vmem:[#allocation2 + $0xac] ss:$0 sps:$4 sm:$0x11]  }
 0x205   : > { %4551 = vrot.lane.b32.xlu0 %v4491_v44, %s13279_s10  ;;  %v4496_v18 = vpop.permute.xlu0 %4495  ;;  %v5713_v53 = vsel %vm1339_vm6, %v5711_v27, %v5712_v1  ;;  %v10969_v44 = vcombine.low %v4098_v48, %v13089_v25  ;;  %v12629_v48 = vld [vmem:[#allocation2 + $0x48] ss:$0 sps:$4 sm:$0x11]   ;;  %v12633_v25 = vld [vmem:[#allocation2 + $0x58] ss:$0 sps:$4 sm:$0x11]  }
 0x206   : > { %11950 = vmatmul.mubr.msk.bf16.gmra.mrb[88].mxu0 %vm2536_vm12, %v5713_v53  ;;  %v4753_v51 = vsel %vm683_vm7, %v10967_v2, %v4496_v18  ;;  %v6508_v18 = vrot.slane %v12631_v24, 2  ;;  %v12722_v53 = vld [vmem:[%s17132_s2 + $0x28] sm:$0x3f]  }
 0x207   : > { %4557 = vrot.lane.b32.xlu1 %v4493_v38, %s13279_s10  ;;  %v4502_v23 = vpop.permute.xlu1 %4501  ;;  %12329 = vmatprep.subr.msk.bf16.mxu0 %vm1725_vm10, %v12722_v53  ;;  %v7105_v2 = vsel %vm1725_vm10, %v12722_v53, 0  ;;  %v12643_v53 = vld [vmem:[#allocation2 + $0xd8] ss:$0 sps:$4 sm:$0x77]  }
 0x208   : > { %v4762_v38 = vsel %vm683_vm7, %v12620_v11, %v4502_v23  ;;  %v6509_v35 = vsel %vm1725_vm10, %v6507_v54, %v6508_v18 }
 0x209   : > { %4555 = vrot.lane.b32.xlu0 %v4494_v41, %s13279_s10  ;;  %v4500_v57 = vpop.permute.xlu0 %4499 }
 0x20a   : > { %v4759_v41 = vsel %vm683_vm7, %v10969_v44, %v4500_v57  ;;  %v4101_v57 = vld [vmem:[#allocation2 + $0x40] sm:$0xe] }
 0x20b   : > { %4745 = vrot.lane.b32.xlu1 %v12622_v13, %s13280_s11  ;;  %v4690_v20 = vpop.permute.xlu1 %4689  ;;  %v6506_v13 = vsel %vm1725_vm10, %v6504_v47, %v6505_v34  ;;  %v12640_v47 = vld [vmem:[#allocation2 + $0xc8] ss:$0 sps:$4 sm:$0x77]  }
 0x20c   : > { %v4850_v8 = vsel %vm1644_vm11, %v4756_v17, %v4690_v20  ;;  %v12638_v20 = vld [vmem:[#allocation2 + $0xbc] ss:$0 sps:$4 sm:$0x11]  }
 0x20d   : > { %4743 = vrot.lane.b32.xlu0 %v12624_v58, %s13280_s11  ;;  %v4688_v30 = vpop.permute.xlu0 %4687  ;;  %v4944_v52 = vrot.slane %v4850_v8, 1  ;;  %v6159_v58 = vld [vmem:[#allocation2 + $0xc4] sm:$0xf] }
 0x20e   : > { %v4848_v26 = vsel %vm1644_vm11, %v4753_v51, %v4688_v30  ;;  %v11201_v24 = vcombine.low %v6204_v43, %v6159_v58  ;;  %v13090_v8 = vld [vmem:[%s13509_s9 + $0x40] sm:$0xff]   ;;  %v10971_v51 = vcombine.low %v4101_v57, %v13091_v40  ;;  %v6162_v30 = vld [vmem:[#allocation2 + $0xd4] sm:$0xf] }
 0x20f   : > { %4749 = vrot.lane.b32.xlu1 %v12625_v14, %s13280_s11  ;;  %v4943_v1 = vrot.slane %v4848_v26, 1  ;;  %v4694_v27 = vpop.permute.xlu1 %4693  ;;  %v4104_v26 = vld [vmem:[#allocation2 + $0x50] sm:$0xe] }
 0x210   : > { %v4854_v12 = vsel %vm1644_vm11, %v4762_v38, %v4694_v27  ;;  %v12639_v38 = vld [vmem:[#allocation2 + $0xb4] sm:$0xfe]   ;;  %v6510_v27 = vrot.slane %v11201_v24, 2  ;;  %v12647_v24 = vld [vmem:[#allocation2 + $0xcc] ss:$0 sps:$4 sm:$0x11]  }
 0x211   : > { %4747 = vrot.lane.b32.xlu0 %v12626_v60, %s13280_s11  ;;  %v4692_v46 = vpop.permute.xlu0 %4691  ;;  %v4945_v6 = vsel %vm1339_vm6, %v4943_v1, %v4944_v52  ;;  %v4947_v23 = vrot.slane %v4854_v12, 1  ;;  %v12637_v60 = vld [vmem:[#allocation2 + $0xa4] sm:$0xfe]  }
 0x212   : > { %v4852_v4 = vsel %vm1644_vm11, %v4759_v41, %v4692_v46  ;;  %11955 = vmatprep.mubr.msk.bf16.mxu0 %vm2536_vm12, %v4945_v6  ;;  %v13092_v41 = vld [vmem:[#allocation2 + $0x54] sm:$0xf] }
 0x213   : > { %6554 = vrot.lane.b32.xlu1 %v6505_v34, %s13279_s10  ;;  %v4946_v14 = vrot.slane %v4852_v4, 1  ;;  %v4506_v63 = vpop.permute.xlu1 %4505  ;;  %v6206_v34 = vld [vmem:[#allocation2 + $0xd0] sm:$0x8]  ;;  %v10973_v46 = vcombine.low %v4104_v26, %v13092_v41 }
 0x214   : > { %v4768_v52 = vsel %vm683_vm7, %v12629_v48, %v4506_v63 }
 0x215   : > { %6552 = vrot.lane.b32.xlu0 %v6506_v13, %s13279_s10  ;;  %v4948_v11 = vsel %vm1339_vm6, %v4946_v14, %v4947_v23  ;;  %v11203_v13 = vcombine.low %v6206_v34, %v6162_v30  ;;  %v4107_v30 = vld [vmem:[#allocation2 + $0x60] sm:$0xe] }
 0x216   : > { %11956 = vmatmul.mubr.msk.bf16.vlgmr.msra.gmra.mrb[60].mxu0 %vm2536_vm12, %v4948_v11 }
 0x217   : > { %6558 = vrot.lane.b32.xlu1 %v6508_v18, %s13279_s10  ;;  %v4504_v5 = vpop.permute.xlu0 %4503  ;;  %11988 = vmatpush3.bf16.msra.mxu0 %v7105_v2  ;;  %v6511_v18 = vrot.slane %v12640_v47, 2  ;;  %v6513_v2 = vrot.slane %v11203_v13, 2 }
 0x218   : > { %v4510_v17 = vpop.permute.xlu1 %4509  ;;  %11759 = vmatprep.subr.bf16.mxu0 %v13090_v8  ;;  %v4765_v54 = vsel %vm683_vm7, %v10971_v51, %v4504_v5  ;;  %v6165_v51 = vld [vmem:[#allocation2 + $0xe4] sm:$0xf] }
 0x219   : > { %6556 = vrot.lane.b32.xlu0 %v6509_v35, %s13279_s10  ;;  %v4774_v58 = vsel %vm683_vm7, %v12633_v25, %v4510_v17  ;;  %v6512_v35 = vsel %vm1725_vm10, %v6510_v27, %v6511_v18  ;;  %v6208_v25 = vld [vmem:[#allocation2 + $0xe0] sm:$0x8] }
 0x21a   : > { %v11205_v13 = vcombine.low %v6208_v25, %v6165_v51 }
 0x21b   : > { %6746 = vrot.lane.b32.xlu1 %v12635_v28, %s13280_s11  ;;  %v4508_v44 = vpop.permute.xlu0 %4507  ;;  %v6514_v28 = vrot.slane %v12643_v53, 2  ;;  %v6210_v53 = vld [vmem:[#allocation2 + $0xf0] sm:$0x8] }
 0x21c   : > { %v4698_v1 = vpop.permute.xlu1 %4697  ;;  %v4771_v11 = vsel %vm683_vm7, %v10973_v46, %v4508_v44  ;;  %v12641_v44 = vld [vmem:[#allocation2 + $0x68] ss:$0 sps:$4 sm:$0x11]  }
 0x21d   : > { %6744 = vrot.lane.b32.xlu0 %v12637_v60, %s13280_s11  ;;  %v4858_v12 = vsel %vm1644_vm11, %v4768_v52, %v4698_v1  ;;  %v6515_v47 = vsel %vm1725_vm10, %v6513_v2, %v6514_v28  ;;  %v12649_v52 = vld [vmem:[#allocation2 + $0xc4] sm:$0xfe]   ;;  %v12650_v1 = vld [vmem:[#allocation2 + $0xdc] ss:$0 sps:$4 sm:$0x11]  }
 0x21e   : > { %v4950_v23 = vrot.slane %v4858_v12, 1  ;;  %v12652_v12 = vld [vmem:[#allocation2 + $0xe8] ss:$0 sps:$4 sm:$0x77]  }
 0x21f   : > { %6750 = vrot.lane.b32.xlu1 %v12638_v20, %s13280_s11  ;;  %v4696_v6 = vpop.permute.xlu0 %4695  ;;  %v15521_v34 = vpop.f32.mrb[32].mxu0 }
 0x220   : > { %v4856_v4 = vsel %vm1644_vm11, %v4765_v54, %v4696_v6  ;;  %v4702_v63 = vpop.permute.xlu1 %4701  ;;  %v13093_v54 = vld [vmem:[#allocation2 + $0x64] sm:$0xf] }
 0x221   : > { %v4949_v14 = vrot.slane %v4856_v4, 1  ;;  %6748 = vrot.lane.b32.xlu0 %v12639_v38, %s13280_s11  ;;  %v4862_v43 = vsel %vm1644_vm11, %v4774_v58, %v4702_v63  ;;  %v15524_v38 = vpop.f32.mrb[33].mxu0  ;;  %v10975_v41 = vcombine.low %v4107_v30, %v13093_v54  ;;  %v4110_v4 = vld [vmem:[#allocation2 + $0x70] sm:$0xe]  ;;  %v12651_v63 = vld [vmem:[#allocation2 + $0xd4] sm:$0xfe]  }
 0x222   : > { %v4953_v60 = vrot.slane %v4862_v43, 1  ;;  %v15527_v27 = vpop.f32.mrb[34].mxu0 }
 0x223   : > { %6562 = vrot.lane.b32.xlu1 %v6511_v18, %s13279_s10  ;;  %v4700_v57 = vpop.permute.xlu0 %4699  ;;  %v4951_v5 = vsel %vm1339_vm6, %v4949_v14, %v4950_v23  ;;  %v15530_v46 = vpop.f32.mrb[35].mxu0  ;;  %v6168_v18 = vld [vmem:[#allocation2 + $0xf4] sm:$0xf]  ;;  %v12645_v23 = vld [vmem:[#allocation2 + $0x78] ss:$0 sps:$4 sm:$0x11]  }
 0x224   : > { %v4860_v48 = vsel %vm1644_vm11, %v4771_v11, %v4700_v57  ;;  %11959 = vmatprep.mubr.msk.bf16.mxu0 %vm2536_vm12, %v4951_v5  ;;  %v4514_v20 = vpop.permute.xlu1 %4513  ;;  %v11207_v2 = vcombine.low %v6210_v53, %v6168_v18  ;;  %v13094_v57 = vld [vmem:[#allocation2 + $0x74] sm:$0xf] }
 0x225   : > { %v4952_v17 = vrot.slane %v4860_v48, 1  ;;  %6560 = vrot.lane.b32.xlu0 %v6512_v35, %s13279_s10  ;;  %v4780_v58 = vsel %vm683_vm7, %v12641_v44, %v4514_v20  ;;  %v6516_v35 = vrot.slane %v11205_v13, 2  ;;  %v10977_v5 = vcombine.low %v4110_v4, %v13094_v57 }
 0x226   : > { %v6517_v48 = vrot.slane %v12652_v12, 2 }
 0x227   : > { %6566 = vrot.lane.b32.xlu1 %v6514_v28, %s13279_s10  ;;  %v4512_v8 = vpop.permute.xlu0 %4511  ;;  %v4954_v40 = vsel %vm1339_vm6, %v4952_v17, %v4953_v60  ;;  %v12655_v60 = vld [vmem:[#allocation2 + $0xf8] ss:$0 sps:$4 sm:$0x77]  }
 0x228   : > { %11960 = vmatmul.mubr.msk.bf16.gmra.mrb[64].mxu0 %vm2536_vm12, %v4954_v40  ;;  %v4777_v11 = vsel %vm683_vm7, %v10975_v41, %v4512_v8  ;;  %v15538_v20 = vpop.f32.mrb[36].mxu0  ;;  %v6518_v30 = vsel %vm1725_vm10, %v6516_v35, %v6517_v48  ;;  %v6520_v54 = vrot.slane %v12655_v60, 2  ;;  %v12653_v35 = vld [vmem:[#allocation2 + $0x88] ss:$0 sps:$4 sm:$0x11]  }
 0x229   : > { %v4518_v26 = vpop.permute.xlu1 %4517  ;;  %6564 = vrot.lane.b32.xlu0 %v6515_v47, %s13279_s10  ;;  %v15541_v25 = vpop.f32.mrb[37].mxu0 }
 0x22a   : > { %v4786_v47 = vsel %vm683_vm7, %v12645_v23, %v4518_v26  ;;  %v15545_v44 = vpop.f32.mrb[38].mxu0 }
 0x22b   : > { %6754 = vrot.lane.b32.xlu1 %v12647_v24, %s13280_s11  ;;  %v4516_v6 = vpop.permute.xlu0 %4515  ;;  %v15550_v12 = vpop.f32.mrb[39].mxu0 }
 0x22d   : > { %v4706_v14 = vpop.permute.xlu1 %4705  ;;  %6752 = vrot.lane.b32.xlu0 %v12649_v52, %s13280_s11  ;;  %v6519_v52 = vrot.slane %v11207_v2, 2  ;;  %v4113_v2 = vld [vmem:[#allocation2 + $0x80] sm:$0xe] }
 0x22e   : > { %v4866_v43 = vsel %vm1644_vm11, %v4780_v58, %v4706_v14 }
 0x22f   : > { %6758 = vrot.lane.b32.xlu1 %v12650_v1, %s13280_s11  ;;  %v4704_v28 = vpop.permute.xlu0 %4703  ;;  %v4956_v24 = vrot.slane %v4866_v43, 1  ;;  %v4783_v1 = vsel %vm683_vm7, %v10977_v5, %v4516_v6  ;;  %v6521_v58 = vsel %vm1725_vm10, %v6519_v52, %v6520_v54  ;;  %v12659_v6 = vld [vmem:[#allocation2 + $0xec] ss:$0 sps:$4 sm:$0x11]   ;;  %v6212_v43 = vld [vmem:[#allocation2 + $0x100] sm:$0x8] }
 0x230   : > { %v4864_v17 = vsel %vm1644_vm11, %v4777_v11, %v4704_v28  ;;  %v15559_v11 = vpop.f32.mrb[40].mxu0  ;;  %v12661_v28 = vld [vmem:[#allocation2 + $0xe4] sm:$0xfe]   ;;  %v6214_v52 = vld [vmem:[#allocation2 + $0x110] sm:$0x8] }
 0x231   : > { %v4955_v40 = vrot.slane %v4864_v17, 1  ;;  %v4710_v51 = vpop.permute.xlu1 %4709  ;;  %6756 = vrot.lane.b32.xlu0 %v12651_v63, %s13280_s11  ;;  %v6171_v63 = vld [vmem:[#allocation2 + $0x104] sm:$0xf]  ;;  %v15562_v5 = vpop.f32.mrb[41].mxu0 }
 0x232   : > { %v4870_v8 = vsel %vm1644_vm11, %v4786_v47, %v4710_v51  ;;  %v15565_v60 = vpop.f32.mrb[42].mxu0  ;;  %v12664_v17 = vld [vmem:[#allocation2 + $0x108] ss:$0 sps:$4 sm:$0x77]   ;;  %v11209_v47 = vcombine.low %v6212_v43, %v6171_v63 }
 0x233   : > { %6570 = vrot.lane.b32.xlu1 %v6517_v48, %s13279_s10  ;;  %v4708_v26 = vpop.permute.xlu0 %4707  ;;  %v4957_v13 = vsel %vm1339_vm6, %v4955_v40, %v4956_v24  ;;  %v4959_v18 = vrot.slane %v4870_v8, 1  ;;  %v12662_v48 = vld [vmem:[#allocation2 + $0xfc] ss:$0 sps:$4 sm:$0x11]   ;;  %v13095_v24 = vld [vmem:[#allocation2 + $0x84] sm:$0xf] }
 0x234   : > { %v4868_v41 = vsel %vm1644_vm11, %v4783_v1, %v4708_v26  ;;  %11963 = vmatprep.mubr.msk.bf16.mxu0 %vm2536_vm12, %v4957_v13  ;;  %v10979_v40 = vcombine.low %v4113_v2, %v13095_v24  ;;  %v15568_v51 = vpop.f32.mrb[43].mxu0  ;;  %v4116_v1 = vld [vmem:[#allocation2 + $0x90] sm:$0xe]  ;;  %v12657_v13 = vld [vmem:[#allocation2 + $0x98] ss:$0 sps:$4 sm:$0x11]  }
 0x235   : > { %v4958_v53 = vrot.slane %v4868_v41, 1  ;;  %v4522_v4 = vpop.permute.xlu1 %4521  ;;  %6568 = vrot.lane.b32.xlu0 %v6518_v30, %s13279_s10  ;;  %v6174_v30 = vld [vmem:[#allocation2 + $0x114] sm:$0xf]  ;;  %v6523_v2 = vrot.slane %v12664_v17, 2 }
 0x236   : > { %v4792_v26 = vsel %vm683_vm7, %v12653_v35, %v4522_v4  ;;  %v12663_v41 = vld [vmem:[#allocation2 + $0xf4] sm:$0xfe]  }
 0x237   : > { %6574 = vrot.lane.b32.xlu1 %v6520_v54, %s13279_s10  ;;  %v4520_v23 = vpop.permute.xlu0 %4519  ;;  %v4960_v14 = vsel %vm1339_vm6, %v4958_v53, %v4959_v18  ;;  %v6522_v53 = vrot.slane %v11209_v47, 2  ;;  %v12667_v24 = vld [vmem:[#allocation2 + $0x118] ss:$0 sps:$4 sm:$0x77]  }
 0x238   : > { %11964 = vmatmul.mubr.msk.bf16.gmra.mrb[68].mxu0 %vm2536_vm12, %v4960_v14  ;;  %v4789_v14 = vsel %vm683_vm7, %v10979_v40, %v4520_v23 }
 0x239   : > { %v4526_v57 = vpop.permute.xlu1 %4525  ;;  %6572 = vrot.lane.b32.xlu0 %v6521_v58, %s13279_s10  ;;  %v11211_v58 = vcombine.low %v6214_v52, %v6174_v30 }
 0x23b   : > { %6762 = vrot.lane.b32.xlu1 %v12659_v6, %s13280_s11  ;;  %v4524_v8 = vpop.permute.xlu0 %4523  ;;  %v13096_v6 = vld [vmem:[#allocation2 + $0x94] sm:$0xf]  ;;  %v6525_v17 = vrot.slane %v11211_v58, 2 }
 0x23c   : > { %v10981_v63 = vcombine.low %v4116_v1, %v13096_v6 }
 0x23d   : > { %v4714_v54 = vpop.permute.xlu1 %4713  ;;  %6760 = vrot.lane.b32.xlu0 %v12661_v28, %s13280_s11  ;;  %v15576_v35 = vpop.f32.mrb[44].mxu0  ;;  %v4798_v28 = vsel %vm683_vm7, %v12657_v13, %v4526_v57  ;;  %v6526_v13 = vrot.slane %v12667_v24, 2 }
 0x23e   : > { %v4874_v18 = vsel %vm1644_vm11, %v4792_v26, %v4714_v54  ;;  %v15579_v47 = vpop.f32.mrb[45].mxu0  ;;  %v4795_v30 = vsel %vm683_vm7, %v10981_v63, %v4524_v8  ;;  %v12671_v8 = vld [vmem:[#allocation2 + $0x10c] ss:$0 sps:$4 sm:$0x11]   ;;  %v6177_v63 = vld [vmem:[#allocation2 + $0x124] sm:$0xf] }
 0x23f   : > { %6766 = vrot.lane.b32.xlu1 %v12662_v48, %s13280_s11  ;;  %v4712_v43 = vpop.permute.xlu0 %4711  ;;  %v4962_v45 = vrot.slane %v4874_v18, 1  ;;  %v15583_v40 = vpop.f32.mrb[46].mxu0  ;;  %v6524_v48 = vsel %vm1725_vm10, %v6522_v53, %v6523_v2  ;;  %v6527_v53 = vsel %vm1725_vm10, %v6525_v17, %v6526_v13 }
 0x240   : > { %v4872_v4 = vsel %vm1644_vm11, %v4789_v14, %v4712_v43  ;;  %v15588_v52 = vpop.f32.mrb[47].mxu0  ;;  %v4119_v43 = vld [vmem:[#allocation2 + $0xa0] sm:$0xe] }
 0x241   : > { %v4961_v55 = vrot.slane %v4872_v4, 1  ;;  %v4718_v26 = vpop.permute.xlu1 %4717  ;;  %6764 = vrot.lane.b32.xlu0 %v12663_v41, %s13280_s11 }
 0x242   : > { %v4878_v23 = vsel %vm1644_vm11, %v4798_v28, %v4718_v26  ;;  %v12673_v28 = vld [vmem:[#allocation2 + $0x104] sm:$0xfe]   ;;  %v12674_v26 = vld [vmem:[#allocation2 + $0x11c] ss:$0 sps:$4 sm:$0x11]  }
 0x243   : > { %6578 = vrot.lane.b32.xlu1 %v6523_v2, %s13279_s10  ;;  %v4716_v57 = vpop.permute.xlu0 %4715  ;;  %v4963_v1 = vsel %vm1339_vm6, %v4961_v55, %v4962_v45  ;;  %v4965_v41 = vrot.slane %v4878_v23, 1  ;;  %v6216_v45 = vld [vmem:[#allocation2 + $0x120] sm:$0x8]  ;;  %v12665_v55 = vld [vmem:[#allocation2 + $0xa8] ss:$0 sps:$4 sm:$0x11]  }
 0x244   : > { %v4876_v54 = vsel %vm1644_vm11, %v4795_v30, %v4716_v57  ;;  %11967 = vmatprep.mubr.msk.bf16.mxu0 %vm2536_vm12, %v4963_v1  ;;  %v11213_v17 = vcombine.low %v6216_v45, %v6177_v63  ;;  %v13097_v30 = vld [vmem:[#allocation2 + $0xa4] sm:$0xf] }
 0x245   : > { %v4964_v18 = vrot.slane %v4876_v54, 1  ;;  %v4530_v14 = vpop.permute.xlu1 %4529  ;;  %6576 = vrot.lane.b32.xlu0 %v6524_v48, %s13279_s10  ;;  %v15597_v2 = vpop.f32.mrb[48].mxu0  ;;  %v12676_v48 = vld [vmem:[#allocation2 + $0x128] ss:$0 sps:$4 sm:$0x77]   ;;  %v10983_v57 = vcombine.low %v4119_v43, %v13097_v30 }
 0x246   : > { %v15600_v4 = vpop.f32.mrb[49].mxu0  ;;  %v6180_v54 = vld [vmem:[#allocation2 + $0x134] sm:$0xf]  ;;  %v6528_v63 = vrot.slane %v11213_v17, 2  ;;  %v6529_v39 = vrot.slane %v12676_v48, 2 }
 0x247   : > { %6582 = vrot.lane.b32.xlu1 %v6526_v13, %s13279_s10  ;;  %v4528_v58 = vpop.permute.xlu0 %4527  ;;  %v4966_v6 = vsel %vm1339_vm6, %v4964_v18, %v4965_v41  ;;  %v15603_v23 = vpop.f32.mrb[50].mxu0  ;;  %v6218_v41 = vld [vmem:[#allocation2 + $0x130] sm:$0x8] }
 0x248   : > { %11968 = vmatmul.mubr.msk.bf16.gmra.mrb[72].mxu0 %vm2536_vm12, %v4966_v6  ;;  %17386 = vst [vmem:[#allocation68_spill] sm:$0xff] %v15603_v23  ;;  %v15606_v1 = vpop.f32.mrb[51].mxu0  ;;  %v4122_v18 = vld [vmem:[#allocation2 + $0xb0] sm:$0xe]  ;;  %v4804_v6 = vsel %vm683_vm7, %v12665_v55, %v4530_v14  ;;  %v11215_v45 = vcombine.low %v6218_v41, %v6180_v54  ;;  %v4801_v43 = vsel %vm683_vm7, %v10983_v57, %v4528_v58 }
 0x249   : > { %v4534_v24 = vpop.permute.xlu1 %4533  ;;  %6580 = vrot.lane.b32.xlu0 %v6527_v53, %s13279_s10  ;;  %17387 = vst [vmem:[#allocation69_spill] sm:$0xff] %v15606_v1 }
 0x24a   : > { %v6531_v48 = vrot.slane %v11215_v45, 2  ;;  %v12683_v45 = vld [vmem:[#allocation2 + $0x12c] ss:$0 sps:$4 sm:$0x11]  }
 0x24b   : > { %6770 = vrot.lane.b32.xlu1 %v12671_v8, %s13280_s11  ;;  %v4532_v13 = vpop.permute.xlu0 %4531  ;;  %v13098_v8 = vld [vmem:[#allocation2 + $0xb4] sm:$0xf] }
 0x24c   : > { %v10985_v30 = vcombine.low %v4122_v18, %v13098_v8 }
 0x24d   : > { %v4722_v53 = vpop.permute.xlu1 %4721  ;;  %6768 = vrot.lane.b32.xlu0 %v12673_v28, %s13280_s11  ;;  %v4810_v28 = vsel %vm683_vm7, %v12669_v36, %v4534_v24  ;;  %v6532_v24 = vrot.slane %v12679_v10, 2 }
 0x24e   : > { %v4882_v56 = vsel %vm1644_vm11, %v4804_v6, %v4722_v53  ;;  %v15614_v55 = vpop.f32.mrb[52].mxu0 }
 0x24f   : > { %6774 = vrot.lane.b32.xlu1 %v12674_v26, %s13280_s11  ;;  %v4720_v29 = vpop.permute.xlu0 %4719  ;;  %17388 = vst [vmem:[#allocation70_spill] sm:$0xff] %v15614_v55  ;;  %v4968_v0 = vrot.slane %v4882_v56, 1  ;;  %v15617_v17 = vpop.f32.mrb[53].mxu0  ;;  %v6530_v26 = vsel %vm1725_vm10, %v6528_v63, %v6529_v39 }
 0x250   : > { %v4880_v14 = vsel %vm1644_vm11, %v4801_v43, %v4720_v29  ;;  %17389 = vst [vmem:[#allocation72_spill] sm:$0xff] %v15617_v17  ;;  %v15621_v57 = vpop.f32.mrb[54].mxu0  ;;  %v4807_v29 = vsel %vm683_vm7, %v10985_v30, %v4532_v13  ;;  %v3048_v13 = vld [vmem:[#allocation2 + $0x88] sm:$0xf]  ;;  %v4125_v43 = vld [vmem:[#allocation2 + $0xc0] sm:$0xe] }
 0x251   : > { %v4967_v22 = vrot.slane %v4880_v14, 1  ;;  %v4726_v6 = vpop.permute.xlu1 %4725  ;;  %6772 = vrot.lane.b32.xlu0 %v12675_v21, %s13280_s11  ;;  %17390 = vst [vmem:[#allocation21_spill] sm:$0xff] %v15621_v57  ;;  %v15626_v54 = vpop.f32.mrb[55].mxu0  ;;  %v12772_v21 = vld [vmem:[%s17132_s2 + $0x10] sm:$0x3f]  }
 0x252   : > { %v4886_v58 = vsel %vm1644_vm11, %v4810_v28, %v4726_v6  ;;  %17391 = vst [vmem:[#allocation78_spill] sm:$0xff] %v15626_v54  ;;  %12326 = vmatprep.subr.msk.bf16.mxu1 %vm1725_vm10, %v12772_v21  ;;  %v3049_v30 = vld [vmem:[#allocation2 + $0x98] sm:$0xf]  ;;  %v12677_v14 = vld [vmem:[#allocation2 + $0xc8] ss:$0 sps:$4 sm:$0x11]  }
 0x253   : > { %6586 = vrot.lane.b32.xlu1 %v6529_v39, %s13279_s10  ;;  %v4724_v56 = vpop.permute.xlu0 %4723  ;;  %v4969_v36 = vsel %vm1339_vm6, %v4967_v22, %v4968_v0  ;;  %v4971_v18 = vrot.slane %v4886_v58, 1  ;;  %v6533_v39 = vsel %vm1725_vm10, %v6531_v48, %v6532_v24  ;;  %v3777_v22 = vsel %vm1725_vm10, %v12772_v21, 0  ;;  %v12685_v58 = vld [vmem:[#allocation2 + $0x124] sm:$0xfe]  }
 0x254   : > { %v4884_v41 = vsel %vm1644_vm11, %v4807_v29, %v4724_v56  ;;  %11971 = vmatprep.mubr.msk.bf16.mxu0 %vm2536_vm12, %v4969_v36  ;;  %11886 = vmatpush3.bf16.msra.mxu1 %v3777_v22  ;;  %v12686_v56 = vld [vmem:[#allocation2 + $0x134] sm:$0xfe]   ;;  %v13100_v36 = vld [vmem:[#allocation2 + $0xc4] sm:$0xf]  ;;  %v6220_v22 = vld [vmem:[#allocation2 + $0x140] sm:$0x8] }
 0x255   : > { %v4970_v53 = vrot.slane %v4884_v41, 1  ;;  %v4538_v63 = vpop.permute.xlu1 %4537  ;;  %6584 = vrot.lane.b32.xlu0 %v6530_v26, %s13279_s10  ;;  %v15646_v26 = vld [vmem:[#allocation2 + $0x84] sm:$0xf]  ;;  %v12712_v54 = vld [vmem:[#allocation2 + $0x178] ss:$0 sps:$4 sm:$0x77]  }
 0x256   : > { %v15640_v8 = vpop.f32.mrb[56].mxu0  ;;  %v10931_v48 = vcombine.low %v15646_v26, %v3048_v13  ;;  %v4816_v32 = vsel %vm683_vm7, %v12677_v14, %v4538_v63  ;;  %v12681_v13 = vld [vmem:[#allocation2 + $0xd8] ss:$0 sps:$4 sm:$0x11]  }
 0x257   : > { %6590 = vrot.lane.b32.xlu1 %v6532_v24, %s13279_s10  ;;  %v4536_v0 = vpop.permute.xlu0 %4535  ;;  %v4972_v10 = vsel %vm1339_vm6, %v4970_v53, %v4971_v18  ;;  %17392 = vst [vmem:[#allocation44_spill] sm:$0xff] %v15640_v8  ;;  %v15643_v6 = vpop.f32.mrb[57].mxu0  ;;  %v10987_v24 = vcombine.low %v4125_v43, %v13100_v36  ;;  %v15654_v18 = vld [vmem:[#allocation2 + $0x94] sm:$0xf] }
 0x258   : > { %11972 = vmatmul.mubr.msk.bf16.gmra.mrb[76].mxu0 %vm2536_vm12, %v4972_v10  ;;  %17393 = vst [vmem:[#allocation45_spill] sm:$0xff] %v15643_v6  ;;  %v15649_v29 = vpop.f32.mrb[58].mxu0  ;;  %v10932_v53 = vcombine.low %v15654_v18, %v3049_v30  ;;  %v4128_v10 = vld [vmem:[#allocation2 + $0xd0] sm:$0xe]  ;;  %v3448_v19 = vrot.slane %v10931_v48, 6 }
 0x259   : > { %v4542_v28 = vpop.permute.xlu1 %4541  ;;  %6588 = vrot.lane.b32.xlu0 %v6533_v39, %s13279_s10  ;;  %17394 = vst [vmem:[#allocation75_spill] sm:$0xff] %v15649_v29  ;;  %v15652_v41 = vpop.f32.mrb[59].mxu0  ;;  %v6183_v39 = vld [vmem:[#allocation2 + $0x144] sm:$0xf]  ;;  %v4813_v31 = vsel %vm683_vm7, %v10987_v24, %v4536_v0  ;;  %v10989_v33 = vcombine.low %v4128_v10, %v13102_v9  ;;  %v6186_v29 = vld [vmem:[#allocation2 + $0x154] sm:$0xf] }
 0x25a   : > { %17395 = vst [vmem:[#allocation25_spill] sm:$0xff] %v15652_v41  ;;  %v11217_v36 = vcombine.low %v6220_v22, %v6183_v39  ;;  %v3449_v41 = vrot.slane %v10932_v53, 6  ;;  %v6222_v6 = vld [vmem:[#allocation2 + $0x150] sm:$0x8]  ;;  %v4822_v14 = vsel %vm683_vm7, %v12681_v13, %v4542_v28 }
 0x25b   : > { %6778 = vrot.lane.b32.xlu1 %v12683_v45, %s13280_s11  ;;  %v4540_v21 = vpop.permute.xlu0 %4539  ;;  %v12689_v45 = vld [vmem:[#allocation2 + $0x148] ss:$0 sps:$4 sm:$0x77]   ;;  %v11219_v9 = vcombine.low %v6222_v6, %v6186_v29  ;;  %v12693_v39 = vld [vmem:[#allocation2 + $0x158] ss:$0 sps:$4 sm:$0x77]  }
 0x25c   : > { %v6534_v0 = vrot.slane %v11217_v36, 2  ;;  %v3022_v13 = vld [vmem:[#allocation2 + $0xb0] sm:$0x8] }
 0x25d   : > { %v4730_v3 = vpop.permute.xlu1 %4729  ;;  %6776 = vrot.lane.b32.xlu0 %v12685_v58, %s13280_s11  ;;  %v6537_v6 = vrot.slane %v11219_v9, 2 }
 0x25e   : > { %v4890_v43 = vsel %vm1644_vm11, %v4816_v32, %v4730_v3  ;;  %v12688_v3 = vld [vmem:[#allocation2 + $0x13c] ss:$0 sps:$4 sm:$0x11]  }
 0x25f   : > { %6780 = vrot.lane.b32.xlu1 %v12686_v56, %s13280_s11  ;;  %v4728_v30 = vpop.permute.xlu0 %4727  ;;  %v4974_v58 = vrot.slane %v4890_v43, 1  ;;  %v4819_v56 = vsel %vm683_vm7, %v10989_v33, %v4540_v21  ;;  %v2978_v21 = vld [vmem:[#allocation2 + $0xb4] sm:$0xf]  ;;  %v4131_v43 = vld [vmem:[#allocation2 + $0xe0] sm:$0xe] }
 0x260   : > { %v4888_v63 = vsel %vm1644_vm11, %v4813_v31, %v4728_v30  ;;  %v6535_v31 = vrot.slane %v12689_v45, 2  ;;  %v12687_v45 = vld [vmem:[#allocation2 + $0xe8] ss:$0 sps:$4 sm:$0x11]  }
 0x261   : > { %v4973_v48 = vrot.slane %v4888_v63, 1  ;;  %v4734_v8 = vpop.permute.xlu1 %4733  ;;  %3464 = vrot.lane.b32.xlu0 %v3448_v19, %s13280_s11  ;;  %v10905_v63 = vcombine.low %v3022_v13, %v2978_v21 }
 0x262   : > { %v4894_v32 = vsel %vm1644_vm11, %v4822_v14, %v4734_v8  ;;  %v6536_v8 = vsel %vm1725_vm10, %v6534_v0, %v6535_v31  ;;  %v13103_v14 = vld [vmem:[#allocation2 + $0xe4] sm:$0xf]  ;;  %v4134_v0 = vld [vmem:[#allocation2 + $0xf0] sm:$0xe] }
 0x263   : > { %3466 = vrot.lane.b32.xlu1 %v3449_v41, %s13280_s11  ;;  %v4732_v24 = vpop.permute.xlu0 %4731  ;;  %v4975_v53 = vsel %vm1339_vm6, %v4973_v48, %v4974_v58  ;;  %v4977_v22 = vrot.slane %v4894_v32, 1  ;;  %v6538_v41 = vrot.slane %v12693_v39, 2  ;;  %v10991_v58 = vcombine.low %v4131_v43, %v13103_v14  ;;  %v12698_v32 = vld [vmem:[#allocation2 + $0xb8] ss:$0 sps:$4 sm:$0x77]  }
 0x264   : > { %v4892_v28 = vsel %vm1644_vm11, %v4819_v56, %v4732_v24  ;;  %11975 = vmatprep.mubr.msk.bf16.mxu0 %vm2536_vm12, %v4975_v53  ;;  %v12691_v56 = vld [vmem:[#allocation2 + $0xf8] ss:$0 sps:$4 sm:$0x11]   ;;  %v12697_v53 = vld [vmem:[#allocation2 + $0x144] sm:$0xfe]   ;;  %v3297_v39 = vrot.slane %v10905_v63, 1 }
 0x265   : > { %v4976_v19 = vrot.slane %v4892_v28, 1  ;;  %v4546_v10 = vpop.permute.xlu1 %4545  ;;  %6782 = vrot.lane.b32.xlu0 %v12688_v3, %s13280_s11  ;;  %v6539_v30 = vsel %vm1725_vm10, %v6537_v6, %v6538_v41  ;;  %v12696_v3 = vld [vmem:[#allocation2 + $0x14c] ss:$0 sps:$4 sm:$0x11]   ;;  %v3050_v28 = vld [vmem:[#allocation2 + $0xa8] sm:$0xf] }
 0x266   : > { %v4828_v9 = vsel %vm683_vm7, %v12687_v45, %v4546_v10  ;;  %v3051_v10 = vld [vmem:[#allocation2 + $0xb8] sm:$0xf]  ;;  %v15687_v63 = vld [vmem:[#allocation2 + $0xa4] sm:$0xf] }
 0x267   : > { %6594 = vrot.lane.b32.xlu1 %v6535_v31, %s13279_s10  ;;  %v4544_v33 = vpop.permute.xlu0 %4543  ;;  %v4978_v29 = vsel %vm1339_vm6, %v4976_v19, %v4977_v22  ;;  %v13104_v19 = vld [vmem:[#allocation2 + $0xf4] sm:$0xf] }
 0x268   : > { %11976 = vmatmul.mubr.msk.bf16.gmra.mrb[80].mxu0 %vm2536_vm12, %v4978_v29  ;;  %v4825_v22 = vsel %vm683_vm7, %v10991_v58, %v4544_v33  ;;  %v3298_v29 = vrot.slane %v12698_v32, 1  ;;  %v10933_v33 = vcombine.low %v15687_v63, %v3050_v28 }
 0x269   : > { %v4550_v36 = vpop.permute.xlu1 %4549  ;;  %6592 = vrot.lane.b32.xlu0 %v6536_v8, %s13279_s10  ;;  %v10993_v8 = vcombine.low %v4134_v0, %v13104_v19  ;;  %v12701_v0 = vld [vmem:[#allocation2 + $0x154] sm:$0xfe]  }
 0x26a   : > { %v4834_v13 = vsel %vm683_vm7, %v12691_v56, %v4550_v36  ;;  %v3299_v58 = vsel %vm1339_vm6, %v3297_v39, %v3298_v29  ;;  %v6189_v56 = vld [vmem:[#allocation2 + $0x164] sm:$0xf]  ;;  %v3450_v39 = vrot.slane %v10933_v33, 6  ;;  %v12709_v33 = vld [vmem:[#allocation2 + $0xc8] ss:$0 sps:$4 sm:$0x77]  }
 0x26b   : > { %6598 = vrot.lane.b32.xlu1 %v6538_v41, %s13279_s10  ;;  %v4548_v48 = vpop.permute.xlu0 %4547 }
 0x26d   : > { %v4738_v24 = vpop.permute.xlu1 %4737  ;;  %6596 = vrot.lane.b32.xlu0 %v6539_v30, %s13279_s10 }
 0x26e   : > { %v4898_v31 = vsel %vm1644_vm11, %v4828_v9, %v4738_v24  ;;  %v10934_v9 = vcombine.low %v2978_v21, %v3051_v10  ;;  %v6224_v24 = vld [vmem:[#allocation2 + $0x160] sm:$0x8] }
 0x26f   : > { %6786 = vrot.lane.b32.xlu1 %v12696_v3, %s13280_s11  ;;  %v4736_v6 = vpop.permute.xlu0 %4735  ;;  %v4980_v43 = vrot.slane %v4898_v31, 1  ;;  %v4831_v3 = vsel %vm683_vm7, %v10993_v8, %v4548_v48  ;;  %v12707_v48 = vld [vmem:[#allocation2 + $0x168] ss:$0 sps:$4 sm:$0x77]   ;;  %v11221_v19 = vcombine.low %v6224_v24, %v6189_v56  ;;  %v4137_v10 = vld [vmem:[#allocation2 + $0x100] sm:$0xe] }
 0x270   : > { %v4896_v41 = vsel %vm1644_vm11, %v4825_v22, %v4736_v6  ;;  %v3451_v21 = vrot.slane %v10934_v9, 6  ;;  %v6226_v9 = vld [vmem:[#allocation2 + $0x170] sm:$0x8] }
 0x271   : > { %v4979_v45 = vrot.slane %v4896_v41, 1  ;;  %v4742_v30 = vpop.permute.xlu1 %4741  ;;  %6784 = vrot.lane.b32.xlu0 %v12697_v53, %s13280_s11  ;;  %v3024_v41 = vld [vmem:[#allocation2 + $0xc0] sm:$0x8]  ;;  %v4140_v56 = vld [vmem:[#allocation2 + $0x110] sm:$0xe] }
 0x272   : > { %v4902_v14 = vsel %vm1644_vm11, %v4834_v13, %v4742_v30  ;;  %v12699_v13 = vld [vmem:[#allocation2 + $0x108] ss:$0 sps:$4 sm:$0x11]   ;;  %v6540_v30 = vrot.slane %v11221_v19, 2 }
 0x273   : > { %3350 = vrot.lane.b32.xlu1 %v3298_v29, %s13279_s10  ;;  %v4740_v32 = vpop.permute.xlu0 %4739  ;;  %v4981_v36 = vsel %vm1339_vm6, %v4979_v45, %v4980_v43  ;;  %v4983_v31 = vrot.slane %v4902_v14, 1  ;;  %v15700_v29 = vld [vmem:[#allocation2 + $0xc4] sm:$0xf]  ;;  %v12706_v45 = vld [vmem:[#allocation2 + $0x15c] ss:$0 sps:$4 sm:$0x11]  }
 0x274   : > { %v4900_v53 = vsel %vm1644_vm11, %v4831_v3, %v4740_v32  ;;  %11979 = vmatprep.mubr.msk.bf16.mxu0 %vm2536_vm12, %v4981_v36  ;;  %v10907_v14 = vcombine.low %v3024_v41, %v15700_v29  ;;  %v6541_v36 = vrot.slane %v12707_v48, 2 }
 0x275   : > { %v4982_v28 = vrot.slane %v4900_v53, 1  ;;  %v4554_v22 = vpop.permute.xlu1 %4553  ;;  %3348 = vrot.lane.b32.xlu0 %v3299_v58, %s13279_s10  ;;  %v13106_v58 = vld [vmem:[#allocation2 + $0x104] sm:$0xf]  ;;  %v12703_v53 = vld [vmem:[#allocation2 + $0x118] ss:$0 sps:$4 sm:$0x11]  }
 0x276   : > { %v10995_v3 = vcombine.low %v4137_v10, %v13106_v58  ;;  %v4840_v24 = vsel %vm683_vm7, %v12699_v13, %v4554_v22  ;;  %v3300_v19 = vrot.slane %v10907_v14, 1  ;;  %v3301_v58 = vrot.slane %v12709_v33, 1 }
 0x277   : > { %6788 = vrot.lane.b32.xlu1 %v12701_v0, %s13280_s11  ;;  %v4552_v8 = vpop.permute.xlu0 %4551  ;;  %v4984_v6 = vsel %vm1339_vm6, %v4982_v28, %v4983_v31  ;;  %v6192_v0 = vld [vmem:[#allocation2 + $0x174] sm:$0xf] }
 0x278   : > { %11980 = vmatmul.mubr.msk.bf16.gmra.mrb[84].mxu0 %vm2536_vm12, %v4984_v6  ;;  %v11223_v6 = vcombine.low %v6226_v9, %v6192_v0  ;;  %v4837_v41 = vsel %vm683_vm7, %v10995_v3, %v4552_v8  ;;  %v3302_v8 = vsel %vm1339_vm6, %v3300_v19, %v3301_v58  ;;  %v6544_v0 = vrot.slane %v12712_v54, 2  ;;  %v2984_v9 = vld [vmem:[#allocation2 + $0xd4] sm:$0xf]  ;;  %v12716_v54 = vld [vmem:[#allocation2 + $0x16c] ss:$0 sps:$4 sm:$0x11]  }
 0x279   : > { %v4558_v43 = vpop.permute.xlu1 %4557  ;;  %3468 = vrot.lane.b32.xlu0 %v3450_v39, %s13280_s11  ;;  %v6542_v39 = vsel %vm1725_vm10, %v6540_v30, %v6541_v36 }
 0x27a   : > { %v4846_v13 = vsel %vm683_vm7, %v12703_v53, %v4558_v43  ;;  %v6543_v14 = vrot.slane %v11223_v6, 2  ;;  %v3026_v43 = vld [vmem:[#allocation2 + $0xd0] sm:$0x8]  ;;  %v12719_v6 = vld [vmem:[#allocation2 + $0xd8] ss:$0 sps:$4 sm:$0x77]  }
 0x27b   : > { %3470 = vrot.lane.b32.xlu1 %v3451_v21, %s13280_s11  ;;  %v4556_v32 = vpop.permute.xlu0 %4555  ;;  %v13107_v21 = vld [vmem:[#allocation2 + $0x114] sm:$0xf] }
 0x27c   : > { %v10997_v10 = vcombine.low %v4140_v56, %v13107_v21  ;;  %v12710_v21 = vld [vmem:[#allocation2 + $0xa8] ss:$0 sps:$4 sm:$0x11]  }
 0x27d   : > { %v4746_v31 = vpop.permute.xlu1 %4745  ;;  %6790 = vrot.lane.b32.xlu0 %v12706_v45, %s13280_s11 }
 0x27e   : > { %v4906_v28 = vsel %vm1644_vm11, %v4840_v24, %v4746_v31  ;;  %v4843_v3 = vsel %vm683_vm7, %v10997_v10, %v4556_v32  ;;  %v10909_v32 = vcombine.low %v3026_v43, %v2984_v9 }
 0x27f   : > { %6602 = vrot.lane.b32.xlu1 %v6541_v36, %s13279_s10  ;;  %v4744_v48 = vpop.permute.xlu0 %4743  ;;  %v4986_v45 = vrot.slane %v4906_v28, 1 }
 0x280   : > { %v4904_v22 = vsel %vm1644_vm11, %v4837_v41, %v4744_v48  ;;  %v6152_v41 = vld [vmem:[#allocation2 + $0xa0] sm:$0xe]  ;;  %v12718_v48 = vld [vmem:[#allocation2 + $0x164] sm:$0xfe]  }
 0x281   : > { %v4985_v57 = vrot.slane %v4904_v22, 1  ;;  %v4750_v24 = vpop.permute.xlu1 %4749  ;;  %6600 = vrot.lane.b32.xlu0 %v6542_v39, %s13279_s10  ;;  %v6545_v39 = vsel %vm1725_vm10, %v6543_v14, %v6544_v0  ;;  %v3052_v22 = vld [vmem:[#allocation2 + $0xc8] sm:$0xf]  ;;  %v3053_v14 = vld [vmem:[#allocation2 + $0xd8] sm:$0xf] }
 0x282   : > { %v4910_v30 = vsel %vm1644_vm11, %v4846_v13, %v4750_v24  ;;  %v13108_v13 = vld [vmem:[#allocation2 + $0xa4] sm:$0xf] }
 0x283   : > { %3354 = vrot.lane.b32.xlu1 %v3301_v58, %s13279_s10  ;;  %v4748_v33 = vpop.permute.xlu0 %4747  ;;  %v4987_v36 = vsel %vm1339_vm6, %v4985_v57, %v4986_v45  ;;  %v4989_v53 = vrot.slane %v4910_v30, 1  ;;  %v3303_v58 = vrot.slane %v10909_v32, 1  ;;  %v11165_v45 = vcombine.low %v6152_v41, %v13108_v13  ;;  %v12729_v13 = vld [vmem:[#allocation2 + $0x188] ss:$0 sps:$4 sm:$0x77]  }
 0x284   : > { %v4908_v56 = vsel %vm1644_vm11, %v4843_v3, %v4748_v33  ;;  %11983 = vmatprep.mubr.msk.bf16.mxu0 %vm2536_vm12, %v4987_v36  ;;  %v3304_v30 = vrot.slane %v12719_v6, 1  ;;  %v12714_v33 = vld [vmem:[#allocation2 + $0xb8] ss:$0 sps:$4 sm:$0x11]   ;;  %v6228_v6 = vld [vmem:[#allocation2 + $0x180] sm:$0x8] }
 0x285   : > { %v4988_v31 = vrot.slane %v4908_v56, 1  ;;  %v6555_v28 = vpop.permute.xlu1 %6554  ;;  %3352 = vrot.lane.b32.xlu0 %v3302_v8, %s13279_s10  ;;  %v6155_v8 = vld [vmem:[#allocation2 + $0xb0] sm:$0xe] }
 0x286   : > { %v6813_v3 = vsel %vm683_vm7, %v12710_v21, %v6555_v28  ;;  %v3305_v56 = vsel %vm1339_vm6, %v3303_v58, %v3304_v30  ;;  %v6195_v28 = vld [vmem:[#allocation2 + $0x184] sm:$0xf] }
 0x287   : > { %6606 = vrot.lane.b32.xlu1 %v6544_v0, %s13279_s10  ;;  %v6553_v19 = vpop.permute.xlu0 %6552  ;;  %v4990_v57 = vsel %vm1339_vm6, %v4988_v31, %v4989_v53  ;;  %v10935_v0 = vcombine.low %v15700_v29, %v3052_v22  ;;  %v13109_v31 = vld [vmem:[#allocation2 + $0xb4] sm:$0xf] }
 0x288   : > { %11984 = vmatmul.mubr.msk.bf16.gmra.mrb[88].mxu0 %vm2536_vm12, %v4990_v57  ;;  %v6810_v53 = vsel %vm683_vm7, %v11165_v45, %v6553_v19  ;;  %v12721_v57 = vld [vmem:[#allocation2 + $0x174] sm:$0xfe]   ;;  %v11225_v45 = vcombine.low %v6228_v6, %v6195_v28  ;;  %v6230_v28 = vld [vmem:[#allocation2 + $0x190] sm:$0x8]  ;;  %v6158_v6 = vld [vmem:[#allocation2 + $0xc0] sm:$0xe] }
 0x289   : > { %v6559_v10 = vpop.permute.xlu1 %6558  ;;  %6604 = vrot.lane.b32.xlu0 %v6545_v39, %s13279_s10  ;;  %v11167_v39 = vcombine.low %v6155_v8, %v13109_v31  ;;  %v3452_v58 = vrot.slane %v10935_v0, 6 }
 0x28a   : > { %v6819_v21 = vsel %vm683_vm7, %v12714_v33, %v6559_v10  ;;  %v3028_v10 = vld [vmem:[#allocation2 + $0xe0] sm:$0x8] }
 0x28b   : > { %6794 = vrot.lane.b32.xlu1 %v12716_v54, %s13280_s11  ;;  %v6557_v24 = vpop.permute.xlu0 %6556  ;;  %v10936_v54 = vcombine.low %v2984_v9, %v3053_v14 }
 0x28d   : > { %v6747_v36 = vpop.permute.xlu1 %6746  ;;  %6792 = vrot.lane.b32.xlu0 %v12718_v48, %s13280_s11  ;;  %v3453_v14 = vrot.slane %v10936_v54, 6  ;;  %v6198_v54 = vld [vmem:[#allocation2 + $0x194] sm:$0xf] }
 0x28e   : > { %v6907_v43 = vsel %vm1644_vm11, %v6813_v3, %v6747_v36  ;;  %v15743_v3 = vld [vmem:[#allocation2 + $0xe4] sm:$0xf] }
 0x28f   : > { %3358 = vrot.lane.b32.xlu1 %v3304_v30, %s13279_s10  ;;  %v6745_v32 = vpop.permute.xlu0 %6744  ;;  %v7001_v29 = vrot.slane %v6907_v43, 1  ;;  %v6816_v30 = vsel %vm683_vm7, %v11167_v39, %v6557_v24  ;;  %v12728_v24 = vld [vmem:[#allocation2 + $0x17c] ss:$0 sps:$4 sm:$0x11]   ;;  %v10911_v31 = vcombine.low %v3028_v10, %v15743_v3 }
 0x290   : > { %v6905_v41 = vsel %vm1644_vm11, %v6810_v53, %v6745_v32  ;;  %v12732_v53 = vld [vmem:[#allocation2 + $0xe8] ss:$0 sps:$4 sm:$0x77]  }
 0x291   : > { %v7000_v48 = vrot.slane %v6905_v41, 1  ;;  %v6751_v22 = vpop.permute.xlu1 %6750  ;;  %3356 = vrot.lane.b32.xlu0 %v3305_v56, %s13279_s10  ;;  %v6546_v56 = vrot.slane %v11225_v45, 2  ;;  %v12723_v41 = vld [vmem:[#allocation2 + $0xc8] ss:$0 sps:$4 sm:$0x11]  }
 0x292   : > { %v6911_v19 = vsel %vm1644_vm11, %v6819_v21, %v6751_v22  ;;  %v3306_v22 = vrot.slane %v10911_v31, 1  ;;  %v13112_v45 = vld [vmem:[#allocation2 + $0xc4] sm:$0xf] }
 0x293   : > { %6796 = vrot.lane.b32.xlu1 %v12721_v57, %s13280_s11  ;;  %v6749_v9 = vpop.permute.xlu0 %6748  ;;  %v7002_v8 = vsel %vm1339_vm6, %v7000_v48, %v7001_v29  ;;  %v7004_v36 = vrot.slane %v6911_v19, 1  ;;  %v6547_v57 = vrot.slane %v12729_v13, 2  ;;  %v13110_v29 = vld [vmem:[%s13509_s9] sm:$0xff]   ;;  %v13111_v19 = vld [vmem:[%s13509_s9 + $0x48] sm:$0xff]   ;;  %v11169_v13 = vcombine.low %v6158_v6, %v13112_v45  ;;  %v15765_v6 = vld [vmem:[#allocation2 + $0xf4] sm:$0xf] }
 0x294   : > { %v6909_v33 = vsel %vm1644_vm11, %v6816_v30, %v6749_v9  ;;  %11989 = vmatprep.mubr.msk.bf16.mxu0 %vm2536_vm12, %v7002_v8  ;;  %v3307_v9 = vrot.slane %v12732_v53, 1  ;;  %v12734_v8 = vld [vmem:[#allocation2 + $0x198] ss:$0 sps:$4 sm:$0x77]  }
 0x295   : > { %v7003_v0 = vrot.slane %v6909_v33, 1  ;;  %v6563_v43 = vpop.permute.xlu1 %6562  ;;  %3472 = vrot.lane.b32.xlu0 %v3452_v58, %s13280_s11  ;;  %v6548_v48 = vsel %vm1725_vm10, %v6546_v56, %v6547_v57  ;;  %v11227_v58 = vcombine.low %v6230_v28, %v6198_v54  ;;  %v12727_v33 = vld [vmem:[#allocation2 + $0xd8] ss:$0 sps:$4 sm:$0x11]   ;;  %v6550_v28 = vrot.slane %v12734_v8, 2 }
 0x296   : > { %v6825_v10 = vsel %vm683_vm7, %v12723_v41, %v6563_v43  ;;  %v3308_v56 = vsel %vm1339_vm6, %v3306_v22, %v3307_v9  ;;  %v3030_v41 = vld [vmem:[#allocation2 + $0xf0] sm:$0x8]  ;;  %v13117_v8 = vld [vmem:[%s13509_s9 + $0x58] sm:$0xff]  }
 0x297   : > { %v7005_v39 = vsel %vm1339_vm6, %v7003_v0, %v7004_v36  ;;  %3474 = vrot.lane.b32.xlu1 %v3453_v14, %s13280_s11  ;;  %v6561_v32 = vpop.permute.xlu0 %6560  ;;  %v6161_v14 = vld [vmem:[#allocation2 + $0xd0] sm:$0xe]  ;;  %v13113_v0 = vld [vmem:[%s13509_s9 + $0x8] sm:$0xff]   ;;  %v6549_v31 = vrot.slane %v11227_v58, 2 }
 0x298   : > { %11990 = vmatmul.mubr.msk.bf16.vlgmr.msra.gmra.mrb[60].mxu0 %vm2536_vm12, %v7005_v39  ;;  %v13114_v39 = vld [vmem:[%s13509_s9 + $0x50] sm:$0xff]   ;;  %v6822_v53 = vsel %vm683_vm7, %v11169_v13, %v6561_v32 }
 0x299   : > { %v6567_v21 = vpop.permute.xlu1 %6566  ;;  %6798 = vrot.lane.b32.xlu0 %v12728_v24, %s13280_s11  ;;  %11760 = vmatpush3.bf16.msra.mxu0 %v13110_v29  ;;  %v13116_v32 = vld [vmem:[%s13509_s9 + $0x10] sm:$0xff]   ;;  %v6551_v13 = vsel %vm1725_vm10, %v6549_v31, %v6550_v28 }
 0x29a   : > { %11761 = vmatprep.subr.bf16.mxu0 %v13111_v19 }
 0x29b   : > { %6610 = vrot.lane.b32.xlu1 %v6547_v57, %s13279_s10  ;;  %v6565_v30 = vpop.permute.xlu0 %6564  ;;  %v13115_v57 = vld [vmem:[#allocation2 + $0xd4] sm:$0xf] }
 0x29c   : > { %v11171_v54 = vcombine.low %v6161_v14, %v13115_v57 }
 0x29d   : > { %v6755_v36 = vpop.permute.xlu1 %6754  ;;  %6608 = vrot.lane.b32.xlu0 %v6548_v48, %s13279_s10  ;;  %11762 = vmatpush3.bf16.msra.mxu0 %v13113_v0  ;;  %v6831_v48 = vsel %vm683_vm7, %v12727_v33, %v6567_v21  ;;  %v12737_v33 = vld [vmem:[#allocation2 + $0x18c] ss:$0 sps:$4 sm:$0x11]  }
 0x29e   : > { %v6915_v24 = vsel %vm1644_vm11, %v6825_v10, %v6755_v36  ;;  %11763 = vmatprep.subr.bf16.mxu0 %v13114_v39  ;;  %v6828_v14 = vsel %vm683_vm7, %v11171_v54, %v6565_v30  ;;  %v12741_v36 = vld [vmem:[#allocation2 + $0xf8] ss:$0 sps:$4 sm:$0x77]   ;;  %v12740_v39 = vld [vmem:[#allocation2 + $0x184] sm:$0xfe]  }
 0x29f   : > { %3362 = vrot.lane.b32.xlu1 %v3307_v9, %s13279_s10  ;;  %v6753_v43 = vpop.permute.xlu0 %6752  ;;  %v7007_v22 = vrot.slane %v6915_v24, 1  ;;  %v10913_v9 = vcombine.low %v3030_v41, %v15765_v6  ;;  %v15785_v30 = vld [vmem:[%s17132_s2 + $0x38] sm:$0x3f]   ;;  %v3054_v54 = vld [vmem:[#allocation2 + $0xe8] sm:$0xf] }
 0x2a0   : > { %v6913_v29 = vsel %vm1644_vm11, %v6822_v53, %v6753_v43  ;;  %v13118_v53 = vld [vmem:[%s13509_s9 + $0x18] sm:$0xff]   ;;  %v13119_v43 = vld [vmem:[%s13509_s9 + $0x60] sm:$0xff]   ;;  %12330 = vmatprep.subr.msk.bf16.mxu1 %vm1725_vm10, %v15785_v30 }
 0x2a1   : > { %v7006_v58 = vrot.slane %v6913_v29, 1  ;;  %v6759_v19 = vpop.permute.xlu1 %6758  ;;  %3360 = vrot.lane.b32.xlu0 %v3308_v56, %s13279_s10  ;;  %11764 = vmatpush3.bf16.msra.mxu0 %v13116_v32  ;;  %v3309_v57 = vrot.slane %v10913_v9, 1  ;;  %v3310_v29 = vrot.slane %v12741_v36, 1  ;;  %v10937_v32 = vcombine.low %v15743_v3, %v3054_v54  ;;  %v13121_v9 = vld [vmem:[%s13509_s9 + $0x68] sm:$0xff]   ;;  %v15800_v36 = vld [vmem:[#allocation2 + $0x104] sm:$0xf] }
 0x2a2   : > { %v6919_v45 = vsel %vm1644_vm11, %v6831_v48, %v6759_v19  ;;  %11765 = vmatprep.subr.bf16.mxu0 %v13117_v8  ;;  %v6164_v48 = vld [vmem:[#allocation2 + $0xe0] sm:$0xe]  ;;  %v13122_v8 = vld [vmem:[#allocation2 + $0xe4] sm:$0xf]  ;;  %v6167_v3 = vld [vmem:[#allocation2 + $0xf0] sm:$0xe] }
 0x2a3   : > { %6614 = vrot.lane.b32.xlu1 %v6550_v28, %s13279_s10  ;;  %v6757_v21 = vpop.permute.xlu0 %6756  ;;  %v7008_v10 = vsel %vm1339_vm6, %v7006_v58, %v7007_v22  ;;  %v7010_v24 = vrot.slane %v6919_v45, 1  ;;  %v3055_v22 = vld [vmem:[#allocation2 + $0xf8] sm:$0xf]  ;;  %v12735_v58 = vld [vmem:[#allocation2 + $0xe8] ss:$0 sps:$4 sm:$0x11]  }
 0x2a4   : > { %v6917_v0 = vsel %vm1644_vm11, %v6828_v14, %v6757_v21  ;;  %11993 = vmatprep.mubr.msk.bf16.mxu0 %vm2536_vm12, %v7008_v10  ;;  %v13120_v45 = vld [vmem:[%s13509_s9 + $0x20] sm:$0xff]   ;;  %v11173_v14 = vcombine.low %v6164_v48, %v13122_v8  ;;  %v12744_v10 = vld [vmem:[#allocation2 + $0x194] sm:$0xfe]  }
 0x2a5   : > { %v7009_v56 = vrot.slane %v6917_v0, 1  ;;  %v6571_v31 = vpop.permute.xlu1 %6570  ;;  %6612 = vrot.lane.b32.xlu0 %v6551_v13, %s13279_s10  ;;  %11766 = vmatpush3.bf16.msra.mxu0 %v13118_v53  ;;  %v3311_v13 = vsel %vm1339_vm6, %v3309_v57, %v3310_v29  ;;  %v3032_v0 = vld [vmem:[#allocation2 + $0x100] sm:$0x8]  ;;  %v3454_v53 = vrot.slane %v10937_v32, 6  ;;  %v13123_v57 = vld [vmem:[%s13509_s9 + $0x28] sm:$0xff]  }
 0x2a6   : > { %11767 = vmatprep.subr.bf16.mxu0 %v13119_v43  ;;  %v12749_v43 = vld [vmem:[#allocation2 + $0x108] ss:$0 sps:$4 sm:$0x77]   ;;  %v13125_v48 = vld [vmem:[#allocation2 + $0xf4] sm:$0xf] }
 0x2a7   : > { %6802 = vrot.lane.b32.xlu1 %v12737_v33, %s13280_s11  ;;  %v6569_v28 = vpop.permute.xlu0 %6568  ;;  %v7011_v41 = vsel %vm1339_vm6, %v7009_v56, %v7010_v24  ;;  %v10938_v33 = vcombine.low %v15765_v6, %v3055_v22  ;;  %v6837_v24 = vsel %vm683_vm7, %v12735_v58, %v6571_v31  ;;  %v12739_v56 = vld [vmem:[#allocation2 + $0xf8] ss:$0 sps:$4 sm:$0x11]   ;;  %v11175_v22 = vcombine.low %v6167_v3, %v13125_v48  ;;  %v2996_v32 = vld [vmem:[#allocation2 + $0x114] sm:$0xf] }
 0x2a8   : > { %11994 = vmatmul.mubr.msk.bf16.gmra.mrb[64].mxu0 %vm2536_vm12, %v7011_v41  ;;  %v10915_v41 = vcombine.low %v3032_v0, %v15800_v36  ;;  %v6834_v6 = vsel %vm683_vm7, %v11173_v14, %v6569_v28  ;;  %v13126_v28 = vld [vmem:[%s13509_s9 + $0x30] sm:$0xff]  }
 0x2a9   : > { %v6575_v19 = vpop.permute.xlu1 %6574  ;;  %6800 = vrot.lane.b32.xlu0 %v12740_v39, %s13280_s11  ;;  %11768 = vmatpush3.bf16.msra.mxu0 %v13120_v45  ;;  %v3455_v58 = vrot.slane %v10938_v33, 6  ;;  %v3034_v45 = vld [vmem:[#allocation2 + $0x110] sm:$0x8]  ;;  %v13127_v33 = vld [vmem:[%s13509_s9 + $0x78] sm:$0xff]  }
 0x2aa   : > { %11769 = vmatprep.subr.bf16.mxu0 %v13121_v9  ;;  %v6843_v9 = vsel %vm683_vm7, %v12739_v56, %v6575_v19  ;;  %v10917_v3 = vcombine.low %v3034_v45, %v2996_v32  ;;  %v13128_v45 = vld [vmem:[%s13509_s9 + $0x38] sm:$0xff]  }
 0x2ab   : > { %3366 = vrot.lane.b32.xlu1 %v3310_v29, %s13279_s10  ;;  %v6573_v21 = vpop.permute.xlu0 %6572  ;;  %v13124_v29 = vld [vmem:[%s13509_s9 + $0x70] sm:$0xff]  }
 0x2ad   : > { %v6763_v39 = vpop.permute.xlu1 %6762  ;;  %3364 = vrot.lane.b32.xlu0 %v3311_v13, %s13279_s10  ;;  %11770 = vmatpush3.bf16.msra.mxu0 %v13123_v57  ;;  %v6840_v57 = vsel %vm683_vm7, %v11175_v22, %v6573_v21  ;;  %v3315_v22 = vrot.slane %v10917_v3, 1 }
 0x2ae   : > { %v6923_v54 = vsel %vm1644_vm11, %v6837_v24, %v6763_v39  ;;  %11771 = vmatprep.subr.bf16.mxu0 %v13124_v29  ;;  %v12748_v39 = vld [vmem:[#allocation2 + $0x19c] ss:$0 sps:$4 sm:$0x11]   ;;  %v12753_v29 = vld [vmem:[#allocation2 + $0x118] ss:$0 sps:$4 sm:$0x77]  }
 0x2af   : > { %6804 = vrot.lane.b32.xlu1 %v12744_v10, %s13280_s11  ;;  %v6761_v31 = vpop.permute.xlu0 %6760  ;;  %v7013_v8 = vrot.slane %v6923_v54, 1  ;;  %v3312_v10 = vrot.slane %v10915_v41, 1  ;;  %v3313_v54 = vrot.slane %v12749_v43, 1 }
 0x2b0   : > { %v6921_v13 = vsel %vm1644_vm11, %v6834_v6, %v6761_v31  ;;  %v3057_v6 = vld [vmem:[#allocation2 + $0x118] sm:$0xf] }
 0x2b1   : > { %v7012_v0 = vrot.slane %v6921_v13, 1  ;;  %v6767_v24 = vpop.permute.xlu1 %6766  ;;  %3476 = vrot.lane.b32.xlu0 %v3454_v53, %s13280_s11  ;;  %11772 = vmatpush3.bf16.msra.mxu0 %v13126_v28  ;;  %v3314_v21 = vsel %vm1339_vm6, %v3312_v10, %v3313_v54  ;;  %v6170_v28 = vld [vmem:[#allocation2 + $0x100] sm:$0xe] }
 0x2b2   : > { %v6927_v14 = vsel %vm1644_vm11, %v6843_v9, %v6767_v24  ;;  %11773 = vmatprep.subr.bf16.mxu0 %v13127_v33  ;;  %v3316_v9 = vrot.slane %v12753_v29, 1  ;;  %v3036_v24 = vld [vmem:[#allocation2 + $0x120] sm:$0x8]  ;;  %v12758_v33 = vld [vmem:[#allocation2 + $0x128] ss:$0 sps:$4 sm:$0x77]  }
 0x2b3   : > { %3478 = vrot.lane.b32.xlu1 %v3455_v58, %s13280_s11  ;;  %v6765_v19 = vpop.permute.xlu0 %6764  ;;  %v7014_v56 = vsel %vm1339_vm6, %v7012_v0, %v7013_v8  ;;  %v7016_v48 = vrot.slane %v6927_v14, 1  ;;  %v3056_v58 = vld [vmem:[#allocation2 + $0x108] sm:$0xf]  ;;  %v10940_v8 = vcombine.low %v2996_v32, %v3057_v6  ;;  %v15826_v0 = vld [vmem:[#allocation2 + $0x124] sm:$0xf] }
 0x2b4   : > { %v6925_v53 = vsel %vm1644_vm11, %v6840_v57, %v6765_v19  ;;  %11997 = vmatprep.mubr.msk.bf16.mxu0 %vm2536_vm12, %v7014_v56  ;;  %v10939_v10 = vcombine.low %v15800_v36, %v3056_v58  ;;  %v3317_v3 = vsel %vm1339_vm6, %v3315_v22, %v3316_v9  ;;  %v10919_v57 = vcombine.low %v3036_v24, %v15826_v0  ;;  %v13129_v19 = vld [vmem:[#allocation2 + $0x104] sm:$0xf]  ;;  %v3002_v29 = vld [vmem:[#allocation2 + $0x134] sm:$0xf]  ;;  %v6173_v6 = vld [vmem:[#allocation2 + $0x110] sm:$0xe] }
 0x2b5   : > { %v7015_v41 = vrot.slane %v6925_v53, 1  ;;  %v6579_v31 = vpop.permute.xlu1 %6578  ;;  %6806 = vrot.lane.b32.xlu0 %v12748_v39, %s13280_s11  ;;  %11774 = vmatpush3.bf16.msra.mxu0 %v13128_v45  ;;  %v12747_v39 = vld [vmem:[#allocation2 + $0x108] ss:$0 sps:$4 sm:$0x11]   ;;  %v11177_v56 = vcombine.low %v6170_v28, %v13129_v19  ;;  %v3038_v53 = vld [vmem:[#allocation2 + $0x130] sm:$0x8] }
 0x2b6   : > { %v3456_v36 = vrot.slane %v10939_v10, 6  ;;  %v3318_v22 = vrot.slane %v10919_v57, 1  ;;  %v10921_v58 = vcombine.low %v3038_v53, %v3002_v29  ;;  %v13130_v24 = vld [vmem:[#allocation2 + $0x114] sm:$0xf]  ;;  %v3319_v28 = vrot.slane %v12758_v33, 1 }
 0x2b7   : > { %3370 = vrot.lane.b32.xlu1 %v3313_v54, %s13279_s10  ;;  %v6577_v43 = vpop.permute.xlu0 %6576  ;;  %v7017_v13 = vsel %vm1339_vm6, %v7015_v41, %v7016_v48  ;;  %v3457_v54 = vrot.slane %v10940_v8, 6  ;;  %v6849_v48 = vsel %vm683_vm7, %v12747_v39, %v6579_v31  ;;  %v12751_v41 = vld [vmem:[#allocation2 + $0x118] ss:$0 sps:$4 sm:$0x11]   ;;  %v3058_v53 = vld [vmem:[#allocation2 + $0x128] sm:$0xf] }
 0x2b8   : > { %11998 = vmatmul.mubr.msk.bf16.gmra.mrb[68].mxu0 %vm2536_vm12, %v7017_v13  ;;  %v6846_v13 = vsel %vm683_vm7, %v11177_v56, %v6577_v43  ;;  %v12761_v19 = vld [vmem:[#allocation2 + $0x138] ss:$0 sps:$4 sm:$0x77]   ;;  %v3320_v43 = vsel %vm1339_vm6, %v3318_v22, %v3319_v28  ;;  %v3321_v56 = vrot.slane %v10921_v58, 1 }
 0x2b9   : > { %v6583_v14 = vpop.permute.xlu1 %6582  ;;  %3368 = vrot.lane.b32.xlu0 %v3314_v21, %s13279_s10  ;;  %v3059_v39 = vld [vmem:[#allocation2 + $0x138] sm:$0xf]  ;;  %v12768_v58 = vld [vmem:[#allocation2 + $0x148] ss:$0 sps:$4 sm:$0x77]  }
 0x2ba   : > { %v6855_v17 = vsel %vm683_vm7, %v12751_v41, %v6583_v14  ;;  %v10942_v14 = vcombine.low %v3002_v29, %v3059_v39  ;;  %v15847_v41 = vld [vmem:[#allocation2 + $0x144] sm:$0xf] }
 0x2bb   : > { %3374 = vrot.lane.b32.xlu1 %v3316_v9, %s13279_s10  ;;  %v6581_v32 = vpop.permute.xlu0 %6580  ;;  %v11179_v9 = vcombine.low %v6173_v6, %v13130_v24 }
 0x2bd   : > { %v6771_v45 = vpop.permute.xlu1 %6770  ;;  %3372 = vrot.lane.b32.xlu0 %v3317_v3, %s13279_s10 }
 0x2be   : > { %v6931_v21 = vsel %vm1644_vm11, %v6849_v48, %v6771_v45  ;;  %v3322_v48 = vrot.slane %v12761_v19, 1  ;;  %v3040_v45 = vld [vmem:[#allocation2 + $0x140] sm:$0x8] }
 0x2bf   : > { %3482 = vrot.lane.b32.xlu1 %v3457_v54, %s13280_s11  ;;  %v6769_v8 = vpop.permute.xlu0 %6768  ;;  %v7019_v3 = vrot.slane %v6931_v21, 1  ;;  %v6852_v54 = vsel %vm683_vm7, %v11179_v9, %v6581_v32  ;;  %v10941_v32 = vcombine.low %v15826_v0, %v3058_v53  ;;  %v3459_v9 = vrot.slane %v10942_v14, 6  ;;  %v6176_v19 = vld [vmem:[#allocation2 + $0x120] sm:$0xe]  ;;  %v3061_v14 = vld [vmem:[#allocation2 + $0x158] sm:$0xf] }
 0x2c0   : > { %v6929_v31 = vsel %vm1644_vm11, %v6846_v13, %v6769_v8  ;;  %v3323_v22 = vsel %vm1339_vm6, %v3321_v56, %v3322_v48  ;;  %v10923_v13 = vcombine.low %v3040_v45, %v15847_v41  ;;  %v3008_v8 = vld [vmem:[#allocation2 + $0x154] sm:$0xf] }
 0x2c1   : > { %v7018_v10 = vrot.slane %v6929_v31, 1  ;;  %v6775_v55 = vpop.permute.xlu1 %6774  ;;  %3480 = vrot.lane.b32.xlu0 %v3456_v36, %s13280_s11  ;;  %v12759_v31 = vld [vmem:[#allocation2 + $0x128] ss:$0 sps:$4 sm:$0x11]   ;;  %v3458_v0 = vrot.slane %v10941_v32, 6 }
 0x2c2   : > { %v6935_v57 = vsel %vm1644_vm11, %v6855_v17, %v6775_v55 }
 0x2c3   : > { %3378 = vrot.lane.b32.xlu1 %v3319_v28, %s13279_s10  ;;  %v6773_v33 = vpop.permute.xlu0 %6772  ;;  %v7020_v6 = vsel %vm1339_vm6, %v7018_v10, %v7019_v3  ;;  %v7022_v55 = vrot.slane %v6935_v57, 1  ;;  %v3042_v28 = vld [vmem:[#allocation2 + $0x150] sm:$0x8]  ;;  %v3324_v3 = vrot.slane %v10923_v13, 1  ;;  %v2968_v57 = vld [vmem:[#allocation2 + $0x80] sm:$0xc] }
 0x2c4   : > { %v6933_v36 = vsel %vm1644_vm11, %v6852_v54, %v6773_v33  ;;  %12001 = vmatprep.mubr.msk.bf16.mxu0 %vm2536_vm12, %v7020_v6  ;;  %v10925_v10 = vcombine.low %v3042_v28, %v3008_v8  ;;  %v3325_v54 = vrot.slane %v12768_v58, 1  ;;  %v12770_v33 = vld [vmem:[#allocation2 + $0x158] ss:$0 sps:$4 sm:$0x77]   ;;  %v10867_v32 = vcombine.low %v2968_v57, %v15646_v26  ;;  %v3044_v58 = vld [vmem:[#allocation2 + $0x160] sm:$0x8] }
 0x2c5   : > { %v7021_v17 = vrot.slane %v6933_v36, 1  ;;  %v6587_v21 = vpop.permute.xlu1 %6586  ;;  %3376 = vrot.lane.b32.xlu0 %v3320_v43, %s13279_s10  ;;  %v13131_v43 = vld [vmem:[#allocation2 + $0x124] sm:$0xf]  ;;  %v12530_v6 = vld [vmem:[#allocation2 + $0x88] ss:$0 sps:$4 sm:$0x33]  }
 0x2c6   : > { %v11181_v56 = vcombine.low %v6176_v19, %v13131_v43  ;;  %v6861_v45 = vsel %vm683_vm7, %v12759_v31, %v6587_v21  ;;  %v6179_v36 = vld [vmem:[#allocation2 + $0x130] sm:$0xe]  ;;  %v3326_v13 = vsel %vm1339_vm6, %v3324_v3, %v3325_v54  ;;  %v12532_v28 = vld [vmem:[#allocation2 + $0x98] ss:$0 sps:$4 sm:$0x33]   ;;  %v10944_v43 = vcombine.low %v3008_v8, %v3061_v14 }
 0x2c7   : > { %3382 = vrot.lane.b32.xlu1 %v3322_v48, %s13279_s10  ;;  %v6585_v29 = vpop.permute.xlu0 %6584  ;;  %v7023_v24 = vsel %vm1339_vm6, %v7021_v17, %v7022_v55  ;;  %v2971_v48 = vld [vmem:[#allocation2 + $0x90] sm:$0xc]  ;;  %v3060_v17 = vld [vmem:[#allocation2 + $0x148] sm:$0xf]  ;;  %v13132_v3 = vld [vmem:[#allocation2 + $0x134] sm:$0xf]  ;;  %v3498_v8 = vsel %vm683_vm7, %v10867_v32, %v14781_v61 }
 0x2c8   : > { %12002 = vmatmul.mubr.msk.bf16.gmra.mrb[72].mxu0 %vm2536_vm12, %v7023_v24  ;;  %v3327_v24 = vrot.slane %v10925_v10, 1  ;;  %v10869_v19 = vcombine.low %v2971_v48, %v15654_v18  ;;  %v6858_v21 = vsel %vm683_vm7, %v11181_v56, %v6585_v29  ;;  %v10943_v57 = vcombine.low %v15847_v41, %v3060_v17  ;;  %v12763_v56 = vld [vmem:[#allocation2 + $0x138] ss:$0 sps:$4 sm:$0x11]   ;;  %v3014_v17 = vld [vmem:[#allocation2 + $0x174] sm:$0xf] }
 0x2c9   : > { %v15858_v39 = vpop.permute.xlu1 %6590  ;;  %3380 = vrot.lane.b32.xlu0 %v3323_v22, %s13279_s10  ;;  %v11183_v10 = vcombine.low %v6179_v36, %v13132_v3  ;;  %v3501_v29 = vsel %vm683_vm7, %v12530_v6, %v14749_v50  ;;  %v3507_v41 = vsel %vm683_vm7, %v12532_v28, %v14784_v16  ;;  %v3461_v36 = vrot.slane %v10944_v43, 6  ;;  %v3046_v50 = vld [vmem:[#allocation2 + $0x170] sm:$0x8]  ;;  %v3062_v3 = vld [vmem:[#allocation2 + $0x168] sm:$0xf] }
 0x2ca   : > { %v3460_v32 = vrot.slane %v10943_v57, 6  ;;  %v12780_v57 = vld [vmem:[#allocation2 + $0x178] ss:$0 sps:$4 sm:$0x77]  }
 0x2cb   : > { %3486 = vrot.lane.b32.xlu1 %v3459_v9, %s13280_s11  ;;  %v6589_v53 = vpop.permute.xlu0 %6588  ;;  %v15867_v9 = vld [vmem:[#allocation2 + $0x164] sm:$0xf] }
 0x2cc   : > { %v10927_v18 = vcombine.low %v3044_v58, %v15867_v9  ;;  %v6864_v16 = vsel %vm683_vm7, %v11183_v10, %v6589_v53  ;;  %v8603_v10 = vsel %vm1725_vm10, %v15785_v30, 0  ;;  %v10945_v30 = vcombine.low %v15867_v9, %v3062_v3 }
 0x2cd   : > { %v6779_v55 = vpop.permute.xlu1 %6778  ;;  %3484 = vrot.lane.b32.xlu0 %v3458_v0, %s13280_s11  ;;  %v3328_v0 = vrot.slane %v12770_v33, 1  ;;  %v3504_v33 = vsel %vm683_vm7, %v10869_v19, %v14830_v37 }
 0x2ce   : > { %v6939_v22 = vsel %vm1644_vm11, %v6861_v45, %v6779_v55  ;;  %v12776_v45 = vld [vmem:[#allocation2 + $0x168] ss:$0 sps:$4 sm:$0x77]   ;;  %v3330_v58 = vrot.slane %v10927_v18, 1 }
 0x2cf   : > { %3386 = vrot.lane.b32.xlu1 %v3325_v54, %s13279_s10  ;;  %v6777_v31 = vpop.permute.xlu0 %6776  ;;  %v7025_v55 = vrot.slane %v6939_v22, 1  ;;  %v3329_v54 = vsel %vm1339_vm6, %v3327_v24, %v3328_v0  ;;  %v3331_v22 = vrot.slane %v12776_v45, 1 }
 0x2d0   : > { %v6937_v26 = vsel %vm1644_vm11, %v6858_v21, %v6777_v31  ;;  %v10929_v21 = vcombine.low %v3046_v50, %v3014_v17  ;;  %v6867_v31 = vsel %vm683_vm7, %v12763_v56, %v15858_v39 }
 0x2d1   : > { %v7024_v1 = vrot.slane %v6937_v26, 1  ;;  %v6781_v23 = vpop.permute.xlu1 %6780  ;;  %3384 = vrot.lane.b32.xlu0 %v3326_v13, %s13279_s10 }
 0x2d2   : > { %v3333_v56 = vrot.slane %v10929_v21, 1 }
 0x2d3   : > { %3390 = vrot.lane.b32.xlu1 %v3328_v0, %s13279_s10  ;;  %v3465_v48 = vpop.permute.xlu0 %3464  ;;  %v7026_v14 = vsel %vm1339_vm6, %v7024_v1, %v7025_v55  ;;  %v6941_v1 = vsel %vm1644_vm11, %v6864_v16, %v6781_v23  ;;  %v3063_v23 = vld [vmem:[#allocation2 + $0x178] sm:$0xf]  ;;  %v13133_v16 = vld [vmem:[#allocation2 + $0x144] sm:$0xf] }
 0x2d4   : > { %v3593_v6 = vsel %vm1644_vm11, %v3498_v8, %v3465_v48  ;;  %v3594_v61 = vsel %vm1644_vm11, %v3501_v29, %v3465_v48  ;;  %12005 = vmatprep.mubr.msk.bf16.mxu0 %vm2536_vm12, %v7026_v14  ;;  %v7027_v55 = vrot.slane %v6941_v1, 1  ;;  %v3332_v8 = vsel %vm1339_vm6, %v3330_v58, %v3331_v22  ;;  %v6182_v14 = vld [vmem:[#allocation2 + $0x140] sm:$0xe]  ;;  %v17397_v1 = vld [vmem:[#allocation7_spill] sm:$0xff] }
 0x2d5   : > { %v3672_v13 = vrot.slane %v3593_v6, 2  ;;  %v3673_v37 = vrot.slane %v3594_v61, 2  ;;  %v3467_v24 = vpop.permute.xlu1 %3466  ;;  %3388 = vrot.lane.b32.xlu0 %v3329_v54, %s13279_s10  ;;  %v10946_v48 = vcombine.low %v3014_v17, %v3063_v23  ;;  %v8116_v6 = vld [vmem:[#allocation2 + $0x74] sm:$0xc]  ;;  %v13137_v23 = vld [vmem:[#allocation2 + $0x68] sm:$0xf] }
 0x2d6   : > { %v3596_v28 = vsel %vm1644_vm11, %v3504_v33, %v3467_v24  ;;  %v3597_v19 = vsel %vm1644_vm11, %v3507_v41, %v3467_v24  ;;  %v3334_v33 = vrot.slane %v12780_v57, 1  ;;  %v17396_v24 = vld [vmem:[#allocation6_spill] sm:$0xff]  ;;  %v13136_v57 = vld [vmem:[#allocation2 + $0x68] ss:$0 sps:$4 sm:$0x77]  }
 0x2d7   : > { %v3675_v0 = vrot.slane %v3596_v28, 2  ;;  %v3676_v43 = vrot.slane %v3597_v19, 2  ;;  %3490 = vrot.lane.b32.xlu1 %v3461_v36, %s13280_s11  ;;  %v6783_v53 = vpop.permute.xlu0 %6782  ;;  %v3674_v26 = vsel %vm1725_vm10, %v3672_v13, %v3673_v37  ;;  %v12774_v36 = vld [vmem:[#allocation2 + $0x148] ss:$0 sps:$4 sm:$0x11]   ;;  %v11185_v13 = vcombine.low %v6182_v14, %v13133_v16 }
 0x2d8   : > { %v6943_v45 = vsel %vm1644_vm11, %v6867_v31, %v6783_v53  ;;  %11887 = vmatprep.mubr.msk.bf16.mxu1 %vm2536_vm12, %v3674_v26  ;;  %v3335_v61 = vsel %vm1339_vm6, %v3333_v56, %v3334_v33  ;;  %v3463_v17 = vrot.slane %v10946_v48, 6  ;;  %v3462_v37 = vrot.slane %v10945_v30, 6  ;;  %v13134_v19 = vld [vmem:[#allocation2 + $0x78] ss:$0 sps:$4 sm:$0x77]  }
 0x2d9   : > { %v3677_v39 = vsel %vm1725_vm10, %v3675_v0, %v3676_v43  ;;  %v7028_v18 = vrot.slane %v6943_v45, 1  ;;  %v6595_v29 = vpop.permute.xlu1 %6594  ;;  %3488 = vrot.lane.b32.xlu0 %v3460_v32, %s13280_s11  ;;  %v8114_v32 = vld [vmem:[#allocation2 + $0x64] sm:$0xc]  ;;  %v8226_v58 = vrot.slane %v17396_v24, 3  ;;  %v8229_v28 = vrot.slane %v17397_v1, 3 }
 0x2da   : > { %11888 = vmatmul.mubr.msk.bf16.vlgmr.msra.gmra.mrb[4].mxu1 %vm2536_vm12, %v3677_v39  ;;  %v8230_v21 = vrot.slane %v13134_v19, 3  ;;  %v13135_v31 = vld [vmem:[#allocation2 + $0x78] sm:$0xf]  ;;  %v12790_v43 = vld [vmem:[#allocation2 + $0x7c] ss:$0 sps:$4 sm:$0x33]   ;;  %v6873_v53 = vsel %vm683_vm7, %v12774_v36, %v6595_v29  ;;  %v11379_v3 = vcombine.low %v8114_v32, %v13137_v23 }
 0x2db   : > { %3394 = vrot.lane.b32.xlu1 %v3331_v22, %s13279_s10  ;;  %v6593_v54 = vpop.permute.xlu0 %6592  ;;  %v7029_v41 = vsel %vm1339_vm6, %v7027_v55, %v7028_v18  ;;  %12022 = vmatpush3.bf16.msra.mxu1 %v8603_v10  ;;  %v15915_v22 = vld [vmem:[#allocation2 + $0xa0] sm:$0xc]  ;;  %v11381_v0 = vcombine.low %v8116_v6, %v13135_v31  ;;  %v8227_v45 = vrot.slane %v13136_v57, 3  ;;  %v12788_v55 = vld [vmem:[#allocation2 + $0x6c] ss:$0 sps:$4 sm:$0x33]  }
 0x2dc   : > { %12006 = vmatmul.mubr.msk.bf16.gmra.mrb[76].mxu0 %vm2536_vm12, %v7029_v41  ;;  %v10871_v39 = vcombine.low %v15915_v22, %v15687_v63  ;;  %v6870_v18 = vsel %vm683_vm7, %v11185_v13, %v6593_v54  ;;  %v8120_v56 = vld [vmem:[#allocation2 + $0x94] sm:$0xc]  ;;  %v12536_v41 = vld [vmem:[#allocation2 + $0xa8] ss:$0 sps:$4 sm:$0x33]   ;;  %v8231_v48 = vsel %vm7710_vm13, %v8229_v28, %v8230_v21  ;;  %v8406_v14 = vrot.slane %v12790_v43, 2 }
 0x2dd   : > { %v15911_v50 = vpop.permute.xlu1 %6598  ;;  %3392 = vrot.lane.b32.xlu0 %v3332_v8, %s13279_s10  ;;  %v6185_v8 = vld [vmem:[#allocation2 + $0x150] sm:$0xe]  ;;  %v8405_v30 = vrot.slane %v11381_v0, 2  ;;  %v8118_v36 = vld [vmem:[#allocation2 + $0x84] sm:$0xc]  ;;  %v8228_v22 = vsel %vm7710_vm13, %v8226_v58, %v8227_v45  ;;  %v8402_v16 = vrot.slane %v11379_v3, 2 }
 0x2de   : > { %v12916_v6 = vld [vmem:[%s17132_s2 + $0x30] sm:$0x3f]   ;;  %v8403_v13 = vrot.slane %v12788_v55, 2  ;;  %v13138_v1 = vld [vmem:[#allocation2 + $0x88] ss:$0 sps:$4 sm:$0x77]  }
 0x2df   : > { %3398 = vrot.lane.b32.xlu1 %v3334_v33, %s13279_s10  ;;  %v15918_v9 = vpop.permute.xlu0 %6596  ;;  %v2977_v32 = vld [vmem:[#allocation2 + $0xb0] sm:$0xc]  ;;  %v8233_v28 = vrot.slane %v13138_v1, 3  ;;  %v13139_v19 = vld [vmem:[#allocation2 + $0x98] sm:$0xf]  ;;  %12331 = vmatprep.subr.msk.bf16.mxu1 %vm1725_vm10, %v12916_v6 }
 0x2e0   : > { %v11385_v21 = vcombine.low %v8120_v56, %v13139_v19  ;;  %v12797_v31 = vld [vmem:[#allocation2 + $0x9c] ss:$0 sps:$4 sm:$0x33]   ;;  %v13141_v57 = vld [vmem:[#allocation2 + $0x88] sm:$0xf]  ;;  %v8404_v6 = vsel %vm1725_vm10, %v8402_v16, %v8403_v13 }
 0x2e1   : > { %v6787_v26 = vpop.permute.xlu1 %6786  ;;  %3396 = vrot.lane.b32.xlu0 %v3335_v61, %s13279_s10  ;;  %v11383_v45 = vcombine.low %v8118_v36, %v13141_v57  ;;  %v13142_v23 = vld [vmem:[#allocation2 + $0x154] sm:$0xf]  ;;  %v12795_v55 = vld [vmem:[#allocation2 + $0x8c] ss:$0 sps:$4 sm:$0x33]   ;;  %v8412_v36 = vrot.slane %v12797_v31, 2 }
 0x2e2   : > { %v6947_v10 = vsel %vm1644_vm11, %v6873_v53, %v6787_v26  ;;  %v13140_v26 = vld [vmem:[#allocation2 + $0x98] ss:$0 sps:$4 sm:$0x77]   ;;  %v11187_v3 = vcombine.low %v6185_v8, %v13142_v23  ;;  %v3510_v8 = vsel %vm683_vm7, %v10871_v39, %v14875_v42  ;;  %v8409_v16 = vrot.slane %v12795_v55, 2  ;;  %v17400_v57 = vld [vmem:[#allocation11_spill] sm:$0xff] }
 0x2e3   : > { %3494 = vrot.lane.b32.xlu1 %v3463_v17, %s13280_s11  ;;  %v6785_v29 = vpop.permute.xlu0 %6784  ;;  %v7031_v63 = vrot.slane %v6947_v10, 1  ;;  %v17398_v17 = vld [vmem:[#allocation8_spill] sm:$0xff]  ;;  %v8236_v58 = vrot.slane %v13140_v26, 3  ;;  %v8407_v10 = vsel %vm1725_vm10, %v8405_v30, %v8406_v14  ;;  %v8122_v26 = vld [vmem:[#allocation2 + $0xa4] sm:$0xc] }
 0x2e4   : > { %v6945_v33 = vsel %vm1644_vm11, %v6870_v18, %v6785_v29  ;;  %v8232_v24 = vrot.slane %v17398_v17, 3  ;;  %v12784_v18 = vld [vmem:[#allocation2 + $0xb8] ss:$0 sps:$4 sm:$0x33]   ;;  %v13143_v29 = vld [vmem:[#allocation2 + $0xb4] sm:$0xf] }
 0x2e5   : > { %v7030_v61 = vrot.slane %v6945_v33, 1  ;;  %v3351_v54 = vpop.permute.xlu1 %3350  ;;  %3492 = vrot.lane.b32.xlu0 %v3462_v37, %s13280_s11  ;;  %v17399_v37 = vld [vmem:[#allocation9_spill] sm:$0xff]  ;;  %v10873_v56 = vcombine.low %v2977_v32, %v13143_v29  ;;  %v8408_v32 = vrot.slane %v11383_v45, 2  ;;  %v8241_v45 = vrot.slane %v17400_v57, 3 }
 0x2e6   : > { %v8235_v53 = vrot.slane %v17399_v37, 3  ;;  %v8234_v30 = vsel %vm7710_vm13, %v8232_v24, %v8233_v28  ;;  %v3519_v13 = vsel %vm683_vm7, %v12784_v18, %v3351_v54  ;;  %v8124_v24 = vld [vmem:[#allocation2 + $0xb4] sm:$0xc]  ;;  %v13144_v23 = vld [vmem:[#allocation2 + $0xb8] ss:$0 sps:$4 sm:$0x77]  }
 0x2e7   : > { %v3349_v0 = vpop.permute.xlu0 %3348  ;;  %v7032_v43 = vsel %vm1339_vm6, %v7030_v61, %v7031_v63  ;;  %8276 = vrot.lane.b32.xlu1 %v8231_v48, %s13279_s10  ;;  %v3513_v48 = vsel %vm683_vm7, %v12536_v41, %v14832_v49  ;;  %v8411_v63 = vrot.slane %v11385_v21, 2  ;;  %v12778_v61 = vld [vmem:[#allocation2 + $0x158] ss:$0 sps:$4 sm:$0x11]  }
 0x2e8   : > { %12009 = vmatprep.mubr.msk.bf16.mxu0 %vm2536_vm12, %v7032_v43  ;;  %v8237_v14 = vsel %vm7710_vm13, %v8235_v53, %v8236_v58  ;;  %v3516_v42 = vsel %vm683_vm7, %v10873_v56, %v3349_v0  ;;  %v6879_v43 = vsel %vm683_vm7, %v12778_v61, %v15911_v50  ;;  %v12804_v18 = vld [vmem:[#allocation2 + $0xbc] ss:$0 sps:$4 sm:$0x33]   ;;  %v13147_v61 = vld [vmem:[#allocation2 + $0xa8] sm:$0xf] }
 0x2e9   : > { %v6789_v33 = vpop.permute.xlu1 %6788  ;;  %8274 = vrot.lane.b32.xlu0 %v8228_v22, %s13279_s10  ;;  %v6876_v22 = vsel %vm683_vm7, %v11187_v3, %v15918_v9  ;;  %v8413_v31 = vsel %vm1725_vm10, %v8411_v63, %v8412_v36  ;;  %v8242_v3 = vrot.slane %v13144_v23, 3  ;;  %v13146_v36 = vld [vmem:[#allocation2 + $0xa8] ss:$0 sps:$4 sm:$0x77]  }
 0x2ea   : > { %v6949_v28 = vsel %vm1644_vm11, %v6876_v22, %v6789_v33  ;;  %v12810_v57 = vld [vmem:[#allocation2 + $0xdc] ss:$0 sps:$4 sm:$0x33]  }
 0x2eb   : > { %v3469_v17 = vpop.permute.xlu0 %3468  ;;  %8452 = vrot.lane.b32.xlu1 %v8407_v10, %s13280_s11  ;;  %v13145_v10 = vld [vmem:[#allocation2 + $0xb8] sm:$0xf]  ;;  %v7033_v50 = vrot.slane %v6949_v28, 1 }
 0x2ec   : > { %v3599_v49 = vsel %vm1644_vm11, %v3510_v8, %v3469_v17  ;;  %v3600_v41 = vsel %vm1644_vm11, %v3513_v48, %v3469_v17  ;;  %v11389_v55 = vcombine.low %v8124_v24, %v13145_v10  ;;  %v8410_v48 = vsel %vm1725_vm10, %v8408_v32, %v8409_v16  ;;  %v8128_v16 = vld [vmem:[#allocation2 + $0xd4] sm:$0xc]  ;;  %v6188_v24 = vld [vmem:[#allocation2 + $0x160] sm:$0xe] }
 0x2ed   : > { %v3678_v39 = vrot.slane %v3599_v49, 2  ;;  %v3679_v1 = vrot.slane %v3600_v41, 2  ;;  %v3471_v19 = vpop.permute.xlu1 %3470  ;;  %8450 = vrot.lane.b32.xlu0 %v8404_v6, %s13280_s11  ;;  %v17401_v6 = vld [vmem:[#allocation10_spill] sm:$0xff]  ;;  %v8239_v8 = vrot.slane %v13146_v36, 3  ;;  %v11387_v17 = vcombine.low %v8122_v26, %v13147_v61  ;;  %v13150_v26 = vld [vmem:[#allocation2 + $0xd8] sm:$0xf] }
 0x2ee   : > { %v3602_v21 = vsel %vm1644_vm11, %v3516_v42, %v3471_v19  ;;  %v3603_v9 = vsel %vm1644_vm11, %v3519_v13, %v3471_v19  ;;  %v8238_v63 = vrot.slane %v17401_v6, 3  ;;  %v8417_v41 = vrot.slane %v11389_v55, 2  ;;  %v8126_v42 = vld [vmem:[#allocation2 + $0xc4] sm:$0xc]  ;;  %v17403_v10 = vld [vmem:[#allocation12_spill] sm:$0xff] }
 0x2ef   : > { %v3681_v54 = vrot.slane %v3602_v21, 2  ;;  %v3682_v37 = vrot.slane %v3603_v9, 2  ;;  %v6791_v0 = vpop.permute.xlu0 %6790  ;;  %v3680_v53 = vsel %vm1725_vm10, %v3678_v39, %v3679_v1  ;;  %8280 = vrot.lane.b32.xlu1 %v8237_v14, %s13279_s10  ;;  %v12802_v14 = vld [vmem:[#allocation2 + $0xac] ss:$0 sps:$4 sm:$0x33]   ;;  %v8418_v13 = vrot.slane %v12804_v18, 2 }
 0x2f0   : > { %v6951_v58 = vsel %vm1644_vm11, %v6879_v43, %v6791_v0  ;;  %11891 = vmatprep.mubr.msk.bf16.mxu1 %vm2536_vm12, %v3680_v53  ;;  %v8240_v39 = vsel %vm7710_vm13, %v8238_v63, %v8239_v8  ;;  %v8414_v1 = vrot.slane %v11387_v17, 2  ;;  %v8415_v19 = vrot.slane %v12802_v14, 2  ;;  %v13148_v21 = vld [vmem:[#allocation2 + $0xc8] sm:$0xf]  ;;  %v8130_v36 = vld [vmem:[#allocation2 + $0xe4] sm:$0xc] }
 0x2f1   : > { %v7034_v29 = vrot.slane %v6951_v58, 1  ;;  %v6603_v56 = vpop.permute.xlu1 %6602  ;;  %8278 = vrot.lane.b32.xlu0 %v8234_v30, %s13279_s10  ;;  %v3683_v33 = vsel %vm1725_vm10, %v3681_v54, %v3682_v37  ;;  %v8243_v30 = vsel %vm7710_vm13, %v8241_v45, %v8242_v3  ;;  %v11391_v9 = vcombine.low %v8126_v42, %v13148_v21  ;;  %v17402_v54 = vld [vmem:[#allocation13_spill] sm:$0xff]  ;;  %v12791_v45 = vld [vmem:[#allocation2 + $0x168] ss:$0 sps:$4 sm:$0x11]  }
 0x2f2   : > { %11892 = vmatmul.mubr.msk.bf16.gmra.mrb[8].mxu1 %vm2536_vm12, %v3683_v33  ;;  %v8419_v43 = vsel %vm1725_vm10, %v8417_v41, %v8418_v13  ;;  %v8247_v37 = vrot.slane %v17402_v54, 3  ;;  %v13149_v0 = vld [vmem:[#allocation2 + $0xd8] ss:$0 sps:$4 sm:$0x77]   ;;  %v11393_v58 = vcombine.low %v8128_v16, %v13150_v26  ;;  %v8416_v3 = vsel %vm1725_vm10, %v8414_v1, %v8415_v19  ;;  %v8132_v8 = vld [vmem:[#allocation2 + $0xf4] sm:$0xc] }
 0x2f3   : > { %v6601_v22 = vpop.permute.xlu0 %6600  ;;  %v7035_v49 = vsel %vm1339_vm6, %v7033_v50, %v7034_v29  ;;  %8456 = vrot.lane.b32.xlu1 %v8413_v31, %s13280_s11  ;;  %v12808_v31 = vld [vmem:[#allocation2 + $0xcc] ss:$0 sps:$4 sm:$0x33]   ;;  %v8248_v53 = vrot.slane %v13149_v0, 3  ;;  %v8244_v55 = vrot.slane %v17403_v10, 3  ;;  %v8420_v6 = vrot.slane %v11391_v9, 2 }
 0x2f4   : > { %12010 = vmatmul.mubr.msk.bf16.gmra.mrb[80].mxu0 %vm2536_vm12, %v7035_v49  ;;  %v13151_v18 = vld [vmem:[#allocation2 + $0xc8] ss:$0 sps:$4 sm:$0x77]   ;;  %v13152_v29 = vld [vmem:[#allocation2 + $0x164] sm:$0xf]  ;;  %v8421_v63 = vrot.slane %v12808_v31, 2  ;;  %v6885_v49 = vsel %vm683_vm7, %v12791_v45, %v6603_v56 }
 0x2f5   : > { %v15979_v32 = vpop.permute.xlu1 %3354  ;;  %8454 = vrot.lane.b32.xlu0 %v8410_v48, %s13280_s11  ;;  %v8245_v50 = vrot.slane %v13151_v18, 3  ;;  %v11189_v33 = vcombine.low %v6188_v24, %v13152_v29  ;;  %v8249_v61 = vsel %vm7710_vm13, %v8247_v37, %v8248_v53  ;;  %v8423_v17 = vrot.slane %v11393_v58, 2  ;;  %v13153_v42 = vld [vmem:[#allocation2 + $0xe8] sm:$0xf]  ;;  %v13154_v1 = vld [vmem:[#allocation2 + $0xf8] sm:$0xf] }
 0x2f6   : > { %v8424_v14 = vrot.slane %v12810_v57, 2  ;;  %v11395_v16 = vcombine.low %v8130_v36, %v13153_v42  ;;  %v11397_v19 = vcombine.low %v8132_v8, %v13154_v1  ;;  %v12815_v24 = vld [vmem:[#allocation2 + $0xfc] ss:$0 sps:$4 sm:$0x33]   ;;  %v8422_v56 = vsel %vm1725_vm10, %v8420_v6, %v8421_v63  ;;  %v2980_v31 = vld [vmem:[#allocation2 + $0xc0] sm:$0xc] }
 0x2f7   : > { %v15983_v28 = vpop.permute.xlu0 %3352  ;;  %8284 = vrot.lane.b32.xlu1 %v8243_v30, %s13279_s10  ;;  %v8246_v13 = vsel %vm7710_vm13, %v8244_v55, %v8245_v50  ;;  %v6882_v21 = vsel %vm683_vm7, %v11189_v33, %v6601_v22  ;;  %v17404_v37 = vld [vmem:[#allocation15_spill] sm:$0xff]  ;;  %v13155_v53 = vld [vmem:[#allocation2 + $0xf8] ss:$0 sps:$4 sm:$0x77]   ;;  %v6191_v58 = vld [vmem:[#allocation2 + $0x170] sm:$0xe] }
 0x2f8   : > { %v8425_v54 = vsel %vm1725_vm10, %v8423_v17, %v8424_v14  ;;  %v8253_v0 = vrot.slane %v17404_v37, 3  ;;  %v8254_v26 = vrot.slane %v13155_v53, 3  ;;  %v17405_v22 = vld [vmem:[#allocation14_spill] sm:$0xff]  ;;  %v13156_v55 = vld [vmem:[#allocation2 + $0xe8] ss:$0 sps:$4 sm:$0x77]  }
 0x2f9   : > { %v15988_v23 = vpop.permute.xlu1 %6606  ;;  %8282 = vrot.lane.b32.xlu0 %v8240_v39, %s13279_s10  ;;  %v12813_v39 = vld [vmem:[#allocation2 + $0xec] ss:$0 sps:$4 sm:$0x33]   ;;  %v8250_v10 = vrot.slane %v17405_v22, 3  ;;  %v8251_v18 = vrot.slane %v13156_v55, 3  ;;  %v8426_v29 = vrot.slane %v11395_v16, 2 }
 0x2fa   : > { %v2983_v50 = vld [vmem:[#allocation2 + $0xd0] sm:$0xc]  ;;  %v8427_v33 = vrot.slane %v12813_v39, 2  ;;  %v8429_v6 = vrot.slane %v11397_v19, 2  ;;  %v8430_v63 = vrot.slane %v12815_v24, 2 }
 0x2fb   : > { %v15993_v48 = vpop.permute.xlu0 %6604  ;;  %8460 = vrot.lane.b32.xlu1 %v8419_v43, %s13280_s11  ;;  %v12793_v36 = vld [vmem:[#allocation2 + $0xc8] ss:$0 sps:$4 sm:$0x33]   ;;  %v13157_v8 = vld [vmem:[#allocation2 + $0xc4] sm:$0xf]  ;;  %v8252_v1 = vsel %vm7710_vm13, %v8250_v10, %v8251_v18 }
 0x2fc   : > { %v13159_v42 = vld [vmem:[#allocation2 + $0xd4] sm:$0xf]  ;;  %v12799_v24 = vld [vmem:[#allocation2 + $0x178] ss:$0 sps:$4 sm:$0x11]  }
 0x2fd   : > { %v6795_v30 = vpop.permute.xlu1 %6794  ;;  %8458 = vrot.lane.b32.xlu0 %v8416_v3, %s13280_s11  ;;  %v10877_v16 = vcombine.low %v2983_v50, %v13159_v42  ;;  %v8136_v19 = vld [vmem:[#allocation2 + $0x114] sm:$0xc]  ;;  %v8134_v22 = vld [vmem:[#allocation2 + $0x104] sm:$0xc]  ;;  %v13162_v50 = vld [vmem:[#allocation2 + $0x118] sm:$0xf] }
 0x2fe   : > { %v6955_v41 = vsel %vm1644_vm11, %v6885_v49, %v6795_v30  ;;  %v13158_v49 = vld [vmem:[#allocation2 + $0x174] sm:$0xf] }
 0x2ff   : > { %v6793_v9 = vpop.permute.xlu0 %6792  ;;  %8288 = vrot.lane.b32.xlu1 %v8249_v61, %s13279_s10  ;;  %v7037_v57 = vrot.slane %v6955_v41, 1  ;;  %v10875_v61 = vcombine.low %v2980_v31, %v13157_v8  ;;  %v11191_v30 = vcombine.low %v6191_v58, %v13158_v49  ;;  %v8255_v41 = vsel %vm7710_vm13, %v8253_v0, %v8254_v26  ;;  %v17406_v31 = vld [vmem:[#allocation16_spill] sm:$0xff] }
 0x300   : > { %v6953_v43 = vsel %vm1644_vm11, %v6882_v21, %v6793_v9  ;;  %v8428_v21 = vsel %vm1725_vm10, %v8426_v29, %v8427_v33  ;;  %v8431_v9 = vsel %vm1725_vm10, %v8429_v6, %v8430_v63  ;;  %v3525_v0 = vsel %vm683_vm7, %v12793_v36, %v15979_v32  ;;  %v12823_v29 = vld [vmem:[#allocation2 + $0x11c] ss:$0 sps:$4 sm:$0x33]  }
 0x301   : > { %v7036_v45 = vrot.slane %v6953_v43, 1  ;;  %v3359_v3 = vpop.permute.xlu1 %3358  ;;  %8286 = vrot.lane.b32.xlu0 %v8246_v13, %s13279_s10  ;;  %v12805_v13 = vld [vmem:[#allocation2 + $0xd8] ss:$0 sps:$4 sm:$0x33]   ;;  %v8256_v43 = vrot.slane %v17406_v31, 3  ;;  %v3522_v53 = vsel %vm683_vm7, %v10875_v61, %v15983_v28  ;;  %v6888_v10 = vsel %vm683_vm7, %v11191_v30, %v15993_v48 }
 0x302   : > { %v11401_v32 = vcombine.low %v8136_v19, %v13162_v50  ;;  %v3531_v28 = vsel %vm683_vm7, %v12805_v13, %v3359_v3  ;;  %v12821_v30 = vld [vmem:[#allocation2 + $0x10c] ss:$0 sps:$4 sm:$0x33]   ;;  %v8436_v19 = vrot.slane %v12823_v29, 2 }
 0x303   : > { %v3357_v17 = vpop.permute.xlu0 %3356  ;;  %v7038_v14 = vsel %vm1339_vm6, %v7036_v45, %v7037_v57  ;;  %8464 = vrot.lane.b32.xlu1 %v8425_v54, %s13280_s11  ;;  %v13160_v54 = vld [vmem:[#allocation2 + $0x108] ss:$0 sps:$4 sm:$0x77]   ;;  %v13161_v57 = vld [vmem:[#allocation2 + $0x118] ss:$0 sps:$4 sm:$0x77]  }
 0x304   : > { %12013 = vmatprep.mubr.msk.bf16.mxu0 %vm2536_vm12, %v7038_v14  ;;  %v8257_v37 = vrot.slane %v13160_v54, 3  ;;  %v8260_v45 = vrot.slane %v13161_v57, 3  ;;  %v3528_v33 = vsel %vm683_vm7, %v10877_v16, %v3357_v17  ;;  %v13163_v14 = vld [vmem:[#allocation2 + $0x108] sm:$0xf] }
 0x305   : > { %v6797_v39 = vpop.permute.xlu1 %6796  ;;  %8462 = vrot.lane.b32.xlu0 %v8422_v56, %s13280_s11  ;;  %v17407_v56 = vld [vmem:[#allocation17_spill] sm:$0xff]  ;;  %v11399_v49 = vcombine.low %v8134_v22, %v13163_v14 }
 0x306   : > { %v8259_v58 = vrot.slane %v17407_v56, 3  ;;  %v6957_v8 = vsel %vm1644_vm11, %v6888_v10, %v6797_v39  ;;  %v8138_v56 = vld [vmem:[#allocation2 + $0x124] sm:$0xc]  ;;  %v13164_v10 = vld [vmem:[#allocation2 + $0x138] ss:$0 sps:$4 sm:$0x77]  }
 0x307   : > { %v3473_v26 = vpop.permute.xlu0 %3472  ;;  %8292 = vrot.lane.b32.xlu1 %v8255_v41, %s13279_s10  ;;  %v6891_v41 = vsel %vm683_vm7, %v12799_v24, %v15988_v23  ;;  %v7039_v31 = vrot.slane %v6957_v8, 1  ;;  %v8140_v24 = vld [vmem:[#allocation2 + $0x134] sm:$0xc] }
 0x308   : > { %v3605_v55 = vsel %vm1644_vm11, %v3522_v53, %v3473_v26  ;;  %v3606_v18 = vsel %vm1644_vm11, %v3525_v0, %v3473_v26  ;;  %v8261_v39 = vsel %vm7710_vm13, %v8259_v58, %v8260_v45  ;;  %v8432_v53 = vrot.slane %v11399_v49, 2  ;;  %v17408_v45 = vld [vmem:[#allocation20_spill] sm:$0xff] }
 0x309   : > { %v3684_v6 = vrot.slane %v3605_v55, 2  ;;  %v3685_v63 = vrot.slane %v3606_v18, 2  ;;  %v3475_v36 = vpop.permute.xlu1 %3474  ;;  %8290 = vrot.lane.b32.xlu0 %v8252_v1, %s13279_s10  ;;  %v8435_v1 = vrot.slane %v11401_v32, 2  ;;  %v8433_v26 = vrot.slane %v12821_v30, 2  ;;  %v13165_v18 = vld [vmem:[#allocation2 + $0x138] sm:$0xf] }
 0x30a   : > { %v3608_v48 = vsel %vm1644_vm11, %v3528_v33, %v3475_v36  ;;  %v3609_v61 = vsel %vm1644_vm11, %v3531_v28, %v3475_v36  ;;  %v8265_v22 = vrot.slane %v17408_v45, 3  ;;  %v8266_v55 = vrot.slane %v13164_v10, 3  ;;  %v13166_v32 = vld [vmem:[#allocation2 + $0x128] sm:$0xf]  ;;  %v7456_v10 = vld [vmem:[#allocation2 + $0x10] sm:$0x8] }
 0x30b   : > { %v3687_v3 = vrot.slane %v3608_v48, 2  ;;  %v3688_v13 = vrot.slane %v3609_v61, 2  ;;  %v6799_v17 = vpop.permute.xlu0 %6798  ;;  %v3686_v42 = vsel %vm1725_vm10, %v3684_v6, %v3685_v63  ;;  %8468 = vrot.lane.b32.xlu1 %v8431_v9, %s13280_s11  ;;  %v8258_v9 = vsel %vm7710_vm13, %v8256_v43, %v8257_v37  ;;  %v12829_v43 = vld [vmem:[#allocation2 + $0x13c] ss:$0 sps:$4 sm:$0x33]   ;;  %v17409_v6 = vld [vmem:[#allocation18_spill] sm:$0xff] }
 0x30c   : > { %v6959_v16 = vsel %vm1644_vm11, %v6891_v41, %v6799_v17  ;;  %11895 = vmatprep.mubr.msk.bf16.mxu1 %vm2536_vm12, %v3686_v42  ;;  %v11405_v50 = vcombine.low %v8140_v24, %v13165_v18  ;;  %v11403_v29 = vcombine.low %v8138_v56, %v13166_v32  ;;  %v12827_v28 = vld [vmem:[#allocation2 + $0x12c] ss:$0 sps:$4 sm:$0x33]   ;;  %v8434_v33 = vsel %vm1725_vm10, %v8432_v53, %v8433_v26  ;;  %v13167_v36 = vld [vmem:[#allocation2 + $0x128] ss:$0 sps:$4 sm:$0x77]  }
 0x30d   : > { %v7040_v54 = vrot.slane %v6959_v16, 1  ;;  %v16041_v0 = vpop.permute.xlu1 %6610  ;;  %8466 = vrot.lane.b32.xlu0 %v8428_v21, %s13280_s11  ;;  %v3689_v23 = vsel %vm1725_vm10, %v3687_v3, %v3688_v13  ;;  %v8437_v21 = vsel %vm1725_vm10, %v8435_v1, %v8436_v19  ;;  %v8262_v63 = vrot.slane %v17409_v6, 3  ;;  %v12811_v48 = vld [vmem:[#allocation2 + $0x188] ss:$0 sps:$4 sm:$0x11]  }
 0x30e   : > { %11896 = vmatmul.mubr.msk.bf16.gmra.mrb[12].mxu1 %vm2536_vm12, %v3689_v23  ;;  %v8263_v8 = vrot.slane %v13167_v36, 3  ;;  %v6194_v61 = vld [vmem:[#allocation2 + $0x180] sm:$0xe]  ;;  %v8267_v49 = vsel %vm7710_vm13, %v8265_v22, %v8266_v55  ;;  %v8441_v30 = vrot.slane %v11405_v50, 2  ;;  %v8442_v41 = vrot.slane %v12829_v43, 2 }
 0x30f   : > { %v16047_v57 = vpop.permute.xlu0 %6608  ;;  %v7041_v58 = vsel %vm1339_vm6, %v7039_v31, %v7040_v54  ;;  %8296 = vrot.lane.b32.xlu1 %v8261_v39, %s13279_s10  ;;  %v8142_v3 = vld [vmem:[#allocation2 + $0x144] sm:$0xc]  ;;  %v8144_v13 = vld [vmem:[#allocation2 + $0x154] sm:$0xc]  ;;  %v8438_v42 = vrot.slane %v11403_v29, 2  ;;  %v8439_v16 = vrot.slane %v12827_v28, 2  ;;  %v6897_v43 = vsel %vm683_vm7, %v12811_v48, %v16041_v0 }
 0x310   : > { %12014 = vmatmul.mubr.msk.bf16.gmra.mrb[84].mxu0 %vm2536_vm12, %v7041_v58  ;;  %v7423_v39 = vld [vmem:[#allocation2 + $0x4] sm:$0xf]  ;;  %v7454_v1 = vld [vmem:[#allocation2] sm:$0x8]  ;;  %v8264_v19 = vsel %vm7710_vm13, %v8262_v63, %v8263_v8  ;;  %v8271_v31 = vrot.slane %v17323_v59, 3  ;;  %v8443_v55 = vsel %vm1725_vm10, %v8441_v30, %v8442_v41  ;;  %v8268_v28 = vrot.slane %v17315_v15, 3 }
 0x311   : > { %v16054_v37 = vpop.permute.xlu1 %3362  ;;  %8294 = vrot.lane.b32.xlu0 %v8258_v9, %s13279_s10  ;;  %v13168_v54 = vld [vmem:[#allocation2 + $0x158] ss:$0 sps:$4 sm:$0x77]   ;;  %v16068_v24 = vld [vmem:[#allocation2 + $0x14c] ss:$0 sps:$4 sm:$0x33]   ;;  %v11297_v59 = vcombine.low %v7454_v1, %v7423_v39  ;;  %v8440_v29 = vsel %vm1725_vm10, %v8438_v42, %v8439_v16 }
 0x312   : > { %v8272_v23 = vrot.slane %v13168_v54, 3  ;;  %v13169_v9 = vld [vmem:[#allocation2 + $0x184] sm:$0xf]  ;;  %v13170_v56 = vld [vmem:[#allocation2 + $0x148] sm:$0xf] }
 0x313   : > { %v16059_v14 = vpop.permute.xlu0 %3360  ;;  %8472 = vrot.lane.b32.xlu1 %v8437_v21, %s13280_s11  ;;  %v11193_v53 = vcombine.low %v6194_v61, %v13169_v9  ;;  %v11407_v58 = vcombine.low %v8142_v3, %v13170_v56  ;;  %v13171_v21 = vld [vmem:[#allocation2 + $0x158] sm:$0xf]  ;;  %v7425_v22 = vld [vmem:[#allocation2 + $0x14] sm:$0xf]  ;;  %v2986_v6 = vld [vmem:[#allocation2 + $0xe0] sm:$0xc] }
 0x314   : > { %v11409_v45 = vcombine.low %v8144_v13, %v13171_v21  ;;  %v12835_v18 = vld [vmem:[#allocation2 + $0x15c] ss:$0 sps:$4 sm:$0x33]   ;;  %v12838_v50 = vld [vmem:[#allocation2 + $0x8] ss:$0 sps:$4 sm:$0x77]   ;;  %v8273_v61 = vsel %vm7710_vm13, %v8271_v31, %v8272_v23 }
 0x315   : > { %v16063_v17 = vpop.permute.xlu1 %6614  ;;  %8470 = vrot.lane.b32.xlu0 %v8434_v33, %s13280_s11  ;;  %v12840_v33 = vld [vmem:[#allocation2 + $0x18] ss:$0 sps:$4 sm:$0x77]   ;;  %v13172_v36 = vld [vmem:[#allocation2 + $0x148] ss:$0 sps:$4 sm:$0x77]   ;;  %v6894_v30 = vsel %vm683_vm7, %v11193_v53, %v16047_v57 }
 0x316   : > { %v8269_v8 = vrot.slane %v13172_v36, 3  ;;  %v6197_v0 = vld [vmem:[#allocation2 + $0x190] sm:$0xe]  ;;  %v8444_v41 = vrot.slane %v11407_v58, 2  ;;  %v8445_v3 = vrot.slane %v16068_v24, 2  ;;  %v8447_v15 = vrot.slane %v11409_v45, 2 }
 0x317   : > { %v16070_v26 = vpop.permute.xlu0 %6612  ;;  %8300 = vrot.lane.b32.xlu1 %v8267_v49, %s13279_s10  ;;  %v11299_v49 = vcombine.low %v7456_v10, %v7425_v22  ;;  %v2989_v42 = vld [vmem:[#allocation2 + $0xf0] sm:$0xc]  ;;  %v8448_v16 = vrot.slane %v12835_v18, 2  ;;  %v7711_v39 = vrot.slane %v11297_v59, 3  ;;  %v7712_v1 = vrot.slane %v12838_v50, 3 }
 0x318   : > { %v12817_v31 = vld [vmem:[#allocation2 + $0xe8] ss:$0 sps:$4 sm:$0x33]   ;;  %v7715_v9 = vrot.slane %v12840_v33, 3  ;;  %v8270_v24 = vsel %vm7710_vm13, %v8268_v28, %v8269_v8  ;;  %v16092_v58 = vld [vmem:[#allocation2 + $0x14] sm:$0xfc]  }
 0x319   : > { %v6803_v32 = vpop.permute.xlu1 %6802  ;;  %8298 = vrot.lane.b32.xlu0 %v8264_v19, %s13279_s10  ;;  %v16086_v19 = vld [vmem:[#allocation2 + $0x4] sm:$0xfc]   ;;  %v16089_v53 = vld [vmem:[#allocation2 + $0xc] ss:$0 sps:$4 sm:$0x33]   ;;  %v7714_v56 = vrot.slane %v11299_v49, 3  ;;  %v7713_v49 = vsel %vm7710_vm13, %v7711_v39, %v7712_v1 }
 0x31a   : > { %v6963_v63 = vsel %vm1644_vm11, %v6897_v43, %v6803_v32  ;;  %v16094_v21 = vld [vmem:[#allocation2 + $0x1c] ss:$0 sps:$4 sm:$0x33]   ;;  %v13173_v45 = vld [vmem:[#allocation2 + $0xe4] sm:$0xf] }
 0x31b   : > { %v6801_v48 = vpop.permute.xlu0 %6800  ;;  %8476 = vrot.lane.b32.xlu1 %v8443_v55, %s13280_s11  ;;  %v7043_v54 = vrot.slane %v6963_v63, 1  ;;  %v10879_v22 = vcombine.low %v2986_v6, %v13173_v45  ;;  %v16098_v18 = vld [vmem:[#allocation2 + $0x24] sm:$0xf]  ;;  %v7429_v59 = vld [vmem:[#allocation2 + $0x34] sm:$0xf] }
 0x31c   : > { %v6961_v13 = vsel %vm1644_vm11, %v6894_v30, %v6801_v48  ;;  %v7460_v50 = vld [vmem:[#allocation2 + $0x30] sm:$0x8]  ;;  %v13174_v43 = vld [vmem:[#allocation2 + $0x194] sm:$0xf]  ;;  %v7458_v28 = vld [vmem:[#allocation2 + $0x20] sm:$0x8] }
 0x31d   : > { %v7042_v23 = vrot.slane %v6961_v13, 1  ;;  %v3367_v57 = vpop.permute.xlu1 %3366  ;;  %8474 = vrot.lane.b32.xlu0 %v8440_v29, %s13280_s11  ;;  %v11195_v32 = vcombine.low %v6197_v0, %v13174_v43  ;;  %v8449_v29 = vsel %vm1725_vm10, %v8447_v15, %v8448_v16  ;;  %v16102_v33 = vld [vmem:[#allocation2 + $0x38] ss:$0 sps:$4 sm:$0x77]   ;;  %v13175_v6 = vld [vmem:[#allocation2 + $0xf4] sm:$0xf]  ;;  %v7716_v0 = vsel %vm7710_vm13, %v7714_v56, %v7715_v9 }
 0x31e   : > { %v12825_v63 = vld [vmem:[#allocation2 + $0xf8] ss:$0 sps:$4 sm:$0x33]   ;;  %v10881_v36 = vcombine.low %v2989_v42, %v13175_v6  ;;  %v7919_v30 = vrot.slane %v16086_v19, 2  ;;  %v7920_v48 = vrot.slane %v16089_v53, 2  ;;  %v7922_v15 = vrot.slane %v16092_v58, 2 }
 0x31f   : > { %v3365_v10 = vpop.permute.xlu0 %3364  ;;  %v7044_v55 = vsel %vm1339_vm6, %v7042_v23, %v7043_v54  ;;  %8304 = vrot.lane.b32.xlu1 %v8273_v61, %s13279_s10  ;;  %v8446_v61 = vsel %vm1725_vm10, %v8444_v41, %v8445_v3  ;;  %v11303_v13 = vcombine.low %v7460_v50, %v7429_v59  ;;  %v3537_v16 = vsel %vm683_vm7, %v12817_v31, %v16054_v37  ;;  %v12819_v54 = vld [vmem:[#allocation2 + $0x198] ss:$0 sps:$4 sm:$0x11]   ;;  %v12849_v56 = vld [vmem:[#allocation2 + $0x28] ss:$0 sps:$4 sm:$0x77]  }
 0x320   : > { %12017 = vmatprep.mubr.msk.bf16.mxu0 %vm2536_vm12, %v7044_v55  ;;  %v3534_v42 = vsel %vm683_vm7, %v10879_v22, %v16059_v14  ;;  %v7923_v41 = vrot.slane %v16094_v21, 2  ;;  %v11301_v3 = vcombine.low %v7458_v28, %v16098_v18  ;;  %v6900_v39 = vsel %vm683_vm7, %v11195_v32, %v16070_v26  ;;  %v16129_v22 = vld [vmem:[#allocation2 + $0x3c] ss:$0 sps:$4 sm:$0x33]   ;;  %v2995_v50 = vld [vmem:[#allocation2 + $0x110] sm:$0xc] }
 0x321   : > { %v6805_v8 = vpop.permute.xlu1 %6804  ;;  %8302 = vrot.lane.b32.xlu0 %v8270_v24, %s13279_s10  ;;  %v7721_v37 = vrot.slane %v16102_v33, 3  ;;  %v3543_v31 = vsel %vm683_vm7, %v12825_v63, %v3367_v57  ;;  %v3540_v14 = vsel %vm683_vm7, %v10881_v36, %v3365_v10  ;;  %v7720_v45 = vrot.slane %v11303_v13, 3  ;;  %v12853_v43 = vld [vmem:[#allocation2 + $0x24] sm:$0xfc]   ;;  %v7433_v32 = vld [vmem:[#allocation2 + $0x54] sm:$0xf] }
 0x322   : > { %v6965_v58 = vsel %vm1644_vm11, %v6900_v39, %v6805_v8  ;;  %v6903_v57 = vsel %vm683_vm7, %v12819_v54, %v16063_v17  ;;  %v7924_v33 = vsel %vm1725_vm10, %v7922_v15, %v7923_v41  ;;  %v12855_v63 = vld [vmem:[#allocation2 + $0x34] sm:$0xfc]   ;;  %v7431_v6 = vld [vmem:[#allocation2 + $0x44] sm:$0xf]  ;;  %v7462_v17 = vld [vmem:[#allocation2 + $0x40] sm:$0x8] }
 0x323   : > { %v3477_v23 = vpop.permute.xlu0 %3476  ;;  %8480 = vrot.lane.b32.xlu1 %v8449_v29, %s13280_s11  ;;  %v7464_v29 = vld [vmem:[#allocation2 + $0x50] sm:$0x8]  ;;  %v7045_v36 = vrot.slane %v6965_v58, 1  ;;  %v7717_v13 = vrot.slane %v11301_v3, 3  ;;  %v7718_v54 = vrot.slane %v12849_v56, 3 }
 0x324   : > { %v3611_v1 = vsel %vm1644_vm11, %v3534_v42, %v3477_v23  ;;  %v3612_v19 = vsel %vm1644_vm11, %v3537_v16, %v3477_v23  ;;  %v12854_v16 = vld [vmem:[#allocation2 + $0x2c] ss:$0 sps:$4 sm:$0x33]   ;;  %v7921_v42 = vsel %vm1725_vm10, %v7919_v30, %v7920_v48  ;;  %v11307_v23 = vcombine.low %v7464_v29, %v7433_v32  ;;  %v12862_v39 = vld [vmem:[#allocation2 + $0x58] ss:$0 sps:$4 sm:$0x77]  }
 0x325   : > { %v3690_v9 = vrot.slane %v3611_v1, 2  ;;  %v3691_v53 = vrot.slane %v3612_v19, 2  ;;  %v3479_v24 = vpop.permute.xlu1 %3478  ;;  %8478 = vrot.lane.b32.xlu0 %v8446_v61, %s13280_s11  ;;  %v12842_v1 = vld [vmem:[#allocation2 + $0x118] ss:$0 sps:$4 sm:$0x33]   ;;  %v11305_v19 = vcombine.low %v7462_v17, %v7431_v6  ;;  %v7929_v30 = vrot.slane %v16129_v22, 2 }
 0x326   : > { %v3614_v26 = vsel %vm1644_vm11, %v3540_v14, %v3479_v24  ;;  %v3615_v21 = vsel %vm1644_vm11, %v3543_v31, %v3479_v24  ;;  %v2992_v31 = vld [vmem:[#allocation2 + $0x100] sm:$0xc]  ;;  %v7722_v14 = vsel %vm7710_vm13, %v7720_v45, %v7721_v37  ;;  %v12836_v48 = vld [vmem:[#allocation2 + $0x108] ss:$0 sps:$4 sm:$0x33]   ;;  %v7925_v24 = vrot.slane %v12853_v43, 2 }
 0x327   : > { %v3693_v55 = vrot.slane %v3614_v26, 2  ;;  %v3694_v10 = vrot.slane %v3615_v21, 2  ;;  %v6807_v18 = vpop.permute.xlu0 %6806  ;;  %v3692_v59 = vsel %vm1725_vm10, %v3690_v9, %v3691_v53  ;;  %7761 = vrot.lane.b32.xlu1 %v7716_v0, %s13279_s10  ;;  %v7928_v9 = vrot.slane %v12855_v63, 2  ;;  %v12860_v58 = vld [vmem:[#allocation2 + $0x48] ss:$0 sps:$4 sm:$0x77]  }
 0x328   : > { %v6967_v28 = vsel %vm1644_vm11, %v6903_v57, %v6807_v18  ;;  %11899 = vmatprep.mubr.msk.bf16.mxu1 %vm2536_vm12, %v3692_v59  ;;  %v7926_v56 = vrot.slane %v12854_v16, 2  ;;  %v13281_v26 = vmov 1065369472   ;;  %v7719_v21 = vsel %vm7710_vm13, %v7717_v13, %v7718_v54  ;;  %v13177_v18 = vld [vmem:[#allocation2 + $0x104] sm:$0xf] }
 0x329   : > { %v7046_v8 = vrot.slane %v6967_v28, 1  ;;  %v3371_v61 = vpop.permute.xlu1 %3370  ;;  %7759 = vrot.lane.b32.xlu0 %v7713_v49, %s13279_s10  ;;  %v3695_v0 = vsel %vm1725_vm10, %v3693_v55, %v3694_v10  ;;  %v13176_v49 = vld [vmem:[#allocation2 + $0x114] sm:$0xf]  ;;  %v7726_v57 = vrot.slane %v11307_v23, 3  ;;  %v7727_v55 = vrot.slane %v12862_v39, 3 }
 0x32a   : > { %11900 = vmatmul.mubr.msk.bf16.gmra.mrb[16].mxu1 %vm2536_vm12, %v3695_v0  ;;  %v10885_v3 = vcombine.low %v2995_v50, %v13176_v49  ;;  %v12866_v10 = vld [vmem:[#allocation2 + $0x54] sm:$0xfc]   ;;  %v10883_v59 = vcombine.low %v2992_v31, %v13177_v18  ;;  %v7723_v22 = vrot.slane %v11305_v19, 3  ;;  %v12867_v50 = vld [vmem:[#allocation2 + $0x5c] ss:$0 sps:$4 sm:$0x33]   ;;  %v7930_v32 = vsel %vm1725_vm10, %v7928_v9, %v7929_v30 }
 0x32b   : > { %v3369_v15 = vpop.permute.xlu0 %3368  ;;  %v7047_v41 = vsel %vm1339_vm6, %v7045_v36, %v7046_v8  ;;  %7969 = vrot.lane.b32.xlu1 %v7924_v33, %s13280_s11  ;;  %v12864_v29 = vld [vmem:[#allocation2 + $0x44] sm:$0xfc]   ;;  %v7437_v28 = vld [vmem:[#allocation2 + $0x74] sm:$0xf]  ;;  %v7468_v33 = vld [vmem:[#allocation2 + $0x70] sm:$0x8]  ;;  %v7927_v6 = vsel %vm1725_vm10, %v7925_v24, %v7926_v56  ;;  %v7728_v16 = vsel %vm7710_vm13, %v7726_v57, %v7727_v55  ;;  %v3549_v39 = vsel %vm683_vm7, %v12836_v48, %v3371_v61 }
 0x32c   : > { %12018 = vmatmul.mubr.msk.bf16.gmra.mrb[88].mxu0 %vm2536_vm12, %v7047_v41  ;;  %v7724_v17 = vrot.slane %v12860_v58, 3  ;;  %v12865_v36 = vld [vmem:[#allocation2 + $0x4c] ss:$0 sps:$4 sm:$0x33]   ;;  %v7435_v8 = vld [vmem:[#allocation2 + $0x64] sm:$0xf]  ;;  %v3546_v41 = vsel %vm683_vm7, %v10883_v59, %v3369_v15  ;;  %v11311_v49 = vcombine.low %v7468_v33, %v7437_v28 }
 0x32d   : > { %v3375_v53 = vpop.permute.xlu1 %3374  ;;  %7967 = vrot.lane.b32.xlu0 %v7921_v42, %s13280_s11  ;;  %10030 = vmatprep.mubr.bf16.mxu0 %v13281_v26  ;;  %v7934_v42 = vrot.slane %v12866_v10, 2  ;;  %v7466_v54 = vld [vmem:[#allocation2 + $0x60] sm:$0x8]  ;;  %v16158_v23 = vld [vmem:[#allocation2 + $0x68] ss:$0 sps:$4 sm:$0x77]  }
 0x32e   : > { %v3555_v37 = vsel %vm683_vm7, %v12842_v1, %v3375_v53  ;;  %v3001_v19 = vld [vmem:[#allocation2 + $0x130] sm:$0xc]  ;;  %v7935_v31 = vrot.slane %v12867_v50, 2  ;;  %v12872_v53 = vld [vmem:[#allocation2 + $0x78] ss:$0 sps:$4 sm:$0x77]   ;;  %v11309_v15 = vcombine.low %v7466_v54, %v7435_v8  ;;  %v7725_v48 = vsel %vm7710_vm13, %v7723_v22, %v7724_v17 }
 0x32f   : > { %v3373_v45 = vpop.permute.xlu0 %3372  ;;  %7765 = vrot.lane.b32.xlu1 %v7722_v14, %s13279_s10  ;;  %v12858_v61 = vld [vmem:[#allocation2 + $0x138] ss:$0 sps:$4 sm:$0x33]   ;;  %v7932_v57 = vrot.slane %v12865_v36, 2  ;;  %v7730_v55 = vrot.slane %v16158_v23, 3  ;;  %v7732_v28 = vrot.slane %v11311_v49, 3 }
 0x330   : > { %v3552_v43 = vsel %vm683_vm7, %v10885_v3, %v3373_v45  ;;  %v12878_v10 = vld [vmem:[#allocation2 + $0x7c] ss:$0 sps:$4 sm:$0x33]   ;;  %v12877_v45 = vld [vmem:[#allocation2 + $0x74] sm:$0xfc]   ;;  %v7733_v33 = vrot.slane %v12872_v53, 3 }
 0x331   : > { %v3483_v63 = vpop.permute.xlu1 %3482  ;;  %7763 = vrot.lane.b32.xlu0 %v7719_v21, %s13279_s10  ;;  %v7931_v21 = vrot.slane %v12864_v29, 2  ;;  %v7441_v50 = vld [vmem:[#allocation2 + $0x94] sm:$0xf]  ;;  %v7936_v29 = vsel %vm1725_vm10, %v7934_v42, %v7935_v31  ;;  %v7729_v17 = vrot.slane %v11309_v15, 3  ;;  %v7439_v8 = vld [vmem:[#allocation2 + $0x84] sm:$0xf] }
 0x332   : > { %v3620_v0 = vsel %vm1644_vm11, %v3552_v43, %v3483_v63  ;;  %v3621_v13 = vsel %vm1644_vm11, %v3555_v37, %v3483_v63  ;;  %v7472_v43 = vld [vmem:[#allocation2 + $0x90] sm:$0x8]  ;;  %v12875_v63 = vld [vmem:[#allocation2 + $0x64] sm:$0xfc]   ;;  %v7941_v31 = vrot.slane %v12878_v10, 2 }
 0x333   : > { %v3481_v1 = vpop.permute.xlu0 %3480  ;;  %7973 = vrot.lane.b32.xlu1 %v7930_v32, %s13280_s11  ;;  %v3699_v3 = vrot.slane %v3620_v0, 2  ;;  %v3700_v14 = vrot.slane %v3621_v13, 2  ;;  %v2998_v32 = vld [vmem:[#allocation2 + $0x120] sm:$0xc]  ;;  %v7933_v0 = vsel %vm1725_vm10, %v7931_v21, %v7932_v57  ;;  %v3007_v15 = vld [vmem:[#allocation2 + $0x150] sm:$0xc] }
 0x334   : > { %v3617_v9 = vsel %vm1644_vm11, %v3546_v41, %v3481_v1  ;;  %v3618_v30 = vsel %vm1644_vm11, %v3549_v39, %v3481_v1  ;;  %10031 = vmatmul.mubr.bf16.vlgmr.msra.gmra.mrb[92].mxu0 %v13281_v26  ;;  %v13178_v26 = vld [vmem:[#allocation2 + $0x134] sm:$0xf]  ;;  %v12876_v36 = vld [vmem:[#allocation2 + $0x6c] ss:$0 sps:$4 sm:$0x33]  }
 0x335   : > { %v3696_v24 = vrot.slane %v3617_v9, 2  ;;  %v3697_v56 = vrot.slane %v3618_v30, 2  ;;  %v3379_v58 = vpop.permute.xlu1 %3378  ;;  %7971 = vrot.lane.b32.xlu0 %v7927_v6, %s13280_s11  ;;  %v10889_v37 = vcombine.low %v3001_v19, %v13178_v26  ;;  %v3701_v22 = vsel %vm1725_vm10, %v3699_v3, %v3700_v14  ;;  %v7470_v13 = vld [vmem:[#allocation2 + $0x80] sm:$0x8]  ;;  %v13179_v39 = vld [vmem:[#allocation2 + $0x124] sm:$0xf] }
 0x336   : > { %v12883_v54 = vld [vmem:[#allocation2 + $0x98] ss:$0 sps:$4 sm:$0x77]   ;;  %v12852_v23 = vld [vmem:[#allocation2 + $0x128] ss:$0 sps:$4 sm:$0x33]   ;;  %v10887_v41 = vcombine.low %v2998_v32, %v13179_v39  ;;  %v7734_v3 = vsel %vm7710_vm13, %v7732_v28, %v7733_v33  ;;  %v7731_v9 = vsel %vm7710_vm13, %v7729_v17, %v7730_v55 }
 0x337   : > { %v3377_v18 = vpop.permute.xlu0 %3376  ;;  %v3698_v59 = vsel %vm1725_vm10, %v3696_v24, %v3697_v56  ;;  %7769 = vrot.lane.b32.xlu1 %v7728_v16, %s13279_s10  ;;  %v11315_v16 = vcombine.low %v7472_v43, %v7441_v50  ;;  %v7940_v19 = vrot.slane %v12877_v45, 2  ;;  %v7937_v30 = vrot.slane %v12875_v63, 2  ;;  %v12886_v45 = vld [vmem:[#allocation2 + $0x8c] ss:$0 sps:$4 sm:$0x33]  }
 0x338   : > { %11903 = vmatprep.mubr.msk.bf16.mxu1 %vm2536_vm12, %v3698_v59  ;;  %v7938_v53 = vrot.slane %v12876_v36, 2  ;;  %v11313_v24 = vcombine.low %v7470_v13, %v7439_v8  ;;  %v7739_v57 = vrot.slane %v12883_v54, 3  ;;  %v3561_v10 = vsel %vm683_vm7, %v12852_v23, %v3379_v58  ;;  %v12887_v50 = vld [vmem:[#allocation2 + $0x94] sm:$0xfc]   ;;  %v7476_v32 = vld [vmem:[#allocation2 + $0xb0] sm:$0x8] }
 0x339   : > { %v3383_v6 = vpop.permute.xlu1 %3382  ;;  %7767 = vrot.lane.b32.xlu0 %v7725_v48, %s13279_s10  ;;  %11904 = vmatmul.mubr.msk.bf16.gmra.mrb[20].mxu1 %vm2536_vm12, %v3701_v22  ;;  %v12881_v48 = vld [vmem:[#allocation2 + $0x88] ss:$0 sps:$4 sm:$0x77]   ;;  %v7738_v21 = vrot.slane %v11315_v16, 3  ;;  %v3558_v59 = vsel %vm683_vm7, %v10887_v41, %v3377_v18  ;;  %v7942_v55 = vsel %vm1725_vm10, %v7940_v19, %v7941_v31  ;;  %v7445_v43 = vld [vmem:[#allocation2 + $0xb4] sm:$0xf] }
 0x33a   : > { %v3567_v42 = vsel %vm683_vm7, %v12858_v61, %v3383_v6  ;;  %v12888_v63 = vld [vmem:[#allocation2 + $0x9c] ss:$0 sps:$4 sm:$0x33]   ;;  %v7443_v17 = vld [vmem:[#allocation2 + $0xa4] sm:$0xf]  ;;  %v7939_v8 = vsel %vm1725_vm10, %v7937_v30, %v7938_v53  ;;  %v7736_v13 = vrot.slane %v12881_v48, 3  ;;  %v11319_v16 = vcombine.low %v7476_v32, %v7445_v43 }
 0x33b   : > { %v3381_v1 = vpop.permute.xlu0 %3380  ;;  %7977 = vrot.lane.b32.xlu1 %v7936_v29, %s13280_s11  ;;  %v7474_v36 = vld [vmem:[#allocation2 + $0xa0] sm:$0x8]  ;;  %v12894_v54 = vld [vmem:[#allocation2 + $0xb8] ss:$0 sps:$4 sm:$0x77]   ;;  %v7740_v19 = vsel %vm7710_vm13, %v7738_v21, %v7739_v57 }
 0x33c   : > { %v3564_v49 = vsel %vm683_vm7, %v10889_v37, %v3381_v1  ;;  %v12885_v37 = vld [vmem:[#allocation2 + $0x84] sm:$0xfc]   ;;  %v12874_v41 = vld [vmem:[#allocation2 + $0x158] ss:$0 sps:$4 sm:$0x33]   ;;  %v7745_v48 = vrot.slane %v12894_v54, 3 }
 0x33d   : > { %v3487_v14 = vpop.permute.xlu1 %3486  ;;  %7975 = vrot.lane.b32.xlu0 %v7933_v0, %s13280_s11  ;;  %v7735_v0 = vrot.slane %v11313_v24, 3  ;;  %v3004_v31 = vld [vmem:[#allocation2 + $0x140] sm:$0xc]  ;;  %v7943_v53 = vrot.slane %v12885_v37, 2  ;;  %v7944_v24 = vrot.slane %v12886_v45, 2 }
 0x33e   : > { %v3626_v56 = vsel %vm1644_vm11, %v3564_v49, %v3487_v14  ;;  %v3627_v61 = vsel %vm1644_vm11, %v3567_v42, %v3487_v14  ;;  %v13180_v42 = vld [vmem:[#allocation2 + $0x154] sm:$0xf]  ;;  %v7947_v14 = vrot.slane %v12888_v63, 2  ;;  %v12868_v57 = vld [vmem:[#allocation2 + $0x148] ss:$0 sps:$4 sm:$0x33]  }
 0x33f   : > { %v3485_v26 = vpop.permute.xlu0 %3484  ;;  %7773 = vrot.lane.b32.xlu1 %v7734_v3, %s13279_s10  ;;  %v3705_v22 = vrot.slane %v3626_v56, 2  ;;  %v3706_v29 = vrot.slane %v3627_v61, 2  ;;  %v10893_v1 = vcombine.low %v3007_v15, %v13180_v42  ;;  %v7946_v3 = vrot.slane %v12887_v50, 2  ;;  %v12892_v56 = vld [vmem:[#allocation2 + $0xa8] ss:$0 sps:$4 sm:$0x77]  }
 0x340   : > { %v3623_v28 = vsel %vm1644_vm11, %v3558_v59, %v3485_v26  ;;  %v3624_v33 = vsel %vm1644_vm11, %v3561_v10, %v3485_v26  ;;  %v7737_v61 = vsel %vm7710_vm13, %v7735_v0, %v7736_v13  ;;  %v7744_v15 = vrot.slane %v11319_v16, 3  ;;  %v12898_v21 = vld [vmem:[#allocation2 + $0xb4] sm:$0xfc]   ;;  %v13181_v10 = vld [vmem:[#allocation2 + $0x144] sm:$0xf] }
 0x341   : > { %v3702_v58 = vrot.slane %v3623_v28, 2  ;;  %v3703_v6 = vrot.slane %v3624_v33, 2  ;;  %v3387_v18 = vpop.permute.xlu1 %3386  ;;  %7771 = vrot.lane.b32.xlu0 %v7731_v9, %s13279_s10  ;;  %v3707_v49 = vsel %vm1725_vm10, %v3705_v22, %v3706_v29  ;;  %v11317_v9 = vcombine.low %v7474_v36, %v7443_v17  ;;  %v12899_v50 = vld [vmem:[#allocation2 + $0xbc] ss:$0 sps:$4 sm:$0x33]  }
 0x342   : > { %v10891_v59 = vcombine.low %v3004_v31, %v13181_v10  ;;  %v7948_v37 = vsel %vm1725_vm10, %v7946_v3, %v7947_v14  ;;  %v7449_v32 = vld [vmem:[#allocation2 + $0xd4] sm:$0xf]  ;;  %v7480_v22 = vld [vmem:[#allocation2 + $0xd0] sm:$0x8]  ;;  %v7945_v28 = vsel %vm1725_vm10, %v7943_v53, %v7944_v24  ;;  %v7742_v33 = vrot.slane %v12892_v56, 3 }
 0x343   : > { %v3385_v23 = vpop.permute.xlu0 %3384  ;;  %v3704_v39 = vsel %vm1725_vm10, %v3702_v58, %v3703_v6  ;;  %7981 = vrot.lane.b32.xlu1 %v7942_v55, %s13280_s11  ;;  %v7741_v45 = vrot.slane %v11317_v9, 3  ;;  %v12896_v63 = vld [vmem:[#allocation2 + $0xa4] sm:$0xfc]   ;;  %v12897_v58 = vld [vmem:[#allocation2 + $0xac] ss:$0 sps:$4 sm:$0x33]   ;;  %v7746_v36 = vsel %vm7710_vm13, %v7744_v15, %v7745_v48  ;;  %v3573_v16 = vsel %vm683_vm7, %v12868_v57, %v3387_v18 }
 0x344   : > { %11907 = vmatprep.mubr.msk.bf16.mxu1 %vm2536_vm12, %v3704_v39  ;;  %v7447_v0 = vld [vmem:[#allocation2 + $0xc4] sm:$0xf]  ;;  %v7478_v13 = vld [vmem:[#allocation2 + $0xc0] sm:$0x8]  ;;  %v3570_v54 = vsel %vm683_vm7, %v10891_v59, %v3385_v23  ;;  %v7953_v42 = vrot.slane %v12899_v50, 2  ;;  %v7949_v23 = vrot.slane %v12896_v63, 2 }
 0x345   : > { %v3391_v30 = vpop.permute.xlu1 %3390  ;;  %7979 = vrot.lane.b32.xlu0 %v7939_v8, %s13280_s11  ;;  %11908 = vmatmul.mubr.msk.bf16.gmra.mrb[24].mxu1 %vm2536_vm12, %v3707_v49  ;;  %v7952_v8 = vrot.slane %v12898_v21, 2  ;;  %v12903_v9 = vld [vmem:[#allocation2 + $0xd8] ss:$0 sps:$4 sm:$0x77]   ;;  %v11321_v56 = vcombine.low %v7478_v13, %v7447_v0  ;;  %v7743_v15 = vsel %vm7710_vm13, %v7741_v45, %v7742_v33  ;;  %v7950_v48 = vrot.slane %v12897_v58, 2 }
 0x346   : > { %v3579_v26 = vsel %vm683_vm7, %v12874_v41, %v3391_v30  ;;  %v3013_v41 = vld [vmem:[#allocation2 + $0x170] sm:$0xc]  ;;  %v12890_v18 = vld [vmem:[#allocation2 + $0x178] ss:$0 sps:$4 sm:$0x33]   ;;  %v7751_v33 = vrot.slane %v12903_v9, 3 }
 0x347   : > { %v3389_v55 = vpop.permute.xlu0 %3388  ;;  %7777 = vrot.lane.b32.xlu1 %v7740_v19, %s13279_s10  ;;  %v11323_v19 = vcombine.low %v7480_v22, %v7449_v32  ;;  %v12909_v21 = vld [vmem:[#allocation2 + $0xdc] ss:$0 sps:$4 sm:$0x33]   ;;  %v7451_v57 = vld [vmem:[#allocation2 + $0xe4] sm:$0xf]  ;;  %v7954_v50 = vsel %vm1725_vm10, %v7952_v8, %v7953_v42  ;;  %v7747_v58 = vrot.slane %v11321_v56, 3  ;;  %v7951_v8 = vsel %vm1725_vm10, %v7949_v23, %v7950_v48 }
 0x348   : > { %v3576_v43 = vsel %vm683_vm7, %v10893_v1, %v3389_v55  ;;  %v12901_v1 = vld [vmem:[#allocation2 + $0xc8] ss:$0 sps:$4 sm:$0x77]   ;;  %v7484_v32 = vld [vmem:[#allocation2 + $0xf0] sm:$0x8] }
 0x349   : > { %v3491_v29 = vpop.permute.xlu1 %3490  ;;  %7775 = vrot.lane.b32.xlu0 %v7737_v61, %s13279_s10  ;;  %v12908_v61 = vld [vmem:[#allocation2 + $0xd4] sm:$0xfc]   ;;  %v3010_v22 = vld [vmem:[#allocation2 + $0x160] sm:$0xc] }
 0x34a   : > { %v3632_v6 = vsel %vm1644_vm11, %v3576_v43, %v3491_v29  ;;  %v3633_v17 = vsel %vm1644_vm11, %v3579_v26, %v3491_v29  ;;  %v13182_v26 = vld [vmem:[#allocation2 + $0x174] sm:$0xf]  ;;  %v7482_v43 = vld [vmem:[#allocation2 + $0xe0] sm:$0x8]  ;;  %v7748_v29 = vrot.slane %v12901_v1, 3  ;;  %v7958_v42 = vrot.slane %v12908_v61, 2 }
 0x34b   : > { %v3489_v39 = vpop.permute.xlu0 %3488  ;;  %7985 = vrot.lane.b32.xlu1 %v7948_v37, %s13280_s11  ;;  %v3711_v31 = vrot.slane %v3632_v6, 2  ;;  %v3712_v49 = vrot.slane %v3633_v17, 2  ;;  %v10897_v55 = vcombine.low %v3013_v41, %v13182_v26  ;;  %v7453_v37 = vld [vmem:[#allocation2 + $0xf4] sm:$0xf]  ;;  %v12906_v6 = vld [vmem:[#allocation2 + $0xc4] sm:$0xfc]   ;;  %v11325_v0 = vcombine.low %v7482_v43, %v7451_v57 }
 0x34c   : > { %v3629_v3 = vsel %vm1644_vm11, %v3570_v54, %v3489_v39  ;;  %v3630_v14 = vsel %vm1644_vm11, %v3573_v16, %v3489_v39  ;;  %v12907_v17 = vld [vmem:[#allocation2 + $0xcc] ss:$0 sps:$4 sm:$0x33]   ;;  %v11327_v13 = vcombine.low %v7484_v32, %v7453_v37  ;;  %v13183_v16 = vld [vmem:[#allocation2 + $0x164] sm:$0xf]  ;;  %v7959_v1 = vrot.slane %v12909_v21, 2 }
 0x34d   : > { %v3708_v30 = vrot.slane %v3629_v3, 2  ;;  %v3709_v53 = vrot.slane %v3630_v14, 2  ;;  %v3395_v24 = vpop.permute.xlu1 %3394  ;;  %7983 = vrot.lane.b32.xlu0 %v7945_v28, %s13280_s11  ;;  %v3713_v45 = vsel %vm1725_vm10, %v3711_v31, %v3712_v49  ;;  %v7750_v28 = vrot.slane %v11323_v19, 3  ;;  %v12913_v19 = vld [vmem:[#allocation2 + $0xf8] ss:$0 sps:$4 sm:$0x77]  }
 0x34e   : > { %v10895_v54 = vcombine.low %v3010_v22, %v13183_v16  ;;  %v7749_v14 = vsel %vm7710_vm13, %v7747_v58, %v7748_v29  ;;  %v7955_v9 = vrot.slane %v12906_v6, 2  ;;  %v7753_v56 = vrot.slane %v11325_v0, 3  ;;  %v12904_v57 = vld [vmem:[#allocation2 + $0x60] sm:$0xff]   ;;  %v9002_v29 = vld [vmem:[#allocation2 + $0xd0] sm:$0x8] }
 0x34f   : > { %v3393_v10 = vpop.permute.xlu0 %3392  ;;  %v3710_v59 = vsel %vm1725_vm10, %v3708_v30, %v3709_v53  ;;  %7781 = vrot.lane.b32.xlu1 %v7746_v36, %s13279_s10  ;;  %v12884_v36 = vld [vmem:[#allocation2 + $0x168] ss:$0 sps:$4 sm:$0x33]   ;;  %v7752_v49 = vsel %vm7710_vm13, %v7750_v28, %v7751_v33  ;;  %v7956_v30 = vrot.slane %v12907_v17, 2  ;;  %v7756_v61 = vrot.slane %v11327_v13, 3 }
 0x350   : > { %11911 = vmatprep.mubr.msk.bf16.mxu1 %vm2536_vm12, %v3710_v59  ;;  %v12911_v53 = vld [vmem:[#allocation2 + $0xe8] ss:$0 sps:$4 sm:$0x77]   ;;  %v3582_v48 = vsel %vm683_vm7, %v10895_v54, %v3393_v10  ;;  %v7960_v59 = vsel %vm1725_vm10, %v7958_v42, %v7959_v1  ;;  %v7757_v26 = vrot.slane %v12913_v19, 3  ;;  %v8969_v17 = vld [vmem:[#allocation2 + $0xc4] sm:$0xf] }
 0x351   : > { %v3399_v63 = vpop.permute.xlu1 %3398  ;;  %7779 = vrot.lane.b32.xlu0 %v7743_v15, %s13279_s10  ;;  %11912 = vmatmul.mubr.msk.bf16.gmra.mrb[28].mxu1 %vm2536_vm12, %v3713_v45  ;;  %v3585_v15 = vsel %vm683_vm7, %v12884_v36, %v3395_v24  ;;  %v8971_v45 = vld [vmem:[#allocation2 + $0xd4] sm:$0xf]  ;;  %v7754_v33 = vrot.slane %v12911_v53, 3  ;;  %v7957_v58 = vsel %vm1725_vm10, %v7955_v9, %v7956_v30  ;;  %v12917_v6 = vld [vmem:[#allocation2 + $0xe4] sm:$0xfc]  }
 0x352   : > { %v3591_v39 = vsel %vm683_vm7, %v12890_v18, %v3399_v63  ;;  %v12918_v63 = vld [vmem:[#allocation2 + $0xec] ss:$0 sps:$4 sm:$0x33]   ;;  %v9000_v36 = vld [vmem:[#allocation2 + $0xc0] sm:$0x8]  ;;  %v11465_v13 = vcombine.low %v9002_v29, %v8971_v45  ;;  %v12905_v19 = vld [vmem:[#allocation2 + $0x70] sm:$0xff]  }
 0x353   : > { %v3397_v41 = vpop.permute.xlu0 %3396  ;;  %7989 = vrot.lane.b32.xlu1 %v7954_v50, %s13280_s11  ;;  %v12920_v50 = vld [vmem:[#allocation2 + $0xfc] ss:$0 sps:$4 sm:$0x33]   ;;  %v12924_v16 = vld [vmem:[#allocation2 + $0xd8] ss:$0 sps:$4 sm:$0x77]  }
 0x354   : > { %v3588_v31 = vsel %vm683_vm7, %v10897_v55, %v3397_v41  ;;  %v12919_v55 = vld [vmem:[#allocation2 + $0xf4] sm:$0xfc]   ;;  %v7965_v42 = vrot.slane %v12920_v50, 2  ;;  %v7961_v9 = vrot.slane %v12917_v6, 2  ;;  %v7962_v30 = vrot.slane %v12918_v63, 2 }
 0x355   : > { %v3495_v3 = vpop.permute.xlu1 %3494  ;;  %7987 = vrot.lane.b32.xlu0 %v7951_v8, %s13280_s11  ;;  %v7964_v41 = vrot.slane %v12919_v55, 2  ;;  %v8973_v45 = vld [vmem:[#allocation2 + $0xe4] sm:$0xf]  ;;  %v9004_v29 = vld [vmem:[#allocation2 + $0xe0] sm:$0x8] }
 0x356   : > { %v3638_v18 = vsel %vm1644_vm11, %v3588_v31, %v3495_v3  ;;  %v3639_v23 = vsel %vm1644_vm11, %v3591_v39, %v3495_v3  ;;  %v7758_v39 = vsel %vm7710_vm13, %v7756_v61, %v7757_v26  ;;  %v12922_v3 = vld [vmem:[#allocation2 + $0xc8] ss:$0 sps:$4 sm:$0x77]   ;;  %v12930_v61 = vld [vmem:[#allocation2 + $0xdc] ss:$0 sps:$4 sm:$0x33]  }
 0x357   : > { %v3493_v21 = vpop.permute.xlu0 %3492  ;;  %7785 = vrot.lane.b32.xlu1 %v7752_v49, %s13279_s10  ;;  %v3717_v43 = vrot.slane %v3638_v18, 2  ;;  %v3718_v37 = vrot.slane %v3639_v23, 2  ;;  %v11463_v49 = vcombine.low %v9000_v36, %v8969_v17  ;;  %v9259_v18 = vrot.slane %v11465_v13, 3  ;;  %v12934_v63 = vld [vmem:[#allocation2 + $0xf8] ss:$0 sps:$4 sm:$0x77]  }
 0x358   : > { %v3635_v32 = vsel %vm1644_vm11, %v3582_v48, %v3493_v21  ;;  %v3636_v22 = vsel %vm1644_vm11, %v3585_v15, %v3493_v21  ;;  %v9260_v23 = vrot.slane %v12924_v16, 3  ;;  %v7966_v48 = vsel %vm1725_vm10, %v7964_v41, %v7965_v42  ;;  %v12929_v21 = vld [vmem:[#allocation2 + $0xd4] sm:$0xfc]   ;;  %v12932_v41 = vld [vmem:[#allocation2 + $0xe8] ss:$0 sps:$4 sm:$0x77]  }
 0x359   : > { %v3714_v24 = vrot.slane %v3635_v32, 2  ;;  %v3715_v28 = vrot.slane %v3636_v22, 2  ;;  %7783 = vrot.lane.b32.xlu0 %v7749_v14, %s13279_s10  ;;  %v8277_v10 = vpop.permute.xlu1 %8276  ;;  %v3719_v54 = vsel %vm1725_vm10, %v3717_v43, %v3718_v37  ;;  %v7755_v14 = vsel %vm7710_vm13, %v7753_v56, %v7754_v33  ;;  %v12914_v56 = vld [vmem:[#allocation2 + $0x80] sm:$0xff]   ;;  %v12928_v37 = vld [vmem:[#allocation2 + $0xcc] ss:$0 sps:$4 sm:$0x33]  }
 0x35a   : > { %v8487_v26 = vsel %vm683_vm7, %v12905_v19, %v8277_v10  ;;  %v9256_v50 = vrot.slane %v11463_v49, 3  ;;  %v9257_v43 = vrot.slane %v12922_v3, 3  ;;  %v7963_v32 = vsel %vm1725_vm10, %v7961_v9, %v7962_v30  ;;  %v12927_v22 = vld [vmem:[#allocation2 + $0xc4] sm:$0xfc]   ;;  %v12915_v13 = vld [vmem:[#allocation2 + $0x90] sm:$0xff]  }
 0x35b   : > { %v8275_v8 = vpop.permute.xlu0 %8274  ;;  %v3716_v0 = vsel %vm1725_vm10, %v3714_v24, %v3715_v28  ;;  %7993 = vrot.lane.b32.xlu1 %v7960_v59, %s13280_s11  ;;  %v9006_v59 = vld [vmem:[#allocation2 + $0xf0] sm:$0x8]  ;;  %v9261_v17 = vsel %vm7710_vm13, %v9259_v18, %v9260_v23  ;;  %v9467_v36 = vrot.slane %v12929_v21, 2  ;;  %v9465_v19 = vrot.slane %v12928_v37, 2  ;;  %v8977_v9 = vld [vmem:[#allocation2 + $0x104] sm:$0xf] }
 0x35c   : > { %11915 = vmatprep.mubr.msk.bf16.mxu1 %vm2536_vm12, %v3716_v0  ;;  %v8484_v1 = vsel %vm683_vm7, %v12904_v57, %v8275_v8  ;;  %v8975_v57 = vld [vmem:[#allocation2 + $0xf4] sm:$0xf]  ;;  %v9468_v8 = vrot.slane %v12930_v61, 2  ;;  %v9258_v42 = vsel %vm7710_vm13, %v9256_v50, %v9257_v43  ;;  %v9008_v30 = vld [vmem:[#allocation2 + $0x100] sm:$0x8] }
 0x35d   : > { %7991 = vrot.lane.b32.xlu0 %v7957_v58, %s13280_s11  ;;  %11916 = vmatmul.mubr.msk.bf16.gmra.mrb[0].mxu1 %vm2536_vm12, %v3719_v54  ;;  %v8453_v31 = vpop.permute.xlu1 %8452  ;;  %v13184_v28 = vld [vmem:[%s17132_s2 + $0x30] sm:$0x3f]   ;;  %v11469_v33 = vcombine.low %v9006_v59, %v8975_v57  ;;  %v16264_v58 = vld [vmem:[%s17132_s2 + $0x40] sm:$0x3f]   ;;  %v12939_v61 = vld [vmem:[#allocation2 + $0xf4] sm:$0xfc]  }
 0x35e   : > { %v8804_v10 = vsel %vm1725_vm10, %v13184_v28, 0  ;;  %v8533_v6 = vsel %vm1644_vm11, %v8487_v26, %v8453_v31  ;;  %v11280_v54 = vld [vmem:[%s17134_s4 + $0x4] sm:$0x3]  ;;  %v16275_v31 = vld [vmem:[#allocation2 + $0xfc] ss:$0 sps:$4 sm:$0x33]   ;;  %v9469_v23 = vsel %vm1725_vm10, %v9467_v36, %v9468_v8 }
 0x35f   : > { %v8451_v53 = vpop.permute.xlu0 %8450  ;;  %7789 = vrot.lane.b32.xlu1 %v7758_v39, %s13279_s10  ;;  %v11467_v39 = vcombine.low %v9004_v29, %v8973_v45  ;;  %v9265_v3 = vrot.slane %v11469_v33, 3  ;;  %v16282_v18 = vrot.slane %v11280_v54, %v14986_v7  ;;  %v12925_v57 = vld [vmem:[#allocation2 + $0xa0] sm:$0xff]   ;;  %v16289_v43 = vrot.slane %v11280_v54, %v14999_v62  ;;  %v12944_v28 = vld [vmem:[#allocation2 + $0x118] ss:$0 sps:$4 sm:$0x77]   ;;  %v12926_v8 = vld [vmem:[#allocation2 + $0xb0] sm:$0xff]  }
 0x360   : > { %v8531_v15 = vsel %vm1644_vm11, %v8484_v1, %v8451_v53  ;;  %v9464_v1 = vrot.slane %v12927_v22, 2  ;;  %v12937_v50 = vld [vmem:[#allocation2 + $0xe4] sm:$0xfc]   ;;  %v11471_v22 = vcombine.low %v9008_v30, %v8977_v9 }
 0x361   : > { %7787 = vrot.lane.b32.xlu0 %v7755_v14, %s13279_s10  ;;  %12023 = vmatprep.mubr.msk.bf16.mxu1 %vm2536_vm12, %v8531_v15  ;;  %v8281_v55 = vpop.permute.xlu1 %8280  ;;  %v9266_v14 = vrot.slane %v12934_v63, 3  ;;  %v8979_v15 = vld [vmem:[#allocation2 + $0x114] sm:$0xf]  ;;  %v9262_v26 = vrot.slane %v11467_v39, 3  ;;  %v12935_v30 = vld [vmem:[#allocation2 + $0xc0] sm:$0xff]  }
 0x362   : > { %v8493_v21 = vsel %vm683_vm7, %v12915_v13, %v8281_v55  ;;  %v9466_v37 = vsel %vm1725_vm10, %v9464_v1, %v9465_v19 }
 0x363   : > { %v8279_v24 = vpop.permute.xlu0 %8278  ;;  %7997 = vrot.lane.b32.xlu1 %v7966_v48, %s13280_s11  ;;  %v9010_v48 = vld [vmem:[#allocation2 + $0x110] sm:$0x8]  ;;  %v9267_v55 = vsel %vm7710_vm13, %v9265_v3, %v9266_v14 }
 0x364   : > { %v8490_v0 = vsel %vm683_vm7, %v12914_v56, %v8279_v24  ;;  %v9263_v56 = vrot.slane %v12932_v41, 3  ;;  %v11473_v24 = vcombine.low %v9010_v48, %v8979_v15  ;;  %v12942_v41 = vld [vmem:[#allocation2 + $0x108] ss:$0 sps:$4 sm:$0x77]  }
 0x365   : > { %7995 = vrot.lane.b32.xlu0 %v7963_v32, %s13280_s11  ;;  %12024 = vmatmul.mubr.msk.bf16.vlgmr.msra.gmra.mrb[32].mxu1 %vm2536_vm12, %v8533_v6  ;;  %v8457_v16 = vpop.permute.xlu1 %8456  ;;  %v12938_v32 = vld [vmem:[#allocation2 + $0xec] ss:$0 sps:$4 sm:$0x33]   ;;  %v9473_v6 = vrot.slane %v12939_v61, 2 }
 0x366   : > { %12056 = vmatpush3.bf16.msra.mxu1 %v8804_v10  ;;  %v8537_v10 = vsel %vm1644_vm11, %v8493_v21, %v8457_v16  ;;  %v9264_v39 = vsel %vm7710_vm13, %v9262_v26, %v9263_v56  ;;  %v9470_v16 = vrot.slane %v12937_v50, 2  ;;  %v12950_v61 = vld [vmem:[#allocation2 + $0x11c] ss:$0 sps:$4 sm:$0x33]   ;;  %v8983_v26 = vld [vmem:[#allocation2 + $0x134] sm:$0xf] }
 0x367   : > { %v8455_v49 = vpop.permute.xlu0 %8454  ;;  %9306 = vrot.lane.b32.xlu1 %v9261_v17, %s13279_s10  ;;  %12332 = vmatprep.subr.msk.bf16.mxu1 %vm1725_vm10, %v16264_v58  ;;  %v9474_v17 = vrot.slane %v16275_v31, 2  ;;  %v9471_v31 = vrot.slane %v12938_v32, 2  ;;  %v9014_v56 = vld [vmem:[#allocation2 + $0x130] sm:$0x8] }
 0x368   : > { %v8535_v53 = vsel %vm1644_vm11, %v8490_v0, %v8455_v49  ;;  %v9268_v49 = vrot.slane %v11471_v22, 3  ;;  %v9269_v22 = vrot.slane %v12942_v41, 3  ;;  %v9480_v41 = vrot.slane %v12950_v61, 2 }
 0x369   : > { %9304 = vrot.lane.b32.xlu0 %v9258_v42, %s13279_s10  ;;  %12027 = vmatprep.mubr.msk.bf16.mxu1 %vm2536_vm12, %v8535_v53  ;;  %v8285_v59 = vpop.permute.xlu1 %8284  ;;  %v9271_v53 = vrot.slane %v11473_v24, 3  ;;  %v9475_v21 = vsel %vm1725_vm10, %v9473_v6, %v9474_v17 }
 0x36a   : > { %v8499_v50 = vsel %vm683_vm7, %v12926_v8, %v8285_v59  ;;  %v12954_v8 = vld [vmem:[#allocation2 + $0x138] ss:$0 sps:$4 sm:$0x77]  }
 0x36b   : > { %v11991_v45 = vpop.f32.mrb[60].mxu0  ;;  %v8283_v29 = vpop.permute.xlu0 %8282  ;;  %9514 = vrot.lane.b32.xlu1 %v9469_v23, %s13280_s11  ;;  %v9272_v23 = vrot.slane %v12944_v28, 3  ;;  %v9472_v28 = vsel %vm1725_vm10, %v9470_v16, %v9471_v31 }
 0x36c   : > { %v7308_v33 = vmul.f32 %v11991_v45, %v16282_v18  ;;  %v7141_v63 = vpop.f32.mrb[61].mxu0  ;;  %v8496_v36 = vsel %vm683_vm7, %v12925_v57, %v8283_v29  ;;  %v12949_v57 = vld [vmem:[#allocation2 + $0x114] sm:$0xfc]   ;;  %v12947_v45 = vld [vmem:[#allocation2 + $0x104] sm:$0xfc]  }
 0x36d   : > { %v7306_v0 = vmul.f32 %v16282_v18, %v7141_v63  ;;  %v11992_v13 = vpop.f32.mrb[62].mxu0  ;;  %9512 = vrot.lane.b32.xlu0 %v9466_v37, %s13280_s11  ;;  %12028 = vmatmul.mubr.msk.bf16.gmra.mrb[36].mxu1 %vm2536_vm12, %v8537_v10  ;;  %v8461_v54 = vpop.permute.xlu1 %8460  ;;  %v12948_v29 = vld [vmem:[#allocation2 + $0x10c] ss:$0 sps:$4 sm:$0x33]   ;;  %v8981_v10 = vld [vmem:[#allocation2 + $0x124] sm:$0xf]  ;;  %v9273_v59 = vsel %vm7710_vm13, %v9271_v53, %v9272_v23 }
 0x36e   : > { %v7344_v42 = vadd.f32 %v16289_v43, %v7308_v33  ;;  %v7309_v1 = vmul.f32 %v11992_v13, %v16282_v18  ;;  %v7144_v19 = vpop.f32.mrb[63].mxu0  ;;  %v9012_v33 = vld [vmem:[#allocation2 + $0x120] sm:$0x8]  ;;  %v8541_v13 = vsel %vm1644_vm11, %v8499_v50, %v8461_v54  ;;  %v9477_v53 = vrot.slane %v12948_v29, 2  ;;  %v9018_v50 = vld [vmem:[#allocation2 + $0x150] sm:$0x8] }
 0x36f   : > { %v7342_v3 = vadd.f32 %v16289_v43, %v7306_v0  ;;  %v7307_v14 = vmul.f32 %v16282_v18, %v7144_v19  ;;  %v8459_v9 = vpop.permute.xlu0 %8458  ;;  %9310 = vrot.lane.b32.xlu1 %v9267_v55, %s13279_s10  ;;  %v11475_v31 = vcombine.low %v9012_v33, %v8981_v10  ;;  %v16326_v23 = vld [vmem:[#allocation2 + $0x13c] ss:$0 sps:$4 sm:$0x33]  }
 0x370   : > { %v7345_v15 = vadd.f32 %v16289_v43, %v7309_v1  ;;  %v8539_v48 = vsel %vm1644_vm11, %v8496_v36, %v8459_v9  ;;  %v7376_v55 = vmax.f32 %v7344_v42, 0.0  ;;  %v11477_v36 = vcombine.low %v9014_v56, %v8983_v26  ;;  %v12936_v1 = vld [vmem:[#allocation2 + $0xd0] sm:$0xff]  }
 0x371   : > { %v7343_v37 = vadd.f32 %v16289_v43, %v7307_v14  ;;  %9308 = vrot.lane.b32.xlu0 %v9264_v39, %s13279_s10  ;;  %12031 = vmatprep.mubr.msk.bf16.mxu1 %vm2536_vm12, %v8539_v48  ;;  %v8289_v32 = vpop.permute.xlu1 %8288  ;;  %v7374_v63 = vmax.f32 %v7342_v3, 0.0  ;;  %v9479_v39 = vrot.slane %v12949_v57, 2  ;;  %v12952_v3 = vld [vmem:[#allocation2 + $0x128] ss:$0 sps:$4 sm:$0x77]   ;;  %v9270_v14 = vsel %vm7710_vm13, %v9268_v49, %v9269_v22 }
 0x372   : > { %v7377_v24 = vmax.f32 %v7345_v15, 0.0  ;;  %v9476_v9 = vrot.slane %v12947_v45, 2  ;;  %v9277_v61 = vrot.slane %v11477_v36, 3  ;;  %v9278_v15 = vrot.slane %v12954_v8, 3  ;;  %v9016_v48 = vld [vmem:[#allocation2 + $0x140] sm:$0x8] }
 0x373   : > { %v7375_v6 = vmax.f32 %v7343_v37, 0.0  ;;  %v8287_v17 = vpop.permute.xlu0 %8286  ;;  %9518 = vrot.lane.b32.xlu1 %v9475_v21, %s13280_s11  ;;  %v9481_v57 = vsel %vm1725_vm10, %v9479_v39, %v9480_v41  ;;  %v12959_v26 = vld [vmem:[#allocation2 + $0x134] sm:$0xfc]   ;;  %v8505_v49 = vsel %vm683_vm7, %v12936_v1, %v8289_v32  ;;  %v12945_v37 = vld [vmem:[#allocation2 + $0xe0] sm:$0xff]   ;;  %v9274_v45 = vrot.slane %v11475_v31, 3 }
 0x374   : > { %v16317_v0 = vpack.c.bf16 %v7377_v24, %v7376_v55  ;;  %v8502_v16 = vsel %vm683_vm7, %v12935_v30, %v8287_v17  ;;  %v8985_v30 = vld [vmem:[#allocation2 + $0x144] sm:$0xf]  ;;  %v8987_v56 = vld [vmem:[#allocation2 + $0x154] sm:$0xf]  ;;  %v9275_v29 = vrot.slane %v12952_v3, 3  ;;  %v9478_v24 = vsel %vm1725_vm10, %v9476_v9, %v9477_v53 }
 0x375   : > { %v16320_v42 = vpack.c.bf16 %v7375_v6, %v7374_v63  ;;  %9516 = vrot.lane.b32.xlu0 %v9472_v28, %s13280_s11  ;;  %12032 = vmatmul.mubr.msk.bf16.gmra.mrb[40].mxu1 %vm2536_vm12, %v8541_v13  ;;  %v8465_v19 = vpop.permute.xlu1 %8464  ;;  %v12957_v55 = vld [vmem:[#allocation2 + $0x124] sm:$0xfc]   ;;  %v12958_v28 = vld [vmem:[#allocation2 + $0x12c] ss:$0 sps:$4 sm:$0x33]   ;;  %v11479_v10 = vcombine.low %v9016_v48, %v8985_v30  ;;  %v9279_v6 = vsel %vm7710_vm13, %v9277_v61, %v9278_v15  ;;  %v9485_v13 = vrot.slane %v12959_v26, 2 }
 0x376   : > { %v11481_v32 = vcombine.low %v9018_v50, %v8987_v56  ;;  %v12964_v17 = vld [vmem:[#allocation2 + $0x158] ss:$0 sps:$4 sm:$0x77]   ;;  %v9486_v39 = vrot.slane %v16326_v23, 2  ;;  %v9483_v61 = vrot.slane %v12958_v28, 2  ;;  %v12955_v26 = vld [vmem:[#allocation2 + $0x100] sm:$0xff]  }
 0x377   : > { %v8463_v54 = vpop.permute.xlu0 %8462  ;;  %9314 = vrot.lane.b32.xlu1 %v9273_v59, %s13279_s10  ;;  %v8545_v59 = vsel %vm1644_vm11, %v8505_v49, %v8465_v19  ;;  %v9482_v19 = vrot.slane %v12957_v55, 2  ;;  %v12962_v9 = vld [vmem:[#allocation2 + $0x148] ss:$0 sps:$4 sm:$0x77]   ;;  %v9280_v15 = vrot.slane %v11479_v10, 3  ;;  %v9284_v50 = vrot.slane %v12964_v17, 3 }
 0x378   : > { %v8543_v21 = vsel %vm1644_vm11, %v8502_v16, %v8463_v54  ;;  %v12946_v16 = vld [vmem:[#allocation2 + $0xf0] sm:$0xff]   ;;  %v12970_v30 = vld [vmem:[#allocation2 + $0x15c] ss:$0 sps:$4 sm:$0x33]   ;;  %v9283_v56 = vrot.slane %v11481_v32, 3  ;;  %v9487_v55 = vsel %vm1725_vm10, %v9485_v13, %v9486_v39  ;;  %v9281_v32 = vrot.slane %v12962_v9, 3 }
 0x379   : > { %9312 = vrot.lane.b32.xlu0 %v9270_v14, %s13279_s10  ;;  %12035 = vmatprep.mubr.msk.bf16.mxu1 %vm2536_vm12, %v8543_v21  ;;  %v8293_v22 = vpop.permute.xlu1 %8292  ;;  %v9276_v14 = vsel %vm7710_vm13, %v9274_v45, %v9275_v29  ;;  %v8989_v49 = vld [vmem:[#allocation2 + $0x164] sm:$0xf]  ;;  %v8991_v28 = vld [vmem:[#allocation2 + $0x174] sm:$0xf]  ;;  %v9022_v10 = vld [vmem:[#allocation2 + $0x170] sm:$0x8] }
 0x37a   : > { %v12967_v17 = vld [vmem:[#allocation2 + $0x144] sm:$0xfc]  }
 0x37b   : > { %v11995_v33 = vpop.f32.mrb[64].mxu0  ;;  %v8291_v63 = vpop.permute.xlu0 %8290  ;;  %9522 = vrot.lane.b32.xlu1 %v9481_v57, %s13280_s11  ;;  %v12972_v39 = vld [vmem:[#allocation2 + $0x168] ss:$0 sps:$4 sm:$0x77]  }
 0x37c   : > { %v7312_v36 = vmul.f32 %v11995_v33, %v16282_v18  ;;  %v7157_v8 = vpop.f32.mrb[65].mxu0  ;;  %v8508_v41 = vsel %vm683_vm7, %v12945_v37, %v8291_v63  ;;  %v9020_v37 = vld [vmem:[#allocation2 + $0x160] sm:$0x8]  ;;  %v8511_v33 = vsel %vm683_vm7, %v12946_v16, %v8293_v22  ;;  %v9285_v22 = vsel %vm7710_vm13, %v9283_v56, %v9284_v50 }
 0x37d   : > { %v7310_v1 = vmul.f32 %v16282_v18, %v7157_v8  ;;  %v11996_v31 = vpop.f32.mrb[66].mxu0  ;;  %9520 = vrot.lane.b32.xlu0 %v9478_v24, %s13280_s11  ;;  %12036 = vmatmul.mubr.msk.bf16.gmra.mrb[44].mxu1 %vm2536_vm12, %v8545_v59  ;;  %v8469_v3 = vpop.permute.xlu1 %8468  ;;  %v12969_v24 = vld [vmem:[#allocation2 + $0x154] sm:$0xfc]   ;;  %v12968_v59 = vld [vmem:[#allocation2 + $0x14c] ss:$0 sps:$4 sm:$0x33]   ;;  %v11483_v13 = vcombine.low %v9020_v37, %v8989_v49  ;;  %v11485_v16 = vcombine.low %v9022_v10, %v8991_v28 }
 0x37e   : > { %v7348_v53 = vadd.f32 %v16289_v43, %v7312_v36  ;;  %v7313_v54 = vmul.f32 %v11996_v31, %v16282_v18  ;;  %v7160_v23 = vpop.f32.mrb[67].mxu0  ;;  %v8549_v9 = vsel %vm1644_vm11, %v8511_v33, %v8469_v3  ;;  %v9282_v56 = vsel %vm7710_vm13, %v9280_v15, %v9281_v32  ;;  %v12979_v33 = vld [vmem:[#allocation2 + $0x174] sm:$0xfc]   ;;  %v12965_v32 = vld [vmem:[#allocation2 + $0x120] sm:$0xff]  }
 0x37f   : > { %v7346_v48 = vadd.f32 %v16289_v43, %v7310_v1  ;;  %v7311_v21 = vmul.f32 %v16282_v18, %v7160_v23  ;;  %v8467_v57 = vpop.permute.xlu0 %8466  ;;  %9318 = vrot.lane.b32.xlu1 %v9279_v6, %s13279_s10  ;;  %v9488_v50 = vrot.slane %v12967_v17, 2  ;;  %v9489_v49 = vrot.slane %v12968_v59, 2  ;;  %v12978_v59 = vld [vmem:[#allocation2 + $0x16c] ss:$0 sps:$4 sm:$0x33]  }
 0x380   : > { %v7349_v45 = vadd.f32 %v16289_v43, %v7313_v54  ;;  %v8547_v29 = vsel %vm1644_vm11, %v8508_v41, %v8467_v57  ;;  %v7380_v36 = vmax.f32 %v7348_v53, 0.0  ;;  %v9484_v41 = vsel %vm1725_vm10, %v9482_v19, %v9483_v61  ;;  %v12956_v61 = vld [vmem:[#allocation2 + $0x110] sm:$0xff]  }
 0x381   : > { %v7347_v63 = vadd.f32 %v16289_v43, %v7311_v21  ;;  %9316 = vrot.lane.b32.xlu0 %v9276_v14, %s13279_s10  ;;  %12039 = vmatprep.mubr.msk.bf16.mxu1 %vm2536_vm12, %v8547_v29  ;;  %v8297_v6 = vpop.permute.xlu1 %8296  ;;  %v7378_v1 = vmax.f32 %v7346_v48, 0.0  ;;  %v12974_v14 = vld [vmem:[#allocation2 + $0x178] ss:$0 sps:$4 sm:$0x77]   ;;  %v9491_v21 = vrot.slane %v12969_v24, 2  ;;  %v9492_v53 = vrot.slane %v12970_v30, 2 }
 0x382   : > { %v7381_v8 = vmax.f32 %v7349_v45, 0.0  ;;  %v9286_v37 = vrot.slane %v11483_v13, 3  ;;  %v9287_v45 = vrot.slane %v12972_v39, 3  ;;  %v16369_v29 = vld [vmem:[#allocation2 + $0x164] sm:$0xfc]   ;;  %v9289_v30 = vrot.slane %v11485_v16, 3 }
 0x383   : > { %v7379_v31 = vmax.f32 %v7347_v63, 0.0  ;;  %v8295_v54 = vpop.permute.xlu0 %8294  ;;  %9526 = vrot.lane.b32.xlu1 %v9487_v55, %s13280_s11  ;;  %v9290_v55 = vrot.slane %v12974_v14, 3  ;;  %v9026_v24 = vld [vmem:[#allocation2 + $0x190] sm:$0x8]  ;;  %v9493_v10 = vsel %vm1725_vm10, %v9491_v21, %v9492_v53  ;;  %v8517_v15 = vsel %vm683_vm7, %v12956_v61, %v8297_v6 }
 0x384   : > { %v16360_v23 = vpack.c.bf16 %v7381_v8, %v7380_v36  ;;  %v8514_v19 = vsel %vm683_vm7, %v12955_v26, %v8295_v54  ;;  %v8995_v26 = vld [vmem:[#allocation2 + $0x194] sm:$0xf]  ;;  %v12980_v63 = vld [vmem:[#allocation2 + $0x17c] ss:$0 sps:$4 sm:$0x33]   ;;  %v9490_v8 = vsel %vm1725_vm10, %v9488_v50, %v9489_v49  ;;  %v9288_v6 = vsel %vm7710_vm13, %v9286_v37, %v9287_v45 }
 0x385   : > { %v16363_v57 = vpack.c.bf16 %v7379_v31, %v7378_v1  ;;  %9524 = vrot.lane.b32.xlu0 %v9484_v41, %s13280_s11  ;;  %12040 = vmatmul.mubr.msk.bf16.gmra.mrb[48].mxu1 %vm2536_vm12, %v8549_v9  ;;  %v8473_v48 = vpop.permute.xlu1 %8472  ;;  %v16377_v36 = vld [vmem:[#allocation2 + $0x184] sm:$0xf]  ;;  %v9024_v41 = vld [vmem:[#allocation2 + $0x180] sm:$0x8]  ;;  %v11489_v13 = vcombine.low %v9026_v24, %v8995_v26  ;;  %v9291_v54 = vsel %vm7710_vm13, %v9289_v30, %v9290_v55  ;;  %v9497_v21 = vrot.slane %v12979_v33, 2  ;;  %v12966_v61 = vld [vmem:[#allocation2 + $0x130] sm:$0xff]  }
 0x386   : > { %v12984_v39 = vld [vmem:[#allocation2 + $0x198] ss:$0 sps:$4 sm:$0x77]   ;;  %v8553_v16 = vsel %vm1644_vm11, %v8517_v15, %v8473_v48  ;;  %v9498_v53 = vrot.slane %v12980_v63, 2  ;;  %v9495_v37 = vrot.slane %v12978_v59, 2  ;;  %v11487_v45 = vcombine.low %v9024_v41, %v16377_v36  ;;  %v12975_v63 = vld [vmem:[#allocation2 + $0x140] sm:$0xff]  }
 0x387   : > { %v8471_v3 = vpop.permute.xlu0 %8470  ;;  %9322 = vrot.lane.b32.xlu1 %v9285_v22, %s13279_s10  ;;  %v9494_v22 = vrot.slane %v16369_v29, 2  ;;  %v12982_v48 = vld [vmem:[#allocation2 + $0x188] ss:$0 sps:$4 sm:$0x77]   ;;  %v9295_v55 = vrot.slane %v11489_v13, 3  ;;  %v9296_v26 = vrot.slane %v12984_v39, 3 }
 0x388   : > { %v8551_v28 = vsel %vm1644_vm11, %v8514_v19, %v8471_v3  ;;  %v12989_v24 = vld [vmem:[#allocation2 + $0x194] sm:$0xfc]   ;;  %v12990_v15 = vld [vmem:[#allocation2 + $0x19c] ss:$0 sps:$4 sm:$0x33]   ;;  %v9499_v41 = vsel %vm1725_vm10, %v9497_v21, %v9498_v53  ;;  %v9293_v53 = vrot.slane %v12982_v48, 3 }
 0x389   : > { %9320 = vrot.lane.b32.xlu0 %v9282_v56, %s13279_s10  ;;  %12043 = vmatprep.mubr.msk.bf16.mxu1 %vm2536_vm12, %v8551_v28  ;;  %v8301_v17 = vpop.permute.xlu1 %8300  ;;  %v9028_v13 = vld [vmem:[#allocation2 + $0x1a0] sm:$0x8]  ;;  %v16401_v39 = vld [vmem:[#allocation2 + $0x1b4] sm:$0xf] }
 0x38b   : > { %v11999_v1 = vpop.f32.mrb[68].mxu0  ;;  %v8299_v31 = vpop.permute.xlu0 %8298  ;;  %9530 = vrot.lane.b32.xlu1 %v9493_v10, %s13280_s11 }
 0x38c   : > { %v7316_v14 = vmul.f32 %v11999_v1, %v16282_v18  ;;  %v7173_v9 = vpop.f32.mrb[69].mxu0  ;;  %v8520_v19 = vsel %vm683_vm7, %v12965_v32, %v8299_v31  ;;  %v16396_v32 = vld [vmem:[#allocation2 + $0x1a4] sm:$0xf]  ;;  %v9030_v1 = vld [vmem:[#allocation2 + $0x1b0] sm:$0x8]  ;;  %v8523_v31 = vsel %vm683_vm7, %v12966_v61, %v8301_v17 }
 0x38d   : > { %v7314_v56 = vmul.f32 %v16282_v18, %v7173_v9  ;;  %v12000_v50 = vpop.f32.mrb[70].mxu0  ;;  %9528 = vrot.lane.b32.xlu0 %v9490_v8, %s13280_s11  ;;  %12044 = vmatmul.mubr.msk.bf16.gmra.mrb[52].mxu1 %vm2536_vm12, %v8553_v16  ;;  %v8477_v49 = vpop.permute.xlu1 %8476  ;;  %v9292_v9 = vrot.slane %v11487_v45, 3  ;;  %v9503_v45 = vrot.slane %v12989_v24, 2 }
 0x38e   : > { %v7352_v29 = vadd.f32 %v16289_v43, %v7316_v14  ;;  %v7317_v3 = vmul.f32 %v12000_v50, %v16282_v18  ;;  %v7176_v30 = vpop.f32.mrb[71].mxu0  ;;  %v9496_v14 = vsel %vm1725_vm10, %v9494_v22, %v9495_v37  ;;  %v8557_v37 = vsel %vm1644_vm11, %v8523_v31, %v8477_v49  ;;  %v7424_v49 = vld [vmem:[#allocation2 + $0x10] sm:$0xf] }
 0x38f   : > { %v7350_v28 = vadd.f32 %v16289_v43, %v7314_v56  ;;  %v7315_v10 = vmul.f32 %v16282_v18, %v7176_v30  ;;  %v8475_v33 = vpop.permute.xlu0 %8474  ;;  %9326 = vrot.lane.b32.xlu1 %v9291_v54, %s13279_s10  ;;  %v12987_v56 = vld [vmem:[#allocation2 + $0x184] sm:$0xfc]  }
 0x390   : > { %v7353_v59 = vadd.f32 %v16289_v43, %v7317_v3  ;;  %v8555_v8 = vsel %vm1644_vm11, %v8520_v19, %v8475_v33  ;;  %v12988_v19 = vld [vmem:[#allocation2 + $0x18c] ss:$0 sps:$4 sm:$0x33]   ;;  %v7384_v50 = vmax.f32 %v7352_v29, 0.0  ;;  %v9297_v3 = vsel %vm7710_vm13, %v9295_v55, %v9296_v26  ;;  %v12976_v26 = vld [vmem:[#allocation2 + $0x150] sm:$0xff]  }
 0x391   : > { %v7351_v16 = vadd.f32 %v16289_v43, %v7315_v10  ;;  %9324 = vrot.lane.b32.xlu0 %v9288_v6, %s13279_s10  ;;  %12047 = vmatprep.mubr.msk.bf16.mxu1 %vm2536_vm12, %v8555_v8  ;;  %v8305_v54 = vpop.permute.xlu1 %8304  ;;  %v12992_v30 = vld [vmem:[#allocation2 + $0x1a8] ss:$0 sps:$4 sm:$0x77]   ;;  %v7382_v33 = vmax.f32 %v7350_v28, 0.0  ;;  %v11491_v6 = vcombine.low %v9028_v13, %v16396_v32  ;;  %v11493_v10 = vcombine.low %v9030_v1, %v16401_v39 }
 0x392   : > { %v7385_v21 = vmax.f32 %v7353_v59, 0.0  ;;  %v12994_v8 = vld [vmem:[#allocation2 + $0x1b8] ss:$0 sps:$4 sm:$0x77]   ;;  %v9504_v29 = vrot.slane %v12990_v15, 2  ;;  %v9294_v59 = vsel %vm7710_vm13, %v9292_v9, %v9293_v53  ;;  %v9500_v13 = vrot.slane %v12987_v56, 2 }
 0x393   : > { %v7383_v17 = vmax.f32 %v7351_v16, 0.0  ;;  %v8303_v61 = vpop.permute.xlu0 %8302  ;;  %9534 = vrot.lane.b32.xlu1 %v9499_v41, %s13280_s11  ;;  %v7422_v41 = vld [vmem:[#allocation2] sm:$0xf]  ;;  %v9501_v1 = vrot.slane %v12988_v19, 2  ;;  %v9298_v24 = vrot.slane %v11491_v6, 3  ;;  %v9299_v15 = vrot.slane %v12992_v30, 3 }
 0x394   : > { %v16412_v22 = vpack.c.bf16 %v7385_v21, %v7384_v50  ;;  %v8526_v55 = vsel %vm683_vm7, %v12975_v63, %v8303_v61  ;;  %v9301_v31 = vrot.slane %v11493_v10, 3  ;;  %v9302_v50 = vrot.slane %v12994_v8, 3  ;;  %v13000_v21 = vld [vmem:[#allocation2 + $0x1b4] sm:$0xfc]   ;;  %v13185_v9 = vld [vmem:[#allocation2 + $0x4] sm:$0xf] }
 0x395   : > { %v16415_v48 = vpack.c.bf16 %v7383_v17, %v7382_v33  ;;  %9532 = vrot.lane.b32.xlu0 %v9496_v14, %s13280_s11  ;;  %12048 = vmatmul.mubr.msk.bf16.gmra.mrb[56].mxu1 %vm2536_vm12, %v8557_v37  ;;  %v8481_v28 = vpop.permute.xlu1 %8480  ;;  %v9505_v14 = vsel %vm1725_vm10, %v9503_v45, %v9504_v29  ;;  %v13001_v33 = vld [vmem:[#allocation2 + $0x1bc] ss:$0 sps:$4 sm:$0x33]   ;;  %v8529_v17 = vsel %vm683_vm7, %v12976_v26, %v8305_v54  ;;  %v12998_v53 = vld [vmem:[#allocation2 + $0x1a4] sm:$0xfc]   ;;  %v13282_v61 = vmov 0.0  }
 0x396   : > { %v11281_v56 = vcombine.low %v7422_v41, %v13185_v9  ;;  %v12999_v30 = vld [vmem:[#allocation2 + $0x1ac] ss:$0 sps:$4 sm:$0x33]   ;;  %12123 = vmatprep.subr.mxu0 %v13282_v61  ;;  %v13186_v8 = vld [vmem:[#allocation2 + $0x14] sm:$0xf]  ;;  %v9300_v54 = vsel %vm7710_vm13, %v9298_v24, %v9299_v15  ;;  %v9303_v45 = vsel %vm7710_vm13, %v9301_v31, %v9302_v50  ;;  %v8561_v29 = vsel %vm1644_vm11, %v8529_v17, %v8481_v28 }
 0x397   : > { %v8479_v16 = vpop.permute.xlu0 %8478  ;;  %9330 = vrot.lane.b32.xlu1 %v9297_v3, %s13279_s10  ;;  %v9502_v3 = vsel %vm1725_vm10, %v9500_v13, %v9501_v1  ;;  %v11282_v37 = vcombine.low %v7424_v49, %v13186_v8  ;;  %v9510_v41 = vrot.slane %v13001_v33, 2  ;;  %v10039_v13 = vld [vmem:[%s17133_s3] sm:$0x3]  ;;  %v9506_v28 = vrot.slane %v12998_v53, 2  ;;  %12125 = vmatprep.mubr.msk.f32.mxu0 %vm13283_vm15, %v13282_v61 }
 0x398   : > { %v8559_v63 = vsel %vm1644_vm11, %v8526_v55, %v8479_v16  ;;  %v10040_v15 = vunpack.c.l.bf16 %v10039_v13 }
 0x399   : > { %9328 = vrot.lane.b32.xlu0 %v9294_v59, %s13279_s10  ;;  %12051 = vmatprep.mubr.msk.bf16.mxu1 %vm2536_vm12, %v8559_v63  ;;  %v7762_v19 = vpop.permute.xlu1 %7761  ;;  %v9509_v59 = vrot.slane %v13000_v21, 2  ;;  %v9507_v21 = vrot.slane %v12999_v30, 2 }
 0x39a   : > { %12124 = vmatpush3.msk.msra.mxu0 %vm10044_vm14, %v10040_v15 }
 0x39b   : > { %v12003_v6 = vpop.f32.mrb[72].mxu0  ;;  %v7760_v10 = vpop.permute.xlu0 %7759  ;;  %9538 = vrot.lane.b32.xlu1 %v9505_v14, %s13280_s11  ;;  %v7426_v14 = vld [vmem:[#allocation2 + $0x20] sm:$0xf]  ;;  %v9508_v13 = vsel %vm1725_vm10, %v9506_v28, %v9507_v21 }
 0x39c   : > { %v7320_v55 = vmul.f32 %v12003_v6, %v16282_v18  ;;  %v7189_v26 = vpop.f32.mrb[73].mxu0  ;;  %v8001_v1 = vsel %vm683_vm7, %v11281_v56, %v7760_v10  ;;  %v8004_v6 = vsel %vm683_vm7, %v11282_v37, %v7762_v19  ;;  %v13187_v10 = vld [vmem:[#allocation2 + $0x24] sm:$0xf]  ;;  %v9665_v19 = vsel %vm1725_vm10, %v16264_v58, 0 }
 0x39d   : > { %v7318_v16 = vmul.f32 %v16282_v18, %v7189_v26  ;;  %v12004_v49 = vpop.f32.mrb[74].mxu0  ;;  %9536 = vrot.lane.b32.xlu0 %v9502_v3, %s13280_s11  ;;  %12052 = vmatmul.mubr.msk.bf16.gmra.mrb[60].mxu1 %vm2536_vm12, %v8561_v29  ;;  %v7970_v24 = vpop.permute.xlu1 %7969  ;;  %v9511_v3 = vsel %vm1725_vm10, %v9509_v59, %v9510_v41  ;;  %v11283_v8 = vcombine.low %v7426_v14, %v13187_v10  ;;  %v7428_v26 = vld [vmem:[#allocation2 + $0x30] sm:$0xf] }
 0x39e   : > { %v7356_v31 = vadd.f32 %v16289_v43, %v7320_v55  ;;  %v7321_v50 = vmul.f32 %v12004_v49, %v16282_v18  ;;  %v7192_v63 = vpop.f32.mrb[75].mxu0  ;;  %v8050_v37 = vsel %vm1644_vm11, %v8004_v6, %v7970_v24  ;;  %v13188_v49 = vld [vmem:[#allocation2 + $0x34] sm:$0xf]  ;;  %v13189_v24 = vld [vmem:[#allocation2 + $0x44] sm:$0xf] }
 0x39f   : > { %v7354_v33 = vadd.f32 %v16289_v43, %v7318_v16  ;;  %v7319_v17 = vmul.f32 %v16282_v18, %v7192_v63  ;;  %v7968_v9 = vpop.permute.xlu0 %7967  ;;  %9334 = vrot.lane.b32.xlu1 %v9303_v45, %s13279_s10  ;;  %v11284_v15 = vcombine.low %v7428_v26, %v13188_v49  ;;  %v13190_v6 = vld [vmem:[#allocation2 + $0x54] sm:$0xf] }
 0x3a0   : > { %v7357_v56 = vadd.f32 %v16289_v43, %v7321_v50  ;;  %v8048_v53 = vsel %vm1644_vm11, %v8001_v1, %v7968_v9  ;;  %v7388_v29 = vmax.f32 %v7356_v31, 0.0  ;;  %v7430_v31 = vld [vmem:[#allocation2 + $0x40] sm:$0xf] }
 0x3a1   : > { %v7355_v30 = vadd.f32 %v16289_v43, %v7319_v17  ;;  %9332 = vrot.lane.b32.xlu0 %v9300_v54, %s13279_s10  ;;  %12057 = vmatprep.mubr.msk.bf16.mxu1 %vm2536_vm12, %v8048_v53  ;;  %v7766_v45 = vpop.permute.xlu1 %7765  ;;  %v7386_v1 = vmax.f32 %v7354_v33, 0.0  ;;  %v11285_v14 = vcombine.low %v7430_v31, %v13189_v24  ;;  %v10966_v33 = vld [vmem:[%s17134_s4 + $0x2] sm:$0x3]  ;;  %v7432_v17 = vld [vmem:[#allocation2 + $0x50] sm:$0xf] }
 0x3a2   : > { %v7389_v55 = vmax.f32 %v7357_v56, 0.0  ;;  %v8010_v63 = vsel %vm683_vm7, %v11284_v15, %v7766_v45  ;;  %v16472_v53 = vrot.slane %v10966_v33, %v14986_v7 }
 0x3a3   : > { %v7387_v59 = vmax.f32 %v7355_v30, 0.0  ;;  %v7764_v41 = vpop.permute.xlu0 %7763  ;;  %9542 = vrot.lane.b32.xlu1 %v9511_v3, %s13280_s11  ;;  %v11286_v30 = vcombine.low %v7432_v17, %v13190_v6 }
 0x3a4   : > { %v16456_v61 = vpack.c.bf16 %v7389_v55, %v7388_v29  ;;  %v8007_v16 = vsel %vm683_vm7, %v11283_v8, %v7764_v41  ;;  %v16478_v55 = vrot.slane %v10966_v33, %v14999_v62  ;;  %v13191_v33 = vld [vmem:[#allocation2 + $0x64] sm:$0xf] }
 0x3a5   : > { %v16459_v54 = vpack.c.bf16 %v7387_v59, %v7386_v1  ;;  %9540 = vrot.lane.b32.xlu0 %v9508_v13, %s13280_s11  ;;  %12058 = vmatmul.mubr.msk.bf16.vlgmr.msra.gmra.mrb[32].mxu1 %vm2536_vm12, %v8050_v37  ;;  %v7974_v28 = vpop.permute.xlu1 %7973  ;;  %v7434_v59 = vld [vmem:[#allocation2 + $0x60] sm:$0xf] }
 0x3a6   : > { %12090 = vmatpush3.bf16.msra.mxu1 %v9665_v19  ;;  %v8054_v56 = vsel %vm1644_vm11, %v8010_v63, %v7974_v28  ;;  %v11287_v17 = vcombine.low %v7434_v59, %v13191_v33 }
 0x3a7   : > { %v7972_v58 = vpop.permute.xlu0 %7971 }
 0x3a8   : > { %v8052_v50 = vsel %vm1644_vm11, %v8007_v16, %v7972_v58 }
 0x3a9   : > { %12061 = vmatprep.mubr.msk.bf16.mxu1 %vm2536_vm12, %v8052_v50  ;;  %v7770_v21 = vpop.permute.xlu1 %7769 }
 0x3aa   : > { %v8016_v15 = vsel %vm683_vm7, %v11286_v30, %v7770_v21  ;;  %v7436_v21 = vld [vmem:[#allocation2 + $0x70] sm:$0xf] }
 0x3ab   : > { %v7768_v9 = vpop.permute.xlu0 %7767 }
 0x3ac   : > { %v8013_v3 = vsel %vm683_vm7, %v11285_v14, %v7768_v9 }
 0x3ad   : > { %v11889_v10 = vpop.f32.mrb[4].mxu1  ;;  %12062 = vmatmul.mubr.msk.bf16.gmra.mrb[36].mxu1 %vm2536_vm12, %v8054_v56  ;;  %v7978_v8 = vpop.permute.xlu1 %7977 }
 0x3ae   : > { %v12130_v45 = vadd.f32 %v11889_v10, %v15521_v34  ;;  %v3813_v29 = vpop.f32.mrb[5].mxu1 }
 0x3af   : > { %v12131_v26 = vadd.f32 %v3813_v29, %v15524_v38  ;;  %v12007_v13 = vpop.f32.mrb[76].mxu0  ;;  %v7976_v1 = vpop.permute.xlu0 %7975 }
 0x3b0   : > { %v3980_v41 = vmul.f32 %v12130_v45, %v16472_v53  ;;  %v7324_v19 = vmul.f32 %v12007_v13, %v16282_v18  ;;  %v8056_v37 = vsel %vm1644_vm11, %v8013_v3, %v7976_v1  ;;  %v11890_v16 = vpop.f32.mrb[6].mxu1  ;;  %v7205_v49 = vpop.f32.mrb[77].mxu0  ;;  %v13192_v1 = vld [vmem:[#allocation2 + $0x74] sm:$0xf] }
 0x3b1   : > { %v3978_v34 = vmul.f32 %v12131_v26, %v16472_v53  ;;  %v12132_v28 = vadd.f32 %v11890_v16, %v15527_v27  ;;  %v3816_v31 = vpop.f32.mrb[7].mxu1  ;;  %v7322_v38 = vmul.f32 %v16282_v18, %v7205_v49  ;;  %v12008_v58 = vpop.f32.mrb[78].mxu0  ;;  %12065 = vmatprep.mubr.msk.bf16.mxu1 %vm2536_vm12, %v8056_v37  ;;  %v11288_v59 = vcombine.low %v7436_v21, %v13192_v1 }
 0x3b2   : > { %v7360_v50 = vadd.f32 %v16289_v43, %v7324_v19  ;;  %v12133_v63 = vadd.f32 %v3816_v31, %v15530_v46  ;;  %v7325_v24 = vmul.f32 %v12008_v58, %v16282_v18  ;;  %v7208_v14 = vpop.f32.mrb[79].mxu0  ;;  %v7774_v9 = vpop.permute.xlu1 %7773  ;;  %v4016_v56 = vadd.f32 %v16478_v55, %v3980_v41 }
 0x3b3   : > { %v3981_v27 = vmul.f32 %v12132_v28, %v16472_v53  ;;  %v7358_v3 = vadd.f32 %v16289_v43, %v7322_v38  ;;  %v7323_v6 = vmul.f32 %v16282_v18, %v7208_v14  ;;  %v7772_v30 = vpop.permute.xlu0 %7771  ;;  %v4014_v10 = vadd.f32 %v16478_v55, %v3978_v34 }
 0x3b4   : > { %v8058_v46 = vsel %vm1644_vm11, %v8016_v15, %v7978_v8  ;;  %v3979_v45 = vmul.f32 %v12133_v63, %v16472_v53  ;;  %v7361_v29 = vadd.f32 %v16289_v43, %v7325_v24  ;;  %v7392_v41 = vmax.f32 %v7360_v50, 0.0  ;;  %v7438_v8 = vld [vmem:[#allocation2 + $0x80] sm:$0xf] }
 0x3b5   : > { %v4017_v26 = vadd.f32 %v16478_v55, %v3981_v27  ;;  %v7359_v13 = vadd.f32 %v16289_v43, %v7323_v6  ;;  %12066 = vmatmul.mubr.msk.bf16.gmra.mrb[40].mxu1 %vm2536_vm12, %v8058_v46  ;;  %v8019_v16 = vsel %vm683_vm7, %v11287_v17, %v7772_v30  ;;  %v4048_v15 = vmax.f32 %v4016_v56, 0.0  ;;  %v13193_v17 = vld [vmem:[#allocation2 + $0x84] sm:$0xf]  ;;  %v7440_v6 = vld [vmem:[#allocation2 + $0x90] sm:$0xf] }
 0x3b6   : > { %v4015_v19 = vadd.f32 %v16478_v55, %v3979_v45  ;;  %v7393_v37 = vmax.f32 %v7361_v29, 0.0  ;;  %v7982_v49 = vpop.permute.xlu1 %7981  ;;  %v7390_v28 = vmax.f32 %v7358_v3, 0.0  ;;  %v4046_v58 = vmax.f32 %v4014_v10, 0.0  ;;  %v13194_v45 = vld [vmem:[#allocation2 + $0x94] sm:$0xf] }
 0x3b7   : > { %v4049_v34 = vmax.f32 %v4017_v26, 0.0  ;;  %v7391_v31 = vmax.f32 %v7359_v13, 0.0  ;;  %v7980_v38 = vpop.permute.xlu0 %7979  ;;  %v8022_v21 = vsel %vm683_vm7, %v11288_v59, %v7774_v9  ;;  %v11289_v27 = vcombine.low %v7438_v8, %v13193_v17  ;;  %v7442_v26 = vld [vmem:[#allocation2 + $0xa0] sm:$0xf] }
 0x3b8   : > { %v4047_v63 = vmax.f32 %v4015_v19, 0.0  ;;  %v16505_v24 = vpack.c.bf16 %v7393_v37, %v7392_v41  ;;  %v8060_v14 = vsel %vm1644_vm11, %v8019_v16, %v7980_v38  ;;  %v8062_v10 = vsel %vm1644_vm11, %v8022_v21, %v7982_v49  ;;  %v13195_v41 = vld [vmem:[#allocation2 + $0xa4] sm:$0xf]  ;;  %v7444_v37 = vld [vmem:[#allocation2 + $0xb0] sm:$0xf] }
 0x3b9   : > { %v4079_v33 = vpack.c.bf16 %v4049_v34, %v4048_v15  ;;  %v16508_v50 = vpack.c.bf16 %v7391_v31, %v7390_v28  ;;  %12069 = vmatprep.mubr.msk.bf16.mxu1 %vm2536_vm12, %v8060_v14  ;;  %v11290_v29 = vcombine.low %v7440_v6, %v13194_v45  ;;  %v11291_v19 = vcombine.low %v7442_v26, %v13195_v41  ;;  %v13196_v34 = vld [vmem:[#allocation2 + $0xb4] sm:$0xf]  ;;  %v7446_v17 = vld [vmem:[#allocation2 + $0xc0] sm:$0xf] }
 0x3ba   : > { %v4078_v56 = vpack.c.bf16 %v4047_v63, %v4046_v58  ;;  %v7778_v3 = vpop.permute.xlu1 %7777  ;;  %v11292_v28 = vcombine.low %v7444_v37, %v13196_v34 }
 0x3bb   : > { %10152 = vrot.lane.b32.xlu1 %v4079_v33, %s13279_s10  ;;  %v7776_v30 = vpop.permute.xlu0 %7775  ;;  %v8028_v59 = vsel %vm683_vm7, %v11290_v29, %v7778_v3 }
 0x3bc   : > { %10150 = vrot.lane.b32.xlu0 %v4078_v56, %s13279_s10  ;;  %v8025_v46 = vsel %vm683_vm7, %v11289_v27, %v7776_v30 }
 0x3bd   : > { %12070 = vmatmul.mubr.msk.bf16.gmra.mrb[44].mxu1 %vm2536_vm12, %v8062_v10 }
 0x3be   : > { %v7986_v9 = vpop.permute.xlu1 %7985 }
 0x3bf   : > { %v7984_v13 = vpop.permute.xlu0 %7983  ;;  %v8066_v8 = vsel %vm1644_vm11, %v8028_v59, %v7986_v9  ;;  %v13197_v59 = vld [vmem:[#allocation2 + $0xc4] sm:$0xf] }
 0x3c0   : > { %v8064_v1 = vsel %vm1644_vm11, %v8025_v46, %v7984_v13  ;;  %v11293_v41 = vcombine.low %v7446_v17, %v13197_v59  ;;  %v13199_v59 = vld [vmem:[#allocation2 + $0xe4] sm:$0xf] }
 0x3c1   : > { %12073 = vmatprep.mubr.msk.bf16.mxu1 %vm2536_vm12, %v8064_v1 }
 0x3c2   : > { %v7782_v16 = vpop.permute.xlu1 %7781 }
 0x3c3   : > { %v7780_v49 = vpop.permute.xlu0 %7779  ;;  %v8034_v10 = vsel %vm683_vm7, %v11292_v28, %v7782_v16 }
 0x3c4   : > { %v8031_v15 = vsel %vm683_vm7, %v11291_v19, %v7780_v49  ;;  %v7448_v19 = vld [vmem:[#allocation2 + $0xd0] sm:$0xf] }
 0x3c5   : > { %v11893_v31 = vpop.f32.mrb[8].mxu1  ;;  %12074 = vmatmul.mubr.msk.bf16.gmra.mrb[48].mxu1 %vm2536_vm12, %v8066_v8 }
 0x3c6   : > { %v12134_v38 = vadd.f32 %v11893_v31, %v15538_v20  ;;  %v3829_v58 = vpop.f32.mrb[9].mxu1  ;;  %v7990_v63 = vpop.permute.xlu1 %7989 }
 0x3c7   : > { %v12135_v14 = vadd.f32 %v3829_v58, %v15541_v25  ;;  %v12011_v33 = vpop.f32.mrb[80].mxu0  ;;  %v7988_v21 = vpop.permute.xlu0 %7987 }
 0x3c8   : > { %v3984_v27 = vmul.f32 %v12134_v38, %v16472_v53  ;;  %v7328_v56 = vmul.f32 %v12011_v33, %v16282_v18  ;;  %v8068_v6 = vsel %vm1644_vm11, %v8031_v15, %v7988_v21  ;;  %v11894_v3 = vpop.f32.mrb[10].mxu1  ;;  %v7221_v30 = vpop.f32.mrb[81].mxu0 }
 0x3c9   : > { %v3982_v46 = vmul.f32 %v12135_v14, %v16472_v53  ;;  %v12136_v20 = vadd.f32 %v11894_v3, %v15545_v44  ;;  %v3832_v45 = vpop.f32.mrb[11].mxu1  ;;  %v7326_v25 = vmul.f32 %v16282_v18, %v7221_v30  ;;  %v12012_v29 = vpop.f32.mrb[82].mxu0  ;;  %12077 = vmatprep.mubr.msk.bf16.mxu1 %vm2536_vm12, %v8068_v6  ;;  %v13198_v14 = vld [vmem:[#allocation2 + $0xd4] sm:$0xf] }
 0x3ca   : > { %v7364_v9 = vadd.f32 %v16289_v43, %v7328_v56  ;;  %v12137_v26 = vadd.f32 %v3832_v45, %v15550_v12  ;;  %v7329_v13 = vmul.f32 %v12012_v29, %v16282_v18  ;;  %v7224_v1 = vpop.f32.mrb[83].mxu0  ;;  %v7786_v37 = vpop.permute.xlu1 %7785  ;;  %v4020_v16 = vadd.f32 %v16478_v55, %v3984_v27 }
 0x3cb   : > { %v3985_v44 = vmul.f32 %v12136_v20, %v16472_v53  ;;  %v7362_v49 = vadd.f32 %v16289_v43, %v7326_v25  ;;  %v7327_v8 = vmul.f32 %v16282_v18, %v7224_v1  ;;  %v7784_v15 = vpop.permute.xlu0 %7783  ;;  %v4018_v34 = vadd.f32 %v16478_v55, %v3982_v46 }
 0x3cc   : > { %v8070_v12 = vsel %vm1644_vm11, %v8034_v10, %v7990_v63  ;;  %v3983_v28 = vmul.f32 %v12137_v26, %v16472_v53  ;;  %v7365_v31 = vadd.f32 %v16289_v43, %v7329_v13  ;;  %v11294_v33 = vcombine.low %v7448_v19, %v13198_v14  ;;  %v7450_v63 = vld [vmem:[#allocation2 + $0xe0] sm:$0xf]  ;;  %v13201_v14 = vld [vmem:[#allocation2 + $0xc4] sm:$0xf] }
 0x3cd   : > { %v4021_v38 = vadd.f32 %v16478_v55, %v3985_v44  ;;  %v7363_v58 = vadd.f32 %v16289_v43, %v7327_v8  ;;  %12078 = vmatmul.mubr.msk.bf16.gmra.mrb[52].mxu1 %vm2536_vm12, %v8070_v12  ;;  %v7396_v21 = vmax.f32 %v7364_v9, 0.0  ;;  %v8037_v56 = vsel %vm683_vm7, %v11293_v41, %v7784_v15 }
 0x3ce   : > { %v4019_v17 = vadd.f32 %v16478_v55, %v3983_v28  ;;  %v7397_v27 = vmax.f32 %v7365_v31, 0.0  ;;  %v7994_v6 = vpop.permute.xlu1 %7993  ;;  %v4052_v3 = vmax.f32 %v4020_v16, 0.0  ;;  %v7394_v10 = vmax.f32 %v7362_v49, 0.0  ;;  %v7452_v16 = vld [vmem:[#allocation2 + $0xf0] sm:$0xf] }
 0x3cf   : > { %v4053_v30 = vmax.f32 %v4021_v38, 0.0  ;;  %v7395_v46 = vmax.f32 %v7363_v58, 0.0  ;;  %v7992_v20 = vpop.permute.xlu0 %7991  ;;  %v4050_v45 = vmax.f32 %v4018_v34, 0.0  ;;  %v8040_v1 = vsel %vm683_vm7, %v11294_v33, %v7786_v37  ;;  %v13200_v34 = vld [vmem:[#allocation2 + $0xf4] sm:$0xf] }
 0x3d0   : > { %v4051_v25 = vmax.f32 %v4019_v17, 0.0  ;;  %v16549_v29 = vpack.c.bf16 %v7397_v27, %v7396_v21  ;;  %v8072_v26 = vsel %vm1644_vm11, %v8037_v56, %v7992_v20  ;;  %v11295_v41 = vcombine.low %v7450_v63, %v13199_v59  ;;  %v8968_v28 = vld [vmem:[#allocation2 + $0xc0] sm:$0xf]  ;;  %v8970_v21 = vld [vmem:[#allocation2 + $0xd0] sm:$0xf] }
 0x3d1   : > { %v4081_v13 = vpack.c.bf16 %v4053_v30, %v4052_v3  ;;  %v16552_v9 = vpack.c.bf16 %v7395_v46, %v7394_v10  ;;  %12081 = vmatprep.mubr.msk.bf16.mxu1 %vm2536_vm12, %v8072_v26  ;;  %v8074_v8 = vsel %vm1644_vm11, %v8040_v1, %v7994_v6  ;;  %v11296_v12 = vcombine.low %v7452_v16, %v13200_v34  ;;  %v13202_v63 = vld [vmem:[#allocation2 + $0xd4] sm:$0xf]  ;;  %v8972_v46 = vld [vmem:[#allocation2 + $0xe0] sm:$0xf]  ;;  %v13203_v1 = vld [vmem:[#allocation2 + $0xe4] sm:$0xf] }
 0x3d2   : > { %v4080_v19 = vpack.c.bf16 %v4051_v25, %v4050_v45  ;;  %v7790_v44 = vpop.permute.xlu1 %7789  ;;  %v11447_v33 = vcombine.low %v8968_v28, %v13201_v14  ;;  %v11448_v3 = vcombine.low %v8970_v21, %v13202_v63  ;;  %v11449_v59 = vcombine.low %v8972_v46, %v13203_v1  ;;  %v8976_v63 = vld [vmem:[#allocation2 + $0x100] sm:$0xf]  ;;  %v13205_v1 = vld [vmem:[#allocation2 + $0x104] sm:$0xf] }
 0x3d3   : > { %10156 = vrot.lane.b32.xlu1 %v4081_v13, %s13279_s10  ;;  %v7788_v49 = vpop.permute.xlu0 %7787  ;;  %v8046_v58 = vsel %vm683_vm7, %v11296_v12, %v7790_v44 }
 0x3d4   : > { %10154 = vrot.lane.b32.xlu0 %v4080_v19, %s13279_s10  ;;  %v8043_v15 = vsel %vm683_vm7, %v11295_v41, %v7788_v49  ;;  %v8974_v41 = vld [vmem:[#allocation2 + $0xf0] sm:$0xf] }
 0x3d5   : > { %12082 = vmatmul.mubr.msk.bf16.gmra.mrb[56].mxu1 %vm2536_vm12, %v8074_v8 }
 0x3d6   : > { %v7998_v37 = vpop.permute.xlu1 %7997 }
 0x3d7   : > { %v7996_v31 = vpop.permute.xlu0 %7995  ;;  %v8078_v56 = vsel %vm1644_vm11, %v8046_v58, %v7998_v37 }
 0x3d8   : > { %v8076_v38 = vsel %vm1644_vm11, %v8043_v15, %v7996_v31  ;;  %v13204_v31 = vld [vmem:[#allocation2 + $0xf4] sm:$0xf] }
 0x3d9   : > { %12085 = vmatprep.mubr.msk.bf16.mxu1 %vm2536_vm12, %v8076_v38  ;;  %v11450_v38 = vcombine.low %v8974_v41, %v13204_v31 }
 0x3da   : > { %v9307_v17 = vpop.permute.xlu1 %9306 }
 0x3db   : > { %v9305_v27 = vpop.permute.xlu0 %9304  ;;  %v9549_v45 = vsel %vm683_vm7, %v11448_v3, %v9307_v17 }
 0x3dc   : > { %v9546_v6 = vsel %vm683_vm7, %v11447_v33, %v9305_v27 }
 0x3dd   : > { %12086 = vmatmul.mubr.msk.bf16.gmra.mrb[60].mxu1 %vm2536_vm12, %v8078_v56 }
 0x3de   : > { %v9515_v30 = vpop.permute.xlu1 %9514 }
 0x3df   : > { %v9513_v10 = vpop.permute.xlu0 %9512  ;;  %v9595_v8 = vsel %vm1644_vm11, %v9549_v45, %v9515_v30 }
 0x3e0   : > { %v9593_v20 = vsel %vm1644_vm11, %v9546_v6, %v9513_v10 }
 0x3e1   : > { %v11897_v25 = vpop.f32.mrb[12].mxu1  ;;  %12091 = vmatprep.mubr.msk.bf16.mxu1 %vm2536_vm12, %v9593_v20 }
 0x3e2   : > { %v12138_v26 = vadd.f32 %v11897_v25, %v15559_v11  ;;  %v3845_v13 = vpop.f32.mrb[13].mxu1  ;;  %v9311_v19 = vpop.permute.xlu1 %9310 }
 0x3e3   : > { %v12139_v16 = vadd.f32 %v3845_v13, %v15562_v5  ;;  %v12015_v44 = vpop.f32.mrb[84].mxu0  ;;  %v9309_v49 = vpop.permute.xlu0 %9308 }
 0x3e4   : > { %v3988_v15 = vmul.f32 %v12138_v26, %v16472_v53  ;;  %v7332_v34 = vmul.f32 %v12015_v44, %v16282_v18  ;;  %v11898_v12 = vpop.f32.mrb[14].mxu1  ;;  %v7237_v37 = vpop.f32.mrb[85].mxu0  ;;  %v9552_v21 = vsel %vm683_vm7, %v11449_v59, %v9309_v49  ;;  %v9555_v26 = vsel %vm683_vm7, %v11450_v38, %v9311_v19 }
 0x3e5   : > { %v3986_v28 = vmul.f32 %v12139_v16, %v16472_v53  ;;  %v12140_v11 = vadd.f32 %v11898_v12, %v15565_v60  ;;  %v3848_v58 = vpop.f32.mrb[15].mxu1  ;;  %v7330_v14 = vmul.f32 %v16282_v18, %v7237_v37  ;;  %v12016_v5 = vpop.f32.mrb[86].mxu0  ;;  %12092 = vmatmul.mubr.msk.bf16.vlgmr.msra.gmra.mrb[32].mxu1 %vm2536_vm12, %v9595_v8  ;;  %v11451_v59 = vcombine.low %v8976_v63, %v13205_v1  ;;  %v8978_v8 = vld [vmem:[#allocation2 + $0x110] sm:$0xf]  ;;  %v8980_v63 = vld [vmem:[#allocation2 + $0x120] sm:$0xf] }
 0x3e6   : > { %v7368_v33 = vadd.f32 %v16289_v43, %v7332_v34  ;;  %v12141_v17 = vadd.f32 %v3848_v58, %v15568_v51  ;;  %v7333_v27 = vmul.f32 %v12016_v5, %v16282_v18  ;;  %v7240_v56 = vpop.f32.mrb[87].mxu0  ;;  %v9519_v6 = vpop.permute.xlu1 %9518  ;;  %v4024_v60 = vadd.f32 %v16478_v55, %v3988_v15 }
 0x3e7   : > { %v3989_v3 = vmul.f32 %v12140_v11, %v16472_v53  ;;  %v7366_v30 = vadd.f32 %v16289_v43, %v7330_v14  ;;  %v7331_v10 = vmul.f32 %v16282_v18, %v7240_v56  ;;  %v9517_v46 = vpop.permute.xlu0 %9516  ;;  %v4022_v20 = vadd.f32 %v16478_v55, %v3986_v28 }
 0x3e8   : > { %v3987_v45 = vmul.f32 %v12141_v17, %v16472_v53  ;;  %v7369_v51 = vadd.f32 %v16289_v43, %v7333_v27  ;;  %v7400_v41 = vmax.f32 %v7368_v33, 0.0  ;;  %v9597_v49 = vsel %vm1644_vm11, %v9552_v21, %v9517_v46  ;;  %v13206_v21 = vld [vmem:[#allocation2 + $0x114] sm:$0xf]  ;;  %v8982_v46 = vld [vmem:[#allocation2 + $0x130] sm:$0xf] }
 0x3e9   : > { %v4025_v25 = vadd.f32 %v16478_v55, %v3989_v3  ;;  %v7367_v13 = vadd.f32 %v16289_v43, %v7331_v10  ;;  %v4056_v34 = vmax.f32 %v4024_v60, 0.0  ;;  %v7398_v37 = vmax.f32 %v7366_v30, 0.0  ;;  %12095 = vmatprep.mubr.msk.bf16.mxu1 %vm2536_vm12, %v9597_v49  ;;  %v13207_v30 = vld [vmem:[#allocation2 + $0x124] sm:$0xf] }
 0x3ea   : > { %v4023_v16 = vadd.f32 %v16478_v55, %v3987_v45  ;;  %v7401_v44 = vmax.f32 %v7369_v51, 0.0  ;;  %v9315_v15 = vpop.permute.xlu1 %9314  ;;  %v4054_v19 = vmax.f32 %v4022_v20, 0.0  ;;  %v9599_v58 = vsel %vm1644_vm11, %v9555_v26, %v9519_v6  ;;  %v13208_v26 = vld [vmem:[#allocation2 + $0x134] sm:$0xf]  ;;  %v13209_v49 = vld [vmem:[#allocation2 + $0x144] sm:$0xf] }
 0x3eb   : > { %v4057_v12 = vmax.f32 %v4025_v25, 0.0  ;;  %v7399_v28 = vmax.f32 %v7367_v13, 0.0  ;;  %v9313_v11 = vpop.permute.xlu0 %9312  ;;  %v11452_v17 = vcombine.low %v8978_v8, %v13206_v21  ;;  %v11453_v10 = vcombine.low %v8980_v63, %v13207_v30 }
 0x3ec   : > { %v4055_v31 = vmax.f32 %v4023_v16, 0.0  ;;  %v16596_v38 = vpack.c.bf16 %v7401_v44, %v7400_v41  ;;  %v9558_v33 = vsel %vm683_vm7, %v11451_v59, %v9313_v11  ;;  %v11454_v13 = vcombine.low %v8982_v46, %v13208_v26  ;;  %v8984_v59 = vld [vmem:[#allocation2 + $0x140] sm:$0xf]  ;;  %v13210_v11 = vld [vmem:[#allocation2 + $0x154] sm:$0xf] }
 0x3ed   : > { %v4083_v14 = vpack.c.bf16 %v4057_v12, %v4056_v34  ;;  %v16599_v5 = vpack.c.bf16 %v7399_v28, %v7398_v37  ;;  %12096 = vmatmul.mubr.msk.bf16.gmra.mrb[36].mxu1 %vm2536_vm12, %v9599_v58  ;;  %v9561_v6 = vsel %vm683_vm7, %v11452_v17, %v9315_v15  ;;  %v11455_v8 = vcombine.low %v8984_v59, %v13209_v49  ;;  %v8986_v15 = vld [vmem:[#allocation2 + $0x150] sm:$0xf] }
 0x3ee   : > { %v4082_v27 = vpack.c.bf16 %v4055_v31, %v4054_v19  ;;  %v9523_v56 = vpop.permute.xlu1 %9522  ;;  %v11456_v19 = vcombine.low %v8986_v15, %v13210_v11 }
 0x3ef   : > { %10160 = vrot.lane.b32.xlu1 %v4083_v14, %s13279_s10  ;;  %v9521_v60 = vpop.permute.xlu0 %9520  ;;  %v9603_v51 = vsel %vm1644_vm11, %v9561_v6, %v9523_v56  ;;  %v8988_v56 = vld [vmem:[#allocation2 + $0x160] sm:$0xf] }
 0x3f0   : > { %v9601_v3 = vsel %vm1644_vm11, %v9558_v33, %v9521_v60  ;;  %10158 = vrot.lane.b32.xlu0 %v4082_v27, %s13279_s10 }
 0x3f1   : > { %12099 = vmatprep.mubr.msk.bf16.mxu1 %vm2536_vm12, %v9601_v3 }
 0x3f2   : > { %v9319_v20 = vpop.permute.xlu1 %9318 }
 0x3f3   : > { %v9317_v45 = vpop.permute.xlu0 %9316  ;;  %v9567_v44 = vsel %vm683_vm7, %v11454_v13, %v9319_v20 }
 0x3f4   : > { %v9564_v25 = vsel %vm683_vm7, %v11453_v10, %v9317_v45 }
 0x3f5   : > { %12100 = vmatmul.mubr.msk.bf16.gmra.mrb[40].mxu1 %vm2536_vm12, %v9603_v51 }
 0x3f6   : > { %v9527_v1 = vpop.permute.xlu1 %9526 }
 0x3f7   : > { %v9525_v41 = vpop.permute.xlu0 %9524  ;;  %v9607_v37 = vsel %vm1644_vm11, %v9567_v44, %v9527_v1  ;;  %v13211_v1 = vld [vmem:[#allocation2 + $0x164] sm:$0xf]  ;;  %v8992_v44 = vld [vmem:[#allocation2 + $0x180] sm:$0xf] }
 0x3f8   : > { %v9605_v16 = vsel %vm1644_vm11, %v9564_v25, %v9525_v41  ;;  %v11457_v59 = vcombine.low %v8988_v56, %v13211_v1  ;;  %v8990_v41 = vld [vmem:[#allocation2 + $0x170] sm:$0xf] }
 0x3f9   : > { %12103 = vmatprep.mubr.msk.bf16.mxu1 %vm2536_vm12, %v9605_v16 }
 0x3fa   : > { %v9323_v34 = vpop.permute.xlu1 %9322 }
 0x3fb   : > { %v9321_v12 = vpop.permute.xlu0 %9320  ;;  %v9573_v10 = vsel %vm683_vm7, %v11456_v19, %v9323_v34 }
 0x3fc   : > { %v9570_v28 = vsel %vm683_vm7, %v11455_v8, %v9321_v12 }
 0x3fd   : > { %v11901_v31 = vpop.f32.mrb[16].mxu1  ;;  %12104 = vmatmul.mubr.msk.bf16.gmra.mrb[44].mxu1 %vm2536_vm12, %v9607_v37 }
 0x3fe   : > { %v12142_v58 = vadd.f32 %v11901_v31, %v15576_v35  ;;  %v3861_v14 = vpop.f32.mrb[17].mxu1  ;;  %v9531_v33 = vpop.permute.xlu1 %9530  ;;  %v13212_v31 = vld [vmem:[#allocation2 + $0x174] sm:$0xf] }
 0x3ff   : > { %v12143_v21 = vadd.f32 %v3861_v14, %v15579_v47  ;;  %v12019_v17 = vpop.f32.mrb[88].mxu0  ;;  %v9529_v27 = vpop.permute.xlu0 %9528  ;;  %v11459_v14 = vcombine.low %v8992_v44, %v16377_v36 }
 0x400   : > { %v3992_v63 = vmul.f32 %v12142_v58, %v16472_v53  ;;  %v7336_v60 = vmul.f32 %v12019_v17, %v16282_v18  ;;  %v9609_v3 = vsel %vm1644_vm11, %v9570_v28, %v9529_v27  ;;  %v11902_v6 = vpop.f32.mrb[18].mxu1  ;;  %v7253_v30 = vpop.f32.mrb[89].mxu0  ;;  %v11458_v58 = vcombine.low %v8990_v41, %v13212_v31  ;;  %v17410_v31 = vld [vmem:[#allocation68_spill] sm:$0xff] }
 0x401   : > { %v3990_v46 = vmul.f32 %v12143_v21, %v16472_v53  ;;  %v12144_v35 = vadd.f32 %v11902_v6, %v15583_v40  ;;  %v3864_v20 = vpop.f32.mrb[19].mxu1  ;;  %v7334_v47 = vmul.f32 %v16282_v18, %v7253_v30  ;;  %v12020_v45 = vpop.f32.mrb[90].mxu0  ;;  %12107 = vmatprep.mubr.msk.bf16.mxu1 %vm2536_vm12, %v9609_v3 }
 0x402   : > { %v7372_v51 = vadd.f32 %v16289_v43, %v7336_v60  ;;  %v12145_v25 = vadd.f32 %v3864_v20, %v15588_v52  ;;  %v7337_v26 = vmul.f32 %v12020_v45, %v16282_v18  ;;  %v7256_v13 = vpop.f32.mrb[91].mxu0  ;;  %v9327_v16 = vpop.permute.xlu1 %9326  ;;  %v4028_v40 = vadd.f32 %v16478_v55, %v3992_v63 }
 0x403   : > { %v3993_v49 = vmul.f32 %v12144_v35, %v16472_v53  ;;  %v7370_v8 = vadd.f32 %v16289_v43, %v7334_v47  ;;  %v7335_v15 = vmul.f32 %v16282_v18, %v7256_v13  ;;  %v9325_v34 = vpop.permute.xlu0 %9324  ;;  %v4026_v12 = vadd.f32 %v16478_v55, %v3990_v46  ;;  %v8994_v13 = vld [vmem:[#allocation2 + $0x190] sm:$0xf] }
 0x404   : > { %v9611_v52 = vsel %vm1644_vm11, %v9573_v10, %v9531_v33  ;;  %v3991_v37 = vmul.f32 %v12145_v25, %v16472_v53  ;;  %v7373_v28 = vadd.f32 %v16289_v43, %v7337_v26  ;;  %v7404_v18 = vmax.f32 %v7372_v51, 0.0 }
 0x405   : > { %v4029_v11 = vadd.f32 %v16478_v55, %v3993_v49  ;;  %v7371_v19 = vadd.f32 %v16289_v43, %v7335_v15  ;;  %12108 = vmatmul.mubr.msk.bf16.gmra.mrb[48].mxu1 %vm2536_vm12, %v9611_v52  ;;  %v9576_v33 = vsel %vm683_vm7, %v11457_v59, %v9325_v34  ;;  %v4060_v56 = vmax.f32 %v4028_v40, 0.0 }
 0x406   : > { %v4027_v21 = vadd.f32 %v16478_v55, %v3991_v37  ;;  %v7405_v17 = vmax.f32 %v7373_v28, 0.0  ;;  %v9535_v27 = vpop.permute.xlu1 %9534  ;;  %v7402_v60 = vmax.f32 %v7370_v8, 0.0  ;;  %v4058_v43 = vmax.f32 %v4026_v12, 0.0 }
 0x407   : > { %v4061_v63 = vmax.f32 %v4029_v11, 0.0  ;;  %v7403_v3 = vmax.f32 %v7371_v19, 0.0  ;;  %v9533_v6 = vpop.permute.xlu0 %9532  ;;  %v11775_v30 = vpop.f32.mrb[92].mxu0  ;;  %v9579_v45 = vsel %vm683_vm7, %v11458_v58, %v9327_v16  ;;  %v13213_v16 = vld [vmem:[#allocation2 + $0x194] sm:$0xf] }
 0x408   : > { %v4059_v10 = vmax.f32 %v4027_v21, 0.0  ;;  %v16644_v46 = vpack.c.bf16 %v7405_v17, %v7404_v18  ;;  %v9613_v35 = vsel %vm1644_vm11, %v9576_v33, %v9533_v6  ;;  %v11776_v36 = vpop.f32.mrb[93].mxu0  ;;  %v9615_v40 = vsel %vm1644_vm11, %v9579_v45, %v9535_v27  ;;  %v8996_v11 = vld [vmem:[#allocation2 + $0x1a0] sm:$0xf]  ;;  %v17411_v17 = vld [vmem:[#allocation69_spill] sm:$0xff] }
 0x409   : > { %v4085_v20 = vpack.c.bf16 %v4061_v63, %v4060_v56  ;;  %v16647_v47 = vpack.c.bf16 %v7403_v3, %v7402_v60  ;;  %12111 = vmatprep.mubr.msk.bf16.mxu1 %vm2536_vm12, %v9613_v35  ;;  %v11777_v51 = vadd.f32 %v11776_v36, %v11775_v30  ;;  %v11778_v25 = vpop.f32.mrb[94].mxu0  ;;  %v11460_v15 = vcombine.low %v8994_v13, %v13213_v16  ;;  %v8998_v6 = vld [vmem:[#allocation2 + $0x1b0] sm:$0xf] }
 0x40a   : > { %v4084_v26 = vpack.c.bf16 %v4059_v10, %v4058_v43  ;;  %v9331_v1 = vpop.permute.xlu1 %9330  ;;  %v11779_v59 = vpop.f32.mrb[95].mxu0  ;;  %v11461_v63 = vcombine.low %v8996_v11, %v16396_v32  ;;  %v11462_v25 = vcombine.low %v8998_v6, %v16401_v39 }
 0x40b   : > { %10164 = vrot.lane.b32.xlu1 %v4085_v20, %s13279_s10  ;;  %v9329_v41 = vpop.permute.xlu0 %9328  ;;  %v10038_v44 = vmul.f32 0.00390625, %v11777_v51  ;;  %v9585_v27 = vsel %vm683_vm7, %v11460_v15, %v9331_v1  ;;  %v17413_v15 = vld [vmem:[#allocation72_spill] sm:$0xff] }
 0x40c   : > { %10162 = vrot.lane.b32.xlu0 %v4084_v26, %s13279_s10  ;;  %v11905_v49 = vpop.f32.mrb[20].mxu1  ;;  %v9582_v8 = vsel %vm683_vm7, %v11459_v14, %v9329_v41 }
 0x40d   : > { %v12146_v34 = vadd.f32 %v11905_v49, %v15597_v2  ;;  %v3877_v12 = vpop.f32.mrb[21].mxu1  ;;  %12112 = vmatmul.mubr.msk.bf16.gmra.mrb[52].mxu1 %vm2536_vm12, %v9615_v40  ;;  %12126 = vmatmul.mubr.msk.f32.vlgmr.msra.gmra.mrb[96].mxu0 %vm683_vm7, %v10038_v44 }
 0x40e   : > { %v12147_v52 = vadd.f32 %v3877_v12, %v15600_v4  ;;  %v11906_v37 = vpop.f32.mrb[22].mxu1  ;;  %v9539_v28 = vpop.permute.xlu1 %9538 }
 0x40f   : > { %v3996_v19 = vmul.f32 %v12146_v34, %v16472_v53  ;;  %v12148_v58 = vadd.f32 %v11906_v37, %v17410_v31  ;;  %v9537_v18 = vpop.permute.xlu0 %9536  ;;  %v3880_v14 = vpop.f32.mrb[23].mxu1  ;;  %v9619_v36 = vsel %vm1644_vm11, %v9585_v27, %v9539_v28  ;;  %v17414_v37 = vld [vmem:[#allocation21_spill] sm:$0xff] }
 0x410   : > { %v3994_v21 = vmul.f32 %v12147_v52, %v16472_v53  ;;  %v9617_v2 = vsel %vm1644_vm11, %v9582_v8, %v9537_v18  ;;  %v12149_v33 = vadd.f32 %v3880_v14, %v17411_v17  ;;  %v17412_v8 = vld [vmem:[#allocation70_spill] sm:$0xff] }
 0x411   : > { %v4032_v56 = vadd.f32 %v16478_v55, %v3996_v19  ;;  %v3997_v4 = vmul.f32 %v12148_v58, %v16472_v53  ;;  %12115 = vmatprep.mubr.msk.bf16.mxu1 %vm2536_vm12, %v9617_v2  ;;  %v17415_v58 = vld [vmem:[#allocation78_spill] sm:$0xff] }
 0x412   : > { %v4030_v60 = vadd.f32 %v16478_v55, %v3994_v21  ;;  %v3995_v3 = vmul.f32 %v12149_v33, %v16472_v53  ;;  %v9335_v10 = vpop.permute.xlu1 %9334 }
 0x413   : > { %v4033_v30 = vadd.f32 %v16478_v55, %v3997_v4  ;;  %v9333_v43 = vpop.permute.xlu0 %9332  ;;  %v4064_v20 = vmax.f32 %v4032_v56, 0.0  ;;  %v9591_v40 = vsel %vm683_vm7, %v11462_v25, %v9335_v10  ;;  %v17418_v25 = vld [vmem:[#allocation75_spill] sm:$0xff] }
 0x414   : > { %v4031_v35 = vadd.f32 %v16478_v55, %v3995_v3  ;;  %v9588_v51 = vsel %vm683_vm7, %v11461_v63, %v9333_v43  ;;  %v4062_v32 = vmax.f32 %v4030_v60, 0.0  ;;  %v17416_v43 = vld [vmem:[#allocation44_spill] sm:$0xff] }
 0x415   : > { %v4065_v45 = vmax.f32 %v4033_v30, 0.0  ;;  %12116 = vmatmul.mubr.msk.bf16.gmra.mrb[56].mxu1 %vm2536_vm12, %v9619_v36  ;;  %v17417_v36 = vld [vmem:[#allocation45_spill] sm:$0xff] }
 0x416   : > { %v4063_v26 = vmax.f32 %v4031_v35, 0.0  ;;  %v9543_v49 = vpop.permute.xlu1 %9542 }
 0x417   : > { %v4087_v13 = vpack.c.bf16 %v4065_v45, %v4064_v20  ;;  %v9541_v1 = vpop.permute.xlu0 %9540  ;;  %v9623_v19 = vsel %vm1644_vm11, %v9591_v40, %v9543_v49 }
 0x418   : > { %v4086_v59 = vpack.c.bf16 %v4063_v26, %v4062_v32  ;;  %v9621_v41 = vsel %vm1644_vm11, %v9588_v51, %v9541_v1  ;;  %v11909_v44 = vpop.f32.mrb[24].mxu1  ;;  %v17419_v1 = vld [vmem:[#allocation25_spill] sm:$0xff] }
 0x419   : > { %v12150_v16 = vadd.f32 %v11909_v44, %v17412_v8  ;;  %12119 = vmatprep.mubr.msk.bf16.mxu1 %vm2536_vm12, %v9621_v41  ;;  %10168 = vrot.lane.b32.xlu1 %v4087_v13, %s13279_s10  ;;  %v3893_v39 = vpop.f32.mrb[25].mxu1 }
 0x41a   : > { %v12151_v34 = vadd.f32 %v3893_v39, %v17413_v15  ;;  %10166 = vrot.lane.b32.xlu0 %v4086_v59, %s13279_s10  ;;  %v11910_v12 = vpop.f32.mrb[26].mxu1 }
 0x41b   : > { %v4000_v52 = vmul.f32 %v12150_v16, %v16472_v53  ;;  %v12152_v28 = vadd.f32 %v11910_v12, %v17414_v37  ;;  %v3896_v11 = vpop.f32.mrb[27].mxu1  ;;  %v17420_v37 = vld [vmem:[#allocation56_spill] sm:$0xff] }
 0x41c   : > { %v3998_v31 = vmul.f32 %v12151_v34, %v16472_v53  ;;  %v12153_v18 = vadd.f32 %v3896_v11, %v17415_v58 }
 0x41d   : > { %v4036_v14 = vadd.f32 %v16478_v55, %v4000_v52  ;;  %v4001_v21 = vmul.f32 %v12152_v28, %v16472_v53  ;;  %12120 = vmatmul.mubr.msk.bf16.gmra.mrb[60].mxu1 %vm2536_vm12, %v9623_v19 }
 0x41e   : > { %v4034_v2 = vadd.f32 %v16478_v55, %v3998_v31  ;;  %v3999_v17 = vmul.f32 %v12153_v18, %v16472_v53  ;;  %v17421_v31 = vld [vmem:[#allocation57_spill] sm:$0xff] }
 0x41f   : > { %v4037_v33 = vadd.f32 %v16478_v55, %v4001_v21  ;;  %v4068_v56 = vmax.f32 %v4036_v14, 0.0 }
 0x420   : > { %v4035_v27 = vadd.f32 %v16478_v55, %v3999_v17  ;;  %v4066_v63 = vmax.f32 %v4034_v2, 0.0 }
 0x421   : > { %v4069_v4 = vmax.f32 %v4037_v33, 0.0 }
 0x422   : > { %v4067_v60 = vmax.f32 %v4035_v27, 0.0 }
 0x423   : > { %v4089_v3 = vpack.c.bf16 %v4069_v4, %v4068_v56 }
 0x424   : > { %v4088_v6 = vpack.c.bf16 %v4067_v60, %v4066_v63  ;;  %v11913_v30 = vpop.f32.mrb[28].mxu1 }
 0x425   : > { %v12154_v10 = vadd.f32 %v11913_v30, %v17416_v43  ;;  %10172 = vrot.lane.b32.xlu1 %v4089_v3, %s13279_s10  ;;  %v3909_v35 = vpop.f32.mrb[29].mxu1 }
 0x426   : > { %v12155_v20 = vadd.f32 %v3909_v35, %v17417_v36  ;;  %10170 = vrot.lane.b32.xlu0 %v4088_v6, %s13279_s10  ;;  %v11914_v45 = vpop.f32.mrb[30].mxu1 }
 0x427   : > { %v4004_v51 = vmul.f32 %v12154_v10, %v16472_v53  ;;  %v12156_v32 = vadd.f32 %v11914_v45, %v17418_v25  ;;  %v3912_v26 = vpop.f32.mrb[31].mxu1  ;;  %v17423_v25 = vld [vmem:[#allocation61_spill] sm:$0xff] }
 0x428   : > { %v4002_v13 = vmul.f32 %v12155_v20, %v16472_v53  ;;  %v12157_v59 = vadd.f32 %v3912_v26, %v17419_v1  ;;  %v17429_v26 = vld [vmem:[#allocation64_spill] sm:$0xff] }
 0x429   : > { %v4040_v41 = vadd.f32 %v16478_v55, %v4004_v51  ;;  %v4005_v44 = vmul.f32 %v12156_v32, %v16472_v53 }
 0x42a   : > { %v4038_v40 = vadd.f32 %v16478_v55, %v4002_v13  ;;  %v4003_v49 = vmul.f32 %v12157_v59, %v16472_v53  ;;  %v17430_v59 = vld [vmem:[#allocation65_spill] sm:$0xff] }
 0x42b   : > { %v4041_v8 = vadd.f32 %v16478_v55, %v4005_v44  ;;  %v4072_v39 = vmax.f32 %v4040_v41, 0.0 }
 0x42c   : > { %v4039_v16 = vadd.f32 %v16478_v55, %v4003_v49  ;;  %v4070_v12 = vmax.f32 %v4038_v40, 0.0  ;;  %v17431_v40 = vld [vmem:[#allocation41_spill] sm:$0xff] }
 0x42d   : > { %v4073_v15 = vmax.f32 %v4041_v8, 0.0  ;;  %v10153_v34 = vpop.permute.xlu1 %10152 }
 0x42e   : > { %v4071_v52 = vmax.f32 %v4039_v16, 0.0  ;;  %v16712_v28 = vsel %vm683_vm7, %v17420_v37, %v10153_v34  ;;  %v10151_v11 = vpop.permute.xlu0 %10150  ;;  %v17432_v16 = vld [vmem:[#allocation42_spill] sm:$0xff]  ;;  %v17434_v37 = vld [vmem:[#allocation43_spill] sm:$0xff] }
 0x42f   : > { %v4091_v19 = vpack.c.bf16 %v4073_v15, %v4072_v39  ;;  %v16716_v58 = vsel %vm683_vm7, %v17421_v31, %v10151_v11  ;;  %v17433_v34 = vld [vmem:[#allocation66_spill] sm:$0xff] }
 0x430   : > { %v4090_v18 = vpack.c.bf16 %v4071_v52, %v4070_v12  ;;  %v11917_v14 = vpop.f32.mrb[0].mxu1 }
 0x431   : > { %v4008_v21 = vmul.f32 %v11917_v14, %v16472_v53  ;;  %10176 = vrot.lane.b32.xlu1 %v4091_v19, %s13279_s10  ;;  %v3925_v2 = vpop.f32.mrb[1].mxu1  ;;  %v11546_v19 = vld [vmem:[%s17134_s4 + $0x6] sm:$0x3] }
 0x432   : > { %v4006_v17 = vmul.f32 %v16472_v53, %v3925_v2  ;;  %10174 = vrot.lane.b32.xlu0 %v4090_v18, %s13279_s10  ;;  %v11918_v33 = vpop.f32.mrb[2].mxu1  ;;  %v16818_v31 = vrot.slane %v11546_v19, %v14986_v7  ;;  %v16821_v18 = vrot.slane %v11546_v19, %v14999_v62 }
 0x433   : > { %v4044_v27 = vadd.f32 %v16478_v55, %v4008_v21  ;;  %v4009_v56 = vmul.f32 %v11918_v33, %v16472_v53  ;;  %v3928_v4 = vpop.f32.mrb[3].mxu1 }
 0x434   : > { %v4042_v63 = vadd.f32 %v16478_v55, %v4006_v17  ;;  %v4007_v60 = vmul.f32 %v16472_v53, %v3928_v4 }
 0x435   : > { %v4045_v3 = vadd.f32 %v16478_v55, %v4009_v56  ;;  %v4076_v30 = vmax.f32 %v4044_v27, 0.0 }
 0x436   : > { %v4043_v6 = vadd.f32 %v16478_v55, %v4007_v60  ;;  %v4074_v10 = vmax.f32 %v4042_v63, 0.0  ;;  %v17422_v55 = vld [vmem:[#allocation60_spill] sm:$0xff] }
 0x437   : > { %v4077_v43 = vmax.f32 %v4045_v3, 0.0 }
 0x438   : > { %v4075_v35 = vmax.f32 %v4043_v6, 0.0 }
 0x439   : > { %v4093_v36 = vpack.c.bf16 %v4077_v43, %v4076_v30 }
 0x43a   : > { %v4092_v20 = vpack.c.bf16 %v4075_v35, %v4074_v10 }
 0x43b   : > { %10180 = vrot.lane.b32.xlu1 %v4093_v36, %s13279_s10 }
 0x43c   : > { %10178 = vrot.lane.b32.xlu0 %v4092_v20, %s13279_s10 }
 0x43f   : > { %10200 = vrot.lane.b32.xlu1 %v16317_v0, %s13280_s11 }
 0x440   : > { %10198 = vrot.lane.b32.xlu0 %v16320_v42, %s13280_s11  ;;  %v17424_v42 = vld [vmem:[#allocation40_spill] sm:$0xff] }
 0x443   : > { %10204 = vrot.lane.b32.xlu1 %v16360_v23, %s13280_s11 }
 0x444   : > { %10202 = vrot.lane.b32.xlu0 %v16363_v57, %s13280_s11 }
 0x445   : > { %v10157_v53 = vpop.permute.xlu1 %10156 }
 0x446   : > { %v16740_v45 = vsel %vm683_vm7, %v17422_v55, %v10157_v53  ;;  %v10155_v51 = vpop.permute.xlu0 %10154 }
 0x447   : > { %v16744_v32 = vsel %vm683_vm7, %v17423_v25, %v10155_v51  ;;  %10208 = vrot.lane.b32.xlu1 %v16412_v22, %s13280_s11  ;;  %v17425_v22 = vld [vmem:[#allocation58_spill] sm:$0xff] }
 0x448   : > { %10206 = vrot.lane.b32.xlu0 %v16415_v48, %s13280_s11 }
 0x44b   : > { %10212 = vrot.lane.b32.xlu1 %v16456_v61, %s13280_s11 }
 0x44c   : > { %10210 = vrot.lane.b32.xlu0 %v16459_v54, %s13280_s11  ;;  %v17426_v54 = vld [vmem:[#allocation59_spill] sm:$0xff] }
 0x44f   : > { %10216 = vrot.lane.b32.xlu1 %v16505_v24, %s13280_s11 }
 0x450   : > { %10214 = vrot.lane.b32.xlu0 %v16508_v50, %s13280_s11 }
 0x453   : > { %10220 = vrot.lane.b32.xlu1 %v16549_v29, %s13280_s11  ;;  %v17427_v29 = vld [vmem:[#allocation62_spill] sm:$0xff] }
 0x454   : > { %10218 = vrot.lane.b32.xlu0 %v16552_v9, %s13280_s11 }
 0x457   : > { %10224 = vrot.lane.b32.xlu1 %v16596_v38, %s13280_s11 }
 0x458   : > { %10222 = vrot.lane.b32.xlu0 %v16599_v5, %s13280_s11  ;;  %v17428_v5 = vld [vmem:[#allocation63_spill] sm:$0xff] }
 0x45b   : > { %10228 = vrot.lane.b32.xlu1 %v16644_v46, %s13280_s11 }
 0x45c   : > { %10226 = vrot.lane.b32.xlu0 %v16647_v47, %s13280_s11  ;;  %s13286_s11 = smov [#allocation3]  }
 0x45d   : > { %s13218_s17 = sshll.u32 %s13286_s11, 4  ;;  %s13219_s17 = int_to_ptr.vmem [resolvable:$false] %s13218_s17 }
 0x45e   : > { %p13221_p0 = scmp.lt.s32.totalorder %s17068_s12, %s13219_s17 }
 0x461   : > { %v10161_v0 = vpop.permute.xlu1 %10160 }
 0x462   : > { %v16772_v23 = vsel %vm683_vm7, %v17424_v42, %v10161_v0  ;;  %v10159_v57 = vpop.permute.xlu0 %10158 }
 0x463   : > { %v16776_v48 = vsel %vm683_vm7, %v17425_v22, %v10159_v57 }
 0x47d   : > { %v10165_v61 = vpop.permute.xlu1 %10164 }
 0x47e   : > { %v16780_v24 = vsel %vm683_vm7, %v17426_v54, %v10165_v61  ;;  %v10163_v50 = vpop.permute.xlu0 %10162 }
 0x47f   : > { %v16784_v9 = vsel %vm683_vm7, %v17427_v29, %v10163_v50 }
 0x48b   : > { %v10169_v38 = vpop.permute.xlu1 %10168 }
 0x48c   : > { %v16788_v46 = vsel %vm683_vm7, %v17428_v5, %v10169_v38  ;;  %v10167_v47 = vpop.permute.xlu0 %10166 }
 0x48d   : > { %v16792_v13 = vsel %vm683_vm7, %v17429_v26, %v10167_v47 }
 0x497   : > { %v10173_v1 = vpop.permute.xlu1 %10172 }
 0x498   : > { %v16796_v41 = vsel %vm683_vm7, %v17430_v59, %v10173_v1  ;;  %v10171_v44 = vpop.permute.xlu0 %10170 }
 0x499   : > { %v16800_v49 = vsel %vm683_vm7, %v17431_v40, %v10171_v44 }
 0x4a3   : > { %v10177_v8 = vpop.permute.xlu1 %10176 }
 0x4a4   : > { %v16804_v39 = vsel %vm683_vm7, %v17432_v16, %v10177_v8  ;;  %v10175_v15 = vpop.permute.xlu0 %10174 }
 0x4a5   : > { %v16808_v12 = vsel %vm683_vm7, %v17433_v34, %v10175_v15 }
 0x4ae   : > { %v10179_v52 = vpop.permute.xlu0 %10178 }
 0x4af   : > { %v16812_v11 = vsel %vm683_vm7, %v17434_v37, %v10179_v52 }
 0x4b8   : > { %v12093_v14 = vpop.f32.mrb[32].mxu1 }
 0x4b9   : > { %v9868_v21 = vmul.f32 %v12093_v14, %v16818_v31  ;;  %v9701_v2 = vpop.f32.mrb[33].mxu1 }
 0x4ba   : > { %v9866_v17 = vmul.f32 %v16818_v31, %v9701_v2  ;;  %v12094_v33 = vpop.f32.mrb[34].mxu1 }
 0x4bb   : > { %v9904_v27 = vadd.f32 %v16821_v18, %v9868_v21  ;;  %v9869_v56 = vmul.f32 %v12094_v33, %v16818_v31  ;;  %v9704_v4 = vpop.f32.mrb[35].mxu1 }
 0x4bc   : > { %v9902_v63 = vadd.f32 %v16821_v18, %v9866_v17  ;;  %v9867_v60 = vmul.f32 %v16818_v31, %v9704_v4 }
 0x4bd   : > { %v9905_v3 = vadd.f32 %v16821_v18, %v9869_v56  ;;  %v9936_v6 = vmax.f32 %v9904_v27, 0.0 }
 0x4be   : > { %v9903_v62 = vadd.f32 %v16821_v18, %v9867_v60  ;;  %v9934_v43 = vmax.f32 %v9902_v63, 0.0 }
 0x4bf   : > { %v9937_v30 = vmax.f32 %v9905_v3, 0.0 }
 0x4c0   : > { %v9935_v10 = vmax.f32 %v9903_v62, 0.0  ;;  %v12097_v35 = vpop.f32.mrb[36].mxu1 }
 0x4c1   : > { %v9967_v36 = vpack.c.bf16 %v9937_v30, %v9936_v6  ;;  %v9872_v20 = vmul.f32 %v12097_v35, %v16818_v31  ;;  %v9717_v53 = vpop.f32.mrb[37].mxu1 }
 0x4c2   : > { %v9966_v55 = vpack.c.bf16 %v9935_v10, %v9934_v43  ;;  %v9870_v51 = vmul.f32 %v16818_v31, %v9717_v53  ;;  %v12098_v25 = vpop.f32.mrb[38].mxu1 }
 0x4c3   : > { %v9908_v0 = vadd.f32 %v16821_v18, %v9872_v20  ;;  %v9873_v42 = vmul.f32 %v12098_v25, %v16818_v31  ;;  %10248 = vrot.lane.b32.xlu1 %v9967_v36, %s13284_s23  ;;  %v9720_v57 = vpop.f32.mrb[39].mxu1 }
 0x4c4   : > { %v9906_v22 = vadd.f32 %v16821_v18, %v9870_v51  ;;  %v9871_v61 = vmul.f32 %v16818_v31, %v9720_v57  ;;  %10246 = vrot.lane.b32.xlu0 %v9966_v55, %s13284_s23 }
 0x4c5   : > { %v9909_v54 = vadd.f32 %v16821_v18, %v9873_v42  ;;  %v9940_v29 = vmax.f32 %v9908_v0, 0.0 }
 0x4c6   : > { %v9907_v50 = vadd.f32 %v16821_v18, %v9871_v61  ;;  %v9938_v5 = vmax.f32 %v9906_v22, 0.0 }
 0x4c7   : > { %v9941_v38 = vmax.f32 %v9909_v54, 0.0 }
 0x4c8   : > { %v9939_v47 = vmax.f32 %v9907_v50, 0.0  ;;  %v12101_v26 = vpop.f32.mrb[40].mxu1 }
 0x4c9   : > { %v9969_v1 = vpack.c.bf16 %v9941_v38, %v9940_v29  ;;  %v9876_v59 = vmul.f32 %v12101_v26, %v16818_v31  ;;  %v9733_v44 = vpop.f32.mrb[41].mxu1 }
 0x4ca   : > { %v9968_v40 = vpack.c.bf16 %v9939_v47, %v9938_v5  ;;  %v9874_v8 = vmul.f32 %v16818_v31, %v9733_v44  ;;  %v12102_v16 = vpop.f32.mrb[42].mxu1 }
 0x4cb   : > { %v9912_v15 = vadd.f32 %v16821_v18, %v9876_v59  ;;  %v9877_v34 = vmul.f32 %v12102_v16, %v16818_v31  ;;  %10252 = vrot.lane.b32.xlu1 %v9969_v1, %s13284_s23  ;;  %v9736_v52 = vpop.f32.mrb[43].mxu1 }
 0x4cc   : > { %v9910_v37 = vadd.f32 %v16821_v18, %v9874_v8  ;;  %v9875_v19 = vmul.f32 %v16818_v31, %v9736_v52  ;;  %10250 = vrot.lane.b32.xlu0 %v9968_v40, %s13284_s23 }
 0x4cd   : > { %v9913_v14 = vadd.f32 %v16821_v18, %v9877_v34  ;;  %v9944_v2 = vmax.f32 %v9912_v15, 0.0 }
 0x4ce   : > { %v9911_v21 = vadd.f32 %v16821_v18, %v9875_v19  ;;  %v9942_v33 = vmax.f32 %v9910_v37, 0.0 }
 0x4cf   : > { %v9945_v17 = vmax.f32 %v9913_v14, 0.0 }
 0x4d0   : > { %v9943_v27 = vmax.f32 %v9911_v21, 0.0  ;;  %v12105_v56 = vpop.f32.mrb[44].mxu1 }
 0x4d1   : > { %v9971_v4 = vpack.c.bf16 %v9945_v17, %v9944_v2  ;;  %v9880_v63 = vmul.f32 %v12105_v56, %v16818_v31  ;;  %v9749_v60 = vpop.f32.mrb[45].mxu1 }
 0x4d2   : > { %v9970_v3 = vpack.c.bf16 %v9943_v27, %v9942_v33  ;;  %v9878_v62 = vmul.f32 %v16818_v31, %v9749_v60  ;;  %v12106_v6 = vpop.f32.mrb[46].mxu1 }
 0x4d3   : > { %v9916_v30 = vadd.f32 %v16821_v18, %v9880_v63  ;;  %v9881_v43 = vmul.f32 %v12106_v6, %v16818_v31  ;;  %10256 = vrot.lane.b32.xlu1 %v9971_v4, %s13284_s23  ;;  %v9752_v10 = vpop.f32.mrb[47].mxu1 }
 0x4d4   : > { %v9914_v35 = vadd.f32 %v16821_v18, %v9878_v62  ;;  %v9879_v36 = vmul.f32 %v16818_v31, %v9752_v10  ;;  %10254 = vrot.lane.b32.xlu0 %v9970_v3, %s13284_s23  ;;  %v11549_v62 = vld [vmem:[%s17134_s4 + $0x8] sm:$0x3] }
 0x4d5   : > { %v9917_v20 = vadd.f32 %v16821_v18, %v9881_v43  ;;  %v9948_v55 = vmax.f32 %v9916_v30, 0.0 }
 0x4d6   : > { %v9915_v53 = vadd.f32 %v16821_v18, %v9879_v36  ;;  %v9946_v25 = vmax.f32 %v9914_v35, 0.0 }
 0x4d7   : > { %v9949_v51 = vmax.f32 %v9917_v20, 0.0 }
 0x4d8   : > { %v9947_v0 = vmax.f32 %v9915_v53, 0.0  ;;  %v12109_v42 = vpop.f32.mrb[48].mxu1  ;;  %v10122_v53 = vrot.slane %v11549_v62, 1 }
 0x4d9   : > { %v9973_v57 = vpack.c.bf16 %v9949_v51, %v9948_v55  ;;  %v9884_v22 = vmul.f32 %v12109_v42, %v16818_v31  ;;  %v9765_v61 = vpop.f32.mrb[49].mxu1 }
 0x4da   : > { %v9972_v54 = vpack.c.bf16 %v9947_v0, %v9946_v25  ;;  %v9882_v50 = vmul.f32 %v16818_v31, %v9765_v61  ;;  %v12110_v29 = vpop.f32.mrb[50].mxu1 }
 0x4db   : > { %v9920_v38 = vadd.f32 %v16821_v18, %v9884_v22  ;;  %v9885_v5 = vmul.f32 %v12110_v29, %v16818_v31  ;;  %10260 = vrot.lane.b32.xlu1 %v9973_v57, %s13284_s23  ;;  %v9768_v47 = vpop.f32.mrb[51].mxu1 }
 0x4dc   : > { %v9918_v26 = vadd.f32 %v16821_v18, %v9882_v50  ;;  %v9883_v1 = vmul.f32 %v16818_v31, %v9768_v47  ;;  %10258 = vrot.lane.b32.xlu0 %v9972_v54, %s13284_s23 }
 0x4dd   : > { %v9921_v59 = vadd.f32 %v16821_v18, %v9885_v5  ;;  %v9952_v40 = vmax.f32 %v9920_v38, 0.0 }
 0x4de   : > { %v9919_v44 = vadd.f32 %v16821_v18, %v9883_v1  ;;  %v9950_v16 = vmax.f32 %v9918_v26, 0.0 }
 0x4df   : > { %v9953_v8 = vmax.f32 %v9921_v59, 0.0 }
 0x4e0   : > { %v9951_v15 = vmax.f32 %v9919_v44, 0.0  ;;  %v12113_v34 = vpop.f32.mrb[52].mxu1  ;;  %v10114_v52 = vpop.f32.mrb[96].mxu0 }
 0x4e1   : > { %v9975_v37 = vpack.c.bf16 %v9953_v8, %v9952_v40  ;;  %v9888_v19 = vmul.f32 %v12113_v34, %v16818_v31  ;;  %v9781_v14 = vpop.f32.mrb[53].mxu1  ;;  %v12127_v21 = vpop.f32.mrb[97].mxu0  ;;  %v10120_v20 = vmul.f32 %v11549_v62, %v10114_v52 }
 0x4e2   : > { %v9974_v2 = vpack.c.bf16 %v9951_v15, %v9950_v16  ;;  %v9886_v17 = vmul.f32 %v16818_v31, %v9781_v14  ;;  %v12114_v33 = vpop.f32.mrb[54].mxu1 }
 0x4e3   : > { %v9924_v27 = vadd.f32 %v16821_v18, %v9888_v19  ;;  %v9889_v56 = vmul.f32 %v12114_v33, %v16818_v31  ;;  %10264 = vrot.lane.b32.xlu1 %v9975_v37, %s13284_s23  ;;  %v9784_v4 = vpop.f32.mrb[55].mxu1  ;;  %v10124_v38 = vadd.f32 %v10122_v53, %v10120_v20 }
 0x4e4   : > { %v9922_v63 = vadd.f32 %v16821_v18, %v9886_v17  ;;  %v9887_v60 = vmul.f32 %v16818_v31, %v9784_v4  ;;  %10262 = vrot.lane.b32.xlu0 %v9974_v2, %s13284_s23 }
 0x4e5   : > { %v9925_v3 = vadd.f32 %v16821_v18, %v9889_v56  ;;  %v9956_v30 = vmax.f32 %v9924_v27, 0.0  ;;  %v10125_v8 = vmax.f32 %v10124_v38, 0.0 }
 0x4e6   : > { %v9923_v6 = vadd.f32 %v16821_v18, %v9887_v60  ;;  %v9954_v10 = vmax.f32 %v9922_v63, 0.0 }
 0x4e7   : > { %v9957_v43 = vmax.f32 %v9925_v3, 0.0  ;;  %v10126_v33 = vpack.c.bf16 %v10125_v8, %v10125_v8 }
 0x4e8   : > { %v9955_v35 = vmax.f32 %v9923_v6, 0.0  ;;  %v12117_v36 = vpop.f32.mrb[56].mxu1 }
 0x4e9   : > { %v9977_v55 = vpack.c.bf16 %v9957_v43, %v9956_v30  ;;  %v9892_v51 = vmul.f32 %v12117_v36, %v16818_v31  ;;  %v9797_v25 = vpop.f32.mrb[57].mxu1  ;;  %v10128_v62 = vpack.i.b16 %v10126_v33, %v10126_v33 }
 0x4ea   : > { %v9976_v0 = vpack.c.bf16 %v9955_v35, %v9954_v10  ;;  %v9890_v42 = vmul.f32 %v16818_v31, %v9797_v25  ;;  %v12118_v57 = vpop.f32.mrb[58].mxu1  ;;  %v10199_v35 = vpop.permute.xlu0 %10198 }
 0x4eb   : > { %v9928_v22 = vadd.f32 %v16821_v18, %v9892_v51  ;;  %v9893_v61 = vmul.f32 %v12118_v57, %v16818_v31  ;;  %10268 = vrot.lane.b32.xlu1 %v9977_v55, %s13284_s23  ;;  %v9800_v54 = vpop.f32.mrb[59].mxu1  ;;  %v10133_v10 = vrot.slane %v10128_v62, %v14986_v7 }
 0x4ec   : > { %v9926_v50 = vadd.f32 %v16821_v18, %v9890_v42  ;;  %v9891_v29 = vmul.f32 %v16818_v31, %v9800_v54  ;;  %10266 = vrot.lane.b32.xlu0 %v9976_v0, %s13284_s23 }
 0x4ed   : > { %v9929_v5 = vadd.f32 %v16821_v18, %v9893_v61  ;;  %v9960_v26 = vmax.f32 %v9928_v22, 0.0 }
 0x4ee   : > { %v9927_v47 = vadd.f32 %v16821_v18, %v9891_v29  ;;  %v9958_v59 = vmax.f32 %v9926_v50, 0.0  ;;  %v10203_v20 = vpop.permute.xlu0 %10202 }
 0x4ef   : > { %v9961_v1 = vmax.f32 %v9929_v5, 0.0 }
 0x4f0   : > { %v9959_v44 = vmax.f32 %v9927_v47, 0.0  ;;  %v12121_v40 = vpop.f32.mrb[60].mxu1 }
 0x4f1   : > { %v9979_v16 = vpack.c.bf16 %v9961_v1, %v9960_v26  ;;  %v9896_v15 = vmul.f32 %v12121_v40, %v16818_v31  ;;  %v9813_v34 = vpop.f32.mrb[61].mxu1 }
 0x4f2   : > { %v9978_v52 = vpack.c.bf16 %v9959_v44, %v9958_v59  ;;  %v9894_v37 = vmul.f32 %v16818_v31, %v9813_v34  ;;  %v12122_v19 = vpop.f32.mrb[62].mxu1  ;;  %v10207_v53 = vpop.permute.xlu0 %10206  ;;  %v17435_v34 = vld [vmem:[#allocation67_spill] sm:$0xff] }
 0x4f3   : > { %v9932_v14 = vadd.f32 %v16821_v18, %v9896_v15  ;;  %v9897_v21 = vmul.f32 %v12122_v19, %v16818_v31  ;;  %10272 = vrot.lane.b32.xlu1 %v9979_v16, %s13284_s23  ;;  %v9816_v2 = vpop.f32.mrb[63].mxu1  ;;  %v10330_v19 = vsel %vm1644_vm11, %v16716_v58, %v10199_v35  ;;  %v10338_v33 = vsel %vm1644_vm11, %v16776_v48, %v10207_v53 }
 0x4f4   : > { %v9930_v17 = vadd.f32 %v16821_v18, %v9894_v37  ;;  %v9895_v27 = vmul.f32 %v16818_v31, %v9816_v2  ;;  %10270 = vrot.lane.b32.xlu0 %v9978_v52, %s13284_s23  ;;  %v10181_v31 = vpop.permute.xlu1 %10180  ;;  %v10334_v2 = vsel %vm1644_vm11, %v16744_v32, %v10203_v20 }
 0x4f5   : > { %v9933_v56 = vadd.f32 %v16821_v18, %v9897_v21  ;;  %v9964_v63 = vmax.f32 %v9932_v14, 0.0  ;;  %v10328_v52 = vsel %vm683_vm7, %v17435_v34, %v10181_v31 }
 0x4f6   : > { %v9931_v4 = vadd.f32 %v16821_v18, %v9895_v27  ;;  %v9962_v3 = vmax.f32 %v9930_v17, 0.0  ;;  %v10211_v51 = vpop.permute.xlu0 %10210 }
 0x4f7   : > { %v9965_v60 = vmax.f32 %v9933_v56, 0.0  ;;  %v10342_v58 = vsel %vm1644_vm11, %v16784_v9, %v10211_v51 }
 0x4f8   : > { %v9963_v6 = vmax.f32 %v9931_v4, 0.0  ;;  %v10201_v36 = vpop.permute.xlu1 %10200 }
 0x4f9   : > { %v9981_v30 = vpack.c.bf16 %v9965_v60, %v9964_v63  ;;  %v10332_v37 = vsel %vm1644_vm11, %v16712_v28, %v10201_v36 }
 0x4fa   : > { %v9980_v43 = vpack.c.bf16 %v9963_v6, %v9962_v3  ;;  %v10215_v0 = vpop.permute.xlu0 %10214 }
 0x4fb   : > { %10276 = vrot.lane.b32.xlu1 %v9981_v30, %s13284_s23 }
 0x4fc   : > { %10274 = vrot.lane.b32.xlu0 %v9980_v43, %s13284_s23  ;;  %v10205_v18 = vpop.permute.xlu1 %10204  ;;  %s13220_s23 = scalar_lea.vmem %s13219_s17, 4096 }
 0x4fd   : > { %v10336_v21 = vsel %vm1644_vm11, %v16740_v45, %v10205_v18  ;;  %v10346_v45 = vsel %vm1644_vm11, %v16792_v13, %v10215_v0  ;;  %p13222_p1 = scmp.lt.s32.totalorder %s13220_s23, %s13214_s16 }
 0x4fe   : > { %v10219_v57 = vpop.permute.xlu0 %10218 }
 0x4ff   : > { %p13223_p2 = por %p13222_p1, %p13221_p0 }
 0x500   : > { %10279 = vrot.lane.b32.xlu0 %v10133_v10, %s13285_s26  ;;  %v10209_v55 = vpop.permute.xlu1 %10208 }
 0x501   : > { %v10340_v17 = vsel %vm1644_vm11, %v16772_v23, %v10209_v55  ;;  %v10350_v23 = vsel %vm1644_vm11, %v16800_v49, %v10219_v57  ;;  %p13224_p3 = pnand %p13223_p2, %p13217_p13 }
 0x502   : > { %v10223_v61 = vpop.permute.xlu0 %10222 }
 0x504   : > { %v10213_v25 = vpop.permute.xlu1 %10212 }
 0x505   : > { %v10344_v28 = vsel %vm1644_vm11, %v16780_v24, %v10213_v25  ;;  %v10354_v24 = vsel %vm1644_vm11, %v16808_v12, %v10223_v61 }
 0x506   : > { %v10227_v7 = vpop.permute.xlu0 %10226 }
 0x508   : > { %v10217_v42 = vpop.permute.xlu1 %10216 }
 0x509   : > { %v10348_v56 = vsel %vm1644_vm11, %v16788_v46, %v10217_v42  ;;  %v10358_v46 = vsel %vm1644_vm11, %v16812_v11, %v10227_v7 }
 0x50c   : > { %v10221_v22 = vpop.permute.xlu1 %10220 }
 0x50d   : > { %v10352_v32 = vsel %vm1644_vm11, %v16796_v41, %v10221_v22 }
 0x510   : > { %v10225_v54 = vpop.permute.xlu1 %10224 }
 0x511   : > { %v10356_v48 = vsel %vm1644_vm11, %v16804_v39, %v10225_v54 }
 0x514   : > { %v10229_v50 = vpop.permute.xlu1 %10228 }
 0x515   : > { %v10360_v9 = vsel %vm1644_vm11, %v10328_v52, %v10229_v50 }
 0x535   : > { %v10249_v38 = vpop.permute.xlu1 %10248 }
 0x536   : > { %v10247_v29 = vpop.permute.xlu0 %10246  ;;  %v10364_v13 = vsel %vm2536_vm12, %v10332_v37, %v10249_v38 }
 0x537   : > { %v10362_v41 = vsel %vm2536_vm12, %v10330_v19, %v10247_v29 }
 0x53d   : > { %v10253_v47 = vpop.permute.xlu1 %10252 }
 0x53e   : > { %v10251_v5 = vpop.permute.xlu0 %10250  ;;  %v10368_v49 = vsel %vm2536_vm12, %v10336_v21, %v10253_v47 }
 0x53f   : > { %v10366_v39 = vsel %vm2536_vm12, %v10334_v2, %v10251_v5 }
 0x545   : > { %v10257_v1 = vpop.permute.xlu1 %10256 }
 0x546   : > { %v10255_v26 = vpop.permute.xlu0 %10254  ;;  %v10372_v12 = vsel %vm2536_vm12, %v10340_v17, %v10257_v1 }
 0x547   : > { %v10370_v60 = vsel %vm2536_vm12, %v10338_v33, %v10255_v26 }
 0x54d   : > { %v10261_v44 = vpop.permute.xlu1 %10260 }
 0x54e   : > { %v10259_v59 = vpop.permute.xlu0 %10258  ;;  %v10376_v3 = vsel %vm2536_vm12, %v10344_v28, %v10261_v44 }
 0x54f   : > { %v10374_v11 = vsel %vm2536_vm12, %v10342_v58, %v10259_v59 }
 0x555   : > { %v10265_v8 = vpop.permute.xlu1 %10264 }
 0x556   : > { %v10263_v40 = vpop.permute.xlu0 %10262  ;;  %v10380_v62 = vsel %vm2536_vm12, %v10348_v56, %v10265_v8 }
 0x557   : > { %v10378_v6 = vsel %vm2536_vm12, %v10346_v45, %v10263_v40 }
 0x55d   : > { %v10269_v15 = vpop.permute.xlu1 %10268 }
 0x55e   : > { %v10267_v16 = vpop.permute.xlu0 %10266  ;;  %v10384_v30 = vsel %vm2536_vm12, %v10352_v32, %v10269_v15 }
 0x55f   : > { %v10382_v43 = vsel %vm2536_vm12, %v10350_v23, %v10267_v16 }
 0x565   : > { %v10273_v27 = vpop.permute.xlu1 %10272 }
 0x566   : > { %v10271_v14 = vpop.permute.xlu0 %10270  ;;  %v10388_v10 = vsel %vm2536_vm12, %v10356_v48, %v10273_v27 }
 0x567   : > { %v10386_v31 = vsel %vm2536_vm12, %v10354_v24, %v10271_v14 }
 0x56d   : > { %v10277_v63 = vpop.permute.xlu1 %10276 }
 0x56e   : > { %v10275_v4 = vpop.permute.xlu0 %10274  ;;  %v10392_v35 = vsel %vm2536_vm12, %v10360_v9, %v10277_v63 }
 0x56f   : > { %v10390_v36 = vsel %vm2536_vm12, %v10358_v46, %v10275_v4 }
 0x572   : > { %v10280_v20 = vpop.permute.xlu0 %10279 }
 0x573   : > { %v10395_v18 = vsel %vm10393_vm0, %v10362_v41, %v10280_v20  ;;  %v10396_v53 = vsel %vm10393_vm0, %v10364_v13, %v10280_v20  ;;  %v10397_v55 = vsel %vm10393_vm0, %v10366_v39, %v10280_v20  ;;  %v10398_v51 = vsel %vm10393_vm0, %v10368_v49, %v10280_v20 }
 0x574   : > { %v10399_v25 = vsel %vm10393_vm0, %v10370_v60, %v10280_v20  ;;  %v10400_v0 = vsel %vm10393_vm0, %v10372_v12, %v10280_v20  ;;  %v10401_v42 = vsel %vm10393_vm0, %v10374_v11, %v10280_v20  ;;  %v10402_v57 = vsel %vm10393_vm0, %v10376_v3, %v10280_v20 }
 0x575   : > { %v10403_v22 = vsel %vm10393_vm0, %v10378_v6, %v10280_v20  ;;  %v10404_v61 = vsel %vm10393_vm0, %v10380_v62, %v10280_v20  ;;  %v16970_v54 = vsel %vm10393_vm0, %v10382_v43, %v10280_v20  ;;  %v16973_v7 = vsel %vm10393_vm0, %v10384_v30, %v10280_v20 }
 0x576   : > { %v16976_v50 = vsel %vm10393_vm0, %v10386_v31, %v10280_v20  ;;  %v16979_v29 = vsel %vm10393_vm0, %v10388_v10, %v10280_v20  ;;  %v16982_v38 = vsel %vm10393_vm0, %v10390_v36, %v10280_v20  ;;  %v16985_v5 = vsel %vm10393_vm0, %v10392_v35, %v10280_v20 }
 0x577   : > { %v11550_v47 = vcombine.low %v10395_v18, %v10395_v18  ;;  %v11551_v26 = vcombine.high %v10395_v18, %v10395_v18  ;;  %v11552_v1 = vcombine.low %v10396_v53, %v10396_v53  ;;  %v11553_v59 = vcombine.high %v10396_v53, %v10396_v53 }
 0x578   : > { %v11554_v44 = vcombine.low %v10397_v55, %v10397_v55  ;;  %v11555_v40 = vcombine.high %v10397_v55, %v10397_v55  ;;  %v11556_v8 = vcombine.low %v10398_v51, %v10398_v51  ;;  %v11557_v16 = vcombine.high %v10398_v51, %v10398_v51 }
 0x579   : > { %v11558_v15 = vcombine.low %v10399_v25, %v10399_v25  ;;  %v11559_v34 = vcombine.high %v10399_v25, %v10399_v25  ;;  %v11560_v52 = vcombine.low %v10400_v0, %v10400_v0  ;;  %v11561_v37 = vcombine.high %v10400_v0, %v10400_v0  ;;  %10524 = vst.msk [vmem:[%s16987_s7] sm:$0xf] %vm10523_vm1, %v11550_v47 }
 0x57a   : > { %10525 = vst.msk [vmem:[%s16987_s7 + $0x4] sm:$0xf] %vm10523_vm1, %v11551_v26  ;;  %10526 = vst.msk [vmem:[%s16987_s7 + $0x8] sm:$0xf] %vm10523_vm1, %v11552_v1  ;;  %v11562_v19 = vcombine.low %v10401_v42, %v10401_v42  ;;  %v11563_v14 = vcombine.high %v10401_v42, %v10401_v42  ;;  %v11564_v21 = vcombine.low %v10402_v57, %v10402_v57 }
 0x57b   : > { %10527 = vst.msk [vmem:[%s16987_s7 + $0xc] sm:$0xf] %vm10523_vm1, %v11553_v59  ;;  %v11565_v2 = vcombine.high %v10402_v57, %v10402_v57  ;;  %10528 = vst.msk [vmem:[%s16987_s7 + $0x10] sm:$0xf] %vm10523_vm1, %v11554_v44  ;;  %v11566_v17 = vcombine.low %v10403_v22, %v10403_v22  ;;  %v11567_v33 = vcombine.high %v10403_v22, %v10403_v22 }
 0x57c   : > { %10529 = vst.msk [vmem:[%s16987_s7 + $0x14] sm:$0xf] %vm10523_vm1, %v11555_v40  ;;  %10530 = vst.msk [vmem:[%s16987_s7 + $0x18] sm:$0xf] %vm10523_vm1, %v11556_v8  ;;  %v11568_v27 = vcombine.low %v10404_v61, %v10404_v61  ;;  %v11569_v28 = vcombine.high %v10404_v61, %v10404_v61  ;;  %v11570_v58 = vcombine.low %v16970_v54, %v16970_v54 }
 0x57d   : > { %10531 = vst.msk [vmem:[%s16987_s7 + $0x1c] sm:$0xf] %vm10523_vm1, %v11557_v16  ;;  %10532 = vst.msk [vmem:[%s16987_s7 + $0x20] sm:$0xf] %vm10523_vm1, %v11558_v15  ;;  %v11571_v56 = vcombine.high %v16970_v54, %v16970_v54  ;;  %v11572_v45 = vcombine.low %v16973_v7, %v16973_v7  ;;  %v11573_v32 = vcombine.high %v16973_v7, %v16973_v7 }
 0x57e   : > { %10533 = vst.msk [vmem:[%s16987_s7 + $0x24] sm:$0xf] %vm10523_vm1, %v11559_v34  ;;  %10534 = vst.msk [vmem:[%s16987_s7 + $0x28] sm:$0xf] %vm10523_vm1, %v11560_v52  ;;  %v11574_v23 = vcombine.low %v16976_v50, %v16976_v50  ;;  %v11575_v48 = vcombine.high %v16976_v50, %v16976_v50  ;;  %v11576_v24 = vcombine.low %v16979_v29, %v16979_v29 }
 0x57f   : > { %10535 = vst.msk [vmem:[%s16987_s7 + $0x2c] sm:$0xf] %vm10523_vm1, %v11561_v37  ;;  %10536 = vst.msk [vmem:[%s16987_s7 + $0x30] sm:$0xf] %vm10523_vm1, %v11562_v19  ;;  %v11577_v9 = vcombine.high %v16979_v29, %v16979_v29  ;;  %v11578_v46 = vcombine.low %v16982_v38, %v16982_v38  ;;  %v11579_v4 = vcombine.high %v16982_v38, %v16982_v38 }
 0x580   : > { %10537 = vst.msk [vmem:[%s16987_s7 + $0x34] sm:$0xf] %vm10523_vm1, %v11563_v14  ;;  %10538 = vst.msk [vmem:[%s16987_s7 + $0x38] sm:$0xf] %vm10523_vm1, %v11564_v21  ;;  %v11580_v13 = vcombine.low %v16985_v5, %v16985_v5  ;;  %v11581_v41 = vcombine.high %v16985_v5, %v16985_v5 }
 0x581   : > { %10539 = vst.msk [vmem:[%s16987_s7 + $0x3c] sm:$0xf] %vm10523_vm1, %v11565_v2  ;;  %10540 = vst.msk [vmem:[%s16987_s7 + $0x40] sm:$0xf] %vm10523_vm1, %v11566_v17 }
 0x582   : > { %10541 = vst.msk [vmem:[%s16987_s7 + $0x44] sm:$0xf] %vm10523_vm1, %v11567_v33  ;;  %10542 = vst.msk [vmem:[%s16987_s7 + $0x48] sm:$0xf] %vm10523_vm1, %v11568_v27 }
 0x583   : > { %10543 = vst.msk [vmem:[%s16987_s7 + $0x4c] sm:$0xf] %vm10523_vm1, %v11569_v28  ;;  %10544 = vst.msk [vmem:[%s16987_s7 + $0x50] sm:$0xf] %vm10523_vm1, %v11570_v58 }
 0x584   : > { %10545 = vst.msk [vmem:[%s16987_s7 + $0x54] sm:$0xf] %vm10523_vm1, %v11571_v56  ;;  %10546 = vst.msk [vmem:[%s16987_s7 + $0x58] sm:$0xf] %vm10523_vm1, %v11572_v45 }
 0x585   : > { %10547 = vst.msk [vmem:[%s16987_s7 + $0x5c] sm:$0xf] %vm10523_vm1, %v11573_v32  ;;  %10548 = vst.msk [vmem:[%s16987_s7 + $0x60] sm:$0xf] %vm10523_vm1, %v11574_v23 }
 0x586   : > { %10549 = vst.msk [vmem:[%s16987_s7 + $0x64] sm:$0xf] %vm10523_vm1, %v11575_v48  ;;  %10550 = vst.msk [vmem:[%s16987_s7 + $0x68] sm:$0xf] %vm10523_vm1, %v11576_v24 }
 0x587   : > { %10551 = vst.msk [vmem:[%s16987_s7 + $0x6c] sm:$0xf] %vm10523_vm1, %v11577_v9  ;;  %10552 = vst.msk [vmem:[%s16987_s7 + $0x70] sm:$0xf] %vm10523_vm1, %v11578_v46 }
 0x588   : > { %10553 = vst.msk [vmem:[%s16987_s7 + $0x74] sm:$0xf] %vm10523_vm1, %v11579_v4  ;;  %10554 = vst.msk [vmem:[%s16987_s7 + $0x78] sm:$0xf] %vm10523_vm1, %v11580_v13 }
 0x589   : > { %10555 = vst.msk [vmem:[%s16987_s7 + $0x7c] sm:$0xf] %vm10523_vm1, %v11581_v41 }
 0x58a   : > { %13227 = shalt.err (!%p13224_p3)
}
 0x58b   : > { %s13228_s9 = scalar_lea.hbm %s17050_s14, 2048  ;;  %s13232_s30 = scalar_lea.hbm %s17135_s5, 4096 }
 0x58c   : > { %p13229_p4 = scmp.ne.s32.totalorder %s17050_s14, %s13228_s9  ;;  %p13233_p9 = scmp.lt.u32.totalorder %s17050_s14, %s17135_s5 }
 0x58d   : > { %p13234_p10 = scmp.lt.u32.totalorder %s13232_s30, %s13228_s9  ;;  %p13236_p12 = scmp.lt.u32.totalorder %s13228_s9, %s17050_s14 }
 0x58e   : > { %p13230_p7 = pnand %p13229_p4, %p13356_p5 }
 0x58f   : > { %p13235_p11 = por %p13234_p10, %p13233_p9 }
 0x590   : > { %p13231_p8 = pneg %p13230_p7 }
 0x591   : > { %p13237_p13 = por %p13236_p12, %p13235_p11 }
 0x593   : > { %p13238_p0 = pnand %p13237_p13, %p13231_p8 }
 0x595   : > { %13241 = shalt.err (!%p13238_p0)
}
 0x596   : > { %s13287_s8 = smov 64  }
 0x597   : > { %12333 = dma.vmem_to_hbm [thread:$0]  (%p13356_p5), %s17068_s12, 2048, %s17050_s14, %s17088_s15, %s13287_s8, %s13287_s8, %s13279_s10  }
 0x598 PF: > { %p12339_p1 = scmp.ge.s32.totalorder %s13276_s21, 2  ;;  %s10585_s22 = sand.u32 1, %s13264_s18  }
 0x599   : > { %s10586_s13 = scalar_lea.sflag [#allocation4], %s10585_s22 }
 0x59a   : > { %p12336_p2 = pnand %p12339_p1, %p13360_p6 }
 0x59c   : > { %13259 = dma.done.wait (!%p12336_p2), %s10586_s13, 2048  }
 0x59d   : > { %13261 = vsyncadd (!%p12336_p2), %s10586_s13, 4294965248  ;;  %p15_p3 = scmp.ge.s32.totalorder %s13343_s24, 4   ;;  %s17436_s18 = smov %s13268_s19 }
 0x59e   : > { %s17437_s19 = smov %s13272_s20  ;;  %s17438_s20 = smov %s13354_s27 }
 0x59f   : > { %s17439_s21 = smov %s13343_s24  ;;  %17 = sbr.rel (!%p15_p3) target bundleno = 3 (0x3), region = 94 }
 0x5a6   :  { %10591 = vsyncpa [#allocation4], 1 }
 0x5a7   :  { %10593 = vsyncpa [#allocation4 + $0x1], 1 }

</bundles_post_ra>
